<compile_context>
chip_gen: v5e
topology: v5e:2x2
jax: 0.10.0
libtpu: 0.0.40
codegen_flags: <defaults>
</compile_context>

<pallas_src>
import functools

import jax
import jax.numpy as jnp
from jax import lax
from jax.experimental import pallas as pl
from jax.experimental.pallas import tpu as pltpu


def _pick_tile_rows(H, W, target_m=64):
    """Largest divisor of H with th*W <= target_m: bounds the f32 accumulator
    footprint of the flattened (th*W, C) matmul to ~8 vregs at C=128."""
    cap = max(1, target_m // max(W, 1))
    th = 1
    for cand in range(1, H + 1):
        if H % cand == 0 and cand <= cap:
            th = cand
    return th


def _aot_block_kernel(rates, r_max, th,
                      x_ref, xp_ref, wbr_ref, bcat_ref, wg_ref, bg_ref,
                      wf_ref, bf_ref, out_ref, cat_ref, gate_ref):
    _, H, W, C = x_ref.shape
    M = th * W
    n_tiles = H // th
    nhw = H * W

    def patch(t, off, dil, ky, kx):
        h0 = t * th + off + ky * dil
        w0 = off + kx * dil
        return xp_ref[0, pl.ds(h0, th), pl.ds(w0, W), :].reshape(M, C)

    # ---- pass 1: all dilated branches into one concat accumulator (padded
    #      weights -> disjoint lanes), gate conv sharing the dilation-1 taps,
    #      running layer-norm statistics of the gate.
    def p1_body(t, carry):
        s, sq = carry
        acc_c = jnp.broadcast_to(bcat_ref[...], (M, C))   # bias folded in
        acc_g = jnp.broadcast_to(bg_ref[...], (M, C))
        for ky in range(3):
            for kx in range(3):
                p1 = patch(t, r_max - 1, 1, ky, kx)       # shared dil-1 taps
                acc_g = acc_g + jnp.dot(p1, wg_ref[ky, kx, :, :],
                                        preferred_element_type=jnp.float32)
                for i, r in enumerate(rates):
                    p = p1 if r == 1 else patch(t, r_max - r, r, ky, kx)
                    acc_c = acc_c + jnp.dot(p, wbr_ref[i, ky, kx, :, :],
                                            preferred_element_type=jnp.float32)
        # ReLU in f32, cast once, single full-lane-width store into the
        # interior of the pre-padded bf16 cat scratch.
        cat_ref[0, pl.ds(t * th + 1, th), pl.ds(1, W), :] = (
            jnp.maximum(acc_c, 0.0).astype(jnp.bfloat16).reshape(th, W, C))
        gate_ref[0, pl.ds(t * th, th), :, :] = acc_g.reshape(th, W, C)
        s = s + jnp.sum(acc_g, axis=0, keepdims=True)
        sq = sq + jnp.sum(acc_g * acc_g, axis=0, keepdims=True)
        return s, sq

    zeros_c = jnp.zeros((1, C), jnp.float32)
    s, sq = lax.fori_loop(0, n_tiles, p1_body, (zeros_c, zeros_c))

    # Fill the 1-wide reflection halo of the cat scratch: full-width rows
    # first, then full-height columns (corners then resolve correctly).
    cat_ref[0, pl.ds(0, 1), :, :] = cat_ref[0, pl.ds(2, 1), :, :]
    cat_ref[0, pl.ds(H + 1, 1), :, :] = cat_ref[0, pl.ds(H - 1, 1), :, :]
    cat_ref[0, :, pl.ds(0, 1), :] = cat_ref[0, :, pl.ds(2, 1), :]
    cat_ref[0, :, pl.ds(W + 1, 1), :] = cat_ref[0, :, pl.ds(W - 1, 1), :]

    # my_layer_norm statistics (unbiased std, like torch.Tensor.std).
    # TODO(synk): switch to two-pass/Welford stats for very large H*W.
    mean = s * (1.0 / nhw)
    var = (sq - s * mean) * (1.0 / max(nhw - 1, 1))
    std = jnp.sqrt(jnp.maximum(var, 0.0)) + 1e-9
    inv_std = pl.reciprocal(std, approx=True)

    # ---- pass 2: fuse conv on the padded cat scratch + mask + residual mix.
    def p2_body(t, carry):
        acc_f = jnp.broadcast_to(bf_ref[...], (M, C))
        for ky in range(3):
            for kx in range(3):
                p = cat_ref[0, pl.ds(t * th + ky, th),
                            pl.ds(kx, W), :].reshape(M, C)
                acc_f = acc_f + jnp.dot(p, wf_ref[ky, kx, :, :],
                                        preferred_element_type=jnp.float32)
        g = gate_ref[0, pl.ds(t * th, th), :, :].reshape(M, C)
        xv = x_ref[0, pl.ds(t * th, th), :, :].reshape(M, C)
        feat = 5.0 * (2.0 * (g - mean) * inv_std - 1.0)
        mask = jax.nn.sigmoid(feat)
        out = xv * (1.0 - mask) + acc_f * mask
        out_ref[0, pl.ds(t * th, th), :, :] = out.reshape(th, W, C)
        return carry

    lax.fori_loop(0, n_tiles, p2_body, 0)


def aot_block_pallas(x_nhwc, params, rates):
    """AOTBlock forward. x_nhwc: [B, H, W, C] float32 -> [B, H, W, C] float32.
    Weights are HWIO ([3,3,Cin,Cout]); PyTorch OIHW converts via
    w.transpose(2, 3, 1, 0)."""
    x = x_nhwc.astype(jnp.float32)
    B, H, W, C = x.shape
    n = len(rates)
    c4 = C // 4
    assert n * c4 == C, "len(rates) * (dim // 4) must equal dim"
    r_max = max(rates)
    assert r_max < min(H, W), "reflection pad requires rate < spatial size"
    th = _pick_tile_rows(H, W)

    # Single reflection pad at max(rates) + bf16 cast, hoisted to the wrapper;
    # every dilated branch and the gate conv read taps from this buffer at
    # offset (r_max - r).
    xp = jnp.pad(x, ((0, 0), (r_max, r_max), (r_max, r_max), (0, 0)),
                 mode="reflect").astype(jnp.bfloat16)
    Hp, Wp = H + 2 * r_max, W + 2 * r_max

    # Zero-pad each branch weight to full Cout at its final lane offset so the
    # sum of branch contributions IS the channel concat.
    wb = []
    for i, (w, _) in enumerate(params["branches"]):
        wb.append(jnp.pad(w.astype(jnp.float32),
                          ((0, 0), (0, 0), (0, 0),
                           (i * c4, C - (i + 1) * c4))))
    w_branch = jnp.stack(wb, axis=0).astype(jnp.bfloat16)          # [n,3,3,C,C]
    b_cat = jnp.concatenate([b for (_, b) in params["branches"]],
                            axis=1).astype(jnp.float32)            # [1, C]
    wf = params["fuse"][0].astype(jnp.bfloat16)
    bf = params["fuse"][1].astype(jnp.float32)
    wg = params["gate"][0].astype(jnp.bfloat16)
    bg = params["gate"][1].astype(jnp.float32)

    def const_spec(shape):
        return pl.BlockSpec(shape, lambda b: (0,) * len(shape))

    grid_spec = pltpu.PrefetchScalarGridSpec(
        num_scalar_prefetch=0,
        grid=(B,),
        in_specs=[
            pl.BlockSpec((1, H, W, C), lambda b: (b, 0, 0, 0)),    # x  (f32)
            pl.BlockSpec((1, Hp, Wp, C), lambda b: (b, 0, 0, 0)),  # xp (bf16)
            const_spec(w_branch.shape),
            const_spec(b_cat.shape),
            const_spec(wg.shape), const_spec(bg.shape),
            const_spec(wf.shape), const_spec(bf.shape),
        ],
        out_specs=pl.BlockSpec((1, H, W, C), lambda b: (b, 0, 0, 0)),
        scratch_shapes=[
            pltpu.VMEM((1, H + 2, W + 2, C), jnp.bfloat16),  # pre-padded cat
            pltpu.VMEM((1, H, W, C), jnp.float32),           # gate activations
        ],
    )
    return pl.pallas_call(
        functools.partial(_aot_block_kernel, tuple(rates), r_max, th),
        out_shape=jax.ShapeDtypeStruct((B, H, W, C), jnp.float32),
        grid_spec=grid_spec,
        compiler_params=pltpu.CompilerParams(
            dimension_semantics=("parallel",),
            vmem_limit_bytes=32 * 1024 * 1024,
        ),
    )(x, xp, w_branch, b_cat, wg, bg, wf, bf)


def aot_block_pallas_nchw(x_nchw, params, rates):
    """Thin adapter for PyTorch-layout callers; keep the surrounding model in
    NHWC to avoid these two extra HBM round trips per block."""
    x = jnp.transpose(x_nchw, (0, 2, 3, 1))
    return jnp.transpose(aot_block_pallas(x, params, rates), (0, 3, 1, 2))


# ----------------------- pure-JAX reference (for checking) -----------------
def aot_block_reference(x_nhwc, params, rates):
    """Matches the kernel numerics: bf16 conv operands, f32 accumulation."""
    x = x_nhwc.astype(jnp.float32)

    def conv(inp, w, b, r):
        p = jnp.pad(inp, ((0, 0), (r, r), (r, r), (0, 0)), mode="reflect")
        y = jax.lax.conv_general_dilated(
            p.astype(jnp.bfloat16), w.astype(jnp.bfloat16),
            window_strides=(1, 1), padding="VALID", rhs_dilation=(r, r),
            dimension_numbers=("NHWC", "HWIO", "NHWC"),
            preferred_element_type=jnp.float32)
        return y + b

    outs = [jax.nn.relu(conv(x, w, b, r))
            for (w, b), r in zip(params["branches"], rates)]
    cat = jnp.concatenate(outs, axis=-1)
    fuse = conv(cat, params["fuse"][0], params["fuse"][1], 1)
    gate = conv(x, params["gate"][0], params["gate"][1], 1)
    mean = gate.mean(axis=(1, 2), keepdims=True)
    std = jnp.std(gate, axis=(1, 2), keepdims=True, ddof=1) + 1e-9
    mask = jax.nn.sigmoid(5.0 * (2.0 * (gate - mean) / std - 1.0))
    return x * (1.0 - mask) + fuse * mask


def init_params(key, dim, rates):
    """Deterministic synthetic parameters: HWIO weights [3,3,Cin,Cout],
    biases [1, Cout]."""
    c4 = dim // 4
    n = len(rates)
    keys = jax.random.split(key, 2 * n + 4)
    params = {"branches": []}
    for i in range(n):
        w = 0.1 * jax.random.normal(keys[2 * i], (3, 3, dim, c4), jnp.float32)
        b = 0.1 * jax.random.normal(keys[2 * i + 1], (1, c4), jnp.float32)
        params["branches"].append((w, b))
    params["fuse"] = (
        0.1 * jax.random.normal(keys[2 * n], (3, 3, dim, dim), jnp.float32),
        0.1 * jax.random.normal(keys[2 * n + 1], (1, dim), jnp.float32),
    )
    params["gate"] = (
        0.1 * jax.random.normal(keys[2 * n + 2], (3, 3, dim, dim), jnp.float32),
        0.1 * jax.random.normal(keys[2 * n + 3], (1, dim), jnp.float32),
    )
    return params


if __name__ == "__main__":
    key = jax.random.PRNGKey(0)
    # dim=128 keeps the channel/lane axis dense; B=2 keeps the parallel grid
    # even (v7x has 2 TensorCores); len(rates) * (dim // 4) == dim.
    B, dim, H, W = 2, 128, 16, 16
    rates = [1, 2, 4, 8]

    kx, kp = jax.random.split(key)
    x = jax.random.normal(kx, (B, H, W, dim), jnp.float32)   # NHWC
    params = init_params(kp, dim, rates)

    fwd = jax.jit(lambda a, p: aot_block_pallas(a, p, rates))
    out = jax.block_until_ready(fwd(x, params))
    ref = jax.block_until_ready(aot_block_reference(x, params, rates))

    assert out.shape == (B, H, W, dim)
    assert bool(jnp.all(jnp.isfinite(out)))
    err = float(jnp.max(jnp.abs(out - ref)))
    scale = float(jnp.max(jnp.abs(ref)))
    assert err <= 2e-2 * max(1.0, scale), (err, scale)

    print("KERNEL_OK")
</pallas_src>

<mosaic_0001>
module attributes {stable_mosaic.version = 11 : i64} {
  func.func @_aot_block_kernel(%arg0: i32, %arg1: memref<1x16x16x128xf32, #tpu.memory_space<vmem>>, %arg2: memref<1x32x32x128xbf16, #tpu.memory_space<vmem>>, %arg3: memref<4x3x3x128x128xbf16, #tpu.memory_space<vmem>>, %arg4: memref<1x128xf32, #tpu.memory_space<vmem>>, %arg5: memref<3x3x128x128xbf16, #tpu.memory_space<vmem>>, %arg6: memref<1x128xf32, #tpu.memory_space<vmem>>, %arg7: memref<3x3x128x128xbf16, #tpu.memory_space<vmem>>, %arg8: memref<1x128xf32, #tpu.memory_space<vmem>>, %arg9: memref<1x16x16x128xf32, #tpu.memory_space<vmem>>, %arg10: memref<1x18x18x128xbf16, #tpu.memory_space<vmem>>, %arg11: memref<1x16x16x128xf32, #tpu.memory_space<vmem>>) attributes {dimension_semantics = [#tpu.dimension_semantics<parallel>], iteration_bounds = array<i64: 2>, scalar_prefetch = 0 : i64, scratch_operands = 2 : i64, tpu.core_type = #tpu.core_type<tc>, window_params = [{transform_indices = @transform_0, window_bounds = array<i64: 1, 16, 16, 128>}, {transform_indices = @transform_1, window_bounds = array<i64: 1, 32, 32, 128>}, {pipeline_mode = #tpu.pipeline_mode<synchronous>, transform_indices = @transform_2, window_bounds = array<i64: 4, 3, 3, 128, 128>}, {pipeline_mode = #tpu.pipeline_mode<synchronous>, transform_indices = @transform_3, window_bounds = array<i64: 1, 128>}, {pipeline_mode = #tpu.pipeline_mode<synchronous>, transform_indices = @transform_4, window_bounds = array<i64: 3, 3, 128, 128>}, {pipeline_mode = #tpu.pipeline_mode<synchronous>, transform_indices = @transform_5, window_bounds = array<i64: 1, 128>}, {pipeline_mode = #tpu.pipeline_mode<synchronous>, transform_indices = @transform_6, window_bounds = array<i64: 3, 3, 128, 128>}, {pipeline_mode = #tpu.pipeline_mode<synchronous>, transform_indices = @transform_7, window_bounds = array<i64: 1, 128>}, {transform_indices = @transform_8, window_bounds = array<i64: 1, 16, 16, 128>}]} {
    %cst = arith.constant 0.000000e+00 : f32
    %0 = vector.broadcast %cst : f32 to vector<1x128xf32>
    %c0_i32 = arith.constant 0 : i32
    %c4_i32 = arith.constant 4 : i32
    %1 = arith.addi %c0_i32, %c4_i32 : i32
    %c1_i32 = arith.constant 1 : i32
    %2:2 = scf.for %arg12 = %c0_i32 to %1 step %c1_i32 iter_args(%arg13 = %0, %arg14 = %0) -> (vector<1x128xf32>, vector<1x128xf32>)  : i32 {
      %c0_37 = arith.constant 0 : index
      %c0_38 = arith.constant 0 : index
      %36 = vector.load %arg4[%c0_37, %c0_38] : memref<1x128xf32, #tpu.memory_space<vmem>>, vector<1x128xf32>
      %37 = vector.shape_cast %36 : vector<1x128xf32> to vector<1x128xf32>
      %38 = vector.broadcast %37 : vector<1x128xf32> to vector<64x128xf32>
      %c0_39 = arith.constant 0 : index
      %c0_40 = arith.constant 0 : index
      %39 = vector.load %arg6[%c0_39, %c0_40] : memref<1x128xf32, #tpu.memory_space<vmem>>, vector<1x128xf32>
      %40 = vector.shape_cast %39 : vector<1x128xf32> to vector<1x128xf32>
      %41 = vector.broadcast %40 : vector<1x128xf32> to vector<64x128xf32>
      %c4_i32_41 = arith.constant 4 : i32
      %42 = arith.muli %arg12, %c4_i32_41 : i32
      %c7_i32 = arith.constant 7 : i32
      %43 = arith.addi %42, %c7_i32 : i32
      %c0_i32_42 = arith.constant 0 : i32
      %44 = arith.addi %43, %c0_i32_42 : i32
      %c0_43 = arith.constant 0 : index
      %45 = arith.index_cast %44 : i32 to index
      %c7 = arith.constant 7 : index
      %c0_44 = arith.constant 0 : index
      %46 = vector.load %arg2[%c0_43, %45, %c7, %c0_44] : memref<1x32x32x128xbf16, #tpu.memory_space<vmem>>, vector<1x4x16x128xbf16>
      %47 = vector.shape_cast %46 : vector<1x4x16x128xbf16> to vector<4x16x128xbf16>
      %48 = vector.shape_cast %47 : vector<4x16x128xbf16> to vector<64x128xbf16>
      %c0_45 = arith.constant 0 : index
      %c0_46 = arith.constant 0 : index
      %c0_47 = arith.constant 0 : index
      %c0_48 = arith.constant 0 : index
      %49 = vector.load %arg5[%c0_45, %c0_46, %c0_47, %c0_48] : memref<3x3x128x128xbf16, #tpu.memory_space<vmem>>, vector<1x1x128x128xbf16>
      %50 = vector.shape_cast %49 : vector<1x1x128x128xbf16> to vector<128x128xbf16>
      %cst_49 = arith.constant dense<0.000000e+00> : vector<64x128xf32>
      %51 = tpu.matmul %48, %50, %cst_49 {dimension_numbers = #tpu.dot_dimension_numbers<[1], [0], [0], [1], [0, 0, 1, 1], [], []>} : vector<64x128xbf16>, vector<128x128xbf16>, vector<64x128xf32> -> vector<64x128xf32>
      %52 = arith.addf %41, %51 : vector<64x128xf32>
      %c0_50 = arith.constant 0 : index
      %c0_51 = arith.constant 0 : index
      %c0_52 = arith.constant 0 : index
      %c0_53 = arith.constant 0 : index
      %c0_54 = arith.constant 0 : index
      %53 = vector.load %arg3[%c0_50, %c0_51, %c0_52, %c0_53, %c0_54] : memref<4x3x3x128x128xbf16, #tpu.memory_space<vmem>>, vector<1x1x1x128x128xbf16>
      %54 = vector.shape_cast %53 : vector<1x1x1x128x128xbf16> to vector<128x128xbf16>
      %cst_55 = arith.constant dense<0.000000e+00> : vector<64x128xf32>
      %55 = tpu.matmul %48, %54, %cst_55 {dimension_numbers = #tpu.dot_dimension_numbers<[1], [0], [0], [1], [0, 0, 1, 1], [], []>} : vector<64x128xbf16>, vector<128x128xbf16>, vector<64x128xf32> -> vector<64x128xf32>
      %56 = arith.addf %38, %55 : vector<64x128xf32>
      %c4_i32_56 = arith.constant 4 : i32
      %57 = arith.muli %arg12, %c4_i32_56 : i32
      %c6_i32 = arith.constant 6 : i32
      %58 = arith.addi %57, %c6_i32 : i32
      %c0_i32_57 = arith.constant 0 : i32
      %59 = arith.addi %58, %c0_i32_57 : i32
      %c0_58 = arith.constant 0 : index
      %60 = arith.index_cast %59 : i32 to index
      %c6 = arith.constant 6 : index
      %c0_59 = arith.constant 0 : index
      %61 = vector.load %arg2[%c0_58, %60, %c6, %c0_59] : memref<1x32x32x128xbf16, #tpu.memory_space<vmem>>, vector<1x4x16x128xbf16>
      %62 = vector.shape_cast %61 : vector<1x4x16x128xbf16> to vector<4x16x128xbf16>
      %63 = vector.shape_cast %62 : vector<4x16x128xbf16> to vector<64x128xbf16>
      %c1 = arith.constant 1 : index
      %c0_60 = arith.constant 0 : index
      %c0_61 = arith.constant 0 : index
      %c0_62 = arith.constant 0 : index
      %c0_63 = arith.constant 0 : index
      %64 = vector.load %arg3[%c1, %c0_60, %c0_61, %c0_62, %c0_63] : memref<4x3x3x128x128xbf16, #tpu.memory_space<vmem>>, vector<1x1x1x128x128xbf16>
      %65 = vector.shape_cast %64 : vector<1x1x1x128x128xbf16> to vector<128x128xbf16>
      %cst_64 = arith.constant dense<0.000000e+00> : vector<64x128xf32>
      %66 = tpu.matmul %63, %65, %cst_64 {dimension_numbers = #tpu.dot_dimension_numbers<[1], [0], [0], [1], [0, 0, 1, 1], [], []>} : vector<64x128xbf16>, vector<128x128xbf16>, vector<64x128xf32> -> vector<64x128xf32>
      %67 = arith.addf %56, %66 : vector<64x128xf32>
      %c4_i32_65 = arith.constant 4 : i32
      %68 = arith.muli %arg12, %c4_i32_65 : i32
      %c4_i32_66 = arith.constant 4 : i32
      %69 = arith.addi %68, %c4_i32_66 : i32
      %c0_i32_67 = arith.constant 0 : i32
      %70 = arith.addi %69, %c0_i32_67 : i32
      %c0_68 = arith.constant 0 : index
      %71 = arith.index_cast %70 : i32 to index
      %c4 = arith.constant 4 : index
      %c0_69 = arith.constant 0 : index
      %72 = vector.load %arg2[%c0_68, %71, %c4, %c0_69] : memref<1x32x32x128xbf16, #tpu.memory_space<vmem>>, vector<1x4x16x128xbf16>
      %73 = vector.shape_cast %72 : vector<1x4x16x128xbf16> to vector<4x16x128xbf16>
      %74 = vector.shape_cast %73 : vector<4x16x128xbf16> to vector<64x128xbf16>
      %c2_70 = arith.constant 2 : index
      %c0_71 = arith.constant 0 : index
      %c0_72 = arith.constant 0 : index
      %c0_73 = arith.constant 0 : index
      %c0_74 = arith.constant 0 : index
      %75 = vector.load %arg3[%c2_70, %c0_71, %c0_72, %c0_73, %c0_74] : memref<4x3x3x128x128xbf16, #tpu.memory_space<vmem>>, vector<1x1x1x128x128xbf16>
      %76 = vector.shape_cast %75 : vector<1x1x1x128x128xbf16> to vector<128x128xbf16>
      %cst_75 = arith.constant dense<0.000000e+00> : vector<64x128xf32>
      %77 = tpu.matmul %74, %76, %cst_75 {dimension_numbers = #tpu.dot_dimension_numbers<[1], [0], [0], [1], [0, 0, 1, 1], [], []>} : vector<64x128xbf16>, vector<128x128xbf16>, vector<64x128xf32> -> vector<64x128xf32>
      %78 = arith.addf %67, %77 : vector<64x128xf32>
      %c4_i32_76 = arith.constant 4 : i32
      %79 = arith.muli %arg12, %c4_i32_76 : i32
      %c0_i32_77 = arith.constant 0 : i32
      %80 = arith.addi %79, %c0_i32_77 : i32
      %c0_i32_78 = arith.constant 0 : i32
      %81 = arith.addi %80, %c0_i32_78 : i32
      %c0_79 = arith.constant 0 : index
      %82 = arith.index_cast %81 : i32 to index
      %c0_80 = arith.constant 0 : index
      %c0_81 = arith.constant 0 : index
      %83 = vector.load %arg2[%c0_79, %82, %c0_80, %c0_81] : memref<1x32x32x128xbf16, #tpu.memory_space<vmem>>, vector<1x4x16x128xbf16>
      %84 = vector.shape_cast %83 : vector<1x4x16x128xbf16> to vector<4x16x128xbf16>
      %85 = vector.shape_cast %84 : vector<4x16x128xbf16> to vector<64x128xbf16>
      %c3 = arith.constant 3 : index
      %c0_82 = arith.constant 0 : index
      %c0_83 = arith.constant 0 : index
      %c0_84 = arith.constant 0 : index
      %c0_85 = arith.constant 0 : index
      %86 = vector.load %arg3[%c3, %c0_82, %c0_83, %c0_84, %c0_85] : memref<4x3x3x128x128xbf16, #tpu.memory_space<vmem>>, vector<1x1x1x128x128xbf16>
      %87 = vector.shape_cast %86 : vector<1x1x1x128x128xbf16> to vector<128x128xbf16>
      %cst_86 = arith.constant dense<0.000000e+00> : vector<64x128xf32>
      %88 = tpu.matmul %85, %87, %cst_86 {dimension_numbers = #tpu.dot_dimension_numbers<[1], [0], [0], [1], [0, 0, 1, 1], [], []>} : vector<64x128xbf16>, vector<128x128xbf16>, vector<64x128xf32> -> vector<64x128xf32>
      %89 = arith.addf %78, %88 : vector<64x128xf32>
      %c4_i32_87 = arith.constant 4 : i32
      %90 = arith.muli %arg12, %c4_i32_87 : i32
      %c7_i32_88 = arith.constant 7 : i32
      %91 = arith.addi %90, %c7_i32_88 : i32
      %c0_i32_89 = arith.constant 0 : i32
      %92 = arith.addi %91, %c0_i32_89 : i32
      %c0_90 = arith.constant 0 : index
      %93 = arith.index_cast %92 : i32 to index
      %c8 = arith.constant 8 : index
      %c0_91 = arith.constant 0 : index
      %94 = vector.load %arg2[%c0_90, %93, %c8, %c0_91] : memref<1x32x32x128xbf16, #tpu.memory_space<vmem>>, vector<1x4x16x128xbf16>
      %95 = vector.shape_cast %94 : vector<1x4x16x128xbf16> to vector<4x16x128xbf16>
      %96 = vector.shape_cast %95 : vector<4x16x128xbf16> to vector<64x128xbf16>
      %c0_92 = arith.constant 0 : index
      %c1_93 = arith.constant 1 : index
      %c0_94 = arith.constant 0 : index
      %c0_95 = arith.constant 0 : index
      %97 = vector.load %arg5[%c0_92, %c1_93, %c0_94, %c0_95] : memref<3x3x128x128xbf16, #tpu.memory_space<vmem>>, vector<1x1x128x128xbf16>
      %98 = vector.shape_cast %97 : vector<1x1x128x128xbf16> to vector<128x128xbf16>
      %cst_96 = arith.constant dense<0.000000e+00> : vector<64x128xf32>
      %99 = tpu.matmul %96, %98, %cst_96 {dimension_numbers = #tpu.dot_dimension_numbers<[1], [0], [0], [1], [0, 0, 1, 1], [], []>} : vector<64x128xbf16>, vector<128x128xbf16>, vector<64x128xf32> -> vector<64x128xf32>
      %100 = arith.addf %52, %99 : vector<64x128xf32>
      %c0_97 = arith.constant 0 : index
      %c0_98 = arith.constant 0 : index
      %c1_99 = arith.constant 1 : index
      %c0_100 = arith.constant 0 : index
      %c0_101 = arith.constant 0 : index
      %101 = vector.load %arg3[%c0_97, %c0_98, %c1_99, %c0_100, %c0_101] : memref<4x3x3x128x128xbf16, #tpu.memory_space<vmem>>, vector<1x1x1x128x128xbf16>
      %102 = vector.shape_cast %101 : vector<1x1x1x128x128xbf16> to vector<128x128xbf16>
      %cst_102 = arith.constant dense<0.000000e+00> : vector<64x128xf32>
      %103 = tpu.matmul %96, %102, %cst_102 {dimension_numbers = #tpu.dot_dimension_numbers<[1], [0], [0], [1], [0, 0, 1, 1], [], []>} : vector<64x128xbf16>, vector<128x128xbf16>, vector<64x128xf32> -> vector<64x128xf32>
      %104 = arith.addf %89, %103 : vector<64x128xf32>
      %c4_i32_103 = arith.constant 4 : i32
      %105 = arith.muli %arg12, %c4_i32_103 : i32
      %c6_i32_104 = arith.constant 6 : i32
      %106 = arith.addi %105, %c6_i32_104 : i32
      %c0_i32_105 = arith.constant 0 : i32
      %107 = arith.addi %106, %c0_i32_105 : i32
      %c0_106 = arith.constant 0 : index
      %108 = arith.index_cast %107 : i32 to index
      %c8_107 = arith.constant 8 : index
      %c0_108 = arith.constant 0 : index
      %109 = vector.load %arg2[%c0_106, %108, %c8_107, %c0_108] : memref<1x32x32x128xbf16, #tpu.memory_space<vmem>>, vector<1x4x16x128xbf16>
      %110 = vector.shape_cast %109 : vector<1x4x16x128xbf16> to vector<4x16x128xbf16>
      %111 = vector.shape_cast %110 : vector<4x16x128xbf16> to vector<64x128xbf16>
      %c1_109 = arith.constant 1 : index
      %c0_110 = arith.constant 0 : index
      %c1_111 = arith.constant 1 : index
      %c0_112 = arith.constant 0 : index
      %c0_113 = arith.constant 0 : index
      %112 = vector.load %arg3[%c1_109, %c0_110, %c1_111, %c0_112, %c0_113] : memref<4x3x3x128x128xbf16, #tpu.memory_space<vmem>>, vector<1x1x1x128x128xbf16>
      %113 = vector.shape_cast %112 : vector<1x1x1x128x128xbf16> to vector<128x128xbf16>
      %cst_114 = arith.constant dense<0.000000e+00> : vector<64x128xf32>
      %114 = tpu.matmul %111, %113, %cst_114 {dimension_numbers = #tpu.dot_dimension_numbers<[1], [0], [0], [1], [0, 0, 1, 1], [], []>} : vector<64x128xbf16>, vector<128x128xbf16>, vector<64x128xf32> -> vector<64x128xf32>
      %115 = arith.addf %104, %114 : vector<64x128xf32>
      %c4_i32_115 = arith.constant 4 : i32
      %116 = arith.muli %arg12, %c4_i32_115 : i32
      %c4_i32_116 = arith.constant 4 : i32
      %117 = arith.addi %116, %c4_i32_116 : i32
      %c0_i32_117 = arith.constant 0 : i32
      %118 = arith.addi %117, %c0_i32_117 : i32
      %c0_118 = arith.constant 0 : index
      %119 = arith.index_cast %118 : i32 to index
      %c8_119 = arith.constant 8 : index
      %c0_120 = arith.constant 0 : index
      %120 = vector.load %arg2[%c0_118, %119, %c8_119, %c0_120] : memref<1x32x32x128xbf16, #tpu.memory_space<vmem>>, vector<1x4x16x128xbf16>
      %121 = vector.shape_cast %120 : vector<1x4x16x128xbf16> to vector<4x16x128xbf16>
      %122 = vector.shape_cast %121 : vector<4x16x128xbf16> to vector<64x128xbf16>
      %c2_121 = arith.constant 2 : index
      %c0_122 = arith.constant 0 : index
      %c1_123 = arith.constant 1 : index
      %c0_124 = arith.constant 0 : index
      %c0_125 = arith.constant 0 : index
      %123 = vector.load %arg3[%c2_121, %c0_122, %c1_123, %c0_124, %c0_125] : memref<4x3x3x128x128xbf16, #tpu.memory_space<vmem>>, vector<1x1x1x128x128xbf16>
      %124 = vector.shape_cast %123 : vector<1x1x1x128x128xbf16> to vector<128x128xbf16>
      %cst_126 = arith.constant dense<0.000000e+00> : vector<64x128xf32>
      %125 = tpu.matmul %122, %124, %cst_126 {dimension_numbers = #tpu.dot_dimension_numbers<[1], [0], [0], [1], [0, 0, 1, 1], [], []>} : vector<64x128xbf16>, vector<128x128xbf16>, vector<64x128xf32> -> vector<64x128xf32>
      %126 = arith.addf %115, %125 : vector<64x128xf32>
      %c4_i32_127 = arith.constant 4 : i32
      %127 = arith.muli %arg12, %c4_i32_127 : i32
      %c0_i32_128 = arith.constant 0 : i32
      %128 = arith.addi %127, %c0_i32_128 : i32
      %c0_i32_129 = arith.constant 0 : i32
      %129 = arith.addi %128, %c0_i32_129 : i32
      %c0_130 = arith.constant 0 : index
      %130 = arith.index_cast %129 : i32 to index
      %c8_131 = arith.constant 8 : index
      %c0_132 = arith.constant 0 : index
      %131 = vector.load %arg2[%c0_130, %130, %c8_131, %c0_132] : memref<1x32x32x128xbf16, #tpu.memory_space<vmem>>, vector<1x4x16x128xbf16>
      %132 = vector.shape_cast %131 : vector<1x4x16x128xbf16> to vector<4x16x128xbf16>
      %133 = vector.shape_cast %132 : vector<4x16x128xbf16> to vector<64x128xbf16>
      %c3_133 = arith.constant 3 : index
      %c0_134 = arith.constant 0 : index
      %c1_135 = arith.constant 1 : index
      %c0_136 = arith.constant 0 : index
      %c0_137 = arith.constant 0 : index
      %134 = vector.load %arg3[%c3_133, %c0_134, %c1_135, %c0_136, %c0_137] : memref<4x3x3x128x128xbf16, #tpu.memory_space<vmem>>, vector<1x1x1x128x128xbf16>
      %135 = vector.shape_cast %134 : vector<1x1x1x128x128xbf16> to vector<128x128xbf16>
      %cst_138 = arith.constant dense<0.000000e+00> : vector<64x128xf32>
      %136 = tpu.matmul %133, %135, %cst_138 {dimension_numbers = #tpu.dot_dimension_numbers<[1], [0], [0], [1], [0, 0, 1, 1], [], []>} : vector<64x128xbf16>, vector<128x128xbf16>, vector<64x128xf32> -> vector<64x128xf32>
      %137 = arith.addf %126, %136 : vector<64x128xf32>
      %c4_i32_139 = arith.constant 4 : i32
      %138 = arith.muli %arg12, %c4_i32_139 : i32
      %c7_i32_140 = arith.constant 7 : i32
      %139 = arith.addi %138, %c7_i32_140 : i32
      %c0_i32_141 = arith.constant 0 : i32
      %140 = arith.addi %139, %c0_i32_141 : i32
      %c0_142 = arith.constant 0 : index
      %141 = arith.index_cast %140 : i32 to index
      %c9 = arith.constant 9 : index
      %c0_143 = arith.constant 0 : index
      %142 = vector.load %arg2[%c0_142, %141, %c9, %c0_143] : memref<1x32x32x128xbf16, #tpu.memory_space<vmem>>, vector<1x4x16x128xbf16>
      %143 = vector.shape_cast %142 : vector<1x4x16x128xbf16> to vector<4x16x128xbf16>
      %144 = vector.shape_cast %143 : vector<4x16x128xbf16> to vector<64x128xbf16>
      %c0_144 = arith.constant 0 : index
      %c2_145 = arith.constant 2 : index
      %c0_146 = arith.constant 0 : index
      %c0_147 = arith.constant 0 : index
      %145 = vector.load %arg5[%c0_144, %c2_145, %c0_146, %c0_147] : memref<3x3x128x128xbf16, #tpu.memory_space<vmem>>, vector<1x1x128x128xbf16>
      %146 = vector.shape_cast %145 : vector<1x1x128x128xbf16> to vector<128x128xbf16>
      %cst_148 = arith.constant dense<0.000000e+00> : vector<64x128xf32>
      %147 = tpu.matmul %144, %146, %cst_148 {dimension_numbers = #tpu.dot_dimension_numbers<[1], [0], [0], [1], [0, 0, 1, 1], [], []>} : vector<64x128xbf16>, vector<128x128xbf16>, vector<64x128xf32> -> vector<64x128xf32>
      %148 = arith.addf %100, %147 : vector<64x128xf32>
      %c0_149 = arith.constant 0 : index
      %c0_150 = arith.constant 0 : index
      %c2_151 = arith.constant 2 : index
      %c0_152 = arith.constant 0 : index
      %c0_153 = arith.constant 0 : index
      %149 = vector.load %arg3[%c0_149, %c0_150, %c2_151, %c0_152, %c0_153] : memref<4x3x3x128x128xbf16, #tpu.memory_space<vmem>>, vector<1x1x1x128x128xbf16>
      %150 = vector.shape_cast %149 : vector<1x1x1x128x128xbf16> to vector<128x128xbf16>
      %cst_154 = arith.constant dense<0.000000e+00> : vector<64x128xf32>
      %151 = tpu.matmul %144, %150, %cst_154 {dimension_numbers = #tpu.dot_dimension_numbers<[1], [0], [0], [1], [0, 0, 1, 1], [], []>} : vector<64x128xbf16>, vector<128x128xbf16>, vector<64x128xf32> -> vector<64x128xf32>
      %152 = arith.addf %137, %151 : vector<64x128xf32>
      %c4_i32_155 = arith.constant 4 : i32
      %153 = arith.muli %arg12, %c4_i32_155 : i32
      %c6_i32_156 = arith.constant 6 : i32
      %154 = arith.addi %153, %c6_i32_156 : i32
      %c0_i32_157 = arith.constant 0 : i32
      %155 = arith.addi %154, %c0_i32_157 : i32
      %c0_158 = arith.constant 0 : index
      %156 = arith.index_cast %155 : i32 to index
      %c10 = arith.constant 10 : index
      %c0_159 = arith.constant 0 : index
      %157 = vector.load %arg2[%c0_158, %156, %c10, %c0_159] : memref<1x32x32x128xbf16, #tpu.memory_space<vmem>>, vector<1x4x16x128xbf16>
      %158 = vector.shape_cast %157 : vector<1x4x16x128xbf16> to vector<4x16x128xbf16>
      %159 = vector.shape_cast %158 : vector<4x16x128xbf16> to vector<64x128xbf16>
      %c1_160 = arith.constant 1 : index
      %c0_161 = arith.constant 0 : index
      %c2_162 = arith.constant 2 : index
      %c0_163 = arith.constant 0 : index
      %c0_164 = arith.constant 0 : index
      %160 = vector.load %arg3[%c1_160, %c0_161, %c2_162, %c0_163, %c0_164] : memref<4x3x3x128x128xbf16, #tpu.memory_space<vmem>>, vector<1x1x1x128x128xbf16>
      %161 = vector.shape_cast %160 : vector<1x1x1x128x128xbf16> to vector<128x128xbf16>
      %cst_165 = arith.constant dense<0.000000e+00> : vector<64x128xf32>
      %162 = tpu.matmul %159, %161, %cst_165 {dimension_numbers = #tpu.dot_dimension_numbers<[1], [0], [0], [1], [0, 0, 1, 1], [], []>} : vector<64x128xbf16>, vector<128x128xbf16>, vector<64x128xf32> -> vector<64x128xf32>
      %163 = arith.addf %152, %162 : vector<64x128xf32>
      %c4_i32_166 = arith.constant 4 : i32
      %164 = arith.muli %arg12, %c4_i32_166 : i32
      %c4_i32_167 = arith.constant 4 : i32
      %165 = arith.addi %164, %c4_i32_167 : i32
      %c0_i32_168 = arith.constant 0 : i32
      %166 = arith.addi %165, %c0_i32_168 : i32
      %c0_169 = arith.constant 0 : index
      %167 = arith.index_cast %166 : i32 to index
      %c12 = arith.constant 12 : index
      %c0_170 = arith.constant 0 : index
      %168 = vector.load %arg2[%c0_169, %167, %c12, %c0_170] : memref<1x32x32x128xbf16, #tpu.memory_space<vmem>>, vector<1x4x16x128xbf16>
      %169 = vector.shape_cast %168 : vector<1x4x16x128xbf16> to vector<4x16x128xbf16>
      %170 = vector.shape_cast %169 : vector<4x16x128xbf16> to vector<64x128xbf16>
      %c2_171 = arith.constant 2 : index
      %c0_172 = arith.constant 0 : index
      %c2_173 = arith.constant 2 : index
      %c0_174 = arith.constant 0 : index
      %c0_175 = arith.constant 0 : index
      %171 = vector.load %arg3[%c2_171, %c0_172, %c2_173, %c0_174, %c0_175] : memref<4x3x3x128x128xbf16, #tpu.memory_space<vmem>>, vector<1x1x1x128x128xbf16>
      %172 = vector.shape_cast %171 : vector<1x1x1x128x128xbf16> to vector<128x128xbf16>
      %cst_176 = arith.constant dense<0.000000e+00> : vector<64x128xf32>
      %173 = tpu.matmul %170, %172, %cst_176 {dimension_numbers = #tpu.dot_dimension_numbers<[1], [0], [0], [1], [0, 0, 1, 1], [], []>} : vector<64x128xbf16>, vector<128x128xbf16>, vector<64x128xf32> -> vector<64x128xf32>
      %174 = arith.addf %163, %173 : vector<64x128xf32>
      %c4_i32_177 = arith.constant 4 : i32
      %175 = arith.muli %arg12, %c4_i32_177 : i32
      %c0_i32_178 = arith.constant 0 : i32
      %176 = arith.addi %175, %c0_i32_178 : i32
      %c0_i32_179 = arith.constant 0 : i32
      %177 = arith.addi %176, %c0_i32_179 : i32
      %c0_180 = arith.constant 0 : index
      %178 = arith.index_cast %177 : i32 to index
      %c16 = arith.constant 16 : index
      %c0_181 = arith.constant 0 : index
      %179 = vector.load %arg2[%c0_180, %178, %c16, %c0_181] : memref<1x32x32x128xbf16, #tpu.memory_space<vmem>>, vector<1x4x16x128xbf16>
      %180 = vector.shape_cast %179 : vector<1x4x16x128xbf16> to vector<4x16x128xbf16>
      %181 = vector.shape_cast %180 : vector<4x16x128xbf16> to vector<64x128xbf16>
      %c3_182 = arith.constant 3 : index
      %c0_183 = arith.constant 0 : index
      %c2_184 = arith.constant 2 : index
      %c0_185 = arith.constant 0 : index
      %c0_186 = arith.constant 0 : index
      %182 = vector.load %arg3[%c3_182, %c0_183, %c2_184, %c0_185, %c0_186] : memref<4x3x3x128x128xbf16, #tpu.memory_space<vmem>>, vector<1x1x1x128x128xbf16>
      %183 = vector.shape_cast %182 : vector<1x1x1x128x128xbf16> to vector<128x128xbf16>
      %cst_187 = arith.constant dense<0.000000e+00> : vector<64x128xf32>
      %184 = tpu.matmul %181, %183, %cst_187 {dimension_numbers = #tpu.dot_dimension_numbers<[1], [0], [0], [1], [0, 0, 1, 1], [], []>} : vector<64x128xbf16>, vector<128x128xbf16>, vector<64x128xf32> -> vector<64x128xf32>
      %185 = arith.addf %174, %184 : vector<64x128xf32>
      %c4_i32_188 = arith.constant 4 : i32
      %186 = arith.muli %arg12, %c4_i32_188 : i32
      %c7_i32_189 = arith.constant 7 : i32
      %187 = arith.addi %186, %c7_i32_189 : i32
      %c1_i32_190 = arith.constant 1 : i32
      %188 = arith.addi %187, %c1_i32_190 : i32
      %c0_191 = arith.constant 0 : index
      %189 = arith.index_cast %188 : i32 to index
      %c7_192 = arith.constant 7 : index
      %c0_193 = arith.constant 0 : index
      %190 = vector.load %arg2[%c0_191, %189, %c7_192, %c0_193] : memref<1x32x32x128xbf16, #tpu.memory_space<vmem>>, vector<1x4x16x128xbf16>
      %191 = vector.shape_cast %190 : vector<1x4x16x128xbf16> to vector<4x16x128xbf16>
      %192 = vector.shape_cast %191 : vector<4x16x128xbf16> to vector<64x128xbf16>
      %c1_194 = arith.constant 1 : index
      %c0_195 = arith.constant 0 : index
      %c0_196 = arith.constant 0 : index
      %c0_197 = arith.constant 0 : index
      %193 = vector.load %arg5[%c1_194, %c0_195, %c0_196, %c0_197] : memref<3x3x128x128xbf16, #tpu.memory_space<vmem>>, vector<1x1x128x128xbf16>
      %194 = vector.shape_cast %193 : vector<1x1x128x128xbf16> to vector<128x128xbf16>
      %cst_198 = arith.constant dense<0.000000e+00> : vector<64x128xf32>
      %195 = tpu.matmul %192, %194, %cst_198 {dimension_numbers = #tpu.dot_dimension_numbers<[1], [0], [0], [1], [0, 0, 1, 1], [], []>} : vector<64x128xbf16>, vector<128x128xbf16>, vector<64x128xf32> -> vector<64x128xf32>
      %196 = arith.addf %148, %195 : vector<64x128xf32>
      %c0_199 = arith.constant 0 : index
      %c1_200 = arith.constant 1 : index
      %c0_201 = arith.constant 0 : index
      %c0_202 = arith.constant 0 : index
      %c0_203 = arith.constant 0 : index
      %197 = vector.load %arg3[%c0_199, %c1_200, %c0_201, %c0_202, %c0_203] : memref<4x3x3x128x128xbf16, #tpu.memory_space<vmem>>, vector<1x1x1x128x128xbf16>
      %198 = vector.shape_cast %197 : vector<1x1x1x128x128xbf16> to vector<128x128xbf16>
      %cst_204 = arith.constant dense<0.000000e+00> : vector<64x128xf32>
      %199 = tpu.matmul %192, %198, %cst_204 {dimension_numbers = #tpu.dot_dimension_numbers<[1], [0], [0], [1], [0, 0, 1, 1], [], []>} : vector<64x128xbf16>, vector<128x128xbf16>, vector<64x128xf32> -> vector<64x128xf32>
      %200 = arith.addf %185, %199 : vector<64x128xf32>
      %c4_i32_205 = arith.constant 4 : i32
      %201 = arith.muli %arg12, %c4_i32_205 : i32
      %c6_i32_206 = arith.constant 6 : i32
      %202 = arith.addi %201, %c6_i32_206 : i32
      %c2_i32 = arith.constant 2 : i32
      %203 = arith.addi %202, %c2_i32 : i32
      %c0_207 = arith.constant 0 : index
      %204 = arith.index_cast %203 : i32 to index
      %c6_208 = arith.constant 6 : index
      %c0_209 = arith.constant 0 : index
      %205 = vector.load %arg2[%c0_207, %204, %c6_208, %c0_209] : memref<1x32x32x128xbf16, #tpu.memory_space<vmem>>, vector<1x4x16x128xbf16>
      %206 = vector.shape_cast %205 : vector<1x4x16x128xbf16> to vector<4x16x128xbf16>
      %207 = vector.shape_cast %206 : vector<4x16x128xbf16> to vector<64x128xbf16>
      %c1_210 = arith.constant 1 : index
      %c1_211 = arith.constant 1 : index
      %c0_212 = arith.constant 0 : index
      %c0_213 = arith.constant 0 : index
      %c0_214 = arith.constant 0 : index
      %208 = vector.load %arg3[%c1_210, %c1_211, %c0_212, %c0_213, %c0_214] : memref<4x3x3x128x128xbf16, #tpu.memory_space<vmem>>, vector<1x1x1x128x128xbf16>
      %209 = vector.shape_cast %208 : vector<1x1x1x128x128xbf16> to vector<128x128xbf16>
      %cst_215 = arith.constant dense<0.000000e+00> : vector<64x128xf32>
      %210 = tpu.matmul %207, %209, %cst_215 {dimension_numbers = #tpu.dot_dimension_numbers<[1], [0], [0], [1], [0, 0, 1, 1], [], []>} : vector<64x128xbf16>, vector<128x128xbf16>, vector<64x128xf32> -> vector<64x128xf32>
      %211 = arith.addf %200, %210 : vector<64x128xf32>
      %c4_i32_216 = arith.constant 4 : i32
      %212 = arith.muli %arg12, %c4_i32_216 : i32
      %c4_i32_217 = arith.constant 4 : i32
      %213 = arith.addi %212, %c4_i32_217 : i32
      %c4_i32_218 = arith.constant 4 : i32
      %214 = arith.addi %213, %c4_i32_218 : i32
      %c0_219 = arith.constant 0 : index
      %215 = arith.index_cast %214 : i32 to index
      %c4_220 = arith.constant 4 : index
      %c0_221 = arith.constant 0 : index
      %216 = vector.load %arg2[%c0_219, %215, %c4_220, %c0_221] : memref<1x32x32x128xbf16, #tpu.memory_space<vmem>>, vector<1x4x16x128xbf16>
      %217 = vector.shape_cast %216 : vector<1x4x16x128xbf16> to vector<4x16x128xbf16>
      %218 = vector.shape_cast %217 : vector<4x16x128xbf16> to vector<64x128xbf16>
      %c2_222 = arith.constant 2 : index
      %c1_223 = arith.constant 1 : index
      %c0_224 = arith.constant 0 : index
      %c0_225 = arith.constant 0 : index
      %c0_226 = arith.constant 0 : index
      %219 = vector.load %arg3[%c2_222, %c1_223, %c0_224, %c0_225, %c0_226] : memref<4x3x3x128x128xbf16, #tpu.memory_space<vmem>>, vector<1x1x1x128x128xbf16>
      %220 = vector.shape_cast %219 : vector<1x1x1x128x128xbf16> to vector<128x128xbf16>
      %cst_227 = arith.constant dense<0.000000e+00> : vector<64x128xf32>
      %221 = tpu.matmul %218, %220, %cst_227 {dimension_numbers = #tpu.dot_dimension_numbers<[1], [0], [0], [1], [0, 0, 1, 1], [], []>} : vector<64x128xbf16>, vector<128x128xbf16>, vector<64x128xf32> -> vector<64x128xf32>
      %222 = arith.addf %211, %221 : vector<64x128xf32>
      %c4_i32_228 = arith.constant 4 : i32
      %223 = arith.muli %arg12, %c4_i32_228 : i32
      %c0_i32_229 = arith.constant 0 : i32
      %224 = arith.addi %223, %c0_i32_229 : i32
      %c8_i32 = arith.constant 8 : i32
      %225 = arith.addi %224, %c8_i32 : i32
      %c0_230 = arith.constant 0 : index
      %226 = arith.index_cast %225 : i32 to index
      %c0_231 = arith.constant 0 : index
      %c0_232 = arith.constant 0 : index
      %227 = vector.load %arg2[%c0_230, %226, %c0_231, %c0_232] : memref<1x32x32x128xbf16, #tpu.memory_space<vmem>>, vector<1x4x16x128xbf16>
      %228 = vector.shape_cast %227 : vector<1x4x16x128xbf16> to vector<4x16x128xbf16>
      %229 = vector.shape_cast %228 : vector<4x16x128xbf16> to vector<64x128xbf16>
      %c3_233 = arith.constant 3 : index
      %c1_234 = arith.constant 1 : index
      %c0_235 = arith.constant 0 : index
      %c0_236 = arith.constant 0 : index
      %c0_237 = arith.constant 0 : index
      %230 = vector.load %arg3[%c3_233, %c1_234, %c0_235, %c0_236, %c0_237] : memref<4x3x3x128x128xbf16, #tpu.memory_space<vmem>>, vector<1x1x1x128x128xbf16>
      %231 = vector.shape_cast %230 : vector<1x1x1x128x128xbf16> to vector<128x128xbf16>
      %cst_238 = arith.constant dense<0.000000e+00> : vector<64x128xf32>
      %232 = tpu.matmul %229, %231, %cst_238 {dimension_numbers = #tpu.dot_dimension_numbers<[1], [0], [0], [1], [0, 0, 1, 1], [], []>} : vector<64x128xbf16>, vector<128x128xbf16>, vector<64x128xf32> -> vector<64x128xf32>
      %233 = arith.addf %222, %232 : vector<64x128xf32>
      %c4_i32_239 = arith.constant 4 : i32
      %234 = arith.muli %arg12, %c4_i32_239 : i32
      %c7_i32_240 = arith.constant 7 : i32
      %235 = arith.addi %234, %c7_i32_240 : i32
      %c1_i32_241 = arith.constant 1 : i32
      %236 = arith.addi %235, %c1_i32_241 : i32
      %c0_242 = arith.constant 0 : index
      %237 = arith.index_cast %236 : i32 to index
      %c8_243 = arith.constant 8 : index
      %c0_244 = arith.constant 0 : index
      %238 = vector.load %arg2[%c0_242, %237, %c8_243, %c0_244] : memref<1x32x32x128xbf16, #tpu.memory_space<vmem>>, vector<1x4x16x128xbf16>
      %239 = vector.shape_cast %238 : vector<1x4x16x128xbf16> to vector<4x16x128xbf16>
      %240 = vector.shape_cast %239 : vector<4x16x128xbf16> to vector<64x128xbf16>
      %c1_245 = arith.constant 1 : index
      %c1_246 = arith.constant 1 : index
      %c0_247 = arith.constant 0 : index
      %c0_248 = arith.constant 0 : index
      %241 = vector.load %arg5[%c1_245, %c1_246, %c0_247, %c0_248] : memref<3x3x128x128xbf16, #tpu.memory_space<vmem>>, vector<1x1x128x128xbf16>
      %242 = vector.shape_cast %241 : vector<1x1x128x128xbf16> to vector<128x128xbf16>
      %cst_249 = arith.constant dense<0.000000e+00> : vector<64x128xf32>
      %243 = tpu.matmul %240, %242, %cst_249 {dimension_numbers = #tpu.dot_dimension_numbers<[1], [0], [0], [1], [0, 0, 1, 1], [], []>} : vector<64x128xbf16>, vector<128x128xbf16>, vector<64x128xf32> -> vector<64x128xf32>
      %244 = arith.addf %196, %243 : vector<64x128xf32>
      %c0_250 = arith.constant 0 : index
      %c1_251 = arith.constant 1 : index
      %c1_252 = arith.constant 1 : index
      %c0_253 = arith.constant 0 : index
      %c0_254 = arith.constant 0 : index
      %245 = vector.load %arg3[%c0_250, %c1_251, %c1_252, %c0_253, %c0_254] : memref<4x3x3x128x128xbf16, #tpu.memory_space<vmem>>, vector<1x1x1x128x128xbf16>
      %246 = vector.shape_cast %245 : vector<1x1x1x128x128xbf16> to vector<128x128xbf16>
      %cst_255 = arith.constant dense<0.000000e+00> : vector<64x128xf32>
      %247 = tpu.matmul %240, %246, %cst_255 {dimension_numbers = #tpu.dot_dimension_numbers<[1], [0], [0], [1], [0, 0, 1, 1], [], []>} : vector<64x128xbf16>, vector<128x128xbf16>, vector<64x128xf32> -> vector<64x128xf32>
      %248 = arith.addf %233, %247 : vector<64x128xf32>
      %c4_i32_256 = arith.constant 4 : i32
      %249 = arith.muli %arg12, %c4_i32_256 : i32
      %c6_i32_257 = arith.constant 6 : i32
      %250 = arith.addi %249, %c6_i32_257 : i32
      %c2_i32_258 = arith.constant 2 : i32
      %251 = arith.addi %250, %c2_i32_258 : i32
      %c0_259 = arith.constant 0 : index
      %252 = arith.index_cast %251 : i32 to index
      %c8_260 = arith.constant 8 : index
      %c0_261 = arith.constant 0 : index
      %253 = vector.load %arg2[%c0_259, %252, %c8_260, %c0_261] : memref<1x32x32x128xbf16, #tpu.memory_space<vmem>>, vector<1x4x16x128xbf16>
      %254 = vector.shape_cast %253 : vector<1x4x16x128xbf16> to vector<4x16x128xbf16>
      %255 = vector.shape_cast %254 : vector<4x16x128xbf16> to vector<64x128xbf16>
      %c1_262 = arith.constant 1 : index
      %c1_263 = arith.constant 1 : index
      %c1_264 = arith.constant 1 : index
      %c0_265 = arith.constant 0 : index
      %c0_266 = arith.constant 0 : index
      %256 = vector.load %arg3[%c1_262, %c1_263, %c1_264, %c0_265, %c0_266] : memref<4x3x3x128x128xbf16, #tpu.memory_space<vmem>>, vector<1x1x1x128x128xbf16>
      %257 = vector.shape_cast %256 : vector<1x1x1x128x128xbf16> to vector<128x128xbf16>
      %cst_267 = arith.constant dense<0.000000e+00> : vector<64x128xf32>
      %258 = tpu.matmul %255, %257, %cst_267 {dimension_numbers = #tpu.dot_dimension_numbers<[1], [0], [0], [1], [0, 0, 1, 1], [], []>} : vector<64x128xbf16>, vector<128x128xbf16>, vector<64x128xf32> -> vector<64x128xf32>
      %259 = arith.addf %248, %258 : vector<64x128xf32>
      %c4_i32_268 = arith.constant 4 : i32
      %260 = arith.muli %arg12, %c4_i32_268 : i32
      %c4_i32_269 = arith.constant 4 : i32
      %261 = arith.addi %260, %c4_i32_269 : i32
      %c4_i32_270 = arith.constant 4 : i32
      %262 = arith.addi %261, %c4_i32_270 : i32
      %c0_271 = arith.constant 0 : index
      %263 = arith.index_cast %262 : i32 to index
      %c8_272 = arith.constant 8 : index
      %c0_273 = arith.constant 0 : index
      %264 = vector.load %arg2[%c0_271, %263, %c8_272, %c0_273] : memref<1x32x32x128xbf16, #tpu.memory_space<vmem>>, vector<1x4x16x128xbf16>
      %265 = vector.shape_cast %264 : vector<1x4x16x128xbf16> to vector<4x16x128xbf16>
      %266 = vector.shape_cast %265 : vector<4x16x128xbf16> to vector<64x128xbf16>
      %c2_274 = arith.constant 2 : index
      %c1_275 = arith.constant 1 : index
      %c1_276 = arith.constant 1 : index
      %c0_277 = arith.constant 0 : index
      %c0_278 = arith.constant 0 : index
      %267 = vector.load %arg3[%c2_274, %c1_275, %c1_276, %c0_277, %c0_278] : memref<4x3x3x128x128xbf16, #tpu.memory_space<vmem>>, vector<1x1x1x128x128xbf16>
      %268 = vector.shape_cast %267 : vector<1x1x1x128x128xbf16> to vector<128x128xbf16>
      %cst_279 = arith.constant dense<0.000000e+00> : vector<64x128xf32>
      %269 = tpu.matmul %266, %268, %cst_279 {dimension_numbers = #tpu.dot_dimension_numbers<[1], [0], [0], [1], [0, 0, 1, 1], [], []>} : vector<64x128xbf16>, vector<128x128xbf16>, vector<64x128xf32> -> vector<64x128xf32>
      %270 = arith.addf %259, %269 : vector<64x128xf32>
      %c4_i32_280 = arith.constant 4 : i32
      %271 = arith.muli %arg12, %c4_i32_280 : i32
      %c0_i32_281 = arith.constant 0 : i32
      %272 = arith.addi %271, %c0_i32_281 : i32
      %c8_i32_282 = arith.constant 8 : i32
      %273 = arith.addi %272, %c8_i32_282 : i32
      %c0_283 = arith.constant 0 : index
      %274 = arith.index_cast %273 : i32 to index
      %c8_284 = arith.constant 8 : index
      %c0_285 = arith.constant 0 : index
      %275 = vector.load %arg2[%c0_283, %274, %c8_284, %c0_285] : memref<1x32x32x128xbf16, #tpu.memory_space<vmem>>, vector<1x4x16x128xbf16>
      %276 = vector.shape_cast %275 : vector<1x4x16x128xbf16> to vector<4x16x128xbf16>
      %277 = vector.shape_cast %276 : vector<4x16x128xbf16> to vector<64x128xbf16>
      %c3_286 = arith.constant 3 : index
      %c1_287 = arith.constant 1 : index
      %c1_288 = arith.constant 1 : index
      %c0_289 = arith.constant 0 : index
      %c0_290 = arith.constant 0 : index
      %278 = vector.load %arg3[%c3_286, %c1_287, %c1_288, %c0_289, %c0_290] : memref<4x3x3x128x128xbf16, #tpu.memory_space<vmem>>, vector<1x1x1x128x128xbf16>
      %279 = vector.shape_cast %278 : vector<1x1x1x128x128xbf16> to vector<128x128xbf16>
      %cst_291 = arith.constant dense<0.000000e+00> : vector<64x128xf32>
      %280 = tpu.matmul %277, %279, %cst_291 {dimension_numbers = #tpu.dot_dimension_numbers<[1], [0], [0], [1], [0, 0, 1, 1], [], []>} : vector<64x128xbf16>, vector<128x128xbf16>, vector<64x128xf32> -> vector<64x128xf32>
      %281 = arith.addf %270, %280 : vector<64x128xf32>
      %c4_i32_292 = arith.constant 4 : i32
      %282 = arith.muli %arg12, %c4_i32_292 : i32
      %c7_i32_293 = arith.constant 7 : i32
      %283 = arith.addi %282, %c7_i32_293 : i32
      %c1_i32_294 = arith.constant 1 : i32
      %284 = arith.addi %283, %c1_i32_294 : i32
      %c0_295 = arith.constant 0 : index
      %285 = arith.index_cast %284 : i32 to index
      %c9_296 = arith.constant 9 : index
      %c0_297 = arith.constant 0 : index
      %286 = vector.load %arg2[%c0_295, %285, %c9_296, %c0_297] : memref<1x32x32x128xbf16, #tpu.memory_space<vmem>>, vector<1x4x16x128xbf16>
      %287 = vector.shape_cast %286 : vector<1x4x16x128xbf16> to vector<4x16x128xbf16>
      %288 = vector.shape_cast %287 : vector<4x16x128xbf16> to vector<64x128xbf16>
      %c1_298 = arith.constant 1 : index
      %c2_299 = arith.constant 2 : index
      %c0_300 = arith.constant 0 : index
      %c0_301 = arith.constant 0 : index
      %289 = vector.load %arg5[%c1_298, %c2_299, %c0_300, %c0_301] : memref<3x3x128x128xbf16, #tpu.memory_space<vmem>>, vector<1x1x128x128xbf16>
      %290 = vector.shape_cast %289 : vector<1x1x128x128xbf16> to vector<128x128xbf16>
      %cst_302 = arith.constant dense<0.000000e+00> : vector<64x128xf32>
      %291 = tpu.matmul %288, %290, %cst_302 {dimension_numbers = #tpu.dot_dimension_numbers<[1], [0], [0], [1], [0, 0, 1, 1], [], []>} : vector<64x128xbf16>, vector<128x128xbf16>, vector<64x128xf32> -> vector<64x128xf32>
      %292 = arith.addf %244, %291 : vector<64x128xf32>
      %c0_303 = arith.constant 0 : index
      %c1_304 = arith.constant 1 : index
      %c2_305 = arith.constant 2 : index
      %c0_306 = arith.constant 0 : index
      %c0_307 = arith.constant 0 : index
      %293 = vector.load %arg3[%c0_303, %c1_304, %c2_305, %c0_306, %c0_307] : memref<4x3x3x128x128xbf16, #tpu.memory_space<vmem>>, vector<1x1x1x128x128xbf16>
      %294 = vector.shape_cast %293 : vector<1x1x1x128x128xbf16> to vector<128x128xbf16>
      %cst_308 = arith.constant dense<0.000000e+00> : vector<64x128xf32>
      %295 = tpu.matmul %288, %294, %cst_308 {dimension_numbers = #tpu.dot_dimension_numbers<[1], [0], [0], [1], [0, 0, 1, 1], [], []>} : vector<64x128xbf16>, vector<128x128xbf16>, vector<64x128xf32> -> vector<64x128xf32>
      %296 = arith.addf %281, %295 : vector<64x128xf32>
      %c4_i32_309 = arith.constant 4 : i32
      %297 = arith.muli %arg12, %c4_i32_309 : i32
      %c6_i32_310 = arith.constant 6 : i32
      %298 = arith.addi %297, %c6_i32_310 : i32
      %c2_i32_311 = arith.constant 2 : i32
      %299 = arith.addi %298, %c2_i32_311 : i32
      %c0_312 = arith.constant 0 : index
      %300 = arith.index_cast %299 : i32 to index
      %c10_313 = arith.constant 10 : index
      %c0_314 = arith.constant 0 : index
      %301 = vector.load %arg2[%c0_312, %300, %c10_313, %c0_314] : memref<1x32x32x128xbf16, #tpu.memory_space<vmem>>, vector<1x4x16x128xbf16>
      %302 = vector.shape_cast %301 : vector<1x4x16x128xbf16> to vector<4x16x128xbf16>
      %303 = vector.shape_cast %302 : vector<4x16x128xbf16> to vector<64x128xbf16>
      %c1_315 = arith.constant 1 : index
      %c1_316 = arith.constant 1 : index
      %c2_317 = arith.constant 2 : index
      %c0_318 = arith.constant 0 : index
      %c0_319 = arith.constant 0 : index
      %304 = vector.load %arg3[%c1_315, %c1_316, %c2_317, %c0_318, %c0_319] : memref<4x3x3x128x128xbf16, #tpu.memory_space<vmem>>, vector<1x1x1x128x128xbf16>
      %305 = vector.shape_cast %304 : vector<1x1x1x128x128xbf16> to vector<128x128xbf16>
      %cst_320 = arith.constant dense<0.000000e+00> : vector<64x128xf32>
      %306 = tpu.matmul %303, %305, %cst_320 {dimension_numbers = #tpu.dot_dimension_numbers<[1], [0], [0], [1], [0, 0, 1, 1], [], []>} : vector<64x128xbf16>, vector<128x128xbf16>, vector<64x128xf32> -> vector<64x128xf32>
      %307 = arith.addf %296, %306 : vector<64x128xf32>
      %c4_i32_321 = arith.constant 4 : i32
      %308 = arith.muli %arg12, %c4_i32_321 : i32
      %c4_i32_322 = arith.constant 4 : i32
      %309 = arith.addi %308, %c4_i32_322 : i32
      %c4_i32_323 = arith.constant 4 : i32
      %310 = arith.addi %309, %c4_i32_323 : i32
      %c0_324 = arith.constant 0 : index
      %311 = arith.index_cast %310 : i32 to index
      %c12_325 = arith.constant 12 : index
      %c0_326 = arith.constant 0 : index
      %312 = vector.load %arg2[%c0_324, %311, %c12_325, %c0_326] : memref<1x32x32x128xbf16, #tpu.memory_space<vmem>>, vector<1x4x16x128xbf16>
      %313 = vector.shape_cast %312 : vector<1x4x16x128xbf16> to vector<4x16x128xbf16>
      %314 = vector.shape_cast %313 : vector<4x16x128xbf16> to vector<64x128xbf16>
      %c2_327 = arith.constant 2 : index
      %c1_328 = arith.constant 1 : index
      %c2_329 = arith.constant 2 : index
      %c0_330 = arith.constant 0 : index
      %c0_331 = arith.constant 0 : index
      %315 = vector.load %arg3[%c2_327, %c1_328, %c2_329, %c0_330, %c0_331] : memref<4x3x3x128x128xbf16, #tpu.memory_space<vmem>>, vector<1x1x1x128x128xbf16>
      %316 = vector.shape_cast %315 : vector<1x1x1x128x128xbf16> to vector<128x128xbf16>
      %cst_332 = arith.constant dense<0.000000e+00> : vector<64x128xf32>
      %317 = tpu.matmul %314, %316, %cst_332 {dimension_numbers = #tpu.dot_dimension_numbers<[1], [0], [0], [1], [0, 0, 1, 1], [], []>} : vector<64x128xbf16>, vector<128x128xbf16>, vector<64x128xf32> -> vector<64x128xf32>
      %318 = arith.addf %307, %317 : vector<64x128xf32>
      %c4_i32_333 = arith.constant 4 : i32
      %319 = arith.muli %arg12, %c4_i32_333 : i32
      %c0_i32_334 = arith.constant 0 : i32
      %320 = arith.addi %319, %c0_i32_334 : i32
      %c8_i32_335 = arith.constant 8 : i32
      %321 = arith.addi %320, %c8_i32_335 : i32
      %c0_336 = arith.constant 0 : index
      %322 = arith.index_cast %321 : i32 to index
      %c16_337 = arith.constant 16 : index
      %c0_338 = arith.constant 0 : index
      %323 = vector.load %arg2[%c0_336, %322, %c16_337, %c0_338] : memref<1x32x32x128xbf16, #tpu.memory_space<vmem>>, vector<1x4x16x128xbf16>
      %324 = vector.shape_cast %323 : vector<1x4x16x128xbf16> to vector<4x16x128xbf16>
      %325 = vector.shape_cast %324 : vector<4x16x128xbf16> to vector<64x128xbf16>
      %c3_339 = arith.constant 3 : index
      %c1_340 = arith.constant 1 : index
      %c2_341 = arith.constant 2 : index
      %c0_342 = arith.constant 0 : index
      %c0_343 = arith.constant 0 : index
      %326 = vector.load %arg3[%c3_339, %c1_340, %c2_341, %c0_342, %c0_343] : memref<4x3x3x128x128xbf16, #tpu.memory_space<vmem>>, vector<1x1x1x128x128xbf16>
      %327 = vector.shape_cast %326 : vector<1x1x1x128x128xbf16> to vector<128x128xbf16>
      %cst_344 = arith.constant dense<0.000000e+00> : vector<64x128xf32>
      %328 = tpu.matmul %325, %327, %cst_344 {dimension_numbers = #tpu.dot_dimension_numbers<[1], [0], [0], [1], [0, 0, 1, 1], [], []>} : vector<64x128xbf16>, vector<128x128xbf16>, vector<64x128xf32> -> vector<64x128xf32>
      %329 = arith.addf %318, %328 : vector<64x128xf32>
      %c4_i32_345 = arith.constant 4 : i32
      %330 = arith.muli %arg12, %c4_i32_345 : i32
      %c7_i32_346 = arith.constant 7 : i32
      %331 = arith.addi %330, %c7_i32_346 : i32
      %c2_i32_347 = arith.constant 2 : i32
      %332 = arith.addi %331, %c2_i32_347 : i32
      %c0_348 = arith.constant 0 : index
      %333 = arith.index_cast %332 : i32 to index
      %c7_349 = arith.constant 7 : index
      %c0_350 = arith.constant 0 : index
      %334 = vector.load %arg2[%c0_348, %333, %c7_349, %c0_350] : memref<1x32x32x128xbf16, #tpu.memory_space<vmem>>, vector<1x4x16x128xbf16>
      %335 = vector.shape_cast %334 : vector<1x4x16x128xbf16> to vector<4x16x128xbf16>
      %336 = vector.shape_cast %335 : vector<4x16x128xbf16> to vector<64x128xbf16>
      %c2_351 = arith.constant 2 : index
      %c0_352 = arith.constant 0 : index
      %c0_353 = arith.constant 0 : index
      %c0_354 = arith.constant 0 : index
      %337 = vector.load %arg5[%c2_351, %c0_352, %c0_353, %c0_354] : memref<3x3x128x128xbf16, #tpu.memory_space<vmem>>, vector<1x1x128x128xbf16>
      %338 = vector.shape_cast %337 : vector<1x1x128x128xbf16> to vector<128x128xbf16>
      %cst_355 = arith.constant dense<0.000000e+00> : vector<64x128xf32>
      %339 = tpu.matmul %336, %338, %cst_355 {dimension_numbers = #tpu.dot_dimension_numbers<[1], [0], [0], [1], [0, 0, 1, 1], [], []>} : vector<64x128xbf16>, vector<128x128xbf16>, vector<64x128xf32> -> vector<64x128xf32>
      %340 = arith.addf %292, %339 : vector<64x128xf32>
      %c0_356 = arith.constant 0 : index
      %c2_357 = arith.constant 2 : index
      %c0_358 = arith.constant 0 : index
      %c0_359 = arith.constant 0 : index
      %c0_360 = arith.constant 0 : index
      %341 = vector.load %arg3[%c0_356, %c2_357, %c0_358, %c0_359, %c0_360] : memref<4x3x3x128x128xbf16, #tpu.memory_space<vmem>>, vector<1x1x1x128x128xbf16>
      %342 = vector.shape_cast %341 : vector<1x1x1x128x128xbf16> to vector<128x128xbf16>
      %cst_361 = arith.constant dense<0.000000e+00> : vector<64x128xf32>
      %343 = tpu.matmul %336, %342, %cst_361 {dimension_numbers = #tpu.dot_dimension_numbers<[1], [0], [0], [1], [0, 0, 1, 1], [], []>} : vector<64x128xbf16>, vector<128x128xbf16>, vector<64x128xf32> -> vector<64x128xf32>
      %344 = arith.addf %329, %343 : vector<64x128xf32>
      %c4_i32_362 = arith.constant 4 : i32
      %345 = arith.muli %arg12, %c4_i32_362 : i32
      %c6_i32_363 = arith.constant 6 : i32
      %346 = arith.addi %345, %c6_i32_363 : i32
      %c4_i32_364 = arith.constant 4 : i32
      %347 = arith.addi %346, %c4_i32_364 : i32
      %c0_365 = arith.constant 0 : index
      %348 = arith.index_cast %347 : i32 to index
      %c6_366 = arith.constant 6 : index
      %c0_367 = arith.constant 0 : index
      %349 = vector.load %arg2[%c0_365, %348, %c6_366, %c0_367] : memref<1x32x32x128xbf16, #tpu.memory_space<vmem>>, vector<1x4x16x128xbf16>
      %350 = vector.shape_cast %349 : vector<1x4x16x128xbf16> to vector<4x16x128xbf16>
      %351 = vector.shape_cast %350 : vector<4x16x128xbf16> to vector<64x128xbf16>
      %c1_368 = arith.constant 1 : index
      %c2_369 = arith.constant 2 : index
      %c0_370 = arith.constant 0 : index
      %c0_371 = arith.constant 0 : index
      %c0_372 = arith.constant 0 : index
      %352 = vector.load %arg3[%c1_368, %c2_369, %c0_370, %c0_371, %c0_372] : memref<4x3x3x128x128xbf16, #tpu.memory_space<vmem>>, vector<1x1x1x128x128xbf16>
      %353 = vector.shape_cast %352 : vector<1x1x1x128x128xbf16> to vector<128x128xbf16>
      %cst_373 = arith.constant dense<0.000000e+00> : vector<64x128xf32>
      %354 = tpu.matmul %351, %353, %cst_373 {dimension_numbers = #tpu.dot_dimension_numbers<[1], [0], [0], [1], [0, 0, 1, 1], [], []>} : vector<64x128xbf16>, vector<128x128xbf16>, vector<64x128xf32> -> vector<64x128xf32>
      %355 = arith.addf %344, %354 : vector<64x128xf32>
      %c4_i32_374 = arith.constant 4 : i32
      %356 = arith.muli %arg12, %c4_i32_374 : i32
      %c4_i32_375 = arith.constant 4 : i32
      %357 = arith.addi %356, %c4_i32_375 : i32
      %c8_i32_376 = arith.constant 8 : i32
      %358 = arith.addi %357, %c8_i32_376 : i32
      %c0_377 = arith.constant 0 : index
      %359 = arith.index_cast %358 : i32 to index
      %c4_378 = arith.constant 4 : index
      %c0_379 = arith.constant 0 : index
      %360 = vector.load %arg2[%c0_377, %359, %c4_378, %c0_379] : memref<1x32x32x128xbf16, #tpu.memory_space<vmem>>, vector<1x4x16x128xbf16>
      %361 = vector.shape_cast %360 : vector<1x4x16x128xbf16> to vector<4x16x128xbf16>
      %362 = vector.shape_cast %361 : vector<4x16x128xbf16> to vector<64x128xbf16>
      %c2_380 = arith.constant 2 : index
      %c2_381 = arith.constant 2 : index
      %c0_382 = arith.constant 0 : index
      %c0_383 = arith.constant 0 : index
      %c0_384 = arith.constant 0 : index
      %363 = vector.load %arg3[%c2_380, %c2_381, %c0_382, %c0_383, %c0_384] : memref<4x3x3x128x128xbf16, #tpu.memory_space<vmem>>, vector<1x1x1x128x128xbf16>
      %364 = vector.shape_cast %363 : vector<1x1x1x128x128xbf16> to vector<128x128xbf16>
      %cst_385 = arith.constant dense<0.000000e+00> : vector<64x128xf32>
      %365 = tpu.matmul %362, %364, %cst_385 {dimension_numbers = #tpu.dot_dimension_numbers<[1], [0], [0], [1], [0, 0, 1, 1], [], []>} : vector<64x128xbf16>, vector<128x128xbf16>, vector<64x128xf32> -> vector<64x128xf32>
      %366 = arith.addf %355, %365 : vector<64x128xf32>
      %c4_i32_386 = arith.constant 4 : i32
      %367 = arith.muli %arg12, %c4_i32_386 : i32
      %c0_i32_387 = arith.constant 0 : i32
      %368 = arith.addi %367, %c0_i32_387 : i32
      %c16_i32 = arith.constant 16 : i32
      %369 = arith.addi %368, %c16_i32 : i32
      %c0_388 = arith.constant 0 : index
      %370 = arith.index_cast %369 : i32 to index
      %c0_389 = arith.constant 0 : index
      %c0_390 = arith.constant 0 : index
      %371 = vector.load %arg2[%c0_388, %370, %c0_389, %c0_390] : memref<1x32x32x128xbf16, #tpu.memory_space<vmem>>, vector<1x4x16x128xbf16>
      %372 = vector.shape_cast %371 : vector<1x4x16x128xbf16> to vector<4x16x128xbf16>
      %373 = vector.shape_cast %372 : vector<4x16x128xbf16> to vector<64x128xbf16>
      %c3_391 = arith.constant 3 : index
      %c2_392 = arith.constant 2 : index
      %c0_393 = arith.constant 0 : index
      %c0_394 = arith.constant 0 : index
      %c0_395 = arith.constant 0 : index
      %374 = vector.load %arg3[%c3_391, %c2_392, %c0_393, %c0_394, %c0_395] : memref<4x3x3x128x128xbf16, #tpu.memory_space<vmem>>, vector<1x1x1x128x128xbf16>
      %375 = vector.shape_cast %374 : vector<1x1x1x128x128xbf16> to vector<128x128xbf16>
      %cst_396 = arith.constant dense<0.000000e+00> : vector<64x128xf32>
      %376 = tpu.matmul %373, %375, %cst_396 {dimension_numbers = #tpu.dot_dimension_numbers<[1], [0], [0], [1], [0, 0, 1, 1], [], []>} : vector<64x128xbf16>, vector<128x128xbf16>, vector<64x128xf32> -> vector<64x128xf32>
      %377 = arith.addf %366, %376 : vector<64x128xf32>
      %c4_i32_397 = arith.constant 4 : i32
      %378 = arith.muli %arg12, %c4_i32_397 : i32
      %c7_i32_398 = arith.constant 7 : i32
      %379 = arith.addi %378, %c7_i32_398 : i32
      %c2_i32_399 = arith.constant 2 : i32
      %380 = arith.addi %379, %c2_i32_399 : i32
      %c0_400 = arith.constant 0 : index
      %381 = arith.index_cast %380 : i32 to index
      %c8_401 = arith.constant 8 : index
      %c0_402 = arith.constant 0 : index
      %382 = vector.load %arg2[%c0_400, %381, %c8_401, %c0_402] : memref<1x32x32x128xbf16, #tpu.memory_space<vmem>>, vector<1x4x16x128xbf16>
      %383 = vector.shape_cast %382 : vector<1x4x16x128xbf16> to vector<4x16x128xbf16>
      %384 = vector.shape_cast %383 : vector<4x16x128xbf16> to vector<64x128xbf16>
      %c2_403 = arith.constant 2 : index
      %c1_404 = arith.constant 1 : index
      %c0_405 = arith.constant 0 : index
      %c0_406 = arith.constant 0 : index
      %385 = vector.load %arg5[%c2_403, %c1_404, %c0_405, %c0_406] : memref<3x3x128x128xbf16, #tpu.memory_space<vmem>>, vector<1x1x128x128xbf16>
      %386 = vector.shape_cast %385 : vector<1x1x128x128xbf16> to vector<128x128xbf16>
      %cst_407 = arith.constant dense<0.000000e+00> : vector<64x128xf32>
      %387 = tpu.matmul %384, %386, %cst_407 {dimension_numbers = #tpu.dot_dimension_numbers<[1], [0], [0], [1], [0, 0, 1, 1], [], []>} : vector<64x128xbf16>, vector<128x128xbf16>, vector<64x128xf32> -> vector<64x128xf32>
      %388 = arith.addf %340, %387 : vector<64x128xf32>
      %c0_408 = arith.constant 0 : index
      %c2_409 = arith.constant 2 : index
      %c1_410 = arith.constant 1 : index
      %c0_411 = arith.constant 0 : index
      %c0_412 = arith.constant 0 : index
      %389 = vector.load %arg3[%c0_408, %c2_409, %c1_410, %c0_411, %c0_412] : memref<4x3x3x128x128xbf16, #tpu.memory_space<vmem>>, vector<1x1x1x128x128xbf16>
      %390 = vector.shape_cast %389 : vector<1x1x1x128x128xbf16> to vector<128x128xbf16>
      %cst_413 = arith.constant dense<0.000000e+00> : vector<64x128xf32>
      %391 = tpu.matmul %384, %390, %cst_413 {dimension_numbers = #tpu.dot_dimension_numbers<[1], [0], [0], [1], [0, 0, 1, 1], [], []>} : vector<64x128xbf16>, vector<128x128xbf16>, vector<64x128xf32> -> vector<64x128xf32>
      %392 = arith.addf %377, %391 : vector<64x128xf32>
      %c4_i32_414 = arith.constant 4 : i32
      %393 = arith.muli %arg12, %c4_i32_414 : i32
      %c6_i32_415 = arith.constant 6 : i32
      %394 = arith.addi %393, %c6_i32_415 : i32
      %c4_i32_416 = arith.constant 4 : i32
      %395 = arith.addi %394, %c4_i32_416 : i32
      %c0_417 = arith.constant 0 : index
      %396 = arith.index_cast %395 : i32 to index
      %c8_418 = arith.constant 8 : index
      %c0_419 = arith.constant 0 : index
      %397 = vector.load %arg2[%c0_417, %396, %c8_418, %c0_419] : memref<1x32x32x128xbf16, #tpu.memory_space<vmem>>, vector<1x4x16x128xbf16>
      %398 = vector.shape_cast %397 : vector<1x4x16x128xbf16> to vector<4x16x128xbf16>
      %399 = vector.shape_cast %398 : vector<4x16x128xbf16> to vector<64x128xbf16>
      %c1_420 = arith.constant 1 : index
      %c2_421 = arith.constant 2 : index
      %c1_422 = arith.constant 1 : index
      %c0_423 = arith.constant 0 : index
      %c0_424 = arith.constant 0 : index
      %400 = vector.load %arg3[%c1_420, %c2_421, %c1_422, %c0_423, %c0_424] : memref<4x3x3x128x128xbf16, #tpu.memory_space<vmem>>, vector<1x1x1x128x128xbf16>
      %401 = vector.shape_cast %400 : vector<1x1x1x128x128xbf16> to vector<128x128xbf16>
      %cst_425 = arith.constant dense<0.000000e+00> : vector<64x128xf32>
      %402 = tpu.matmul %399, %401, %cst_425 {dimension_numbers = #tpu.dot_dimension_numbers<[1], [0], [0], [1], [0, 0, 1, 1], [], []>} : vector<64x128xbf16>, vector<128x128xbf16>, vector<64x128xf32> -> vector<64x128xf32>
      %403 = arith.addf %392, %402 : vector<64x128xf32>
      %c4_i32_426 = arith.constant 4 : i32
      %404 = arith.muli %arg12, %c4_i32_426 : i32
      %c4_i32_427 = arith.constant 4 : i32
      %405 = arith.addi %404, %c4_i32_427 : i32
      %c8_i32_428 = arith.constant 8 : i32
      %406 = arith.addi %405, %c8_i32_428 : i32
      %c0_429 = arith.constant 0 : index
      %407 = arith.index_cast %406 : i32 to index
      %c8_430 = arith.constant 8 : index
      %c0_431 = arith.constant 0 : index
      %408 = vector.load %arg2[%c0_429, %407, %c8_430, %c0_431] : memref<1x32x32x128xbf16, #tpu.memory_space<vmem>>, vector<1x4x16x128xbf16>
      %409 = vector.shape_cast %408 : vector<1x4x16x128xbf16> to vector<4x16x128xbf16>
      %410 = vector.shape_cast %409 : vector<4x16x128xbf16> to vector<64x128xbf16>
      %c2_432 = arith.constant 2 : index
      %c2_433 = arith.constant 2 : index
      %c1_434 = arith.constant 1 : index
      %c0_435 = arith.constant 0 : index
      %c0_436 = arith.constant 0 : index
      %411 = vector.load %arg3[%c2_432, %c2_433, %c1_434, %c0_435, %c0_436] : memref<4x3x3x128x128xbf16, #tpu.memory_space<vmem>>, vector<1x1x1x128x128xbf16>
      %412 = vector.shape_cast %411 : vector<1x1x1x128x128xbf16> to vector<128x128xbf16>
      %cst_437 = arith.constant dense<0.000000e+00> : vector<64x128xf32>
      %413 = tpu.matmul %410, %412, %cst_437 {dimension_numbers = #tpu.dot_dimension_numbers<[1], [0], [0], [1], [0, 0, 1, 1], [], []>} : vector<64x128xbf16>, vector<128x128xbf16>, vector<64x128xf32> -> vector<64x128xf32>
      %414 = arith.addf %403, %413 : vector<64x128xf32>
      %c4_i32_438 = arith.constant 4 : i32
      %415 = arith.muli %arg12, %c4_i32_438 : i32
      %c0_i32_439 = arith.constant 0 : i32
      %416 = arith.addi %415, %c0_i32_439 : i32
      %c16_i32_440 = arith.constant 16 : i32
      %417 = arith.addi %416, %c16_i32_440 : i32
      %c0_441 = arith.constant 0 : index
      %418 = arith.index_cast %417 : i32 to index
      %c8_442 = arith.constant 8 : index
      %c0_443 = arith.constant 0 : index
      %419 = vector.load %arg2[%c0_441, %418, %c8_442, %c0_443] : memref<1x32x32x128xbf16, #tpu.memory_space<vmem>>, vector<1x4x16x128xbf16>
      %420 = vector.shape_cast %419 : vector<1x4x16x128xbf16> to vector<4x16x128xbf16>
      %421 = vector.shape_cast %420 : vector<4x16x128xbf16> to vector<64x128xbf16>
      %c3_444 = arith.constant 3 : index
      %c2_445 = arith.constant 2 : index
      %c1_446 = arith.constant 1 : index
      %c0_447 = arith.constant 0 : index
      %c0_448 = arith.constant 0 : index
      %422 = vector.load %arg3[%c3_444, %c2_445, %c1_446, %c0_447, %c0_448] : memref<4x3x3x128x128xbf16, #tpu.memory_space<vmem>>, vector<1x1x1x128x128xbf16>
      %423 = vector.shape_cast %422 : vector<1x1x1x128x128xbf16> to vector<128x128xbf16>
      %cst_449 = arith.constant dense<0.000000e+00> : vector<64x128xf32>
      %424 = tpu.matmul %421, %423, %cst_449 {dimension_numbers = #tpu.dot_dimension_numbers<[1], [0], [0], [1], [0, 0, 1, 1], [], []>} : vector<64x128xbf16>, vector<128x128xbf16>, vector<64x128xf32> -> vector<64x128xf32>
      %425 = arith.addf %414, %424 : vector<64x128xf32>
      %c4_i32_450 = arith.constant 4 : i32
      %426 = arith.muli %arg12, %c4_i32_450 : i32
      %c7_i32_451 = arith.constant 7 : i32
      %427 = arith.addi %426, %c7_i32_451 : i32
      %c2_i32_452 = arith.constant 2 : i32
      %428 = arith.addi %427, %c2_i32_452 : i32
      %c0_453 = arith.constant 0 : index
      %429 = arith.index_cast %428 : i32 to index
      %c9_454 = arith.constant 9 : index
      %c0_455 = arith.constant 0 : index
      %430 = vector.load %arg2[%c0_453, %429, %c9_454, %c0_455] : memref<1x32x32x128xbf16, #tpu.memory_space<vmem>>, vector<1x4x16x128xbf16>
      %431 = vector.shape_cast %430 : vector<1x4x16x128xbf16> to vector<4x16x128xbf16>
      %432 = vector.shape_cast %431 : vector<4x16x128xbf16> to vector<64x128xbf16>
      %c2_456 = arith.constant 2 : index
      %c2_457 = arith.constant 2 : index
      %c0_458 = arith.constant 0 : index
      %c0_459 = arith.constant 0 : index
      %433 = vector.load %arg5[%c2_456, %c2_457, %c0_458, %c0_459] : memref<3x3x128x128xbf16, #tpu.memory_space<vmem>>, vector<1x1x128x128xbf16>
      %434 = vector.shape_cast %433 : vector<1x1x128x128xbf16> to vector<128x128xbf16>
      %cst_460 = arith.constant dense<0.000000e+00> : vector<64x128xf32>
      %435 = tpu.matmul %432, %434, %cst_460 {dimension_numbers = #tpu.dot_dimension_numbers<[1], [0], [0], [1], [0, 0, 1, 1], [], []>} : vector<64x128xbf16>, vector<128x128xbf16>, vector<64x128xf32> -> vector<64x128xf32>
      %436 = arith.addf %388, %435 : vector<64x128xf32>
      %c0_461 = arith.constant 0 : index
      %c2_462 = arith.constant 2 : index
      %c2_463 = arith.constant 2 : index
      %c0_464 = arith.constant 0 : index
      %c0_465 = arith.constant 0 : index
      %437 = vector.load %arg3[%c0_461, %c2_462, %c2_463, %c0_464, %c0_465] : memref<4x3x3x128x128xbf16, #tpu.memory_space<vmem>>, vector<1x1x1x128x128xbf16>
      %438 = vector.shape_cast %437 : vector<1x1x1x128x128xbf16> to vector<128x128xbf16>
      %cst_466 = arith.constant dense<0.000000e+00> : vector<64x128xf32>
      %439 = tpu.matmul %432, %438, %cst_466 {dimension_numbers = #tpu.dot_dimension_numbers<[1], [0], [0], [1], [0, 0, 1, 1], [], []>} : vector<64x128xbf16>, vector<128x128xbf16>, vector<64x128xf32> -> vector<64x128xf32>
      %440 = arith.addf %425, %439 : vector<64x128xf32>
      %c4_i32_467 = arith.constant 4 : i32
      %441 = arith.muli %arg12, %c4_i32_467 : i32
      %c6_i32_468 = arith.constant 6 : i32
      %442 = arith.addi %441, %c6_i32_468 : i32
      %c4_i32_469 = arith.constant 4 : i32
      %443 = arith.addi %442, %c4_i32_469 : i32
      %c0_470 = arith.constant 0 : index
      %444 = arith.index_cast %443 : i32 to index
      %c10_471 = arith.constant 10 : index
      %c0_472 = arith.constant 0 : index
      %445 = vector.load %arg2[%c0_470, %444, %c10_471, %c0_472] : memref<1x32x32x128xbf16, #tpu.memory_space<vmem>>, vector<1x4x16x128xbf16>
      %446 = vector.shape_cast %445 : vector<1x4x16x128xbf16> to vector<4x16x128xbf16>
      %447 = vector.shape_cast %446 : vector<4x16x128xbf16> to vector<64x128xbf16>
      %c1_473 = arith.constant 1 : index
      %c2_474 = arith.constant 2 : index
      %c2_475 = arith.constant 2 : index
      %c0_476 = arith.constant 0 : index
      %c0_477 = arith.constant 0 : index
      %448 = vector.load %arg3[%c1_473, %c2_474, %c2_475, %c0_476, %c0_477] : memref<4x3x3x128x128xbf16, #tpu.memory_space<vmem>>, vector<1x1x1x128x128xbf16>
      %449 = vector.shape_cast %448 : vector<1x1x1x128x128xbf16> to vector<128x128xbf16>
      %cst_478 = arith.constant dense<0.000000e+00> : vector<64x128xf32>
      %450 = tpu.matmul %447, %449, %cst_478 {dimension_numbers = #tpu.dot_dimension_numbers<[1], [0], [0], [1], [0, 0, 1, 1], [], []>} : vector<64x128xbf16>, vector<128x128xbf16>, vector<64x128xf32> -> vector<64x128xf32>
      %451 = arith.addf %440, %450 : vector<64x128xf32>
      %c4_i32_479 = arith.constant 4 : i32
      %452 = arith.muli %arg12, %c4_i32_479 : i32
      %c4_i32_480 = arith.constant 4 : i32
      %453 = arith.addi %452, %c4_i32_480 : i32
      %c8_i32_481 = arith.constant 8 : i32
      %454 = arith.addi %453, %c8_i32_481 : i32
      %c0_482 = arith.constant 0 : index
      %455 = arith.index_cast %454 : i32 to index
      %c12_483 = arith.constant 12 : index
      %c0_484 = arith.constant 0 : index
      %456 = vector.load %arg2[%c0_482, %455, %c12_483, %c0_484] : memref<1x32x32x128xbf16, #tpu.memory_space<vmem>>, vector<1x4x16x128xbf16>
      %457 = vector.shape_cast %456 : vector<1x4x16x128xbf16> to vector<4x16x128xbf16>
      %458 = vector.shape_cast %457 : vector<4x16x128xbf16> to vector<64x128xbf16>
      %c2_485 = arith.constant 2 : index
      %c2_486 = arith.constant 2 : index
      %c2_487 = arith.constant 2 : index
      %c0_488 = arith.constant 0 : index
      %c0_489 = arith.constant 0 : index
      %459 = vector.load %arg3[%c2_485, %c2_486, %c2_487, %c0_488, %c0_489] : memref<4x3x3x128x128xbf16, #tpu.memory_space<vmem>>, vector<1x1x1x128x128xbf16>
      %460 = vector.shape_cast %459 : vector<1x1x1x128x128xbf16> to vector<128x128xbf16>
      %cst_490 = arith.constant dense<0.000000e+00> : vector<64x128xf32>
      %461 = tpu.matmul %458, %460, %cst_490 {dimension_numbers = #tpu.dot_dimension_numbers<[1], [0], [0], [1], [0, 0, 1, 1], [], []>} : vector<64x128xbf16>, vector<128x128xbf16>, vector<64x128xf32> -> vector<64x128xf32>
      %462 = arith.addf %451, %461 : vector<64x128xf32>
      %c4_i32_491 = arith.constant 4 : i32
      %463 = arith.muli %arg12, %c4_i32_491 : i32
      %c0_i32_492 = arith.constant 0 : i32
      %464 = arith.addi %463, %c0_i32_492 : i32
      %c16_i32_493 = arith.constant 16 : i32
      %465 = arith.addi %464, %c16_i32_493 : i32
      %c0_494 = arith.constant 0 : index
      %466 = arith.index_cast %465 : i32 to index
      %c16_495 = arith.constant 16 : index
      %c0_496 = arith.constant 0 : index
      %467 = vector.load %arg2[%c0_494, %466, %c16_495, %c0_496] : memref<1x32x32x128xbf16, #tpu.memory_space<vmem>>, vector<1x4x16x128xbf16>
      %468 = vector.shape_cast %467 : vector<1x4x16x128xbf16> to vector<4x16x128xbf16>
      %469 = vector.shape_cast %468 : vector<4x16x128xbf16> to vector<64x128xbf16>
      %c3_497 = arith.constant 3 : index
      %c2_498 = arith.constant 2 : index
      %c2_499 = arith.constant 2 : index
      %c0_500 = arith.constant 0 : index
      %c0_501 = arith.constant 0 : index
      %470 = vector.load %arg3[%c3_497, %c2_498, %c2_499, %c0_500, %c0_501] : memref<4x3x3x128x128xbf16, #tpu.memory_space<vmem>>, vector<1x1x1x128x128xbf16>
      %471 = vector.shape_cast %470 : vector<1x1x1x128x128xbf16> to vector<128x128xbf16>
      %cst_502 = arith.constant dense<0.000000e+00> : vector<64x128xf32>
      %472 = tpu.matmul %469, %471, %cst_502 {dimension_numbers = #tpu.dot_dimension_numbers<[1], [0], [0], [1], [0, 0, 1, 1], [], []>} : vector<64x128xbf16>, vector<128x128xbf16>, vector<64x128xf32> -> vector<64x128xf32>
      %473 = arith.addf %462, %472 : vector<64x128xf32>
      %cst_503 = arith.constant 0.000000e+00 : f32
      %474 = vector.broadcast %cst_503 : f32 to vector<64x128xf32>
      %475 = arith.maximumf %473, %474 : vector<64x128xf32>
      %476 = arith.truncf %475 : vector<64x128xf32> to vector<64x128xbf16>
      %477 = vector.shape_cast %476 : vector<64x128xbf16> to vector<4x16x128xbf16>
      %c4_i32_504 = arith.constant 4 : i32
      %478 = arith.muli %arg12, %c4_i32_504 : i32
      %c1_i32_505 = arith.constant 1 : i32
      %479 = arith.addi %478, %c1_i32_505 : i32
      %c0_506 = arith.constant 0 : index
      %480 = arith.index_cast %479 : i32 to index
      %c1_507 = arith.constant 1 : index
      %c0_508 = arith.constant 0 : index
      %481 = vector.load %arg10[%c0_506, %480, %c1_507, %c0_508] : memref<1x18x18x128xbf16, #tpu.memory_space<vmem>>, vector<1x4x16x128xbf16>
      %482 = vector.shape_cast %481 : vector<1x4x16x128xbf16> to vector<4x16x128xbf16>
      %483 = vector.shape_cast %477 : vector<4x16x128xbf16> to vector<1x4x16x128xbf16>
      tpu.vector_store %arg10[%c0_506, %480, %c1_507, %c0_508], %483 {strides = array<i32>} : memref<1x18x18x128xbf16, #tpu.memory_space<vmem>>, vector<1x4x16x128xbf16>,
      %484 = vector.shape_cast %436 : vector<64x128xf32> to vector<4x16x128xf32>
      %c4_i32_509 = arith.constant 4 : i32
      %485 = arith.muli %arg12, %c4_i32_509 : i32
      %c0_510 = arith.constant 0 : index
      %486 = arith.index_cast %485 : i32 to index
      %c0_511 = arith.constant 0 : index
      %c0_512 = arith.constant 0 : index
      %487 = vector.load %arg11[%c0_510, %486, %c0_511, %c0_512] : memref<1x16x16x128xf32, #tpu.memory_space<vmem>>, vector<1x4x16x128xf32>
      %488 = vector.shape_cast %487 : vector<1x4x16x128xf32> to vector<4x16x128xf32>
      %489 = vector.shape_cast %484 : vector<4x16x128xf32> to vector<1x4x16x128xf32>
      tpu.vector_store %arg11[%c0_510, %486, %c0_511, %c0_512], %489 {strides = array<i32>} : memref<1x16x16x128xf32, #tpu.memory_space<vmem>>, vector<1x4x16x128xf32>,
      %cst_513 = arith.constant dense<0.000000e+00> : vector<128xf32>
      %490 = vector.multi_reduction <add>, %436, %cst_513 [0] : vector<64x128xf32> to vector<128xf32>
      %491 = vector.shape_cast %490 : vector<128xf32> to vector<1x128xf32>
      %492 = arith.addf %arg13, %491 : vector<1x128xf32>
      %493 = arith.mulf %436, %436 : vector<64x128xf32>
      %cst_514 = arith.constant dense<0.000000e+00> : vector<128xf32>
      %494 = vector.multi_reduction <add>, %493, %cst_514 [0] : vector<64x128xf32> to vector<128xf32>
      %495 = vector.shape_cast %494 : vector<128xf32> to vector<1x128xf32>
      %496 = arith.addf %arg14, %495 : vector<1x128xf32>
      scf.yield %492, %496 : vector<1x128xf32>, vector<1x128xf32>
    }
    %c4_i32_0 = arith.constant 4 : i32
    %c0 = arith.constant 0 : index
    %c2 = arith.constant 2 : index
    %c0_1 = arith.constant 0 : index
    %c0_2 = arith.constant 0 : index
    %3 = vector.load %arg10[%c0, %c2, %c0_1, %c0_2] : memref<1x18x18x128xbf16, #tpu.memory_space<vmem>>, vector<1x1x18x128xbf16>
    %4 = vector.shape_cast %3 : vector<1x1x18x128xbf16> to vector<1x18x128xbf16>
    %c0_3 = arith.constant 0 : index
    %c0_4 = arith.constant 0 : index
    %c0_5 = arith.constant 0 : index
    %c0_6 = arith.constant 0 : index
    %5 = vector.load %arg10[%c0_3, %c0_4, %c0_5, %c0_6] : memref<1x18x18x128xbf16, #tpu.memory_space<vmem>>, vector<1x1x18x128xbf16>
    %6 = vector.shape_cast %5 : vector<1x1x18x128xbf16> to vector<1x18x128xbf16>
    %7 = vector.shape_cast %4 : vector<1x18x128xbf16> to vector<1x1x18x128xbf16>
    tpu.vector_store %arg10[%c0_3, %c0_4, %c0_5, %c0_6], %7 {strides = array<i32>} : memref<1x18x18x128xbf16, #tpu.memory_space<vmem>>, vector<1x1x18x128xbf16>,
    %c0_7 = arith.constant 0 : index
    %c15 = arith.constant 15 : index
    %c0_8 = arith.constant 0 : index
    %c0_9 = arith.constant 0 : index
    %8 = vector.load %arg10[%c0_7, %c15, %c0_8, %c0_9] : memref<1x18x18x128xbf16, #tpu.memory_space<vmem>>, vector<1x1x18x128xbf16>
    %9 = vector.shape_cast %8 : vector<1x1x18x128xbf16> to vector<1x18x128xbf16>
    %c0_10 = arith.constant 0 : index
    %c17 = arith.constant 17 : index
    %c0_11 = arith.constant 0 : index
    %c0_12 = arith.constant 0 : index
    %10 = vector.load %arg10[%c0_10, %c17, %c0_11, %c0_12] : memref<1x18x18x128xbf16, #tpu.memory_space<vmem>>, vector<1x1x18x128xbf16>
    %11 = vector.shape_cast %10 : vector<1x1x18x128xbf16> to vector<1x18x128xbf16>
    %12 = vector.shape_cast %9 : vector<1x18x128xbf16> to vector<1x1x18x128xbf16>
    tpu.vector_store %arg10[%c0_10, %c17, %c0_11, %c0_12], %12 {strides = array<i32>} : memref<1x18x18x128xbf16, #tpu.memory_space<vmem>>, vector<1x1x18x128xbf16>,
    %c0_13 = arith.constant 0 : index
    %c0_14 = arith.constant 0 : index
    %c2_15 = arith.constant 2 : index
    %c0_16 = arith.constant 0 : index
    %13 = vector.load %arg10[%c0_13, %c0_14, %c2_15, %c0_16] : memref<1x18x18x128xbf16, #tpu.memory_space<vmem>>, vector<1x18x1x128xbf16>
    %14 = vector.shape_cast %13 : vector<1x18x1x128xbf16> to vector<18x1x128xbf16>
    %c0_17 = arith.constant 0 : index
    %c0_18 = arith.constant 0 : index
    %c0_19 = arith.constant 0 : index
    %c0_20 = arith.constant 0 : index
    %15 = vector.load %arg10[%c0_17, %c0_18, %c0_19, %c0_20] : memref<1x18x18x128xbf16, #tpu.memory_space<vmem>>, vector<1x18x1x128xbf16>
    %16 = vector.shape_cast %15 : vector<1x18x1x128xbf16> to vector<18x1x128xbf16>
    %17 = vector.shape_cast %14 : vector<18x1x128xbf16> to vector<1x18x1x128xbf16>
    tpu.vector_store %arg10[%c0_17, %c0_18, %c0_19, %c0_20], %17 {strides = array<i32>} : memref<1x18x18x128xbf16, #tpu.memory_space<vmem>>, vector<1x18x1x128xbf16>,
    %c0_21 = arith.constant 0 : index
    %c0_22 = arith.constant 0 : index
    %c15_23 = arith.constant 15 : index
    %c0_24 = arith.constant 0 : index
    %18 = vector.load %arg10[%c0_21, %c0_22, %c15_23, %c0_24] : memref<1x18x18x128xbf16, #tpu.memory_space<vmem>>, vector<1x18x1x128xbf16>
    %19 = vector.shape_cast %18 : vector<1x18x1x128xbf16> to vector<18x1x128xbf16>
    %c0_25 = arith.constant 0 : index
    %c0_26 = arith.constant 0 : index
    %c17_27 = arith.constant 17 : index
    %c0_28 = arith.constant 0 : index
    %20 = vector.load %arg10[%c0_25, %c0_26, %c17_27, %c0_28] : memref<1x18x18x128xbf16, #tpu.memory_space<vmem>>, vector<1x18x1x128xbf16>
    %21 = vector.shape_cast %20 : vector<1x18x1x128xbf16> to vector<18x1x128xbf16>
    %22 = vector.shape_cast %19 : vector<18x1x128xbf16> to vector<1x18x1x128xbf16>
    tpu.vector_store %arg10[%c0_25, %c0_26, %c17_27, %c0_28], %22 {strides = array<i32>} : memref<1x18x18x128xbf16, #tpu.memory_space<vmem>>, vector<1x18x1x128xbf16>,
    %cst_29 = arith.constant 3.906250e-03 : f32
    %23 = vector.broadcast %cst_29 : f32 to vector<1x128xf32>
    %24 = arith.mulf %2#0, %23 : vector<1x128xf32>
    %25 = arith.mulf %2#0, %24 : vector<1x128xf32>
    %26 = arith.subf %2#1, %25 : vector<1x128xf32>
    %cst_30 = arith.constant 0.00392156886 : f32
    %27 = vector.broadcast %cst_30 : f32 to vector<1x128xf32>
    %28 = arith.mulf %26, %27 : vector<1x128xf32>
    %cst_31 = arith.constant 0.000000e+00 : f32
    %29 = vector.broadcast %cst_31 : f32 to vector<1x128xf32>
    %30 = arith.maximumf %28, %29 : vector<1x128xf32>
    %31 = math.sqrt %30 : vector<1x128xf32>
    %cst_32 = arith.constant 9.99999971E-10 : f32
    %32 = vector.broadcast %cst_32 : f32 to vector<1x128xf32>
    %33 = arith.addf %31, %32 : vector<1x128xf32>
    %34 = tpu.reciprocal %33 {approx = true} : vector<1x128xf32> -> vector<1x128xf32>
    %c0_i32_33 = arith.constant 0 : i32
    %c4_i32_34 = arith.constant 4 : i32
    %35 = arith.addi %c0_i32_33, %c4_i32_34 : i32
    %c1_i32_35 = arith.constant 1 : i32
    scf.for %arg12 = %c0_i32_33 to %35 step %c1_i32_35  : i32 {
      %c0_37 = arith.constant 0 : index
      %c0_38 = arith.constant 0 : index
      %36 = vector.load %arg8[%c0_37, %c0_38] : memref<1x128xf32, #tpu.memory_space<vmem>>, vector<1x128xf32>
      %37 = vector.shape_cast %36 : vector<1x128xf32> to vector<1x128xf32>
      %38 = vector.broadcast %37 : vector<1x128xf32> to vector<64x128xf32>
      %c4_i32_39 = arith.constant 4 : i32
      %39 = arith.muli %arg12, %c4_i32_39 : i32
      %c0_i32_40 = arith.constant 0 : i32
      %40 = arith.addi %39, %c0_i32_40 : i32
      %c0_41 = arith.constant 0 : index
      %41 = arith.index_cast %40 : i32 to index
      %c0_42 = arith.constant 0 : index
      %c0_43 = arith.constant 0 : index
      %42 = vector.load %arg10[%c0_41, %41, %c0_42, %c0_43] : memref<1x18x18x128xbf16, #tpu.memory_space<vmem>>, vector<1x4x16x128xbf16>
      %43 = vector.shape_cast %42 : vector<1x4x16x128xbf16> to vector<4x16x128xbf16>
      %44 = vector.shape_cast %43 : vector<4x16x128xbf16> to vector<64x128xbf16>
      %c0_44 = arith.constant 0 : index
      %c0_45 = arith.constant 0 : index
      %c0_46 = arith.constant 0 : index
      %c0_47 = arith.constant 0 : index
      %45 = vector.load %arg7[%c0_44, %c0_45, %c0_46, %c0_47] : memref<3x3x128x128xbf16, #tpu.memory_space<vmem>>, vector<1x1x128x128xbf16>
      %46 = vector.shape_cast %45 : vector<1x1x128x128xbf16> to vector<128x128xbf16>
      %cst_48 = arith.constant dense<0.000000e+00> : vector<64x128xf32>
      %47 = tpu.matmul %44, %46, %cst_48 {dimension_numbers = #tpu.dot_dimension_numbers<[1], [0], [0], [1], [0, 0, 1, 1], [], []>} : vector<64x128xbf16>, vector<128x128xbf16>, vector<64x128xf32> -> vector<64x128xf32>
      %48 = arith.addf %38, %47 : vector<64x128xf32>
      %c4_i32_49 = arith.constant 4 : i32
      %49 = arith.muli %arg12, %c4_i32_49 : i32
      %c0_i32_50 = arith.constant 0 : i32
      %50 = arith.addi %49, %c0_i32_50 : i32
      %c0_51 = arith.constant 0 : index
      %51 = arith.index_cast %50 : i32 to index
      %c1 = arith.constant 1 : index
      %c0_52 = arith.constant 0 : index
      %52 = vector.load %arg10[%c0_51, %51, %c1, %c0_52] : memref<1x18x18x128xbf16, #tpu.memory_space<vmem>>, vector<1x4x16x128xbf16>
      %53 = vector.shape_cast %52 : vector<1x4x16x128xbf16> to vector<4x16x128xbf16>
      %54 = vector.shape_cast %53 : vector<4x16x128xbf16> to vector<64x128xbf16>
      %c0_53 = arith.constant 0 : index
      %c1_54 = arith.constant 1 : index
      %c0_55 = arith.constant 0 : index
      %c0_56 = arith.constant 0 : index
      %55 = vector.load %arg7[%c0_53, %c1_54, %c0_55, %c0_56] : memref<3x3x128x128xbf16, #tpu.memory_space<vmem>>, vector<1x1x128x128xbf16>
      %56 = vector.shape_cast %55 : vector<1x1x128x128xbf16> to vector<128x128xbf16>
      %cst_57 = arith.constant dense<0.000000e+00> : vector<64x128xf32>
      %57 = tpu.matmul %54, %56, %cst_57 {dimension_numbers = #tpu.dot_dimension_numbers<[1], [0], [0], [1], [0, 0, 1, 1], [], []>} : vector<64x128xbf16>, vector<128x128xbf16>, vector<64x128xf32> -> vector<64x128xf32>
      %58 = arith.addf %48, %57 : vector<64x128xf32>
      %c4_i32_58 = arith.constant 4 : i32
      %59 = arith.muli %arg12, %c4_i32_58 : i32
      %c0_i32_59 = arith.constant 0 : i32
      %60 = arith.addi %59, %c0_i32_59 : i32
      %c0_60 = arith.constant 0 : index
      %61 = arith.index_cast %60 : i32 to index
      %c2_61 = arith.constant 2 : index
      %c0_62 = arith.constant 0 : index
      %62 = vector.load %arg10[%c0_60, %61, %c2_61, %c0_62] : memref<1x18x18x128xbf16, #tpu.memory_space<vmem>>, vector<1x4x16x128xbf16>
      %63 = vector.shape_cast %62 : vector<1x4x16x128xbf16> to vector<4x16x128xbf16>
      %64 = vector.shape_cast %63 : vector<4x16x128xbf16> to vector<64x128xbf16>
      %c0_63 = arith.constant 0 : index
      %c2_64 = arith.constant 2 : index
      %c0_65 = arith.constant 0 : index
      %c0_66 = arith.constant 0 : index
      %65 = vector.load %arg7[%c0_63, %c2_64, %c0_65, %c0_66] : memref<3x3x128x128xbf16, #tpu.memory_space<vmem>>, vector<1x1x128x128xbf16>
      %66 = vector.shape_cast %65 : vector<1x1x128x128xbf16> to vector<128x128xbf16>
      %cst_67 = arith.constant dense<0.000000e+00> : vector<64x128xf32>
      %67 = tpu.matmul %64, %66, %cst_67 {dimension_numbers = #tpu.dot_dimension_numbers<[1], [0], [0], [1], [0, 0, 1, 1], [], []>} : vector<64x128xbf16>, vector<128x128xbf16>, vector<64x128xf32> -> vector<64x128xf32>
      %68 = arith.addf %58, %67 : vector<64x128xf32>
      %c4_i32_68 = arith.constant 4 : i32
      %69 = arith.muli %arg12, %c4_i32_68 : i32
      %c1_i32_69 = arith.constant 1 : i32
      %70 = arith.addi %69, %c1_i32_69 : i32
      %c0_70 = arith.constant 0 : index
      %71 = arith.index_cast %70 : i32 to index
      %c0_71 = arith.constant 0 : index
      %c0_72 = arith.constant 0 : index
      %72 = vector.load %arg10[%c0_70, %71, %c0_71, %c0_72] : memref<1x18x18x128xbf16, #tpu.memory_space<vmem>>, vector<1x4x16x128xbf16>
      %73 = vector.shape_cast %72 : vector<1x4x16x128xbf16> to vector<4x16x128xbf16>
      %74 = vector.shape_cast %73 : vector<4x16x128xbf16> to vector<64x128xbf16>
      %c1_73 = arith.constant 1 : index
      %c0_74 = arith.constant 0 : index
      %c0_75 = arith.constant 0 : index
      %c0_76 = arith.constant 0 : index
      %75 = vector.load %arg7[%c1_73, %c0_74, %c0_75, %c0_76] : memref<3x3x128x128xbf16, #tpu.memory_space<vmem>>, vector<1x1x128x128xbf16>
      %76 = vector.shape_cast %75 : vector<1x1x128x128xbf16> to vector<128x128xbf16>
      %cst_77 = arith.constant dense<0.000000e+00> : vector<64x128xf32>
      %77 = tpu.matmul %74, %76, %cst_77 {dimension_numbers = #tpu.dot_dimension_numbers<[1], [0], [0], [1], [0, 0, 1, 1], [], []>} : vector<64x128xbf16>, vector<128x128xbf16>, vector<64x128xf32> -> vector<64x128xf32>
      %78 = arith.addf %68, %77 : vector<64x128xf32>
      %c4_i32_78 = arith.constant 4 : i32
      %79 = arith.muli %arg12, %c4_i32_78 : i32
      %c1_i32_79 = arith.constant 1 : i32
      %80 = arith.addi %79, %c1_i32_79 : i32
      %c0_80 = arith.constant 0 : index
      %81 = arith.index_cast %80 : i32 to index
      %c1_81 = arith.constant 1 : index
      %c0_82 = arith.constant 0 : index
      %82 = vector.load %arg10[%c0_80, %81, %c1_81, %c0_82] : memref<1x18x18x128xbf16, #tpu.memory_space<vmem>>, vector<1x4x16x128xbf16>
      %83 = vector.shape_cast %82 : vector<1x4x16x128xbf16> to vector<4x16x128xbf16>
      %84 = vector.shape_cast %83 : vector<4x16x128xbf16> to vector<64x128xbf16>
      %c1_83 = arith.constant 1 : index
      %c1_84 = arith.constant 1 : index
      %c0_85 = arith.constant 0 : index
      %c0_86 = arith.constant 0 : index
      %85 = vector.load %arg7[%c1_83, %c1_84, %c0_85, %c0_86] : memref<3x3x128x128xbf16, #tpu.memory_space<vmem>>, vector<1x1x128x128xbf16>
      %86 = vector.shape_cast %85 : vector<1x1x128x128xbf16> to vector<128x128xbf16>
      %cst_87 = arith.constant dense<0.000000e+00> : vector<64x128xf32>
      %87 = tpu.matmul %84, %86, %cst_87 {dimension_numbers = #tpu.dot_dimension_numbers<[1], [0], [0], [1], [0, 0, 1, 1], [], []>} : vector<64x128xbf16>, vector<128x128xbf16>, vector<64x128xf32> -> vector<64x128xf32>
      %88 = arith.addf %78, %87 : vector<64x128xf32>
      %c4_i32_88 = arith.constant 4 : i32
      %89 = arith.muli %arg12, %c4_i32_88 : i32
      %c1_i32_89 = arith.constant 1 : i32
      %90 = arith.addi %89, %c1_i32_89 : i32
      %c0_90 = arith.constant 0 : index
      %91 = arith.index_cast %90 : i32 to index
      %c2_91 = arith.constant 2 : index
      %c0_92 = arith.constant 0 : index
      %92 = vector.load %arg10[%c0_90, %91, %c2_91, %c0_92] : memref<1x18x18x128xbf16, #tpu.memory_space<vmem>>, vector<1x4x16x128xbf16>
      %93 = vector.shape_cast %92 : vector<1x4x16x128xbf16> to vector<4x16x128xbf16>
      %94 = vector.shape_cast %93 : vector<4x16x128xbf16> to vector<64x128xbf16>
      %c1_93 = arith.constant 1 : index
      %c2_94 = arith.constant 2 : index
      %c0_95 = arith.constant 0 : index
      %c0_96 = arith.constant 0 : index
      %95 = vector.load %arg7[%c1_93, %c2_94, %c0_95, %c0_96] : memref<3x3x128x128xbf16, #tpu.memory_space<vmem>>, vector<1x1x128x128xbf16>
      %96 = vector.shape_cast %95 : vector<1x1x128x128xbf16> to vector<128x128xbf16>
      %cst_97 = arith.constant dense<0.000000e+00> : vector<64x128xf32>
      %97 = tpu.matmul %94, %96, %cst_97 {dimension_numbers = #tpu.dot_dimension_numbers<[1], [0], [0], [1], [0, 0, 1, 1], [], []>} : vector<64x128xbf16>, vector<128x128xbf16>, vector<64x128xf32> -> vector<64x128xf32>
      %98 = arith.addf %88, %97 : vector<64x128xf32>
      %c4_i32_98 = arith.constant 4 : i32
      %99 = arith.muli %arg12, %c4_i32_98 : i32
      %c2_i32 = arith.constant 2 : i32
      %100 = arith.addi %99, %c2_i32 : i32
      %c0_99 = arith.constant 0 : index
      %101 = arith.index_cast %100 : i32 to index
      %c0_100 = arith.constant 0 : index
      %c0_101 = arith.constant 0 : index
      %102 = vector.load %arg10[%c0_99, %101, %c0_100, %c0_101] : memref<1x18x18x128xbf16, #tpu.memory_space<vmem>>, vector<1x4x16x128xbf16>
      %103 = vector.shape_cast %102 : vector<1x4x16x128xbf16> to vector<4x16x128xbf16>
      %104 = vector.shape_cast %103 : vector<4x16x128xbf16> to vector<64x128xbf16>
      %c2_102 = arith.constant 2 : index
      %c0_103 = arith.constant 0 : index
      %c0_104 = arith.constant 0 : index
      %c0_105 = arith.constant 0 : index
      %105 = vector.load %arg7[%c2_102, %c0_103, %c0_104, %c0_105] : memref<3x3x128x128xbf16, #tpu.memory_space<vmem>>, vector<1x1x128x128xbf16>
      %106 = vector.shape_cast %105 : vector<1x1x128x128xbf16> to vector<128x128xbf16>
      %cst_106 = arith.constant dense<0.000000e+00> : vector<64x128xf32>
      %107 = tpu.matmul %104, %106, %cst_106 {dimension_numbers = #tpu.dot_dimension_numbers<[1], [0], [0], [1], [0, 0, 1, 1], [], []>} : vector<64x128xbf16>, vector<128x128xbf16>, vector<64x128xf32> -> vector<64x128xf32>
      %108 = arith.addf %98, %107 : vector<64x128xf32>
      %c4_i32_107 = arith.constant 4 : i32
      %109 = arith.muli %arg12, %c4_i32_107 : i32
      %c2_i32_108 = arith.constant 2 : i32
      %110 = arith.addi %109, %c2_i32_108 : i32
      %c0_109 = arith.constant 0 : index
      %111 = arith.index_cast %110 : i32 to index
      %c1_110 = arith.constant 1 : index
      %c0_111 = arith.constant 0 : index
      %112 = vector.load %arg10[%c0_109, %111, %c1_110, %c0_111] : memref<1x18x18x128xbf16, #tpu.memory_space<vmem>>, vector<1x4x16x128xbf16>
      %113 = vector.shape_cast %112 : vector<1x4x16x128xbf16> to vector<4x16x128xbf16>
      %114 = vector.shape_cast %113 : vector<4x16x128xbf16> to vector<64x128xbf16>
      %c2_112 = arith.constant 2 : index
      %c1_113 = arith.constant 1 : index
      %c0_114 = arith.constant 0 : index
      %c0_115 = arith.constant 0 : index
      %115 = vector.load %arg7[%c2_112, %c1_113, %c0_114, %c0_115] : memref<3x3x128x128xbf16, #tpu.memory_space<vmem>>, vector<1x1x128x128xbf16>
      %116 = vector.shape_cast %115 : vector<1x1x128x128xbf16> to vector<128x128xbf16>
      %cst_116 = arith.constant dense<0.000000e+00> : vector<64x128xf32>
      %117 = tpu.matmul %114, %116, %cst_116 {dimension_numbers = #tpu.dot_dimension_numbers<[1], [0], [0], [1], [0, 0, 1, 1], [], []>} : vector<64x128xbf16>, vector<128x128xbf16>, vector<64x128xf32> -> vector<64x128xf32>
      %118 = arith.addf %108, %117 : vector<64x128xf32>
      %c4_i32_117 = arith.constant 4 : i32
      %119 = arith.muli %arg12, %c4_i32_117 : i32
      %c2_i32_118 = arith.constant 2 : i32
      %120 = arith.addi %119, %c2_i32_118 : i32
      %c0_119 = arith.constant 0 : index
      %121 = arith.index_cast %120 : i32 to index
      %c2_120 = arith.constant 2 : index
      %c0_121 = arith.constant 0 : index
      %122 = vector.load %arg10[%c0_119, %121, %c2_120, %c0_121] : memref<1x18x18x128xbf16, #tpu.memory_space<vmem>>, vector<1x4x16x128xbf16>
      %123 = vector.shape_cast %122 : vector<1x4x16x128xbf16> to vector<4x16x128xbf16>
      %124 = vector.shape_cast %123 : vector<4x16x128xbf16> to vector<64x128xbf16>
      %c2_122 = arith.constant 2 : index
      %c2_123 = arith.constant 2 : index
      %c0_124 = arith.constant 0 : index
      %c0_125 = arith.constant 0 : index
      %125 = vector.load %arg7[%c2_122, %c2_123, %c0_124, %c0_125] : memref<3x3x128x128xbf16, #tpu.memory_space<vmem>>, vector<1x1x128x128xbf16>
      %126 = vector.shape_cast %125 : vector<1x1x128x128xbf16> to vector<128x128xbf16>
      %cst_126 = arith.constant dense<0.000000e+00> : vector<64x128xf32>
      %127 = tpu.matmul %124, %126, %cst_126 {dimension_numbers = #tpu.dot_dimension_numbers<[1], [0], [0], [1], [0, 0, 1, 1], [], []>} : vector<64x128xbf16>, vector<128x128xbf16>, vector<64x128xf32> -> vector<64x128xf32>
      %128 = arith.addf %118, %127 : vector<64x128xf32>
      %c4_i32_127 = arith.constant 4 : i32
      %129 = arith.muli %arg12, %c4_i32_127 : i32
      %c0_128 = arith.constant 0 : index
      %130 = arith.index_cast %129 : i32 to index
      %c0_129 = arith.constant 0 : index
      %c0_130 = arith.constant 0 : index
      %131 = vector.load %arg11[%c0_128, %130, %c0_129, %c0_130] : memref<1x16x16x128xf32, #tpu.memory_space<vmem>>, vector<1x4x16x128xf32>
      %132 = vector.shape_cast %131 : vector<1x4x16x128xf32> to vector<4x16x128xf32>
      %133 = vector.shape_cast %132 : vector<4x16x128xf32> to vector<64x128xf32>
      %c4_i32_131 = arith.constant 4 : i32
      %134 = arith.muli %arg12, %c4_i32_131 : i32
      %c0_132 = arith.constant 0 : index
      %135 = arith.index_cast %134 : i32 to index
      %c0_133 = arith.constant 0 : index
      %c0_134 = arith.constant 0 : index
      %136 = vector.load %arg1[%c0_132, %135, %c0_133, %c0_134] : memref<1x16x16x128xf32, #tpu.memory_space<vmem>>, vector<1x4x16x128xf32>
      %137 = vector.shape_cast %136 : vector<1x4x16x128xf32> to vector<4x16x128xf32>
      %138 = vector.shape_cast %137 : vector<4x16x128xf32> to vector<64x128xf32>
      %139 = vector.broadcast %24 : vector<1x128xf32> to vector<64x128xf32>
      %140 = arith.subf %133, %139 : vector<64x128xf32>
      %cst_135 = arith.constant 2.000000e+00 : f32
      %141 = vector.broadcast %cst_135 : f32 to vector<64x128xf32>
      %142 = arith.mulf %141, %140 : vector<64x128xf32>
      %143 = vector.broadcast %34 : vector<1x128xf32> to vector<64x128xf32>
      %144 = arith.mulf %142, %143 : vector<64x128xf32>
      %cst_136 = arith.constant 1.000000e+00 : f32
      %145 = vector.broadcast %cst_136 : f32 to vector<64x128xf32>
      %146 = arith.subf %144, %145 : vector<64x128xf32>
      %cst_137 = arith.constant 5.000000e+00 : f32
      %147 = vector.broadcast %cst_137 : f32 to vector<64x128xf32>
      %148 = arith.mulf %147, %146 : vector<64x128xf32>
      %149 = arith.negf %148 : vector<64x128xf32>
      %150 = math.exp %149 : vector<64x128xf32>
      %cst_138 = arith.constant 1.000000e+00 : f32
      %151 = vector.broadcast %cst_138 : f32 to vector<64x128xf32>
      %152 = arith.addf %151, %150 : vector<64x128xf32>
      %153 = arith.divf %151, %152 : vector<64x128xf32>
      %cst_139 = arith.constant 1.000000e+00 : f32
      %154 = vector.broadcast %cst_139 : f32 to vector<64x128xf32>
      %155 = arith.subf %154, %153 : vector<64x128xf32>
      %156 = arith.mulf %138, %155 : vector<64x128xf32>
      %157 = arith.mulf %128, %153 : vector<64x128xf32>
      %158 = arith.addf %156, %157 : vector<64x128xf32>
      %159 = vector.shape_cast %158 : vector<64x128xf32> to vector<4x16x128xf32>
      %c4_i32_140 = arith.constant 4 : i32
      %160 = arith.muli %arg12, %c4_i32_140 : i32
      %c0_141 = arith.constant 0 : index
      %161 = arith.index_cast %160 : i32 to index
      %c0_142 = arith.constant 0 : index
      %c0_143 = arith.constant 0 : index
      %162 = vector.load %arg9[%c0_141, %161, %c0_142, %c0_143] : memref<1x16x16x128xf32, #tpu.memory_space<vmem>>, vector<1x4x16x128xf32>
      %163 = vector.shape_cast %162 : vector<1x4x16x128xf32> to vector<4x16x128xf32>
      %164 = vector.shape_cast %159 : vector<4x16x128xf32> to vector<1x4x16x128xf32>
      tpu.vector_store %arg9[%c0_141, %161, %c0_142, %c0_143], %164 {strides = array<i32>} : memref<1x16x16x128xf32, #tpu.memory_space<vmem>>, vector<1x4x16x128xf32>,
    }
    %c4_i32_36 = arith.constant 4 : i32
    return
  }
  func.func @transform_0(%arg0: i32) -> (i32, i32, i32, i32) {
    %c0_i32 = arith.constant 0 : i32
    %c0_i32_0 = arith.constant 0 : i32
    %c0_i32_1 = arith.constant 0 : i32
    %c0_i32_2 = arith.constant 0 : i32
    return %arg0, %c0_i32, %c0_i32_0, %c0_i32_1 : i32, i32, i32, i32
  }
  func.func @transform_1(%arg0: i32) -> (i32, i32, i32, i32) {
    %c0_i32 = arith.constant 0 : i32
    %c0_i32_0 = arith.constant 0 : i32
    %c0_i32_1 = arith.constant 0 : i32
    %c0_i32_2 = arith.constant 0 : i32
    return %arg0, %c0_i32, %c0_i32_0, %c0_i32_1 : i32, i32, i32, i32
  }
  func.func @transform_2(%arg0: i32) -> (i32, i32, i32, i32, i32) {
    %c0_i32 = arith.constant 0 : i32
    %c0_i32_0 = arith.constant 0 : i32
    %c0_i32_1 = arith.constant 0 : i32
    %c0_i32_2 = arith.constant 0 : i32
    %c0_i32_3 = arith.constant 0 : i32
    %c0_i32_4 = arith.constant 0 : i32
    return %c0_i32, %c0_i32_0, %c0_i32_1, %c0_i32_2, %c0_i32_3 : i32, i32, i32, i32, i32
  }
  func.func @transform_3(%arg0: i32) -> (i32, i32) {
    %c0_i32 = arith.constant 0 : i32
    %c0_i32_0 = arith.constant 0 : i32
    %c0_i32_1 = arith.constant 0 : i32
    return %c0_i32, %c0_i32_0 : i32, i32
  }
  func.func @transform_4(%arg0: i32) -> (i32, i32, i32, i32) {
    %c0_i32 = arith.constant 0 : i32
    %c0_i32_0 = arith.constant 0 : i32
    %c0_i32_1 = arith.constant 0 : i32
    %c0_i32_2 = arith.constant 0 : i32
    %c0_i32_3 = arith.constant 0 : i32
    return %c0_i32, %c0_i32_0, %c0_i32_1, %c0_i32_2 : i32, i32, i32, i32
  }
  func.func @transform_5(%arg0: i32) -> (i32, i32) {
    %c0_i32 = arith.constant 0 : i32
    %c0_i32_0 = arith.constant 0 : i32
    %c0_i32_1 = arith.constant 0 : i32
    return %c0_i32, %c0_i32_0 : i32, i32
  }
  func.func @transform_6(%arg0: i32) -> (i32, i32, i32, i32) {
    %c0_i32 = arith.constant 0 : i32
    %c0_i32_0 = arith.constant 0 : i32
    %c0_i32_1 = arith.constant 0 : i32
    %c0_i32_2 = arith.constant 0 : i32
    %c0_i32_3 = arith.constant 0 : i32
    return %c0_i32, %c0_i32_0, %c0_i32_1, %c0_i32_2 : i32, i32, i32, i32
  }
  func.func @transform_7(%arg0: i32) -> (i32, i32) {
    %c0_i32 = arith.constant 0 : i32
    %c0_i32_0 = arith.constant 0 : i32
    %c0_i32_1 = arith.constant 0 : i32
    return %c0_i32, %c0_i32_0 : i32, i32
  }
  func.func @transform_8(%arg0: i32) -> (i32, i32, i32, i32) {
    %c0_i32 = arith.constant 0 : i32
    %c0_i32_0 = arith.constant 0 : i32
    %c0_i32_1 = arith.constant 0 : i32
    %c0_i32_2 = arith.constant 0 : i32
    return %arg0, %c0_i32, %c0_i32_0, %c0_i32_1 : i32, i32, i32, i32
  }
}

</mosaic_0001>

<bundles_post_ra>
// kernel: _lambda_.1
= control target key start
LH: loop header
LB: loop body
LE: loop exit
PB: predicated region body
PF: predicated region fallthrough
CT: control target
= control target key end

     0   :  { %s17375_s0 = inlined_call_operand.vmem [shape: f32[2,16,16,128], index: 0, kind: input, shape index: {}]   ;;  %s17376_s1 = inlined_call_operand.vmem [shape: bf16[2,32,32,128], index: 1, kind: input, shape index: {}]   ;;  %s17377_s2 = inlined_call_operand.vmem [shape: bf16[4,3,3,128,128], index: 2, kind: input, shape index: {}]   ;;  %s17378_s3 = inlined_call_operand.vmem [shape: f32[1,128], index: 3, kind: input, shape index: {}]   ;;  %s17379_s4 = inlined_call_operand.vmem [shape: bf16[3,3,128,128], index: 4, kind: input, shape index: {}]   ;;  %s17380_s5 = inlined_call_operand.vmem [shape: f32[1,128], index: 5, kind: input, shape index: {}]   ;;  %s17381_s6 = inlined_call_operand.vmem [shape: bf16[3,3,128,128], index: 6, kind: input, shape index: {}]   ;;  %s17382_s7 = inlined_call_operand.vmem [shape: f32[1,128], index: 7, kind: input, shape index: {}]   ;;  %s17383_s8 = inlined_call_operand.hbm [shape: f32[2,16,16,128], index: 8, kind: output, shape index: {}]  }
   0x1   :  { %17386 = sst [smem:[#allocation7_spill]] %s17375_s0 }
   0x2   :  { %17387 = sst [smem:[#allocation8_spill]] %s17376_s1 }
   0x3   :  { %13 = vsyncpa [#allocation5], 0 }
   0x4   :  { %15 = vsyncpa [#allocation5 + $0x1], 0  ;;  %s13526_s27 = smov 0   ;;  %s13528_s28 = smov 0  }
   0x5   :  { %s13530_s29 = smov 0   ;;  %s13532_s30 = smov 0  }
   0x6 LB: > { %s13547_s9 = sadd.s32 4294967295, %s13461_s30   ;;  %s9407_s10 = sadd.s32 4294967294, %s13461_s30   ;;  %s13461_s30 = sphi %s13532_s30, %s17437_s30   ;;  %s13457_s29 = sphi %s13530_s29, %s17436_s29   ;;  %s13453_s28 = sphi %s13528_s28, %s17435_s28   ;;  %s13449_s27 = sphi %s13526_s27, %s17434_s27  }
   0x7   : > { %s13551_s11 = sadd.s32 1, %s13461_s30   ;;  %s206_s12 = sadd.s32 1, %s13457_s29 }
   0x8   : > { %s203_s13 = ssub.s32 %s13461_s30, %s13551_s11  ;;  %p216_p0 = scmp.ne.s32.totalorder %s13457_s29, %s13453_s28 }
   0x9   : > { %p204_p1 = scmp.eq.s32.totalorder %s203_s13, 0  ;;  %p217_p2 = scmp.eq.s32.totalorder %s13547_s9, 1 }
   0xa   : > { %p222_p3 = scmp.ne.s32.totalorder %s13453_s28, %s13449_s27  ;;  %p223_p4 = scmp.eq.s32.totalorder %s9407_s10, 1 }
   0xb   : > { %s13562_s14 = scalar_select %p204_p1, %s13457_s29, %s206_s12  }
   0xc   : > { %p13564_p5 = por %p217_p2, %p216_p0  ;;  %p13568_p6 = por %p223_p4, %p222_p3 }
   0xd   : > { %p9410_p7 = scmp.ge.s32.totalorder %s13461_s30, 1  ;;  %p275_p8 = scmp.lt.s32.totalorder %s13461_s30, 3 }
   0xf   : > { %p276_p9 = pnand %p9410_p7, %p275_p8 }
  0x10   : > { %s17384_s17 = sand.u32 (!%p276_p9), 1, %s13453_s28   ;;  %p314_p10 = scmp.lt.s32.totalorder (!%p276_p9), %s13547_s9, 1 }
  0x11   : > { %279 = sbr.rel (%p276_p9) target bundleno = 1349 (0x545), region = 52  ;;  %s13578_s18 = sshll.u32 (!%p276_p9), %s17384_s17, 8 }
  0x12   : > { %s17390_s0 = sld [smem:[#allocation7_spill]] (!%p276_p9)  ;;  %s13596_s13 = smov (!%p276_p9), 0  }
  0x13   : > { %s17391_s1 = sld [smem:[#allocation8_spill]] (!%p276_p9) }
  0x16   : > { %s315_s19 = scalar_select %p314_p10, %s13547_s9, 1  ;;  %v13592_v0 = vmov 0.0   ;;  %v13594_v1 = vmov 0.0  }
  0x18   : > { %s12719_s20 = sshll.u32 %s315_s19, 8  ;;  %s12720_s21 = sshll.u32 %s315_s19, 9 }
  0x19   : > { %s13584_s24 = scalar_lea.vmem %s17390_s0, %s12719_s20  ;;  %s13589_s10 = scalar_lea.vmem %s17391_s1, %s12720_s21 }
  0x1a LB: >> { %v12733_v2 = vld [vmem:[%s17379_s4 + $0x38] sm:$0xff]  ;;  %v12732_v5 = vld [vmem:[%s17379_s4 + $0x30] sm:$0xff]  ;;  %s17385_s12 = sshll.u32 %s13473_s13, 6  ;;  %v12731_v8 = vld [vmem:[%s17379_s4 + $0x28] sm:$0xff]  ;;  %vm357_vm0 = vsmask.f32 256  ;;  %s13473_s13 = sphi %s13596_s13, %s329_s13   ;;  %v13469_v1 = vphi %v13594_v1, %v17410_v1   ;;  %v13465_v0 = vphi %v13592_v0, %v17409_v0  }
  0x1b   : >> { %v12750_v3 = vld [vmem:[%s17377_s2 + $0x278] sm:$0xff]  ;;  %528 = vmatpush.bf16.msra.mxu0 %v12733_v2  ;;  %13239 = vmatpush.bf16.msra.mxu1 %v12733_v2  ;;  %v12749_v6 = vld [vmem:[%s17377_s2 + $0x270] sm:$0xff]  ;;  %s13629_s22 = scalar_lea.vmem %s13589_s10, %s17385_s12  ;;  %v12748_v9 = vld [vmem:[%s17377_s2 + $0x268] sm:$0xff]  ;;  %vm358_vm1 = vsmask.f32 4368  ;;  %vm694_vm2 = vcmask 1040384  }
  0x1c   : >> { %v12759_v4 = vld [vmem:[%s17377_s2 + $0x4b8] sm:$0xff]  ;;  %806 = vmatpush.bf16.msra.mxu2 %v12750_v3  ;;  %v12758_v7 = vld [vmem:[%s17377_s2 + $0x4b0] sm:$0xff]  ;;  %v12757_v10 = vld [vmem:[%s17377_s2 + $0x4a8] sm:$0xff]  ;;  %vm695_vm3 = vcmask 1044484   ;;  %vm871_vm4 = vcmask 1041408   ;;  %vm872_vm5 = vcmask 1045508  }
  0x1d   : >> { %983 = vmatpush.bf16.msra.mxu3 %v12759_v4  ;;  %v9419_v11 = vld [vmem:[%s13629_s22 + $0x70] sm:$0x8]  ;;  %v9420_v12 = vld [vmem:[%s13629_s22 + $0x74] sm:$0xf]  ;;  %v9421_v13 = vld [vmem:[%s13629_s22 + $0x78] sm:$0xf] }
  0x1e   : >> { %v366_v14 = vshrl.u32 %v9420_v12, 16  ;;  %v375_v15 = vshrl.u32 %v9421_v13, 16  ;;  %v9425_v16 = vld [vmem:[%s13629_s22 + $0x90] sm:$0x8]  ;;  %v12730_v17 = vld [vmem:[%s17379_s4 + $0x20] sm:$0xff]  ;;  %v361_v18 = vshrl.u32 %v9419_v11, 16  ;;  %vm13670_vm6 = vmor %vm357_vm0, %vm358_vm1 }
  0x1f   : >> { %529 = vmatpush.bf16.msra.mxu0 %v12732_v5  ;;  %13240 = vmatpush.bf16.msra.mxu1 %v12732_v5  ;;  %v9426_v19 = vld [vmem:[%s13629_s22 + $0x94] sm:$0xf]  ;;  %v9427_v20 = vld [vmem:[%s13629_s22 + $0x98] sm:$0xf]  ;;  %v12747_v21 = vld [vmem:[%s17377_s2 + $0x260] sm:$0xff]  ;;  %v369_v24 = vshll.u32 %v9420_v12, 16 }
  0x20   : >> { %807 = vmatpush.bf16.msra.mxu2 %v12749_v6  ;;  %v12756_v22 = vld [vmem:[%s17377_s2 + $0x4a0] sm:$0xff]  ;;  %v368_v23 = vrot.slane %v366_v14, 7  ;;  %v405_v25 = vshrl.u32 %v9425_v16, 16  ;;  %v410_v26 = vshrl.u32 %v9426_v19, 16  ;;  %v377_v27 = vrot.slane %v375_v15, 7  ;;  %v12729_v36 = vld [vmem:[%s17379_s4 + $0x18] sm:$0xff]  ;;  %vm13678_vm7 = vmor %vm694_vm2, %vm695_vm3 }
  0x21   : >> { %984 = vmatpush.bf16.msra.mxu3 %v12758_v7  ;;  %v378_v28 = vshll.u32 %v9421_v13, 16  ;;  %v413_v29 = vshll.u32 %v9426_v19, 16  ;;  %v419_v30 = vshrl.u32 %v9427_v20, 16  ;;  %v9501_v31 = vld [vmem:[%s13629_s22 + $0x60] sm:$0x8]  ;;  %v422_v33 = vshll.u32 %v9427_v20, 16  ;;  %vm13699_vm8 = vmor %vm871_vm4, %vm872_vm5 }
  0x22   : >> { %v412_v32 = vrot.slane %v410_v26, 7  ;;  %v9502_v34 = vld [vmem:[%s13629_s22 + $0x64] sm:$0xf]  ;;  %v9503_v35 = vld [vmem:[%s13629_s22 + $0x68] sm:$0x7]  ;;  %v12746_v37 = vld [vmem:[%s17377_s2 + $0x258] sm:$0xff]  ;;  %v371_v42 = vor.u32 %v369_v24, %v368_v23 }
  0x23   : >> { %530 = vmatpush.bf16.msra.mxu0 %v12731_v8  ;;  %13241 = vmatpush.bf16.msra.mxu1 %v12731_v8  ;;  %v421_v38 = vrot.slane %v419_v30, 7  ;;  %v699_v39 = vrot.slane %v9502_v34, 7  ;;  %v12755_v40 = vld [vmem:[%s17377_s2 + $0x498] sm:$0xff]  ;;  %v9431_v41 = vrot.slane %v361_v18, 11  ;;  %v373_v43 = vrot.slane %v368_v23, 4  ;;  %v12728_v57 = vld [vmem:[%s17379_s4 + $0x10] sm:$0xff]  ;;  %vm16273_vm4 = vmand %vm694_vm2, %vm357_vm0 }
  0x24   : >> { %808 = vmatpush.bf16.msra.mxu2 %v12748_v9  ;;  %v9433_v44 = vrot.slane %v405_v25, 11  ;;  %v9568_v45 = vld [vmem:[%s13629_s22 + $0x44] sm:$0xf]  ;;  %v380_v47 = vor.u32 %v378_v28, %v377_v27  ;;  %v9513_v48 = vrot.slane %v9501_v31, 11  ;;  %v702_v49 = vrot.slane %v9503_v35, 7  ;;  %v12745_v59 = vld [vmem:[%s17377_s2 + $0x250] sm:$0xff] }
  0x25   : >> { %985 = vmatpush.bf16.msra.mxu3 %v12757_v10  ;;  %v9567_v50 = vld [vmem:[%s13629_s22 + $0x40] sm:$0xc]  ;;  %v9569_v51 = vld [vmem:[%s13629_s22 + $0x48] sm:$0x3]  ;;  %v415_v52 = vor.u32 %v413_v29, %v412_v32  ;;  %v417_v53 = vrot.slane %v412_v32, 4  ;;  %v424_v54 = vor.u32 %v422_v33, %v421_v38  ;;  %v701_v56 = vrot.slane %v699_v39, 4 }
  0x26   : >> { %v876_v58 = vrot.slane %v9568_v45, 6  ;;  %v12754_v60 = vld [vmem:[%s17377_s2 + $0x490] sm:$0xff]  ;;  %v372_v61 = vsel %vm13670_vm6, %v9431_v41, %v371_v42  ;;  %v9579_v62 = vrot.slane %v9567_v50, 10  ;;  %v879_v63 = vrot.slane %v9569_v51, 6  ;;  %v13710_v9 = vld [vmem:[%s13629_s22 + $0x84] sm:$0xf] }
  0x27   : >> { %531 = vmatpush.bf16.msra.mxu0 %v12730_v17  ;;  %13242 = vmatpush.bf16.msra.mxu1 %v12730_v17  ;;  %v381_v2 = vsel %vm13670_vm6, %v373_v43, %v380_v47  ;;  %v700_v3 = vsel %vm13678_vm7, %v9513_v48, %v699_v39  ;;  %v416_v6 = vsel %vm13670_vm6, %v9433_v44, %v415_v52  ;;  %v12727_v10 = vld [vmem:[%s17379_s4 + $0x8] sm:$0xff]  ;;  %v464_v12 = vunpack.c.l.b16 %v372_v61  ;;  %v13729_v19 = vld [vmem:[%s13629_s22 + $0xa4] sm:$0xf]  ;;  %v9422_v24 = vld [vmem:[%s13629_s22 + $0x80] sm:$0x8]  ;;  %s12108_s19 = smul.u32 48, %s13473_s13 }
  0x28   : >> { %809 = vmatpush.bf16.msra.mxu2 %v12747_v21  ;;  %v878_v5 = vrot.slane %v876_v58, 4  ;;  %v425_v7 = vsel %vm13670_vm6, %v417_v53, %v424_v54  ;;  %v703_v8 = vsel %vm13678_vm7, %v701_v56, %v702_v49  ;;  %v12744_v11 = vld [vmem:[%s17377_s2 + $0x248] sm:$0xff]  ;;  %v465_v15 = vunpack.c.l.b16 %v381_v2  ;;  %v12726_v27 = vld [vmem:[%s17379_s4] sm:$0xff]  ;;  %v9504_v43 = vld [vmem:[%s13629_s22 + $0x70] sm:$0x8] }
  0x29   : >> { %986 = vmatpush.bf16.msra.mxu3 %v12756_v22  ;;  %v13719_v13 = vld [vmem:[%s13629_s22 + $0x88] sm:$0xf]  ;;  %v742_v16 = vunpack.c.l.b16 %v700_v3  ;;  %v877_v17 = vsel %vm13699_vm8, %v9579_v62, %v876_v58  ;;  %v468_v21 = vunpack.c.l.b16 %v416_v6  ;;  %v469_v22 = vunpack.c.l.b16 %v425_v7  ;;  %v12743_v28 = vld [vmem:[%s17377_s2 + $0x240] sm:$0xff]  ;;  %v9505_v44 = vld [vmem:[%s13629_s22 + $0x74] sm:$0xf]  ;;  %s16263_s1 = scalar_lea.vmem [#allocation2], %s12108_s19 }
  0x2a   : >> { %v12753_v14 = vld [vmem:[%s17377_s2 + $0x488] sm:$0xff]  ;;  %v880_v18 = vsel %vm13699_vm8, %v878_v5, %v879_v63  ;;  %v743_v23 = vunpack.c.l.b16 %v703_v8  ;;  %v388_v25 = vshrl.u32 %v13710_v9, 16  ;;  %v397_v26 = vshrl.u32 %v13719_v13, 16  ;;  %v9428_v31 = vld [vmem:[%s13629_s22 + $0xa0] sm:$0x8]  ;;  %v12740_v53 = vld [vmem:[%s17377_s2 + $0x30] sm:$0xff] }
  0x2b   : >> { %532 = vmatpush.bf16.msra.mxu0 %v12729_v36  ;;  %13243 = vmatpush.bf16.msra.mxu1 %v12729_v36  ;;  %v13732_v20 = vld [vmem:[%s13629_s22 + $0xa8] sm:$0xf]  ;;  %v919_v29 = vunpack.c.l.b16 %v877_v17  ;;  %v920_v30 = vunpack.c.l.b16 %v880_v18  ;;  %v432_v32 = vshrl.u32 %v13729_v19, 16  ;;  %v12752_v34 = vld [vmem:[%s17377_s2 + $0x480] sm:$0xff]  ;;  %v13749_v35 = vpack.c.b16 %v465_v15, %v464_v12  ;;  %v12741_v36 = vld [vmem:[%s17377_s2 + $0x38] sm:$0xff] }
  0x2c   : >> { %810 = vmatpush.bf16.msra.mxu2 %v12746_v37  ;;  %v441_v33 = vshrl.u32 %v13732_v20, 16  ;;  %v12773_v37 = vld [vmem:[%s17377_s2 + $0x6f8] sm:$0xff]  ;;  %v383_v38 = vshrl.u32 %v9422_v24, 16  ;;  %v13757_v39 = vpack.c.b16 %v469_v22, %v468_v21  ;;  %v390_v41 = vrot.slane %v388_v25, 7  ;;  %v9571_v45 = vld [vmem:[%s13629_s22 + $0x54] sm:$0xf] }
  0x2d   : >> { %987 = vmatpush.bf16.msra.mxu3 %v12755_v40  ;;  %v750_v40 = vpack.c.b16 %v743_v23, %v742_v16  ;;  %v391_v42 = vshll.u32 %v13710_v9, 16  ;;  %v399_v47 = vrot.slane %v397_v26, 7  ;;  %v400_v48 = vshll.u32 %v13719_v13, 16  ;;  %v9506_v51 = vld [vmem:[%s13629_s22 + $0x78] sm:$0x7]  ;;  %v12772_v62 = vld [vmem:[%s17377_s2 + $0x6f0] sm:$0xff] }
  0x2e   : >> { %v427_v49 = vshrl.u32 %v9428_v31, 16  ;;  %v435_v50 = vshll.u32 %v13729_v19, 16  ;;  %v927_v52 = vpack.c.b16 %v920_v30, %v919_v29  ;;  %v434_v54 = vrot.slane %v432_v32, 7  ;;  %v12801_v61 = vld [vmem:[%s17377_s2 + $0x2b8] sm:$0xff]  ;;  %v9570_v3 = vld [vmem:[%s13629_s22 + $0x50] sm:$0xc] }
  0x2f   : >> { %533 = vmatpush.bf16.msra.mxu0 %v12728_v57  ;;  %13244 = vmatpush.bf16.msra.mxu1 %v12728_v57  ;;  %v443_v56 = vrot.slane %v441_v33, 7  ;;  %v444_v57 = vshll.u32 %v13732_v20, 16  ;;  %v706_v58 = vrot.slane %v9505_v44, 7  ;;  %v9432_v63 = vrot.slane %v383_v38, 11  ;;  %v9572_v5 = vld [vmem:[%s13629_s22 + $0x58] sm:$0x3] }
  0x30   : >> { %811 = vmatpush.bf16.msra.mxu2 %v12745_v59  ;;  %v883_v59 = vrot.slane %v9571_v45, 6  ;;  %v393_v2 = vor.u32 %v391_v42, %v390_v41  ;;  %v395_v6 = vrot.slane %v390_v41, 4  ;;  %v402_v7 = vor.u32 %v400_v48, %v399_v47  ;;  %v12788_v18 = vld [vmem:[%s17377_s2 + $0x70] sm:$0xff]  ;;  %v12739_v20 = vld [vmem:[%s17377_s2 + $0x28] sm:$0xff]  ;;  %v12738_v32 = vld [vmem:[%s17377_s2 + $0x20] sm:$0xff] }
  0x31   : >> { %988 = vmatpush.bf16.msra.mxu3 %v12754_v60  ;;  %v12789_v60 = vld [vmem:[%s17377_s2 + $0x78] sm:$0xff]  ;;  %v9434_v8 = vrot.slane %v427_v49, 11  ;;  %v9514_v9 = vrot.slane %v9504_v43, 11  ;;  %v446_v12 = vor.u32 %v444_v57, %v443_v56  ;;  %v709_v13 = vrot.slane %v9506_v51, 7  ;;  %v12800_v19 = vld [vmem:[%s17377_s2 + $0x2b0] sm:$0xff]  ;;  %v12771_v21 = vld [vmem:[%s17377_s2 + $0x6e8] sm:$0xff] }
  0x32   : >> { %v9580_v15 = vrot.slane %v9570_v3, 10  ;;  %v885_v16 = vrot.slane %v883_v59, 4  ;;  %v886_v17 = vrot.slane %v9572_v5, 6  ;;  %v394_v22 = vsel %vm13670_vm6, %v9432_v63, %v393_v2  ;;  %v12787_v30 = vld [vmem:[%s17377_s2 + $0x68] sm:$0xff]  ;;  %v12770_v33 = vld [vmem:[%s17377_s2 + $0x6e0] sm:$0xff]  ;;  %v12737_v44 = vld [vmem:[%s17377_s2 + $0x18] sm:$0xff] }
  0x33   : >> { %534 = vmatpush.bf16.msra.mxu0 %v12727_v10  ;;  %13245 = vmatpush.bf16.msra.mxu1 %v12727_v10  ;;  %v437_v10 = vor.u32 %v435_v50, %v434_v54  ;;  %v403_v23 = vsel %vm13670_vm6, %v395_v6, %v402_v7  ;;  %v707_v26 = vsel %vm13678_vm7, %v9514_v9, %v706_v58  ;;  %v12799_v31 = vld [vmem:[%s17377_s2 + $0x2a8] sm:$0xff]  ;;  %v12786_v45 = vld [vmem:[%s17377_s2 + $0x60] sm:$0xff]  ;;  %v12769_v48 = vld [vmem:[%s17377_s2 + $0x6d8] sm:$0xff]  ;;  %vm1783_vm9 = vsmask.f32 3328 }
  0x34   : >> { %812 = vmatpush.bf16.msra.mxu2 %v12744_v11  ;;  %v439_v11 = vrot.slane %v434_v54, 4  ;;  %v887_v29 = vsel %vm13699_vm8, %v885_v16, %v886_v17  ;;  %v12798_v47 = vld [vmem:[%s17377_s2 + $0x2a0] sm:$0xff]  ;;  %v12736_v56 = vld [vmem:[%s17377_s2 + $0x10] sm:$0xff]  ;;  %v9575_v63 = vld [vmem:[%s13629_s22 + $0x68] sm:$0x3]  ;;  %vm2126_vm12 = vcmask 1042432  }
  0x35   : >> { %989 = vmatpush.bf16.msra.mxu3 %v12753_v14  ;;  %v708_v14 = vrot.slane %v706_v58, 4  ;;  %v438_v24 = vsel %vm13670_vm6, %v9434_v8, %v437_v10  ;;  %v922_v43 = vunpack.c.l.b16 %v887_v29  ;;  %v9508_v49 = vld [vmem:[%s13629_s22 + $0x84] sm:$0xf]  ;;  %v9507_v57 = vld [vmem:[%s13629_s22 + $0x80] sm:$0x8]  ;;  %v12785_v2 = vld [vmem:[%s17377_s2 + $0x58] sm:$0xff] }
  0x36   : >> { %v447_v25 = vsel %vm13670_vm6, %v439_v11, %v446_v12  ;;  %v9574_v50 = vld [vmem:[%s13629_s22 + $0x64] sm:$0xf]  ;;  %v9509_v58 = vld [vmem:[%s13629_s22 + $0x88] sm:$0x7]  ;;  %v12797_v3 = vld [vmem:[%s17377_s2 + $0x298] sm:$0xff]  ;;  %v9515_v5 = vrot.slane %v9507_v57, 11 }
  0x37   : >> { %535 = vmatpush.bf16.msra.mxu0 %v12726_v27  ;;  %13246 = vmatpush.bf16.msra.mxu1 %v12726_v27  ;;  %v710_v27 = vsel %vm13678_vm7, %v708_v14, %v709_v13  ;;  %v471_v38 = vunpack.c.l.b16 %v447_v25  ;;  %v716_v6 = vrot.slane %v9509_v58, 7  ;;  %v893_v10 = vrot.slane %v9575_v63, 6  ;;  %v12784_v11 = vld [vmem:[%s17377_s2 + $0x50] sm:$0xff]  ;;  %v12735_v13 = vld [vmem:[%s17377_s2 + $0x8] sm:$0xff]  ;;  %v13091_v55 = vld [vmem:[%s17377_s2 + $0x660] sm:$0xff] }
  0x38   : >> { %813 = vmatpush.bf16.msra.mxu2 %v12743_v28  ;;  %v884_v28 = vsel %vm13699_vm8, %v9580_v15, %v883_v59  ;;  %v745_v41 = vunpack.c.l.b16 %v710_v27  ;;  %v713_v59 = vrot.slane %v9508_v49, 7  ;;  %v12796_v12 = vld [vmem:[%s17377_s2 + $0x290] sm:$0xff]  ;;  %v12767_v14 = vld [vmem:[%s17377_s2 + $0x6c8] sm:$0xff]  ;;  %vm1784_vm10 = vsmask.f32 7440 }
  0x39   : >> { %990 = vmatpush.bf16.msra.mxu3 %v12752_v34  ;;  %v466_v34 = vunpack.c.l.b16 %v394_v22  ;;  %v921_v42 = vunpack.c.l.b16 %v884_v28  ;;  %v12766_v22 = vld [vmem:[%s17377_s2 + $0x6c0] sm:$0xff]  ;;  %v9511_v29 = vld [vmem:[%s13629_s22 + $0x94] sm:$0xf]  ;;  %v12811_v57 = vld [vmem:[%s17377_s2 + $0x4e8] sm:$0xff]  ;;  %vm2127_vm13 = vcmask 1046532   ;;  %vm6995_vm15 = vcmask 1043456  }
  0x3a   : >> { %536 = vmatmul.bf16.vlgmr.msra.gmra.mxu0 %v13749_v35  ;;  %546 = vmatmul.bf16.vlgmr.msra.gmra.mxu1 %v13757_v39  ;;  %v715_v7 = vrot.slane %v713_v59, 4  ;;  %v714_v15 = vsel %vm13678_vm7, %v9515_v5, %v713_v59  ;;  %vm14077_vm11 = vmor %vm1783_vm9, %vm1784_vm10  ;;  %vm6996_vm1 = vsmask.f32 7938 }
  0x3b   : >> { %629 = vmatpush.bf16.msrb.mxu1 %v12741_v36  ;;  %1120 = vmatpush.bf16.msrb.mxu0 %v12773_v37  ;;  %v467_v36 = vunpack.c.l.b16 %v403_v23  ;;  %v470_v37 = vunpack.c.l.b16 %v438_v24  ;;  %v928_v54 = vpack.c.b16 %v922_v43, %v921_v42  ;;  %v12781_v23 = vld [vmem:[%s17379_s4 + $0x78] sm:$0xff]  ;;  %v746_v25 = vunpack.c.l.b16 %v714_v15  ;;  %v12812_v42 = vld [vmem:[%s17377_s2 + $0x4f0] sm:$0xff]  ;;  %vm14171_vm14 = vmor %vm2126_vm12, %vm2127_vm13 }
  0x3c   : >> { %814 = vmatmul.bf16.vlgmr.msra.gmra.mxu2 %v750_v40  ;;  %991 = vmatmul.bf16.vlgmr.msra.gmra.mxu3 %v927_v52  ;;  %v744_v40 = vunpack.c.l.b16 %v707_v26  ;;  %v717_v16 = vsel %vm13678_vm7, %v715_v7, %v716_v6  ;;  %v12813_v24 = vld [vmem:[%s17377_s2 + $0x4f8] sm:$0xff]  ;;  %v12763_v7 = vld [vmem:[%s13629_s22 + $0x10] sm:$0xff]  ;;  %vm16259_vm3 = vmand %vm6995_vm15, %vm6996_vm1 }
  0x3d   : >> { %1348 = vmatpush.bf16.msrb.mxu2 %v12789_v60  ;;  %1474 = vmatpush.bf16.msrb.mxu3 %v12801_v61  ;;  %v13837_v51 = vpack.c.b16 %v467_v36, %v466_v34  ;;  %v13839_v52 = vpack.c.b16 %v471_v38, %v470_v37  ;;  %v890_v60 = vrot.slane %v9574_v50, 6  ;;  %v12768_v61 = vld [vmem:[%s17377_s2 + $0x6d0] sm:$0xff]  ;;  %v747_v26 = vunpack.c.l.b16 %v717_v16  ;;  %v9512_v43 = vld [vmem:[%s13629_s22 + $0x98] sm:$0x7]  ;;  %v12774_v16 = vld [vmem:[%s17379_s4 + $0x40] sm:$0xff] }
  0x3e   : >> { %v720_v37 = vrot.slane %v9511_v29, 7  ;;  %v12780_v38 = vld [vmem:[%s17379_s4 + $0x70] sm:$0xff]  ;;  %v723_v49 = vrot.slane %v9512_v43, 7  ;;  %v12777_v6 = vld [vmem:[%s17379_s4 + $0x58] sm:$0xff]  ;;  %v13999_v29 = vld [vmem:[%s13629_s22 + $0x84] sm:$0xff] }
  0x3f   : >> { %630 = vmatpush.bf16.msrb.mxu1 %v12740_v53  ;;  %1121 = vmatpush.bf16.msrb.mxu0 %v12772_v62  ;;  %v751_v53 = vpack.c.b16 %v745_v41, %v744_v40  ;;  %v9573_v62 = vld [vmem:[%s13629_s22 + $0x60] sm:$0xc]  ;;  %v892_v9 = vrot.slane %v890_v60, 4  ;;  %v752_v34 = vpack.c.b16 %v747_v26, %v746_v25  ;;  %v9510_v40 = vld [vmem:[%s13629_s22 + $0x90] sm:$0x8]  ;;  %v12841_v15 = vld [vmem:[%s17377_s2 + $0xb8] sm:$0xff] }
  0x40   : >> { %v9581_v8 = vrot.slane %v9573_v62, 10  ;;  %v12810_v62 = vld [vmem:[%s17377_s2 + $0x4e0] sm:$0xff]  ;;  %v12839_v26 = vld [vmem:[%s17377_s2 + $0xa8] sm:$0xff] }
  0x41   : >> { %1349 = vmatpush.bf16.msrb.mxu2 %v12788_v18  ;;  %1475 = vmatpush.bf16.msrb.mxu3 %v12800_v19  ;;  %v894_v18 = vsel %vm13699_vm8, %v892_v9, %v893_v10  ;;  %v12783_v19 = vld [vmem:[%s17377_s2 + $0x48] sm:$0xff]  ;;  %v12776_v10 = vld [vmem:[%s17379_s4 + $0x50] sm:$0xff]  ;;  %v12830_v25 = vld [vmem:[%s17379_s4 + $0xa0] sm:$0xff] }
  0x42   : >> { %v891_v17 = vsel %vm13699_vm8, %v9581_v8, %v890_v60  ;;  %v924_v28 = vunpack.c.l.b16 %v894_v18  ;;  %v12806_v18 = vld [vmem:[%s17377_s2 + $0x4c0] sm:$0xff] }
  0x43   : >> { %631 = vmatpush.bf16.msrb.mxu1 %v12739_v20  ;;  %1122 = vmatpush.bf16.msrb.mxu0 %v12771_v21  ;;  %v12795_v20 = vld [vmem:[%s17377_s2 + $0x288] sm:$0xff]  ;;  %v12734_v21 = vld [vmem:[%s17377_s2] sm:$0xff]  ;;  %v923_v27 = vunpack.c.l.b16 %v891_v17 }
  0x44   : >> { %v12807_v17 = vld [vmem:[%s17377_s2 + $0x4c8] sm:$0xff]  ;;  %v12834_v43 = vld [vmem:[%s17377_s2 + $0x80] sm:$0xff] }
  0x45   : >> { %1350 = vmatpush.bf16.msrb.mxu2 %v12787_v30  ;;  %1476 = vmatpush.bf16.msrb.mxu3 %v12799_v31  ;;  %v12782_v30 = vld [vmem:[%s17377_s2 + $0x40] sm:$0xff]  ;;  %v929_v36 = vpack.c.b16 %v924_v28, %v923_v27  ;;  %v12765_v28 = vld [vmem:[%s13629_s22 + $0x30] sm:$0xff] }
  0x46   : >> { %v12794_v31 = vld [vmem:[%s17377_s2 + $0x280] sm:$0xff] }
  0x47   : >> { %632 = vmatpush.bf16.msrb.mxu1 %v12738_v32  ;;  %1123 = vmatpush.bf16.msrb.mxu0 %v12770_v33  ;;  %v9577_v32 = vld [vmem:[%s13629_s22 + $0x74] sm:$0xf]  ;;  %v12762_v33 = vld [vmem:[%s13629_s22] sm:$0xff] }
  0x48   : >> { %v897_v41 = vrot.slane %v9577_v32, 6  ;;  %v12838_v27 = vld [vmem:[%s17377_s2 + $0xa0] sm:$0xff]  ;;  %v12837_v32 = vld [vmem:[%s17377_s2 + $0x98] sm:$0xff] }
  0x49   : >> { %1351 = vmatpush.bf16.msrb.mxu2 %v12786_v45  ;;  %1477 = vmatpush.bf16.msrb.mxu3 %v12798_v47  ;;  %v9578_v45 = vld [vmem:[%s13629_s22 + $0x78] sm:$0x3]  ;;  %v9516_v47 = vrot.slane %v9510_v40, 11  ;;  %v12835_v40 = vld [vmem:[%s17377_s2 + $0x88] sm:$0xff] }
  0x4a   : >> { %541 = vmatmul.bf16.gmra.mxu0 %v13837_v51  ;;  %551 = vmatmul.bf16.gmra.mxu1 %v13839_v52 }
  0x4b   : >> { %633 = vmatpush.bf16.msrb.mxu1 %v12737_v44  ;;  %1124 = vmatpush.bf16.msrb.mxu0 %v12769_v48  ;;  %v9576_v44 = vld [vmem:[%s13629_s22 + $0x70] sm:$0xc]  ;;  %v722_v48 = vrot.slane %v720_v37, 4 }
  0x4c   : >> { %819 = vmatmul.bf16.gmra.mxu2 %v751_v53  ;;  %996 = vmatmul.bf16.gmra.mxu3 %v928_v54  ;;  %v9582_v50 = vrot.slane %v9576_v44, 10  ;;  %v899_v53 = vrot.slane %v897_v41, 4  ;;  %v900_v54 = vrot.slane %v9578_v45, 6  ;;  %v14039_v44 = vld [vmem:[%s13629_s22 + $0x94] sm:$0xff]  ;;  %v12792_v45 = vld [vmem:[%s13629_s22 + $0x84] sm:$0xff] }
  0x4d   : >> { %1352 = vmatpush.bf16.msrb.mxu2 %v12785_v2  ;;  %1478 = vmatpush.bf16.msrb.mxu3 %v12797_v3  ;;  %v724_v58 = vsel %vm13678_vm7, %v722_v48, %v723_v49  ;;  %v12821_v48 = vld [vmem:[%s17377_s2 + $0x718] sm:$0xff]  ;;  %v10009_v49 = vld [vmem:[%s13629_s22 + $0x74] sm:$0xf] }
  0x4e   : >> { %v898_v59 = vsel %vm13699_vm8, %v9582_v50, %v897_v41  ;;  %v901_v60 = vsel %vm13699_vm8, %v899_v53, %v900_v54  ;;  %v749_v2 = vunpack.c.l.b16 %v724_v58  ;;  %v12802_v41 = vld [vmem:[%s13629_s22 + $0x44] sm:$0xff]  ;;  %v10010_v50 = vld [vmem:[%s13629_s22 + $0x78] sm:$0xf]  ;;  %v1787_v53 = vshrl.u32 %v10009_v49, 16  ;;  %v12820_v58 = vld [vmem:[%s17377_s2 + $0x710] sm:$0xff] }
  0x4f   : >> { %634 = vmatpush.bf16.msrb.mxu1 %v12736_v56  ;;  %1125 = vmatpush.bf16.msrb.mxu0 %v12768_v61  ;;  %v12779_v56 = vld [vmem:[%s17379_s4 + $0x68] sm:$0xff]  ;;  %v12778_v61 = vld [vmem:[%s17379_s4 + $0x60] sm:$0xff]  ;;  %v925_v3 = vunpack.c.l.b16 %v898_v59  ;;  %v926_v5 = vunpack.c.l.b16 %v901_v60  ;;  %v1790_v54 = vshll.u32 %v10009_v49, 16 }
  0x50   : >> { %v1789_v59 = vrot.slane %v1787_v53, 4 }
  0x51   : >> { %1353 = vmatpush.bf16.msrb.mxu2 %v12784_v11  ;;  %1479 = vmatpush.bf16.msrb.mxu3 %v12796_v12  ;;  %v930_v9 = vpack.c.b16 %v926_v5, %v925_v3  ;;  %v12809_v11 = vld [vmem:[%s17377_s2 + $0x4d8] sm:$0xff]  ;;  %v1792_v60 = vrot.slane %v1790_v54, 5  ;;  %v12846_v3 = vld [vmem:[%s17377_s2 + $0x2e0] sm:$0xff] }
  0x52   : >> { %v12833_v12 = vld [vmem:[%s17379_s4 + $0xb8] sm:$0xff]  ;;  %v14063_v5 = vld [vmem:[%s13629_s22 + $0xa4] sm:$0xff] }
  0x53   : >> { %635 = vmatpush.bf16.msrb.mxu1 %v12735_v13  ;;  %1126 = vmatpush.bf16.msrb.mxu0 %v12767_v14  ;;  %v12775_v13 = vld [vmem:[%s17379_s4 + $0x48] sm:$0xff]  ;;  %v12832_v14 = vld [vmem:[%s17379_s4 + $0xb0] sm:$0xff] }
  0x55   : >> { %1354 = vmatpush.bf16.msrb.mxu2 %v12783_v19  ;;  %1480 = vmatpush.bf16.msrb.mxu3 %v12795_v20  ;;  %v12764_v19 = vld [vmem:[%s13629_s22 + $0x20] sm:$0xff]  ;;  %v12722_v20 = vld [vmem:[%s13629_s22 + $0x74] sm:$0xff] }
  0x57   : >> { %636 = vmatpush.bf16.msrb.mxu1 %v12734_v21  ;;  %1127 = vmatpush.bf16.msrb.mxu0 %v12766_v22  ;;  %v12790_v21 = vld [vmem:[%s13629_s22 + $0x64] sm:$0xff]  ;;  %v12825_v22 = vld [vmem:[%s17377_s2 + $0x738] sm:$0xff] }
  0x59   : >> { %1355 = vmatpush.bf16.msrb.mxu2 %v12782_v30  ;;  %1481 = vmatpush.bf16.msrb.mxu3 %v12794_v31  ;;  %v12791_v30 = vld [vmem:[%s13629_s22 + $0x74] sm:$0xff] }
  0x5a   : >> { %637 = vmatmul.bf16.vlgmr.msrb.gmra.mxu1 %v13749_v35  ;;  %1128 = vmatmul.bf16.vlgmr.msrb.gmra.mxu0 %v12762_v33  ;;  %v721_v35 = vsel %vm13678_vm7, %v9516_v47, %v720_v37  ;;  %v12829_v31 = vld [vmem:[%s17379_s4 + $0x98] sm:$0xff]  ;;  %v12823_v33 = vld [vmem:[%s17377_s2 + $0x728] sm:$0xff]  ;;  %v12822_v37 = vld [vmem:[%s17377_s2 + $0x720] sm:$0xff] }
  0x5b   : >> { %1246 = vmatpush.bf16.msra.mxu1 %v12781_v23  ;;  %1600 = vmatpush.bf16.msra.mxu0 %v12813_v24  ;;  %v748_v63 = vunpack.c.l.b16 %v721_v35  ;;  %v12831_v23 = vld [vmem:[%s17379_s4 + $0xa8] sm:$0xff]  ;;  %v12840_v24 = vld [vmem:[%s17377_s2 + $0xb0] sm:$0xff] }
  0x5c   : >> { %824 = vmatmul.bf16.gmra.mxu2 %v752_v34  ;;  %1001 = vmatmul.bf16.gmra.mxu3 %v929_v36  ;;  %v12836_v34 = vld [vmem:[%s17377_s2 + $0x90] sm:$0xff]  ;;  %v12849_v36 = vld [vmem:[%s17377_s2 + $0x2f8] sm:$0xff]  ;;  %v12847_v35 = vld [vmem:[%s17377_s2 + $0x2e8] sm:$0xff] }
  0x5d   : >> { %v753_v8 = vpack.c.b16 %v749_v2, %v748_v63  ;;  %1963 = vmatpush.bf16.msra.mxu2 %v12833_v12  ;;  %2065 = vmatpush.bf16.msra.mxu3 %v12841_v15  ;;  %v12848_v47 = vld [vmem:[%s17377_s2 + $0x2f0] sm:$0xff]  ;;  %v10011_v63 = vld [vmem:[%s13629_s22 + $0x7c] sm:$0x1] }
  0x5e   : >> { %v12803_v2 = vld [vmem:[%s13629_s22 + $0x54] sm:$0xff] }
  0x5f   : >> { %1247 = vmatpush.bf16.msra.mxu1 %v12780_v38  ;;  %1601 = vmatpush.bf16.msra.mxu0 %v12812_v42  ;;  %v12827_v38 = vld [vmem:[%s17379_s4 + $0x88] sm:$0xff]  ;;  %v12826_v42 = vld [vmem:[%s17379_s4 + $0x80] sm:$0xff] }
  0x61   : >> { %1964 = vmatpush.bf16.msra.mxu2 %v12832_v14  ;;  %2066 = vmatpush.bf16.msra.mxu3 %v12840_v24 }
  0x63   : >> { %1248 = vmatpush.bf16.msra.mxu1 %v12779_v56  ;;  %1602 = vmatpush.bf16.msra.mxu0 %v12811_v57  ;;  %v1796_v56 = vshll.u32 %v10010_v50, 16  ;;  %v1800_v57 = vshrl.u32 %v10010_v50, 16  ;;  %v10016_v50 = vld [vmem:[%s13629_s22 + $0x98] sm:$0xf] }
  0x65   : >> { %1965 = vmatpush.bf16.msra.mxu2 %v12831_v23  ;;  %2067 = vmatpush.bf16.msra.mxu3 %v12839_v26  ;;  %v12843_v26 = vld [vmem:[%s17377_s2 + $0x2c8] sm:$0xff] }
  0x67   : >> { %1249 = vmatpush.bf16.msra.mxu1 %v12778_v61  ;;  %1603 = vmatpush.bf16.msra.mxu0 %v12810_v62  ;;  %v1798_v61 = vrot.slane %v1796_v56, 5  ;;  %v1802_v62 = vrot.slane %v1800_v57, 4 }
  0x69   : >> { %1966 = vmatpush.bf16.msra.mxu2 %v12830_v25  ;;  %2068 = vmatpush.bf16.msra.mxu3 %v12838_v27  ;;  %v12868_v25 = vld [vmem:[%s17377_s2 + $0x770] sm:$0xff] }
  0x6a   : >> { %642 = vmatmul.bf16.gmra.mxu1 %v13837_v51  ;;  %1133 = vmatmul.bf16.gmra.mxu0 %v12763_v7  ;;  %v12808_v51 = vld [vmem:[%s17377_s2 + $0x4d0] sm:$0xff]  ;;  %v1793_v7 = vor.u32 %v1792_v60, %v1789_v59 }
  0x6b   : >> { %1250 = vmatpush.bf16.msra.mxu1 %v12777_v6  ;;  %1604 = vmatpush.bf16.msra.mxu0 %v12809_v11  ;;  %v12793_v6 = vld [vmem:[%s13629_s22 + $0x94] sm:$0xff] }
  0x6c   : >> { %829 = vmatmul.bf16.gmra.mxu2 %v753_v8  ;;  %1006 = vmatmul.bf16.gmra.mxu3 %v930_v9  ;;  %v1803_v8 = vor.u32 %v1802_v62, %v1798_v61  ;;  %v1806_v9 = vshll.u32 %v10011_v63, 16  ;;  %v12845_v11 = vld [vmem:[%s17377_s2 + $0x2d8] sm:$0xff]  ;;  %v1794_v12 = vrot.slane %v1793_v7, 4  ;;  %v1848_v62 = vshrl.u32 %v10016_v50, 16  ;;  %v12880_v7 = vld [vmem:[%s17379_s4 + $0xe8] sm:$0xff] }
  0x6d   : >> { %1967 = vmatpush.bf16.msra.mxu2 %v12829_v31  ;;  %2069 = vmatpush.bf16.msra.mxu3 %v12837_v32 }
  0x6e   : >> { %v1804_v14 = vrot.slane %v1803_v8, 4  ;;  %v1808_v15 = vrot.slane %v1806_v9, 5 }
  0x6f   : >> { %1251 = vmatpush.bf16.msra.mxu1 %v12776_v10  ;;  %1605 = vmatpush.bf16.msra.mxu0 %v12808_v51  ;;  %v12819_v10 = vld [vmem:[%s17377_s2 + $0x708] sm:$0xff] }
  0x71   : >> { %2070 = vmatpush.bf16.msra.mxu3 %v12836_v34  ;;  %v12842_v34 = vld [vmem:[%s17377_s2 + $0x2c0] sm:$0xff] }
  0x73   : >> { %1252 = vmatpush.bf16.msra.mxu1 %v12775_v13  ;;  %1606 = vmatpush.bf16.msra.mxu0 %v12807_v17  ;;  %v12869_v13 = vld [vmem:[%s17377_s2 + $0x778] sm:$0xff]  ;;  %v10013_v17 = vld [vmem:[%s13629_s22 + $0x88] sm:$0xf] }
  0x74   : >> { %v1820_v23 = vshll.u32 %v10013_v17, 16  ;;  %v1824_v24 = vshrl.u32 %v10013_v17, 16 }
  0x75   : >> { %2071 = vmatpush.bf16.msra.mxu3 %v12835_v40 }
  0x76   : >> { %v1822_v31 = vrot.slane %v1820_v23, 5  ;;  %v1826_v32 = vrot.slane %v1824_v24, 4 }
  0x77   : >> { %1253 = vmatpush.bf16.msra.mxu1 %v12774_v16  ;;  %1607 = vmatpush.bf16.msra.mxu0 %v12806_v18  ;;  %v10012_v16 = vld [vmem:[%s13629_s22 + $0x84] sm:$0xf]  ;;  %v12844_v18 = vld [vmem:[%s17377_s2 + $0x2d0] sm:$0xff] }
  0x79   : >> { %2072 = vmatpush.bf16.msra.mxu3 %v12834_v43  ;;  %v12882_v43 = vld [vmem:[%s17379_s4 + $0xf8] sm:$0xff] }
  0x7a   : >> { %647 = vmatmul.bf16.gmra.mxu1 %v13757_v39  ;;  %1138 = vmatmul.bf16.gmra.mxu0 %v12764_v19  ;;  %v12824_v39 = vld [vmem:[%s17377_s2 + $0x730] sm:$0xff]  ;;  %v1799_v19 = vsel %vm14077_vm11, %v1794_v12, %v1798_v61  ;;  %v1844_v61 = vshll.u32 %v10016_v50, 16  ;;  %v1850_v12 = vrot.slane %v1848_v62, 4 }
  0x7b   : >> { %1734 = vmatpush.bf16.msrb.mxu1 %v12825_v22  ;;  %2238 = vmatpush.bf16.msrb.mxu0 %v12849_v36  ;;  %v1814_v22 = vshll.u32 %v10012_v16, 16  ;;  %v1899_v27 = vunpack.c.l.b16 %v1799_v19  ;;  %v12856_v19 = vld [vmem:[%s17377_s2 + $0x530] sm:$0xff] }
  0x7c   : >> { %1356 = vmatmul.bf16.vlgmr.msrb.gmra.mxu2 %v12722_v20  ;;  %1482 = vmatmul.bf16.vlgmr.msrb.gmra.mxu3 %v12790_v21  ;;  %v1809_v21 = vsel %vm14077_vm11, %v1804_v14, %v1808_v15  ;;  %v12805_v14 = vld [vmem:[%s13629_s22 + $0x74] sm:$0xff] }
  0x7d   : >> { %2764 = vmatpush.bf16.msrb.mxu3 %v12882_v43  ;;  %v12855_v43 = vld [vmem:[%s17377_s2 + $0x528] sm:$0xff] }
  0x7f   : >> { %1735 = vmatpush.bf16.msrb.mxu1 %v12824_v39  ;;  %2239 = vmatpush.bf16.msrb.mxu0 %v12848_v47  ;;  %v12818_v39 = vld [vmem:[%s17377_s2 + $0x700] sm:$0xff] }
  0x83   : >> { %1736 = vmatpush.bf16.msrb.mxu1 %v12823_v33  ;;  %2240 = vmatpush.bf16.msrb.mxu0 %v12847_v35  ;;  %v10014_v33 = vld [vmem:[%s13629_s22 + $0x8c] sm:$0x1] }
  0x84   : >> { %v12867_v35 = vld [vmem:[%s17377_s2 + $0x768] sm:$0xff] }
  0x87   : >> { %1737 = vmatpush.bf16.msrb.mxu1 %v12822_v37  ;;  %2241 = vmatpush.bf16.msrb.mxu0 %v12846_v3 }
  0x8a   : >> { %652 = vmatmul.bf16.gmra.mxu1 %v13839_v52  ;;  %1143 = vmatmul.bf16.gmra.mxu0 %v12765_v28  ;;  %v12828_v52 = vld [vmem:[%s17379_s4 + $0x90] sm:$0xff]  ;;  %v1900_v28 = vunpack.c.l.b16 %v1809_v21  ;;  %v12879_v21 = vld [vmem:[%s17379_s4 + $0xe0] sm:$0xff] }
  0x8b   : >> { %1968 = vmatpush.bf16.msra.mxu2 %v12828_v52  ;;  %1738 = vmatpush.bf16.msrb.mxu1 %v12821_v48  ;;  %v12804_v52 = vld [vmem:[%s13629_s22 + $0x64] sm:$0xff] }
  0x8c   : >> { %1361 = vmatmul.bf16.gmra.mxu2 %v13999_v29  ;;  %1487 = vmatmul.bf16.gmra.mxu3 %v12791_v30  ;;  %v1816_v30 = vrot.slane %v1814_v22, 5 }
  0x8d   : >> { %2242 = vmatpush.bf16.msrb.mxu0 %v12845_v11  ;;  %v14139_v11 = vrot.slane %v1844_v61, 5 }
  0x8f   : >> { %1969 = vmatpush.bf16.msra.mxu2 %v12827_v38  ;;  %1739 = vmatpush.bf16.msrb.mxu1 %v12820_v58  ;;  %v1907_v38 = vpack.c.b16 %v1900_v28, %v1899_v27  ;;  %v12881_v58 = vld [vmem:[%s17379_s4 + $0xf0] sm:$0xff]  ;;  %v10119_v27 = vld [vmem:[%s13629_s22 + $0x6c] sm:$0x1] }
  0x90   : >> { %2765 = vmatpush.bf16.msrb.mxu3 %v12881_v58 }
  0x91   : >> { %2243 = vmatpush.bf16.msrb.mxu0 %v12844_v18 }
  0x93   : >> { %1970 = vmatpush.bf16.msra.mxu2 %v12826_v42  ;;  %1740 = vmatpush.bf16.msrb.mxu1 %v12819_v10  ;;  %v1830_v42 = vshll.u32 %v10014_v33, 16  ;;  %v10017_v10 = vld [vmem:[%s13629_s22 + $0x9c] sm:$0x1] }
  0x94   : >> { %2766 = vmatpush.bf16.msrb.mxu3 %v12880_v7  ;;  %v1854_v18 = vshll.u32 %v10017_v10, 16  ;;  %v14212_v7 = vld [vmem:[%s17378_s3] ss:$0 sm:$0xff] }
  0x95   : >> { %2244 = vmatpush.bf16.msrb.mxu0 %v12843_v26  ;;  %v1832_v49 = vrot.slane %v1830_v42, 5  ;;  %v10117_v26 = vld [vmem:[%s13629_s22 + $0x64] sm:$0xe] }
  0x96   : >> { %v10129_v33 = vrot.slane %v10117_v26, 9 }
  0x97   : >> { %2542 = vmatpush.bf16.msrb.mxu2 %v12869_v13  ;;  %1741 = vmatpush.bf16.msrb.mxu1 %v12818_v39  ;;  %v10118_v13 = vld [vmem:[%s13629_s22 + $0x68] sm:$0xf]  ;;  %v1851_v39 = vor.u32 %v1850_v12, %v14139_v11 }
  0x98   : >> { %2767 = vmatpush.bf16.msrb.mxu3 %v12879_v21 }
  0x99   : >> { %2245 = vmatpush.bf16.msrb.mxu0 %v12842_v34  ;;  %v2134_v34 = vrot.slane %v10119_v27, 5 }
  0x9a   : >> { %1254 = vmatmul.bf16.vlgmr.msra.gmra.mxu1 %v12722_v20  ;;  %1608 = vmatmul.bf16.vlgmr.msra.gmra.mxu0 %v12802_v41  ;;  %v1811_v20 = vshrl.u32 %v10012_v16, 16  ;;  %v1827_v41 = vor.u32 %v1826_v32, %v1822_v31  ;;  %v1852_v32 = vrot.slane %v1851_v39, 4  ;;  %v12854_v39 = vld [vmem:[%s17377_s2 + $0x520] sm:$0xff] }
  0x9b   : >> { %2543 = vmatpush.bf16.msrb.mxu2 %v12868_v25  ;;  %v2131_v25 = vrot.slane %v10118_v13, 5 }
  0x9c   : >> { %1366 = vmatmul.bf16.gmra.mxu2 %v14039_v44  ;;  %1492 = vmatmul.bf16.gmra.mxu3 %v12792_v45  ;;  %v10015_v45 = vld [vmem:[%s13629_s22 + $0x94] sm:$0xf]  ;;  %v1828_v48 = vrot.slane %v1827_v41, 4 }
  0x9d   : >> { %v1835_v56 = vshrl.u32 %v10015_v45, 16  ;;  %v1838_v57 = vshll.u32 %v10015_v45, 16  ;;  %v12864_v45 = vld [vmem:[%s17377_s2 + $0x750] sm:$0xff] }
  0x9f   : >> { %2544 = vmatpush.bf16.msrb.mxu2 %v12867_v35  ;;  %v1837_v3 = vrot.slane %v1835_v56, 4 }
  0xaa   : >> { %1259 = vmatmul.bf16.gmra.mxu1 %v13999_v29  ;;  %1613 = vmatmul.bf16.gmra.mxu0 %v12803_v2  ;;  %v1813_v29 = vrot.slane %v1811_v20, 4  ;;  %v1833_v2 = vsel %vm14077_vm11, %v1828_v48, %v1832_v49  ;;  %v12866_v20 = vld [vmem:[%s17377_s2 + $0x760] sm:$0xff] }
  0xab   : >> { %v1902_v9 = vunpack.c.l.b16 %v1833_v2  ;;  %2545 = vmatpush.bf16.msrb.mxu2 %v12866_v20 }
  0xac   : >> { %1371 = vmatmul.bf16.gmra.mxu2 %v14063_v5  ;;  %1497 = vmatmul.bf16.gmra.mxu3 %v12793_v6  ;;  %v1817_v40 = vor.u32 %v1816_v30, %v1813_v29  ;;  %v1840_v6 = vrot.slane %v1838_v57, 5  ;;  %v1856_v29 = vrot.slane %v1854_v18, 5  ;;  %v12865_v30 = vld [vmem:[%s17377_s2 + $0x758] sm:$0xff]  ;;  %v2132_v57 = vsel %vm14171_vm14, %v10129_v33, %v2131_v25  ;;  %v10020_v18 = vld [vmem:[%s13629_s22 + $0xac] sm:$0x1] }
  0xae   : >> { %v1818_v47 = vrot.slane %v1817_v40, 4  ;;  %v1841_v17 = vor.u32 %v1840_v6, %v1837_v3  ;;  %v10019_v40 = vld [vmem:[%s13629_s22 + $0xa8] sm:$0xf]  ;;  %v1857_v56 = vsel %vm14077_vm11, %v1852_v32, %v1856_v29 }
  0xaf   : >> { %2546 = vmatpush.bf16.msrb.mxu2 %v12865_v30  ;;  %v1868_v61 = vshll.u32 %v10019_v40, 16  ;;  %v1872_v62 = vshrl.u32 %v10019_v40, 16  ;;  %v12863_v3 = vld [vmem:[%s17377_s2 + $0x748] sm:$0xff]  ;;  %v12875_v30 = vld [vmem:[%s17379_s4 + $0xc0] sm:$0xff] }
  0xb0   : >> { %v1823_v63 = vsel %vm14077_vm11, %v1818_v47, %v1822_v31  ;;  %v1842_v28 = vrot.slane %v1841_v17, 4  ;;  %v12878_v31 = vld [vmem:[%s17379_s4 + $0xd8] sm:$0xff]  ;;  %v12877_v47 = vld [vmem:[%s17379_s4 + $0xd0] sm:$0xff]  ;;  %v12876_v6 = vld [vmem:[%s17379_s4 + $0xc8] sm:$0xff] }
  0xb1   : >> { %v1901_v8 = vunpack.c.l.b16 %v1823_v63  ;;  %2768 = vmatpush.bf16.msrb.mxu3 %v12878_v31  ;;  %v2174_v63 = vunpack.c.l.b16 %v2132_v57  ;;  %v1870_v12 = vrot.slane %v1868_v61, 5  ;;  %v1874_v13 = vrot.slane %v1872_v62, 4  ;;  %v12814_v17 = vld [vmem:[%s13629_s22 + $0x4] sm:$0xff]  ;;  %v12853_v62 = vld [vmem:[%s17377_s2 + $0x518] sm:$0xff] }
  0xb2   : >> { %v1847_v50 = vsel %vm14077_vm11, %v1842_v28, %v14139_v11 }
  0xb3   : >> { %v1908_v24 = vpack.c.b16 %v1902_v9, %v1901_v8  ;;  %2547 = vmatpush.bf16.msrb.mxu2 %v12864_v45  ;;  %v1903_v8 = vunpack.c.l.b16 %v1847_v50  ;;  %v1904_v9 = vunpack.c.l.b16 %v1857_v56  ;;  %v1875_v33 = vor.u32 %v1874_v13, %v1870_v12 }
  0xb5   : >> { %2769 = vmatpush.bf16.msrb.mxu3 %v12877_v47  ;;  %v1909_v28 = vpack.c.b16 %v1904_v9, %v1903_v8  ;;  %v1876_v57 = vrot.slane %v1875_v33, 4  ;;  %v12852_v33 = vld [vmem:[%s17377_s2 + $0x510] sm:$0xff] }
  0xb7   : >> { %v14104_v36 = vpop.f32.mrf.mxu0  ;;  %v14106_v37 = vpop.f32.mrf.mxu1  ;;  %2548 = vmatpush.bf16.msrb.mxu2 %v12863_v3 }
  0xb9   : >> { %2770 = vmatpush.bf16.msrb.mxu3 %v12876_v6 }
  0xba   : >> { %1264 = vmatmul.bf16.gmra.mxu1 %v14039_v44  ;;  %1618 = vmatmul.bf16.gmra.mxu0 %v12804_v52  ;;  %v12857_v44 = vld [vmem:[%s17377_s2 + $0x538] sm:$0xff]  ;;  %v2133_v52 = vrot.slane %v2131_v25, 4  ;;  %v12862_v25 = vld [vmem:[%s17377_s2 + $0x740] sm:$0xff] }
  0xbb   : >> { %2408 = vmatpush.bf16.msra.mxu1 %v12857_v44  ;;  %2549 = vmatpush.bf16.msrb.mxu2 %v12862_v25 }
  0xbc   : >> { %1971 = vmatmul.bf16.vlgmr.msra.gmra.mxu2 %v1907_v38  ;;  %2073 = vmatmul.bf16.vlgmr.msra.gmra.mxu3 %v1907_v38  ;;  %v10018_v38 = vld [vmem:[%s13629_s22 + $0xa4] sm:$0xf]  ;;  %v2135_v44 = vsel %vm14171_vm14, %v2133_v52, %v2134_v34  ;;  %v1878_v52 = vshll.u32 %v10020_v18, 16  ;;  %v10120_v34 = vld [vmem:[%s13629_s22 + $0x74] sm:$0xe]  ;;  %v12888_v18 = vld [vmem:[%s17377_s2 + $0xe8] sm:$0xff] }
  0xbd   : >> { %v1859_v35 = vshrl.u32 %v10018_v38, 16  ;;  %v1862_v58 = vshll.u32 %v10018_v38, 16  ;;  %v2175_v2 = vunpack.c.l.b16 %v2135_v44  ;;  %v10122_v38 = vld [vmem:[%s13629_s22 + $0x7c] sm:$0x1]  ;;  %2771 = vmatpush.bf16.msrb.mxu3 %v12875_v30  ;;  %v12815_v30 = vld [vmem:[%s13629_s22 + $0x14] sm:$0xff] }
  0xbe   : >> { %v2141_v47 = vrot.slane %v10122_v38, 5  ;;  %v1880_v44 = vrot.slane %v1878_v52, 5 }
  0xbf   : >> { %v14114_v53 = vpop.f32.mrf.mxu2  ;;  %v14116_v54 = vpop.f32.mrf.mxu3  ;;  %2409 = vmatpush.bf16.msra.mxu1 %v12856_v19  ;;  %v1861_v10 = vrot.slane %v1859_v35, 4  ;;  %v1864_v11 = vrot.slane %v1862_v58, 5  ;;  %v2182_v21 = vpack.c.b16 %v2175_v2, %v2174_v63 }
  0xc0   : >> { %v14127_v59 = vpop.f32.mrf.mxu0  ;;  %v14129_v60 = vpop.f32.mrf.mxu1  ;;  %v1881_v9 = vsel %vm14077_vm11, %v1876_v57, %v1880_v44 }
  0xc1   : >> { %v1865_v32 = vor.u32 %v1864_v11, %v1861_v10  ;;  %v14260_v10 = vld [vmem:[%s13629_s22 + $0x84] sm:$0xf]  ;;  %v10313_v11 = vld [vmem:[%s13629_s22 + $0x88] sm:$0xf] }
  0xc2   : >> { %v2613_v44 = vshll.u32 %v10313_v11, 16 }
  0xc3   : >> { %2410 = vmatpush.bf16.msra.mxu1 %v12855_v43  ;;  %v10130_v43 = vrot.slane %v10120_v34, 9  ;;  %v1866_v56 = vrot.slane %v1865_v32, 4 }
  0xc5   : >> { %v1871_v8 = vsel %vm14077_vm11, %v1866_v56, %v1870_v12  ;;  %v10124_v12 = vld [vmem:[%s13629_s22 + $0x88] sm:$0xf]  ;;  %v2604_v56 = vshll.u32 %v14260_v10, 16 }
  0xc6   : >> { %v2145_v32 = vrot.slane %v10124_v12, 5  ;;  %v12885_v12 = vld [vmem:[%s17377_s2 + $0xd0] sm:$0xff] }
  0xc7   : >> { %v14143_v15 = vpop.f32.mrf.mxu2  ;;  %v14145_v16 = vpop.f32.mrf.mxu3  ;;  %2411 = vmatpush.bf16.msra.mxu1 %v12854_v39  ;;  %v2601_v39 = vshrl.u32 %v14260_v10, 16 }
  0xc8   : >> { %v14156_v22 = vpop.f32.mrf.mxu0  ;;  %v14158_v23 = vpop.f32.mrf.mxu1 }
  0xca   : >> { %1269 = vmatmul.bf16.gmra.mxu1 %v14063_v5  ;;  %1623 = vmatmul.bf16.gmra.mxu0 %v12805_v14  ;;  %v10121_v14 = vld [vmem:[%s13629_s22 + $0x78] sm:$0xf] }
  0xcb   : >> { %v2138_v29 = vrot.slane %v10121_v14, 5  ;;  %2412 = vmatpush.bf16.msra.mxu1 %v12853_v62 }
  0xcc   : >> { %1976 = vmatmul.bf16.gmra.mxu2 %v1908_v24  ;;  %2078 = vmatmul.bf16.gmra.mxu3 %v1908_v24  ;;  %v12890_v24 = vld [vmem:[%s17377_s2 + $0xf8] sm:$0xff] }
  0xcd   : >> { %2866 = vmatpush.bf16.msra.mxu0 %v12890_v24  ;;  %v2140_v45 = vrot.slane %v2138_v29, 4  ;;  %v2139_v2 = vsel %vm14171_vm14, %v10130_v43, %v2138_v29  ;;  %v1906_v24 = vunpack.c.l.b16 %v1881_v9  ;;  %v10125_v43 = vld [vmem:[%s13629_s22 + $0x8c] sm:$0x1] }
  0xce   : >> { %v2176_v14 = vunpack.c.l.b16 %v2139_v2  ;;  %v12886_v2 = vld [vmem:[%s17377_s2 + $0xd8] sm:$0xff] }
  0xcf   : >> { %v14177_v41 = vpop.f32.mrf.mxu2  ;;  %v14179_v42 = vpop.f32.mrf.mxu3  ;;  %v2142_v3 = vsel %vm14171_vm14, %v2140_v45, %v2141_v47  ;;  %v2603_v47 = vrot.slane %v2601_v39, 7  ;;  %2413 = vmatpush.bf16.msra.mxu1 %v12852_v33 }
  0xd0   : >> { %v14190_v48 = vpop.f32.mrf.mxu0  ;;  %v14192_v49 = vpop.f32.mrf.mxu1 }
  0xd1   : >> { %v2608_v9 = vrot.slane %v2603_v47, 4 }
  0xd7   : >> { %v14217_v19 = vpop.f32.mrf.mxu2  ;;  %v14219_v20 = vpop.f32.mrf.mxu3 }
  0xd8   : >> { %v638_v26 = vpop.f32.mrf.mxu1  ;;  %v1129_v27 = vpop.f32.mrf.mxu0 }
  0xd9   : >> { %v658_v31 = vadd.f32 %v14212_v7, %v638_v26  ;;  %v14271_v26 = vld [vmem:[%s13629_s22 + $0x80] sm:$0x8] }
  0xda   : >> { %1742 = vmatmul.bf16.vlgmr.msrb.gmra.mxu1 %v12814_v17  ;;  %2246 = vmatmul.bf16.vlgmr.msrb.gmra.mxu0 %v2182_v21  ;;  %v2177_v17 = vunpack.c.l.b16 %v2142_v3  ;;  %v1905_v21 = vunpack.c.l.b16 %v1871_v8  ;;  %v2596_v45 = vshrl.u32 %v14271_v26, 16  ;;  %v2606_v8 = vor.u32 %v2604_v56, %v2603_v47 }
  0xdb   : >> { %v835_v40 = vadd.f32 %v14114_v53, %v658_v31  ;;  %v12889_v53 = vld [vmem:[%s17377_s2 + $0xf0] sm:$0xff] }
  0xdc   : >> { %1981 = vmatmul.bf16.gmra.mxu2 %v1909_v28  ;;  %2083 = vmatmul.bf16.gmra.mxu3 %v1909_v28  ;;  %v2183_v31 = vpack.c.b16 %v2177_v17, %v2176_v14  ;;  %v1910_v38 = vpack.c.b16 %v1906_v24, %v1905_v21  ;;  %v10323_v3 = vrot.slane %v2596_v45, 11  ;;  %v12851_v21 = vld [vmem:[%s17377_s2 + $0x508] sm:$0xff]  ;;  %v12906_v24 = vld [vmem:[%s17377_s2 + $0x578] sm:$0xff] }
  0xdd   : >> { %v1012_v50 = vadd.f32 %v14116_v54, %v835_v40  ;;  %2867 = vmatpush.bf16.msra.mxu0 %v12889_v53  ;;  %v10123_v40 = vld [vmem:[%s13629_s22 + $0x84] sm:$0xe]  ;;  %2414 = vmatpush.bf16.msra.mxu1 %v12851_v21  ;;  %v12884_v45 = vld [vmem:[%s17377_s2 + $0xc8] sm:$0xff] }
  0xde   : >> { %v10131_v62 = vrot.slane %v10123_v40, 9  ;;  %3190 = vmatpush.bf16.msra.mxu2 %v12906_v24  ;;  %v14328_v40 = vld [vmem:[%s13629_s22 + $0x90] sm:$0x8] }
  0xdf   : >> { %v14238_v35 = vadd.f32 %v1129_v27, %v1012_v50  ;;  %v14240_v58 = vpop.f32.mrf.mxu2  ;;  %v14242_v61 = vpop.f32.mrf.mxu3  ;;  %v2610_v27 = vshrl.u32 %v10313_v11, 16 }
  0xe0   : >> { %v640_v54 = vpop.f32.mrf.mxu1  ;;  %v1131_v63 = vpop.f32.mrf.mxu0 }
  0xe1   : >> { %v659_v6 = vadd.f32 %v14212_v7, %v640_v54  ;;  %2868 = vmatpush.bf16.msra.mxu0 %v12888_v18  ;;  %v2612_v57 = vrot.slane %v2610_v27, 7  ;;  %v2147_v54 = vrot.slane %v2145_v32, 4  ;;  %v2146_v18 = vsel %vm14171_vm14, %v10131_v62, %v2145_v32  ;;  %v10316_v27 = vld [vmem:[%s13629_s22 + $0x98] sm:$0xf]  ;;  %v10126_v62 = vld [vmem:[%s13629_s22 + $0x94] sm:$0xe] }
  0xe2   : >> { %v2178_v33 = vunpack.c.l.b16 %v2146_v18  ;;  %v12905_v18 = vld [vmem:[%s17377_s2 + $0x570] sm:$0xff] }
  0xe3   : >> { %v836_v13 = vadd.f32 %v14143_v15, %v659_v6  ;;  %v2615_v11 = vor.u32 %v2613_v44, %v2612_v57  ;;  %v12816_v57 = vld [vmem:[%s13629_s22 + $0x24] sm:$0xff]  ;;  %3191 = vmatpush.bf16.msra.mxu2 %v12905_v18 }
  0xe5   : >> { %v1013_v25 = vadd.f32 %v14145_v16, %v836_v13  ;;  %v12887_v16 = vld [vmem:[%s17377_s2 + $0xe0] sm:$0xff]  ;;  %v2616_v32 = vsel %vm13670_vm6, %v2608_v9, %v2615_v11 }
  0xe6   : >> { %2869 = vmatpush.bf16.msra.mxu0 %v12887_v16  ;;  %v12850_v11 = vld [vmem:[%s17377_s2 + $0x500] sm:$0xff] }
  0xe7   : >> { %v14273_v15 = vadd.f32 %v1131_v63, %v1013_v25  ;;  %v14275_v28 = vpop.f32.mrf.mxu2  ;;  %v14277_v29 = vpop.f32.mrf.mxu3  ;;  %v2148_v63 = vrot.slane %v10125_v43, 5  ;;  %v2632_v43 = vshrl.u32 %v10316_v27, 16  ;;  %2415 = vmatpush.bf16.msra.mxu1 %v12850_v11  ;;  %v10319_v11 = vld [vmem:[%s13629_s22 + $0xa8] sm:$0xf] }
  0xe8   : >> { %v643_v52 = vpop.f32.mrf.mxu1  ;;  %v1134_v34 = vpop.f32.mrf.mxu0 }
  0xe9   : >> { %v660_v50 = vadd.f32 %v14212_v7, %v643_v52  ;;  %v10127_v52 = vld [vmem:[%s13629_s22 + $0x98] sm:$0xf]  ;;  %v2634_v9 = vrot.slane %v2632_v43, 7 }
  0xea   : >> { %1747 = vmatmul.bf16.gmra.mxu1 %v12815_v30  ;;  %2251 = vmatmul.bf16.gmra.mxu0 %v2183_v31  ;;  %v2607_v31 = vsel %vm13670_vm6, %v10323_v3, %v2606_v8  ;;  %v2152_v44 = vrot.slane %v10127_v52, 5  ;;  %v12898_v43 = vld [vmem:[%s17377_s2 + $0x338] sm:$0xff] }
  0xeb   : >> { %v837_v53 = vadd.f32 %v14177_v41, %v660_v50  ;;  %2870 = vmatpush.bf16.msra.mxu0 %v12886_v2  ;;  %v14297_v41 = vld [vmem:[%s13629_s22 + $0x94] sm:$0xf]  ;;  %v2700_v47 = vunpack.c.l.b16 %v2607_v31  ;;  %v2701_v50 = vunpack.c.l.b16 %v2616_v32  ;;  %3028 = vmatpush.bf16.msrb.mxu1 %v12898_v43 }
  0xec   : >> { %1986 = vmatmul.bf16.gmra.mxu2 %v1910_v38  ;;  %2088 = vmatmul.bf16.gmra.mxu3 %v1910_v38  ;;  %v2626_v8 = vshll.u32 %v14297_v41, 16 }
  0xed   : >> { %v1014_v6 = vadd.f32 %v14179_v42, %v837_v53  ;;  %v2149_v42 = vsel %vm14171_vm14, %v2147_v54, %v2148_v63  ;;  %v10128_v54 = vld [vmem:[%s13629_s22 + $0x9c] sm:$0x1]  ;;  %v2618_v63 = vshrl.u32 %v14328_v40, 16 }
  0xee   : >> { %v2179_v16 = vunpack.c.l.b16 %v2149_v42  ;;  %v12883_v42 = vld [vmem:[%s17377_s2 + $0xc0] sm:$0xff]  ;;  %v2155_v31 = vrot.slane %v10128_v54, 5 }
  0xef   : >> { %v14299_v13 = vadd.f32 %v1134_v34, %v1014_v6  ;;  %v14301_v14 = vpop.f32.mrf.mxu2  ;;  %v14303_v17 = vpop.f32.mrf.mxu3  ;;  %v2623_v34 = vshrl.u32 %v14297_v41, 16  ;;  %2871 = vmatpush.bf16.msra.mxu0 %v12885_v12  ;;  %v12858_v12 = vld [vmem:[%s13629_s22 + $0x8] sm:$0xff]  ;;  %v10324_v32 = vrot.slane %v2618_v63, 11 }
  0xf0   : >> { %v645_v39 = vpop.f32.mrf.mxu1  ;;  %v1136_v25 = vpop.f32.mrf.mxu0  ;;  %v2184_v53 = vpack.c.b16 %v2179_v16, %v2178_v33  ;;  %v12918_v33 = vld [vmem:[%s17377_s2 + $0x7b8] sm:$0xff] }
  0xf1   : >> { %v661_v30 = vadd.f32 %v14212_v7, %v645_v39  ;;  %v14355_v39 = vpack.c.b16 %v2701_v50, %v2700_v47  ;;  %3324 = vmatpush.bf16.msra.mxu3 %v12918_v33  ;;  %v2654_v33 = vshrl.u32 %v10319_v11, 16 }
  0xf3   : >> { %v838_v38 = vadd.f32 %v14217_v19, %v661_v30  ;;  %v2625_v19 = vrot.slane %v2623_v34, 7  ;;  %2872 = vmatpush.bf16.msra.mxu0 %v12884_v45  ;;  %v2154_v30 = vrot.slane %v2152_v44, 4  ;;  %v12904_v45 = vld [vmem:[%s17377_s2 + $0x568] sm:$0xff] }
  0xf4   : >> { %3192 = vmatpush.bf16.msra.mxu2 %v12904_v45 }
  0xf5   : >> { %v1015_v56 = vadd.f32 %v14219_v20, %v838_v38  ;;  %v2635_v20 = vshll.u32 %v10316_v27, 16  ;;  %v10132_v27 = vrot.slane %v10126_v62, 9  ;;  %v2628_v52 = vor.u32 %v2626_v8, %v2625_v19  ;;  %v14385_v8 = vld [vmem:[%s13629_s22 + $0xa4] sm:$0xf] }
  0xf6   : >> { %v2630_v34 = vrot.slane %v2625_v19, 4 }
  0xf7   : >> { %v14338_v2 = vadd.f32 %v1136_v25, %v1015_v56  ;;  %v14340_v3 = vpop.f32.mrf.mxu2  ;;  %v14342_v6 = vpop.f32.mrf.mxu3  ;;  %2873 = vmatpush.bf16.msra.mxu0 %v12883_v42  ;;  %v2637_v38 = vor.u32 %v2635_v20, %v2634_v9  ;;  %v2629_v62 = vsel %vm13670_vm6, %v10324_v32, %v2628_v52  ;;  %v14404_v32 = vld [vmem:[%s13629_s22 + $0xa0] sm:$0x8]  ;;  %v12817_v52 = vld [vmem:[%s13629_s22 + $0x34] sm:$0xff] }
  0xf8   : >> { %v648_v21 = vpop.f32.mrf.mxu1  ;;  %v1139_v24 = vpop.f32.mrf.mxu0 }
  0xf9   : >> { %v662_v25 = vadd.f32 %v14212_v7, %v648_v21  ;;  %v2702_v21 = vunpack.c.l.b16 %v2629_v62 }
  0xfa   : >> { %1752 = vmatmul.bf16.gmra.mxu1 %v12816_v57  ;;  %2256 = vmatmul.bf16.gmra.mxu0 %v2184_v53  ;;  %v2156_v53 = vsel %vm14171_vm14, %v2154_v30, %v2155_v31  ;;  %v2645_v30 = vshrl.u32 %v14385_v8, 16  ;;  %v10182_v31 = vld [vmem:[%s13629_s22 + $0x48] sm:$0xf] }
  0xfb   : >> { %v839_v16 = vadd.f32 %v14240_v58, %v662_v25  ;;  %v2153_v58 = vsel %vm14171_vm14, %v10132_v27, %v2152_v44  ;;  %v12917_v44 = vld [vmem:[%s17377_s2 + $0x7b0] sm:$0xff]  ;;  %v2181_v42 = vunpack.c.l.b16 %v2156_v53  ;;  %v12916_v25 = vld [vmem:[%s17377_s2 + $0x7a8] sm:$0xff] }
  0xfc   : >> { %2550 = vmatmul.bf16.vlgmr.msrb.gmra.mxu2 %v12858_v12  ;;  %2772 = vmatmul.bf16.vlgmr.msrb.gmra.mxu3 %v14355_v39  ;;  %v2180_v20 = vunpack.c.l.b16 %v2153_v58  ;;  %v12903_v12 = vld [vmem:[%s17377_s2 + $0x560] sm:$0xff]  ;;  %v2301_v58 = vrot.slane %v10182_v31, 6  ;;  %v12896_v31 = vld [vmem:[%s17377_s2 + $0x328] sm:$0xff] }
  0xfd   : >> { %v1016_v47 = vadd.f32 %v14242_v61, %v839_v16  ;;  %v2638_v61 = vsel %vm13670_vm6, %v2630_v34, %v2637_v38  ;;  %3325 = vmatpush.bf16.msra.mxu3 %v12917_v44  ;;  %3193 = vmatpush.bf16.msra.mxu2 %v12903_v12  ;;  %v12859_v44 = vld [vmem:[%s13629_s22 + $0x18] sm:$0xff] }
  0xfe   : >> { %v2185_v34 = vpack.c.b16 %v2181_v42, %v2180_v20  ;;  %v12902_v12 = vld [vmem:[%s17377_s2 + $0x558] sm:$0xff] }
  0xff   : >> { %v14372_v50 = vadd.f32 %v1139_v24, %v1016_v47  ;;  %v1357_v56 = vpop.f32.mrf.mxu2  ;;  %v1483_v57 = vpop.f32.mrf.mxu3  ;;  %v2703_v24 = vunpack.c.l.b16 %v2638_v61  ;;  %v10181_v47 = vld [vmem:[%s13629_s22 + $0x44] sm:$0xc] }
 0x100   : >> { %v1377_v54 = vadd.f32 %v1357_v56, %v14238_v35  ;;  %v650_v63 = vpop.f32.mrf.mxu1  ;;  %v1141_v19 = vpop.f32.mrf.mxu0  ;;  %v12897_v35 = vld [vmem:[%s17377_s2 + $0x330] sm:$0xff]  ;;  %v2640_v56 = vshrl.u32 %v14404_v32, 16 }
 0x101   : >> { %v663_v9 = vadd.f32 %v14212_v7, %v650_v63  ;;  %3029 = vmatpush.bf16.msrb.mxu1 %v12897_v35  ;;  %3326 = vmatpush.bf16.msra.mxu3 %v12916_v25  ;;  %v14408_v38 = vpack.c.b16 %v2703_v24, %v2702_v21  ;;  %v2648_v63 = vshll.u32 %v14385_v8, 16  ;;  %v10193_v24 = vrot.slane %v10181_v47, 10  ;;  %v12901_v47 = vld [vmem:[%s17377_s2 + $0x550] sm:$0xff] }
 0x102   : >> { %v14389_v18 = vadd.f32 %v1483_v57, %v1377_v54  ;;  %v2647_v57 = vrot.slane %v2645_v30, 7  ;;  %v10183_v54 = vld [vmem:[%s13629_s22 + $0x4c] sm:$0x3]  ;;  %v2303_v35 = vrot.slane %v2301_v58, 4  ;;  %v10325_v25 = vrot.slane %v2640_v56, 11  ;;  %3194 = vmatpush.bf16.msra.mxu2 %v12902_v12 }
 0x103   : >> { %v840_v27 = vadd.f32 %v14275_v28, %v663_v9  ;;  %v2657_v9 = vshll.u32 %v10319_v11, 16  ;;  %v12914_v11 = vld [vmem:[%s17377_s2 + $0x798] sm:$0xff]  ;;  %v14477_v12 = vld [vmem:[%s17380_s5] ss:$0 sm:$0xff] }
 0x104   : >> { %v2652_v30 = vrot.slane %v2647_v57, 4 }
 0x105   : >> { %v1017_v16 = vadd.f32 %v14277_v29, %v840_v27  ;;  %v12915_v29 = vld [vmem:[%s17377_s2 + $0x7a0] sm:$0xff]  ;;  %v2650_v27 = vor.u32 %v2648_v63, %v2647_v57  ;;  %3030 = vmatpush.bf16.msrb.mxu1 %v12896_v31 }
 0x106   : >> { %3327 = vmatpush.bf16.msra.mxu3 %v12915_v29  ;;  %3195 = vmatpush.bf16.msra.mxu2 %v12901_v47 }
 0x107   : >> { %v14410_v43 = vadd.f32 %v1141_v19, %v1017_v16  ;;  %v1359_v28 = vpop.f32.mrf.mxu2  ;;  %v1485_v45 = vpop.f32.mrf.mxu3  ;;  %v2656_v19 = vrot.slane %v2654_v33, 7 }
 0x108   : >> { %v1378_v53 = vadd.f32 %v1359_v28, %v14273_v15  ;;  %v653_v62 = vpop.f32.mrf.mxu1  ;;  %v1144_v61 = vpop.f32.mrf.mxu0  ;;  %v2304_v15 = vrot.slane %v10183_v54, 6  ;;  %v2302_v28 = vsel %vm13699_vm8, %v10193_v24, %v2301_v58 }
 0x109   : >> { %v664_v20 = vadd.f32 %v14212_v7, %v653_v62  ;;  %v14454_v62 = vld [vmem:[%s13629_s22 + $0xb4] sm:$0xf] }
 0x10a   : >> { %v14422_v42 = vadd.f32 %v1485_v45, %v1378_v53  ;;  %1757 = vmatmul.bf16.gmra.mxu1 %v12817_v52  ;;  %2261 = vmatmul.bf16.gmra.mxu0 %v2185_v34  ;;  %v2305_v45 = vsel %vm13699_vm8, %v2303_v35, %v2304_v15  ;;  %v2651_v53 = vsel %vm13670_vm6, %v10325_v25, %v2650_v27  ;;  %v2667_v35 = vshrl.u32 %v14454_v62, 16  ;;  %v12912_v15 = vld [vmem:[%s17377_s2 + $0x788] sm:$0xff]  ;;  %v10185_v25 = vld [vmem:[%s13629_s22 + $0x58] sm:$0xf]  ;;  %v14482_v27 = vld [vmem:[%s13629_s22 + $0xb0] sm:$0x8] }
 0x10b   : >> { %v841_v21 = vadd.f32 %v14301_v14, %v664_v20  ;;  %v2659_v14 = vor.u32 %v2657_v9, %v2656_v19  ;;  %3328 = vmatpush.bf16.msra.mxu3 %v12914_v11  ;;  %v2345_v63 = vunpack.c.l.b16 %v2305_v45  ;;  %v12926_v19 = vld [vmem:[%s17379_s4 + $0x138] sm:$0xff]  ;;  %v12895_v9 = vld [vmem:[%s17377_s2 + $0x320] sm:$0xff] }
 0x10c   : >> { %2555 = vmatmul.bf16.gmra.mxu2 %v12859_v44  ;;  %2777 = vmatmul.bf16.gmra.mxu3 %v14408_v38  ;;  %v10322_v44 = vld [vmem:[%s13629_s22 + $0xb8] sm:$0xf]  ;;  %v12911_v45 = vld [vmem:[%s17377_s2 + $0x780] sm:$0xff] }
 0x10d   : >> { %v1018_v33 = vadd.f32 %v14303_v17, %v841_v21  ;;  %v12913_v17 = vld [vmem:[%s17377_s2 + $0x790] sm:$0xff]  ;;  %v2660_v58 = vsel %vm13670_vm6, %v2652_v30, %v2659_v14  ;;  %v2704_v21 = vunpack.c.l.b16 %v2651_v53  ;;  %3446 = vmatpush.bf16.msrb.mxu0 %v12926_v19  ;;  %3031 = vmatpush.bf16.msrb.mxu1 %v12895_v9  ;;  %v557_v30 = vadd.f32 %v14477_v12, %v14104_v36 }
 0x10e   : >> { %v2705_v24 = vunpack.c.l.b16 %v2660_v58  ;;  %v2670_v53 = vshll.u32 %v14454_v62, 16  ;;  %v2679_v9 = vshll.u32 %v10322_v44, 16 }
 0x10f   : >> { %v14436_v16 = vadd.f32 %v1144_v61, %v1018_v33  ;;  %v1362_v52 = vpop.f32.mrf.mxu2  ;;  %v1488_v34 = vpop.f32.mrf.mxu3  ;;  %3329 = vmatpush.bf16.msra.mxu3 %v12913_v17 }
 0x110   : >> { %v1379_v56 = vadd.f32 %v1362_v52, %v14299_v13  ;;  %v655_v57 = vpop.f32.mrf.mxu1  ;;  %v1146_v29 = vpop.f32.mrf.mxu0  ;;  %v2344_v13 = vunpack.c.l.b16 %v2302_v28  ;;  %v12899_v28 = vld [vmem:[%s17377_s2 + $0x540] sm:$0xff] }
 0x111   : >> { %v665_v61 = vadd.f32 %v14212_v7, %v655_v57  ;;  %v12900_v7 = vld [vmem:[%s17377_s2 + $0x548] sm:$0xff]  ;;  %v2308_v57 = vrot.slane %v10185_v25, 6  ;;  %v558_v25 = vadd.f32 %v14477_v12, %v14127_v59 }
 0x112   : >> { %v14458_v54 = vadd.f32 %v1488_v34, %v1379_v56  ;;  %3196 = vmatpush.bf16.msra.mxu2 %v12900_v7  ;;  %v2352_v52 = vpack.c.b16 %v2345_v63, %v2344_v13  ;;  %v14488_v34 = vpack.c.b16 %v2705_v24, %v2704_v21  ;;  %v12860_v56 = vld [vmem:[%s13629_s22 + $0x28] sm:$0xff]  ;;  %v10184_v13 = vld [vmem:[%s13629_s22 + $0x54] sm:$0xc]  ;;  %v10186_v63 = vld [vmem:[%s13629_s22 + $0x5c] sm:$0x3] }
 0x113   : >> { %v842_v20 = vadd.f32 %v14340_v3, %v665_v61  ;;  %v2676_v3 = vshrl.u32 %v10322_v44, 16  ;;  %3330 = vmatpush.bf16.msra.mxu3 %v12912_v15  ;;  %v12925_v7 = vld [vmem:[%s17379_s4 + $0x130] sm:$0xff]  ;;  %v2310_v44 = vrot.slane %v2308_v57, 4  ;;  %v2311_v21 = vrot.slane %v10186_v63, 6 }
 0x114   : >> { %3447 = vmatpush.bf16.msrb.mxu0 %v12925_v7  ;;  %v12923_v7 = vld [vmem:[%s17379_s4 + $0x120] sm:$0xff] }
 0x115   : >> { %v1019_v11 = vadd.f32 %v14342_v6, %v842_v20  ;;  %v2669_v6 = vrot.slane %v2667_v35, 7  ;;  %v2678_v19 = vrot.slane %v2676_v3, 7  ;;  %v10194_v20 = vrot.slane %v10184_v13, 10 }
 0x116   : >> { %3197 = vmatpush.bf16.msra.mxu2 %v12899_v28  ;;  %v2312_v28 = vsel %vm13699_vm8, %v2310_v44, %v2311_v21  ;;  %v559_v13 = vadd.f32 %v14477_v12, %v14156_v22  ;;  %v12861_v21 = vld [vmem:[%s13629_s22 + $0x38] sm:$0xff] }
 0x117   : >> { %v14486_v14 = vadd.f32 %v1146_v29, %v1019_v11  ;;  %v1364_v31 = vpop.f32.mrf.mxu2  ;;  %v1490_v33 = vpop.f32.mrf.mxu3  ;;  %v2662_v29 = vshrl.u32 %v14482_v27, 16  ;;  %3331 = vmatpush.bf16.msra.mxu3 %v12911_v45  ;;  %v2672_v35 = vor.u32 %v2670_v53, %v2669_v6  ;;  %v2674_v15 = vrot.slane %v2669_v6, 4  ;;  %v10188_v53 = vld [vmem:[%s13629_s22 + $0x68] sm:$0xf] }
 0x118   : >> { %v1380_v36 = vadd.f32 %v1364_v31, %v14338_v2  ;;  %v1255_v47 = vpop.f32.mrf.mxu1  ;;  %v1609_v17 = vpop.f32.mrf.mxu0  ;;  %v2681_v11 = vor.u32 %v2679_v9, %v2678_v19 }
 0x119   : >> { %v14500_v58 = vadd.f32 %v1255_v47, %v557_v30  ;;  %v14503_v61 = vadd.f32 %v1609_v17, %v14389_v18  ;;  %v12894_v18 = vld [vmem:[%s17377_s2 + $0x318] sm:$0xff]  ;;  %v10326_v24 = vrot.slane %v2662_v29, 11  ;;  %v12893_v47 = vld [vmem:[%s17377_s2 + $0x310] sm:$0xff] }
 0x11a   : >> { %v14507_v2 = vadd.f32 %v1490_v33, %v1380_v36  ;;  %2416 = vmatmul.bf16.vlgmr.msra.gmra.mxu1 %v2352_v52  ;;  %2874 = vmatmul.bf16.vlgmr.msra.gmra.mxu0 %v14355_v39  ;;  %v2309_v52 = vsel %vm13699_vm8, %v10194_v20, %v2308_v57  ;;  %v12924_v36 = vld [vmem:[%s17379_s4 + $0x128] sm:$0xff] }
 0x11b   : >> { %3032 = vmatpush.bf16.msrb.mxu1 %v12894_v18  ;;  %v2673_v59 = vsel %vm13670_vm6, %v10326_v24, %v2672_v35  ;;  %3448 = vmatpush.bf16.msrb.mxu0 %v12924_v36  ;;  %v2315_v35 = vrot.slane %v10188_v53, 6 }
 0x11c   : >> { %2560 = vmatmul.bf16.gmra.mxu2 %v12860_v56  ;;  %2782 = vmatmul.bf16.gmra.mxu3 %v14488_v34  ;;  %v2346_v56 = vunpack.c.l.b16 %v2309_v52  ;;  %v2706_v57 = vunpack.c.l.b16 %v2673_v59  ;;  %v12942_v59 = vld [vmem:[%s17377_s2 + $0x378] sm:$0xff] }
 0x11d   : >> { %v2317_v52 = vrot.slane %v2315_v35, 4  ;;  %3650 = vmatpush.bf16.msrb.mxu2 %v12942_v59 }
 0x11f   : >> { %v1367_v39 = vpop.f32.mrf.mxu2  ;;  %v1493_v3 = vpop.f32.mrf.mxu3  ;;  %3033 = vmatpush.bf16.msrb.mxu1 %v12893_v47  ;;  %3449 = vmatpush.bf16.msrb.mxu0 %v12923_v7  ;;  %v560_v47 = vadd.f32 %v14477_v12, %v14190_v48 }
 0x120   : >> { %v1381_v30 = vadd.f32 %v1367_v39, %v14372_v50  ;;  %v1257_v31 = vpop.f32.mrf.mxu1  ;;  %v1611_v33 = vpop.f32.mrf.mxu0  ;;  %v2682_v50 = vsel %vm13670_vm6, %v2674_v15, %v2681_v11  ;;  %v10187_v11 = vld [vmem:[%s13629_s22 + $0x64] sm:$0xc]  ;;  %v3083_v39 = vrot.slane %v14260_v10, 6 }
 0x121   : >> { %v14524_v6 = vadd.f32 %v1257_v31, %v558_v25  ;;  %v14527_v45 = vadd.f32 %v1611_v33, %v14422_v42  ;;  %v2347_v42 = vunpack.c.l.b16 %v2312_v28  ;;  %v2707_v29 = vunpack.c.l.b16 %v2682_v50  ;;  %v10189_v25 = vld [vmem:[%s13629_s22 + $0x6c] sm:$0x3] }
 0x122   : >> { %v14539_v17 = vadd.f32 %v1493_v3, %v1381_v30  ;;  %v10479_v30 = vld [vmem:[%s13629_s22 + $0x80] sm:$0xc]  ;;  %v12892_v31 = vld [vmem:[%s17377_s2 + $0x308] sm:$0xff]  ;;  %v10195_v33 = vrot.slane %v10187_v11, 10  ;;  %v2318_v28 = vrot.slane %v10189_v25, 6 }
 0x123   : >> { %v2353_v9 = vpack.c.b16 %v2347_v42, %v2346_v56  ;;  %v14549_v24 = vpack.c.b16 %v2707_v29, %v2706_v57  ;;  %v10487_v50 = vrot.slane %v10479_v30, 10  ;;  %3034 = vmatpush.bf16.msrb.mxu1 %v12892_v31  ;;  %v12921_v57 = vld [vmem:[%s17379_s4 + $0x110] sm:$0xff]  ;;  %v561_v30 = vadd.f32 %v14477_v12, %v14106_v37 }
 0x125   : >> { %v3084_v7 = vsel %vm13699_vm8, %v10487_v50, %v3083_v39 }
 0x126   : >> { %v3126_v11 = vunpack.c.l.b16 %v3084_v7 }
 0x127   : >> { %v1369_v63 = vpop.f32.mrf.mxu2  ;;  %v1495_v19 = vpop.f32.mrf.mxu3 }
 0x128   : >> { %v1382_v18 = vadd.f32 %v1369_v63, %v14410_v43  ;;  %v1260_v20 = vpop.f32.mrf.mxu1  ;;  %v1614_v44 = vpop.f32.mrf.mxu0  ;;  %v10480_v43 = vld [vmem:[%s13629_s22 + $0x88] sm:$0x3]  ;;  %v2316_v63 = vsel %vm13699_vm8, %v10195_v33, %v2315_v35  ;;  %v12919_v33 = vld [vmem:[%s17379_s4 + $0x100] sm:$0xff] }
 0x129   : >> { %v14551_v15 = vadd.f32 %v1260_v20, %v559_v13  ;;  %v14554_v22 = vadd.f32 %v1614_v44, %v14458_v54  ;;  %v12922_v54 = vld [vmem:[%s17379_s4 + $0x118] sm:$0xff]  ;;  %v3086_v36 = vrot.slane %v10480_v43, 6  ;;  %v12941_v20 = vld [vmem:[%s17377_s2 + $0x370] sm:$0xff] }
 0x12a   : >> { %v14559_v3 = vadd.f32 %v1495_v19, %v1382_v18  ;;  %2421 = vmatmul.bf16.gmra.mxu1 %v2353_v9  ;;  %2879 = vmatmul.bf16.gmra.mxu0 %v14408_v38  ;;  %v3085_v38 = vrot.slane %v3083_v39, 4  ;;  %v2319_v19 = vsel %vm13699_vm8, %v2317_v52, %v2318_v28  ;;  %v12891_v18 = vld [vmem:[%s17377_s2 + $0x300] sm:$0xff]  ;;  %v10191_v39 = vld [vmem:[%s13629_s22 + $0x78] sm:$0xf] }
 0x12b   : >> { %3450 = vmatpush.bf16.msrb.mxu0 %v12922_v54  ;;  %v2349_v35 = vunpack.c.l.b16 %v2319_v19  ;;  %3035 = vmatpush.bf16.msrb.mxu1 %v12891_v18 }
 0x12c   : >> { %2565 = vmatmul.bf16.gmra.mxu2 %v12861_v21  ;;  %2787 = vmatmul.bf16.gmra.mxu3 %v14549_v24  ;;  %v2348_v21 = vunpack.c.l.b16 %v2316_v63 }
 0x12d   : >> { %3651 = vmatpush.bf16.msrb.mxu2 %v12941_v20  ;;  %v12934_v20 = vld [vmem:[%s17377_s2 + $0x138] sm:$0xff] }
 0x12e   : >> { %v2354_v54 = vpack.c.b16 %v2349_v35, %v2348_v21 }
 0x12f   : >> { %v1372_v56 = vpop.f32.mrf.mxu2  ;;  %v1498_v42 = vpop.f32.mrf.mxu3  ;;  %3451 = vmatpush.bf16.msrb.mxu0 %v12921_v57  ;;  %v3090_v57 = vrot.slane %v14297_v41, 6  ;;  %3548 = vmatpush.bf16.msra.mxu1 %v12934_v20  ;;  %v10423_v20 = vld [vmem:[%s13629_s22 + $0x88] sm:$0x7] }
 0x130   : >> { %v1383_v29 = vadd.f32 %v1372_v56, %v14436_v16  ;;  %v1262_v53 = vpop.f32.mrf.mxu1  ;;  %v1616_v13 = vpop.f32.mrf.mxu0  ;;  %v3087_v16 = vsel %vm13699_vm8, %v3085_v38, %v3086_v36  ;;  %v12907_v38 = vld [vmem:[%s13629_s22 + $0x80] sm:$0xff]  ;;  %v2322_v36 = vrot.slane %v10191_v39, 6  ;;  %v10190_v56 = vld [vmem:[%s13629_s22 + $0x74] sm:$0xc] }
 0x131   : >> { %v14584_v9 = vadd.f32 %v1262_v53, %v560_v47  ;;  %v14587_v48 = vadd.f32 %v1616_v13, %v14507_v2  ;;  %v12920_v2 = vld [vmem:[%s17379_s4 + $0x108] sm:$0xff]  ;;  %v3127_v25 = vunpack.c.l.b16 %v3087_v16  ;;  %v10481_v53 = vld [vmem:[%s13629_s22 + $0x90] sm:$0xc]  ;;  %v10482_v13 = vld [vmem:[%s13629_s22 + $0x98] sm:$0x3]  ;;  %v3092_v16 = vrot.slane %v3090_v57, 4 }
 0x132   : >> { %v14602_v44 = vadd.f32 %v1498_v42, %v1383_v29  ;;  %v10192_v42 = vld [vmem:[%s13629_s22 + $0x7c] sm:$0x3]  ;;  %v2324_v63 = vrot.slane %v2322_v36, 4  ;;  %v10488_v7 = vrot.slane %v10481_v53, 10  ;;  %v3093_v18 = vrot.slane %v10482_v13, 6  ;;  %v12947_v13 = vld [vmem:[%s17377_s2 + $0x5a0] sm:$0xff] }
 0x133   : >> { %3452 = vmatpush.bf16.msrb.mxu0 %v12920_v2  ;;  %v3134_v50 = vpack.c.b16 %v3127_v25, %v3126_v11  ;;  %v2325_v19 = vrot.slane %v10192_v42, 6  ;;  %v562_v2 = vadd.f32 %v14477_v12, %v14129_v60  ;;  %v12949_v11 = vld [vmem:[%s17377_s2 + $0x5b0] sm:$0xff] }
 0x135   : >> { %v2326_v60 = vsel %vm13699_vm8, %v2324_v63, %v2325_v19 }
 0x137   : >> { %v1374_v43 = vpop.f32.mrf.mxu2  ;;  %v1500_v31 = vpop.f32.mrf.mxu3  ;;  %3453 = vmatpush.bf16.msrb.mxu0 %v12919_v33  ;;  %v3091_v33 = vsel %vm13699_vm8, %v10488_v7, %v3090_v57  ;;  %v12908_v7 = vld [vmem:[%s13629_s22 + $0x90] sm:$0xff] }
 0x138   : >> { %v1384_v52 = vadd.f32 %v1374_v43, %v14486_v14  ;;  %v1265_v28 = vpop.f32.mrf.mxu1  ;;  %v1619_v59 = vpop.f32.mrf.mxu0  ;;  %v12950_v14 = vld [vmem:[%s17377_s2 + $0x5b8] sm:$0xff] }
 0x139   : >> { %v14612_v47 = vadd.f32 %v1265_v28, %v561_v30  ;;  %v14615_v37 = vadd.f32 %v1619_v59, %v14539_v17  ;;  %v10196_v17 = vrot.slane %v10190_v56, 10  ;;  %3752 = vmatpush.bf16.msrb.mxu3 %v12950_v14  ;;  %v2351_v28 = vunpack.c.l.b16 %v2326_v60  ;;  %v12948_v59 = vld [vmem:[%s17377_s2 + $0x5a8] sm:$0xff] }
 0x13a   : >> { %v14620_v29 = vadd.f32 %v1500_v31, %v1384_v52  ;;  %2426 = vmatmul.bf16.gmra.mxu1 %v2354_v54  ;;  %2884 = vmatmul.bf16.gmra.mxu0 %v14488_v34  ;;  %v12940_v34 = vld [vmem:[%s17377_s2 + $0x368] sm:$0xff]  ;;  %v563_v56 = vadd.f32 %v14477_v12, %v14158_v23  ;;  %v2921_v23 = vrot.slane %v14260_v10, 7  ;;  %v12946_v10 = vld [vmem:[%s17377_s2 + $0x598] sm:$0xff] }
 0x13b   : >> { %3652 = vmatpush.bf16.msrb.mxu2 %v12940_v34  ;;  %v2323_v43 = vsel %vm13699_vm8, %v10196_v17, %v2322_v36  ;;  %v12939_v36 = vld [vmem:[%s17377_s2 + $0x360] sm:$0xff] }
 0x13c   : >> { %3198 = vmatmul.bf16.vlgmr.msra.gmra.mxu2 %v3134_v50  ;;  %3332 = vmatmul.bf16.vlgmr.msra.gmra.mxu3 %v12907_v38  ;;  %v2350_v52 = vunpack.c.l.b16 %v2323_v43  ;;  %v3128_v50 = vunpack.c.l.b16 %v3091_v33  ;;  %v10483_v34 = vld [vmem:[%s13629_s22 + $0xa0] sm:$0xc]  ;;  %v564_v33 = vadd.f32 %v14477_v12, %v14192_v49 }
 0x13d   : >> { %3753 = vmatpush.bf16.msrb.mxu3 %v12949_v11  ;;  %v2923_v11 = vrot.slane %v2921_v23, 4 }
 0x13e   : >> { %v2355_v53 = vpack.c.b16 %v2351_v28, %v2350_v52  ;;  %v12945_v28 = vld [vmem:[%s17377_s2 + $0x590] sm:$0xff] }
 0x13f   : >> { %v1972_v21 = vpop.f32.mrf.mxu2  ;;  %v14636_v35 = vpop.f32.mrf.mxu3  ;;  %3653 = vmatpush.bf16.msrb.mxu2 %v12939_v36 }
 0x140   : >> { %v14642_v25 = vadd.f32 %v1972_v21, %v14500_v58  ;;  %v1267_v39 = vpop.f32.mrf.mxu1  ;;  %v1621_v30 = vpop.f32.mrf.mxu0  ;;  %v3094_v58 = vsel %vm13699_vm8, %v3092_v16, %v3093_v18  ;;  %v10484_v21 = vld [vmem:[%s13629_s22 + $0xa8] sm:$0x3] }
 0x141   : >> { %v14648_v31 = vadd.f32 %v1267_v39, %v562_v2  ;;  %v14651_v54 = vadd.f32 %v1621_v30, %v14559_v3  ;;  %v3129_v38 = vunpack.c.l.b16 %v3094_v58  ;;  %v12933_v3 = vld [vmem:[%s17377_s2 + $0x130] sm:$0xff]  ;;  %3754 = vmatpush.bf16.msrb.mxu3 %v12948_v59  ;;  %v3097_v2 = vrot.slane %v14385_v8, 6 }
 0x142   : >> { %3549 = vmatpush.bf16.msra.mxu1 %v12933_v3  ;;  %v2924_v39 = vrot.slane %v10423_v20, 7  ;;  %v10489_v30 = vrot.slane %v10483_v34, 10  ;;  %v3100_v60 = vrot.slane %v10484_v21, 6  ;;  %v12935_v21 = vld [vmem:[%s17377_s2 + $0x340] sm:$0xff] }
 0x143   : >> { %v3135_v19 = vpack.c.b16 %v3129_v38, %v3128_v50  ;;  %v3099_v43 = vrot.slane %v3097_v2, 4 }
 0x144   : >> { %v2925_v12 = vsel %vm13678_vm7, %v2923_v11, %v2924_v39  ;;  %v3098_v3 = vsel %vm13699_vm8, %v10489_v30, %v3097_v2  ;;  %v14739_v2 = vld [vmem:[%s13629_s22 + $0x84] sm:$0xff] }
 0x145   : >> { %3755 = vmatpush.bf16.msrb.mxu3 %v12947_v13  ;;  %v12936_v13 = vld [vmem:[%s17377_s2 + $0x348] sm:$0xff]  ;;  %v12909_v30 = vld [vmem:[%s13629_s22 + $0xa0] sm:$0xff] }
 0x147   : >> { %v1974_v42 = vpop.f32.mrf.mxu2  ;;  %v14668_v57 = vpop.f32.mrf.mxu3 }
 0x148   : >> { %v14674_v14 = vadd.f32 %v1974_v42, %v14524_v6  ;;  %v1270_v17 = vpop.f32.mrf.mxu1  ;;  %v1624_v63 = vpop.f32.mrf.mxu0  ;;  %v12938_v6 = vld [vmem:[%s17377_s2 + $0x358] sm:$0xff] }
 0x149   : >> { %v14678_v16 = vadd.f32 %v1270_v17, %v563_v56  ;;  %v14681_v18 = vadd.f32 %v1624_v63, %v14602_v44  ;;  %v10427_v44 = vrot.slane %v14271_v26, 11  ;;  %3654 = vmatpush.bf16.msrb.mxu2 %v12938_v6  ;;  %3756 = vmatpush.bf16.msrb.mxu3 %v12946_v10  ;;  %v12937_v26 = vld [vmem:[%s17377_s2 + $0x350] sm:$0xff]  ;;  %v12944_v17 = vld [vmem:[%s17377_s2 + $0x588] sm:$0xff]  ;;  %v3130_v63 = vunpack.c.l.b16 %v3098_v3  ;;  %v12943_v6 = vld [vmem:[%s17377_s2 + $0x580] sm:$0xff] }
 0x14a   : >> { %2431 = vmatmul.bf16.gmra.mxu1 %v2355_v53  ;;  %2889 = vmatmul.bf16.gmra.mxu0 %v14549_v24  ;;  %v12932_v24 = vld [vmem:[%s17377_s2 + $0x128] sm:$0xff]  ;;  %v2965_v53 = vunpack.c.l.b16 %v2925_v12  ;;  %v12957_v3 = vld [vmem:[%s17377_s2 + $0x7f0] sm:$0xff] }
 0x14b   : >> { %3550 = vmatpush.bf16.msra.mxu1 %v12932_v24  ;;  %v2922_v49 = vsel %vm13678_vm7, %v10427_v44, %v2921_v23  ;;  %v10424_v24 = vld [vmem:[%s13629_s22 + $0x98] sm:$0x7] }
 0x14c   : >> { %3203 = vmatmul.bf16.gmra.mxu2 %v3135_v19  ;;  %3337 = vmatmul.bf16.gmra.mxu3 %v12908_v7  ;;  %v2964_v42 = vunpack.c.l.b16 %v2922_v49  ;;  %v12931_v7 = vld [vmem:[%s17377_s2 + $0x120] sm:$0xff] }
 0x14d   : >> { %3655 = vmatpush.bf16.msrb.mxu2 %v12937_v26  ;;  %3757 = vmatpush.bf16.msrb.mxu3 %v12945_v28  ;;  %v10486_v26 = vld [vmem:[%s13629_s22 + $0xb8] sm:$0x3] }
 0x14e   : >> { %v2972_v34 = vpack.c.b16 %v2965_v53, %v2964_v42  ;;  %v3107_v12 = vrot.slane %v10486_v26, 6 }
 0x14f   : >> { %v1977_v58 = vpop.f32.mrf.mxu2  ;;  %v14700_v52 = vpop.f32.mrf.mxu3  ;;  %3551 = vmatpush.bf16.msra.mxu1 %v12931_v7 }
 0x150   : >> { %v14709_v59 = vadd.f32 %v1977_v58, %v14551_v15  ;;  %v1272_v50 = vpop.f32.mrf.mxu1  ;;  %v1626_v38 = vpop.f32.mrf.mxu0  ;;  %v3101_v15 = vsel %vm13699_vm8, %v3099_v43, %v3100_v60  ;;  %v2928_v43 = vrot.slane %v14297_v41, 7  ;;  %v10485_v58 = vld [vmem:[%s13629_s22 + $0xb0] sm:$0xc]  ;;  %v2931_v41 = vrot.slane %v10424_v24, 7 }
 0x151   : >> { %v14717_v36 = vadd.f32 %v1272_v50, %v564_v33  ;;  %v14720_v56 = vadd.f32 %v1626_v38, %v14620_v29  ;;  %v3131_v19 = vunpack.c.l.b16 %v3101_v15  ;;  %v12958_v29 = vld [vmem:[%s17377_s2 + $0x7f8] sm:$0xff]  ;;  %3656 = vmatpush.bf16.msrb.mxu2 %v12936_v13  ;;  %3758 = vmatpush.bf16.msrb.mxu3 %v12944_v17  ;;  %v3104_v33 = vrot.slane %v14454_v62, 6 }
 0x152   : >> { %3854 = vmatpush.bf16.msra.mxu0 %v12958_v29  ;;  %v2930_v50 = vrot.slane %v2928_v43, 4 }
 0x153   : >> { %v3136_v39 = vpack.c.b16 %v3131_v19, %v3130_v63  ;;  %v3106_v49 = vrot.slane %v3104_v33, 4 }
 0x154   : >> { %v2932_v63 = vsel %vm13678_vm7, %v2930_v50, %v2931_v41  ;;  %v10425_v41 = vld [vmem:[%s13629_s22 + $0xa8] sm:$0x7] }
 0x155   : >> { %3657 = vmatpush.bf16.msrb.mxu2 %v12935_v21  ;;  %3759 = vmatpush.bf16.msrb.mxu3 %v12943_v6  ;;  %v3108_v7 = vsel %vm13699_vm8, %v3106_v49, %v3107_v12  ;;  %v12956_v21 = vld [vmem:[%s17377_s2 + $0x7e8] sm:$0xff]  ;;  %v10429_v49 = vrot.slane %v14404_v32, 11  ;;  %v12953_v32 = vld [vmem:[%s17377_s2 + $0x7d0] sm:$0xff] }
 0x156   : >> { %3855 = vmatpush.bf16.msra.mxu0 %v12957_v3  ;;  %v2938_v3 = vrot.slane %v10425_v41, 7 }
 0x157   : >> { %v1979_v23 = vpop.f32.mrf.mxu2  ;;  %v14736_v20 = vpop.f32.mrf.mxu3 }
 0x158   : >> { %v14748_v10 = vadd.f32 %v1979_v23, %v14584_v9  ;;  %v1743_v44 = vpop.f32.mrf.mxu1  ;;  %v2247_v11 = vpop.f32.mrf.mxu0  ;;  %v10428_v9 = vrot.slane %v14328_v40, 11 }
 0x159   : >> { %v1763_v60 = vadd.f32 %v1743_v44, %v14503_v61  ;;  %v10490_v61 = vrot.slane %v10485_v58, 10  ;;  %v3133_v44 = vunpack.c.l.b16 %v3108_v7 }
 0x15a   : >> { %3036 = vmatmul.bf16.vlgmr.msrb.gmra.mxu1 %v2972_v34  ;;  %3454 = vmatmul.bf16.vlgmr.msrb.gmra.mxu0 %v14739_v2  ;;  %v2929_v17 = vsel %vm13678_vm7, %v10428_v9, %v2928_v43  ;;  %v2967_v34 = vunpack.c.l.b16 %v2932_v63  ;;  %v14794_v43 = vld [vmem:[%s13629_s22 + $0x94] sm:$0xff]  ;;  %v2935_v9 = vrot.slane %v14385_v8, 7 }
 0x15b   : >> { %v2094_v28 = vadd.f32 %v14636_v35, %v1763_v60  ;;  %v12930_v35 = vld [vmem:[%s17377_s2 + $0x118] sm:$0xff]  ;;  %v3105_v29 = vsel %vm13699_vm8, %v10490_v61, %v3104_v33  ;;  %v2966_v23 = vunpack.c.l.b16 %v2929_v17  ;;  %3856 = vmatpush.bf16.msra.mxu0 %v12956_v21  ;;  %v12955_v60 = vld [vmem:[%s17377_s2 + $0x7e0] sm:$0xff] }
 0x15c   : >> { %3208 = vmatmul.bf16.gmra.mxu2 %v3136_v39  ;;  %3342 = vmatmul.bf16.gmra.mxu3 %v12909_v30  ;;  %v3132_v6 = vunpack.c.l.b16 %v3105_v29  ;;  %v2937_v12 = vrot.slane %v2935_v9, 4  ;;  %v2936_v63 = vsel %vm13678_vm7, %v10429_v49, %v2935_v9  ;;  %v12927_v21 = vld [vmem:[%s17377_s2 + $0x100] sm:$0xff] }
 0x15d   : >> { %v14760_v38 = vadd.f32 %v2247_v11, %v2094_v28  ;;  %3552 = vmatpush.bf16.msra.mxu1 %v12930_v35  ;;  %v12910_v28 = vld [vmem:[%s13629_s22 + $0xb0] sm:$0xff] }
 0x15e   : >> { %v3137_v26 = vpack.c.b16 %v3133_v44, %v3132_v6 }
 0x15f   : >> { %v1982_v15 = vpop.f32.mrf.mxu2  ;;  %v14768_v42 = vpop.f32.mrf.mxu3  ;;  %3857 = vmatpush.bf16.msra.mxu0 %v12955_v60 }
 0x160   : >> { %v14771_v40 = vadd.f32 %v1982_v15, %v14612_v47  ;;  %v1745_v53 = vpop.f32.mrf.mxu1  ;;  %v2249_v13 = vpop.f32.mrf.mxu0 }
 0x161   : >> { %v1764_v19 = vadd.f32 %v1745_v53, %v14527_v45  ;;  %v12929_v45 = vld [vmem:[%s17377_s2 + $0x110] sm:$0xff] }
 0x162   : >> { %3553 = vmatpush.bf16.msra.mxu1 %v12929_v45  ;;  %v14848_v45 = vld [vmem:[%s13629_s22 + $0xa4] sm:$0xff] }
 0x163   : >> { %v2095_v47 = vadd.f32 %v14668_v57, %v1764_v19  ;;  %v2973_v57 = vpack.c.b16 %v2967_v34, %v2966_v23  ;;  %v2939_v19 = vsel %vm13678_vm7, %v2937_v12, %v2938_v3 }
 0x164   : >> { %v2969_v23 = vunpack.c.l.b16 %v2939_v19 }
 0x165   : >> { %v14786_v11 = vadd.f32 %v2249_v13, %v2095_v47  ;;  %v2968_v47 = vunpack.c.l.b16 %v2936_v63 }
 0x167   : >> { %v1984_v39 = vpop.f32.mrf.mxu2  ;;  %v14791_v30 = vpop.f32.mrf.mxu3  ;;  %v2974_v44 = vpack.c.b16 %v2969_v23, %v2968_v47  ;;  %v14903_v23 = vld [vmem:[%s13629_s22 + $0xb4] sm:$0xff] }
 0x168   : >> { %v14800_v24 = vadd.f32 %v1984_v39, %v14648_v31  ;;  %v1748_v33 = vpop.f32.mrf.mxu1  ;;  %v2252_v58 = vpop.f32.mrf.mxu0  ;;  %v12954_v31 = vld [vmem:[%s17377_s2 + $0x7d8] sm:$0xff]  ;;  %v12951_v39 = vld [vmem:[%s17377_s2 + $0x7c0] sm:$0xff] }
 0x169   : >> { %v1765_v50 = vadd.f32 %v1748_v33, %v14554_v22  ;;  %v12928_v22 = vld [vmem:[%s17377_s2 + $0x108] sm:$0xff]  ;;  %3858 = vmatpush.bf16.msra.mxu0 %v12954_v31 }
 0x16a   : >> { %3041 = vmatmul.bf16.gmra.mxu1 %v2973_v57  ;;  %3459 = vmatmul.bf16.gmra.mxu0 %v14794_v43 }
 0x16b   : >> { %v2096_v61 = vadd.f32 %v14700_v52, %v1765_v50  ;;  %v12974_v52 = vld [vmem:[%s17377_s2 + $0x178] sm:$0xff]  ;;  %3554 = vmatpush.bf16.msra.mxu1 %v12928_v22 }
 0x16c   : >> { %3213 = vmatmul.bf16.gmra.mxu2 %v3137_v26  ;;  %3347 = vmatmul.bf16.gmra.mxu3 %v12910_v28  ;;  %v10426_v28 = vld [vmem:[%s13629_s22 + $0xb8] sm:$0x7] }
 0x16d   : >> { %v14812_v8 = vadd.f32 %v2252_v58, %v2096_v61  ;;  %4182 = vmatpush.bf16.msra.mxu2 %v12974_v52  ;;  %3859 = vmatpush.bf16.msra.mxu0 %v12953_v32  ;;  %v2942_v58 = vrot.slane %v14454_v62, 7  ;;  %v12982_v50 = vld [vmem:[%s17377_s2 + $0x3b8] sm:$0xff]  ;;  %v2945_v41 = vrot.slane %v10426_v28, 7  ;;  %v12972_v61 = vld [vmem:[%s17377_s2 + $0x168] sm:$0xff]  ;;  %v12977_v28 = vld [vmem:[%s17377_s2 + $0x390] sm:$0xff] }
 0x16e   : >> { %4344 = vmatpush.bf16.msra.mxu3 %v12982_v50 }
 0x16f   : >> { %v1987_v35 = vpop.f32.mrf.mxu2  ;;  %v14820_v15 = vpop.f32.mrf.mxu3  ;;  %3555 = vmatpush.bf16.msra.mxu1 %v12927_v21  ;;  %v2944_v62 = vrot.slane %v2942_v58, 4 }
 0x170   : >> { %v14826_v53 = vadd.f32 %v1987_v35, %v14678_v16  ;;  %v1750_v13 = vpop.f32.mrf.mxu1  ;;  %v2254_v17 = vpop.f32.mrf.mxu0  ;;  %v12952_v16 = vld [vmem:[%s17377_s2 + $0x7c8] sm:$0xff] }
 0x171   : >> { %v1766_v29 = vadd.f32 %v1750_v13, %v14587_v48  ;;  %v12973_v48 = vld [vmem:[%s17377_s2 + $0x170] sm:$0xff]  ;;  %3860 = vmatpush.bf16.msra.mxu0 %v12952_v16  ;;  %v2946_v35 = vsel %vm13678_vm7, %v2944_v62, %v2945_v41  ;;  %v12979_v16 = vld [vmem:[%s17377_s2 + $0x3a0] sm:$0xff] }
 0x172   : >> { %4183 = vmatpush.bf16.msra.mxu2 %v12973_v48  ;;  %v2971_v63 = vunpack.c.l.b16 %v2946_v35 }
 0x173   : >> { %v2097_v7 = vadd.f32 %v14736_v20, %v1766_v29  ;;  %v12965_v29 = vld [vmem:[%s17379_s4 + $0x170] sm:$0xff] }
 0x175   : >> { %v14837_v34 = vadd.f32 %v2254_v17, %v2097_v7  ;;  %3861 = vmatpush.bf16.msra.mxu0 %v12951_v39  ;;  %v12971_v7 = vld [vmem:[%s17377_s2 + $0x160] sm:$0xff] }
 0x176   : >> { %4184 = vmatpush.bf16.msra.mxu2 %v12972_v61  ;;  %v12976_v61 = vld [vmem:[%s17377_s2 + $0x388] sm:$0xff] }
 0x177   : >> { %v1989_v6 = vpop.f32.mrf.mxu2  ;;  %v14845_v20 = vpop.f32.mrf.mxu3 }
 0x178   : >> { %v14854_v57 = vadd.f32 %v1989_v6, %v14717_v36  ;;  %v1753_v60 = vpop.f32.mrf.mxu1  ;;  %v2257_v33 = vpop.f32.mrf.mxu0  ;;  %v10430_v36 = vrot.slane %v14482_v27, 11  ;;  %v12981_v27 = vld [vmem:[%s17377_s2 + $0x3b0] sm:$0xff] }
 0x179   : >> { %v1767_v26 = vadd.f32 %v1753_v60, %v14615_v37  ;;  %4345 = vmatpush.bf16.msra.mxu3 %v12981_v27  ;;  %v12970_v60 = vld [vmem:[%s17377_s2 + $0x158] sm:$0xff] }
 0x17a   : >> { %3046 = vmatmul.bf16.gmra.mxu1 %v2974_v44  ;;  %3464 = vmatmul.bf16.gmra.mxu0 %v14848_v45  ;;  %v2943_v52 = vsel %vm13678_vm7, %v10430_v36, %v2942_v58 }
 0x17b   : >> { %v2098_v9 = vadd.f32 %v14768_v42, %v1767_v26  ;;  %v12966_v42 = vld [vmem:[%s17379_s4 + $0x178] sm:$0xff]  ;;  %v2970_v17 = vunpack.c.l.b16 %v2943_v52  ;;  %4185 = vmatpush.bf16.msra.mxu2 %v12971_v7  ;;  %v12969_v26 = vld [vmem:[%s17377_s2 + $0x150] sm:$0xff] }
 0x17c   : >> { %3658 = vmatmul.bf16.vlgmr.msrb.gmra.mxu2 %v14739_v2  ;;  %3760 = vmatmul.bf16.vlgmr.msrb.gmra.mxu3 %v14739_v2 }
 0x17d   : >> { %v14867_v37 = vadd.f32 %v2257_v33, %v2098_v9  ;;  %4080 = vmatpush.bf16.msrb.mxu1 %v12966_v42  ;;  %v2975_v47 = vpack.c.b16 %v2971_v63, %v2970_v17  ;;  %v12978_v33 = vld [vmem:[%s17377_s2 + $0x398] sm:$0xff]  ;;  %v12968_v42 = vld [vmem:[%s17377_s2 + $0x148] sm:$0xff]  ;;  %v10867_v63 = vld [vmem:[%s13629_s22 + $0x84] sm:$0xf] }
 0x17f   : >> { %v14875_v31 = vpop.f32.mrf.mxu2  ;;  %v2773_v49 = vpop.f32.mrf.mxu3  ;;  %4186 = vmatpush.bf16.msra.mxu2 %v12970_v60 }
 0x180   : >> { %v14881_v12 = vadd.f32 %v2773_v49, %v14642_v25  ;;  %v1755_v3 = vpop.f32.mrf.mxu1  ;;  %v2259_v22 = vpop.f32.mrf.mxu0  ;;  %v12980_v25 = vld [vmem:[%s17377_s2 + $0x3a8] sm:$0xff] }
 0x181   : >> { %v1768_v32 = vadd.f32 %v1755_v3, %v14651_v54  ;;  %4346 = vmatpush.bf16.msra.mxu3 %v12980_v25  ;;  %4081 = vmatpush.bf16.msrb.mxu1 %v12965_v29  ;;  %v12967_v3 = vld [vmem:[%s17377_s2 + $0x140] sm:$0xff]  ;;  %v14973_v25 = vld [vmem:[%s13629_s22 + $0x88] sm:$0xf]  ;;  %v3904_v29 = vshrl.u32 %v10867_v63, 16 }
 0x183   : >> { %v2099_v13 = vadd.f32 %v14791_v30, %v1768_v32  ;;  %4187 = vmatpush.bf16.msra.mxu2 %v12969_v26  ;;  %v3906_v60 = vrot.slane %v3904_v29, 4  ;;  %v12986_v29 = vld [vmem:[%s17377_s2 + $0x5d8] sm:$0xff] }
 0x185   : >> { %v14892_v19 = vadd.f32 %v2259_v22, %v2099_v13  ;;  %4347 = vmatpush.bf16.msra.mxu3 %v12979_v16  ;;  %v12975_v22 = vld [vmem:[%s17377_s2 + $0x380] sm:$0xff]  ;;  %v3917_v16 = vshrl.u32 %v14973_v25, 16 }
 0x187   : >> { %v14900_v54 = vpop.f32.mrf.mxu2  ;;  %v2775_v30 = vpop.f32.mrf.mxu3  ;;  %4188 = vmatpush.bf16.msra.mxu2 %v12968_v42 }
 0x188   : >> { %v14909_v21 = vadd.f32 %v2775_v30, %v14674_v14  ;;  %v1758_v48 = vpop.f32.mrf.mxu1  ;;  %v2262_v6 = vpop.f32.mrf.mxu0 }
 0x189   : >> { %v1769_v44 = vadd.f32 %v1758_v48, %v14681_v18  ;;  %v12964_v18 = vld [vmem:[%s17379_s4 + $0x168] sm:$0xff]  ;;  %4348 = vmatpush.bf16.msra.mxu3 %v12978_v33 }
 0x18a   : >> { %3051 = vmatmul.bf16.gmra.mxu1 %v2975_v47  ;;  %3469 = vmatmul.bf16.gmra.mxu0 %v14903_v23  ;;  %v3913_v47 = vshll.u32 %v14973_v25, 16 }
 0x18b   : >> { %v2100_v39 = vadd.f32 %v14820_v15, %v1769_v44  ;;  %4082 = vmatpush.bf16.msrb.mxu1 %v12964_v18  ;;  %4189 = vmatpush.bf16.msra.mxu2 %v12967_v3 }
 0x18c   : >> { %3663 = vmatmul.bf16.gmra.mxu2 %v14794_v43  ;;  %3765 = vmatmul.bf16.gmra.mxu3 %v14794_v43  ;;  %v3915_v26 = vrot.slane %v3913_v47, 5 }
 0x18d   : >> { %v14922_v14 = vadd.f32 %v2262_v6, %v2100_v39  ;;  %4349 = vmatpush.bf16.msra.mxu3 %v12977_v28  ;;  %v3919_v28 = vrot.slane %v3917_v16, 4 }
 0x18f   : >> { %v14927_v15 = vpop.f32.mrf.mxu2  ;;  %v2778_v58 = vpop.f32.mrf.mxu3 }
 0x190   : >> { %v14936_v9 = vadd.f32 %v2778_v58, %v14709_v59  ;;  %v1760_v50 = vpop.f32.mrf.mxu1  ;;  %v2264_v36 = vpop.f32.mrf.mxu0  ;;  %v12990_v59 = vld [vmem:[%s17377_s2 + $0x5f8] sm:$0xff]  ;;  %v10869_v58 = vld [vmem:[%s13629_s22 + $0x8c] sm:$0x1] }
 0x191   : >> { %v1770_v62 = vadd.f32 %v1760_v50, %v14720_v56  ;;  %v12963_v56 = vld [vmem:[%s17379_s4 + $0x160] sm:$0xff]  ;;  %4350 = vmatpush.bf16.msra.mxu3 %v12976_v61  ;;  %4506 = vmatpush.bf16.msrb.mxu0 %v12990_v59  ;;  %v12988_v50 = vld [vmem:[%s17377_s2 + $0x5e8] sm:$0xff]  ;;  %v4237_v59 = vrot.slane %v14973_v25, 5 }
 0x192   : >> { %4083 = vmatpush.bf16.msrb.mxu1 %v12963_v56  ;;  %v10975_v61 = vld [vmem:[%s13629_s22 + $0x84] sm:$0xe] }
 0x193   : >> { %v2101_v41 = vadd.f32 %v14845_v20, %v1770_v62  ;;  %v3923_v62 = vshll.u32 %v10869_v58, 16  ;;  %v12987_v56 = vld [vmem:[%s17377_s2 + $0x5e0] sm:$0xff] }
 0x195   : >> { %v14946_v49 = vadd.f32 %v2264_v36, %v2101_v41  ;;  %4351 = vmatpush.bf16.msra.mxu3 %v12975_v22 }
 0x197   : >> { %v14954_v20 = vpop.f32.mrf.mxu2  ;;  %v2780_v27 = vpop.f32.mrf.mxu3 }
 0x198   : >> { %v14963_v52 = vadd.f32 %v2780_v27, %v14748_v10  ;;  %v2417_v35 = vpop.f32.mrf.mxu1  ;;  %v2875_v32 = vpop.f32.mrf.mxu0 }
 0x199   : >> { %v2437_v13 = vadd.f32 %v2417_v35, %v14760_v38  ;;  %v12989_v38 = vld [vmem:[%s17377_s2 + $0x5f0] sm:$0xff] }
 0x19a   : >> { %3556 = vmatmul.bf16.vlgmr.msra.gmra.mxu1 %v14739_v2  ;;  %3862 = vmatmul.bf16.vlgmr.msra.gmra.mxu0 %v14739_v2  ;;  %v3907_v2 = vshll.u32 %v10867_v63, 16 }
 0x19b   : >> { %v2571_v17 = vadd.f32 %v14875_v31, %v2437_v13  ;;  %v12962_v31 = vld [vmem:[%s17379_s4 + $0x158] sm:$0xff]  ;;  %4507 = vmatpush.bf16.msrb.mxu0 %v12989_v38  ;;  %v3925_v13 = vrot.slane %v3923_v62, 5 }
 0x19c   : >> { %3668 = vmatmul.bf16.gmra.mxu2 %v14848_v45  ;;  %3770 = vmatmul.bf16.gmra.mxu3 %v14848_v45  ;;  %v3909_v33 = vrot.slane %v3907_v2, 5 }
 0x19d   : >> { %v14975_v10 = vadd.f32 %v2875_v32, %v2571_v17  ;;  %4084 = vmatpush.bf16.msrb.mxu1 %v12962_v31  ;;  %v10979_v17 = vrot.slane %v10975_v61, 9  ;;  %v4239_v31 = vrot.slane %v4237_v59, 4 }
 0x19f   : >> { %v14983_v7 = vpop.f32.mrf.mxu2  ;;  %v2783_v30 = vpop.f32.mrf.mxu3  ;;  %4508 = vmatpush.bf16.msrb.mxu0 %v12988_v50 }
 0x1a0   : >> { %v14988_v48 = vadd.f32 %v2783_v30, %v14771_v40  ;;  %v2419_v6 = vpop.f32.mrf.mxu1  ;;  %v2877_v44 = vpop.f32.mrf.mxu0  ;;  %v12961_v40 = vld [vmem:[%s17379_s4 + $0x150] sm:$0xff]  ;;  %v15027_v30 = vld [vmem:[%s13629_s22 + $0x98] sm:$0xf] }
 0x1a1   : >> { %v2438_v39 = vadd.f32 %v2419_v6, %v14786_v11  ;;  %v3910_v11 = vor.u32 %v3909_v33, %v3906_v60  ;;  %4085 = vmatpush.bf16.msrb.mxu1 %v12961_v40  ;;  %v3937_v40 = vshll.u32 %v15027_v30, 16 }
 0x1a3   : >> { %v2572_v18 = vadd.f32 %v14900_v54, %v2438_v39  ;;  %v3920_v54 = vor.u32 %v3919_v28, %v3915_v26  ;;  %4509 = vmatpush.bf16.msrb.mxu0 %v12987_v56  ;;  %v3911_v32 = vrot.slane %v3910_v11, 4  ;;  %v4238_v39 = vsel %vm14171_vm14, %v10979_v17, %v4237_v59  ;;  %v10872_v17 = vld [vmem:[%s13629_s22 + $0x9c] sm:$0x1] }
 0x1a4   : >> { %v3941_v11 = vshrl.u32 %v15027_v30, 16  ;;  %v4280_v59 = vunpack.c.l.b16 %v4238_v39 }
 0x1a5   : >> { %v14996_v36 = vadd.f32 %v2877_v44, %v2572_v18  ;;  %v3921_v38 = vrot.slane %v3920_v54, 4  ;;  %v3916_v47 = vsel %vm14077_vm11, %v3911_v32, %v3915_v26  ;;  %v12985_v18 = vld [vmem:[%s17377_s2 + $0x5d0] sm:$0xff] }
 0x1a6   : >> { %v3943_v32 = vrot.slane %v3941_v11, 4 }
 0x1a7   : >> { %v15001_v41 = vpop.f32.mrf.mxu2  ;;  %v2785_v42 = vpop.f32.mrf.mxu3  ;;  %4510 = vmatpush.bf16.msrb.mxu0 %v12986_v29  ;;  %v3926_v44 = vsel %vm14077_vm11, %v3921_v38, %v3925_v13  ;;  %v12983_v29 = vld [vmem:[%s17377_s2 + $0x5c0] sm:$0xff] }
 0x1a8   : >> { %v15009_v27 = vadd.f32 %v2785_v42, %v14800_v24  ;;  %v2422_v3 = vpop.f32.mrf.mxu1  ;;  %v2880_v22 = vpop.f32.mrf.mxu0  ;;  %v4240_v24 = vrot.slane %v10869_v58, 5  ;;  %v4016_v42 = vunpack.c.l.b16 %v3916_v47  ;;  %v4017_v61 = vunpack.c.l.b16 %v3926_v44 }
 0x1a9   : >> { %v2439_v35 = vadd.f32 %v2422_v3, %v14812_v8  ;;  %v10870_v8 = vld [vmem:[%s13629_s22 + $0x94] sm:$0xf]  ;;  %v3947_v44 = vshll.u32 %v10872_v17, 16 }
 0x1aa   : >> { %3561 = vmatmul.bf16.gmra.mxu1 %v14794_v43  ;;  %3867 = vmatmul.bf16.gmra.mxu0 %v14794_v43  ;;  %v13015_v43 = vld [vmem:[%s17379_s4 + $0x1b8] sm:$0xff]  ;;  %v4241_v60 = vsel %vm14171_vm14, %v4239_v31, %v4240_v24  ;;  %v3928_v33 = vshrl.u32 %v10870_v8, 16  ;;  %v3931_v50 = vshll.u32 %v10870_v8, 16  ;;  %v15068_v31 = vpack.c.b16 %v4017_v61, %v4016_v42 }
 0x1ab   : >> { %v2573_v63 = vadd.f32 %v14927_v15, %v2439_v35  ;;  %v12960_v15 = vld [vmem:[%s17379_s4 + $0x148] sm:$0xff]  ;;  %4854 = vmatpush.bf16.msrb.mxu2 %v13015_v43  ;;  %4511 = vmatpush.bf16.msrb.mxu0 %v12985_v18  ;;  %v4281_v56 = vunpack.c.l.b16 %v4241_v60  ;;  %v15055_v35 = vrot.slane %v3937_v40, 5  ;;  %v10976_v60 = vld [vmem:[%s13629_s22 + $0x94] sm:$0xe]  ;;  %v4247_v42 = vrot.slane %v10872_v17, 5 }
 0x1ac   : >> { %3673 = vmatmul.bf16.gmra.mxu2 %v14903_v23  ;;  %3775 = vmatmul.bf16.gmra.mxu3 %v14903_v23  ;;  %v3930_v3 = vrot.slane %v3928_v33, 4  ;;  %v4244_v33 = vrot.slane %v15027_v30, 5  ;;  %v10980_v40 = vrot.slane %v10976_v60, 9 }
 0x1ad   : >> { %v15021_v2 = vadd.f32 %v2880_v22, %v2573_v63  ;;  %4086 = vmatpush.bf16.msrb.mxu1 %v12960_v15  ;;  %v3933_v22 = vrot.slane %v3931_v50, 5  ;;  %v4288_v24 = vpack.c.b16 %v4281_v56, %v4280_v59  ;;  %v3949_v50 = vrot.slane %v3947_v44, 5  ;;  %v13021_v44 = vld [vmem:[%s17377_s2 + $0x1a8] sm:$0xff] }
 0x1af   : >> { %v15034_v16 = vpop.f32.mrf.mxu2  ;;  %v2788_v6 = vpop.f32.mrf.mxu3  ;;  %v3934_v47 = vor.u32 %v3933_v22, %v3930_v3  ;;  %v13022_v3 = vld [vmem:[%s17377_s2 + $0x1b0] sm:$0xff] }
 0x1b0   : >> { %v15046_v58 = vadd.f32 %v2788_v6, %v14826_v53  ;;  %v2424_v26 = vpop.f32.mrf.mxu1  ;;  %v2882_v28 = vpop.f32.mrf.mxu0  ;;  %v12984_v53 = vld [vmem:[%s17377_s2 + $0x5c8] sm:$0xff]  ;;  %v3944_v6 = vor.u32 %v3943_v32, %v15055_v35 }
 0x1b1   : >> { %v2440_v62 = vadd.f32 %v2424_v26, %v14837_v34  ;;  %v12959_v34 = vld [vmem:[%s17379_s4 + $0x140] sm:$0xff]  ;;  %4512 = vmatpush.bf16.msrb.mxu0 %v12984_v53 }
 0x1b2   : >> { %4087 = vmatpush.bf16.msrb.mxu1 %v12959_v34  ;;  %v10873_v26 = vld [vmem:[%s13629_s22 + $0xa4] sm:$0xf] }
 0x1b3   : >> { %v2574_v54 = vadd.f32 %v14954_v20, %v2440_v62  ;;  %v13014_v20 = vld [vmem:[%s17379_s4 + $0x1b0] sm:$0xff]  ;;  %v4246_v62 = vrot.slane %v4244_v33, 4  ;;  %v3952_v61 = vshrl.u32 %v10873_v26, 16  ;;  %v3955_v59 = vshll.u32 %v10873_v26, 16 }
 0x1b4   : >> { %4855 = vmatpush.bf16.msrb.mxu2 %v13014_v20  ;;  %v4245_v20 = vsel %vm14171_vm14, %v10980_v40, %v4244_v33 }
 0x1b5   : >> { %v15057_v13 = vadd.f32 %v2882_v28, %v2574_v54  ;;  %4513 = vmatpush.bf16.msrb.mxu0 %v12983_v29  ;;  %v3945_v28 = vrot.slane %v3944_v6, 4  ;;  %v15097_v54 = vld [vmem:[%s13629_s22 + $0xa8] sm:$0xf]  ;;  %v13001_v6 = vld [vmem:[%s17377_s2 + $0x830] sm:$0xff]  ;;  %v4282_v33 = vunpack.c.l.b16 %v4245_v20 }
 0x1b6   : >> { %v3961_v29 = vshll.u32 %v15097_v54, 16  ;;  %v4251_v20 = vrot.slane %v15097_v54, 5 }
 0x1b7   : >> { %v15066_v63 = vpop.f32.mrf.mxu2  ;;  %v2790_v38 = vpop.f32.mrf.mxu3  ;;  %v3950_v34 = vsel %vm14077_vm11, %v3945_v28, %v3949_v50 }
 0x1b8   : >> { %v15074_v8 = vadd.f32 %v2790_v38, %v14854_v57  ;;  %v2427_v15 = vpop.f32.mrf.mxu1  ;;  %v2885_v43 = vpop.f32.mrf.mxu0  ;;  %v13023_v57 = vld [vmem:[%s17377_s2 + $0x1b8] sm:$0xff]  ;;  %v4019_v60 = vunpack.c.l.b16 %v3950_v34  ;;  %v15133_v26 = vrot.slane %v3961_v29, 5  ;;  %v10977_v34 = vld [vmem:[%s13629_s22 + $0xa4] sm:$0xe] }
 0x1b9   : >> { %v2441_v39 = vadd.f32 %v2427_v15, %v14867_v37  ;;  %v3935_v37 = vrot.slane %v3934_v47, 4  ;;  %4956 = vmatpush.bf16.msrb.mxu3 %v13023_v57  ;;  %v3965_v15 = vshrl.u32 %v15097_v54, 16  ;;  %v3957_v47 = vrot.slane %v3955_v59, 5  ;;  %v15129_v57 = vld [vmem:[%s13629_s22 + $0xac] sm:$0x1] }
 0x1ba   : >> { %3566 = vmatmul.bf16.gmra.mxu1 %v14848_v45  ;;  %3872 = vmatmul.bf16.gmra.mxu0 %v14848_v45  ;;  %v13013_v45 = vld [vmem:[%s17379_s4 + $0x1a8] sm:$0xff] }
 0x1bb   : >> { %v2575_v18 = vadd.f32 %v14983_v7, %v2441_v39  ;;  %v13002_v7 = vld [vmem:[%s17377_s2 + $0x838] sm:$0xff]  ;;  %4856 = vmatpush.bf16.msrb.mxu2 %v13013_v45  ;;  %v3940_v17 = vsel %vm14077_vm11, %v3935_v37, %v15055_v35  ;;  %v3967_v37 = vrot.slane %v3965_v15, 4  ;;  %v13020_v45 = vld [vmem:[%s17377_s2 + $0x1a0] sm:$0xff] }
 0x1bc   : >> { %4190 = vmatmul.bf16.vlgmr.msra.gmra.mxu2 %v15068_v31  ;;  %4352 = vmatmul.bf16.vlgmr.msra.gmra.mxu3 %v4288_v24  ;;  %v4248_v24 = vsel %vm14171_vm14, %v4246_v62, %v4247_v42  ;;  %v4018_v39 = vunpack.c.l.b16 %v3940_v17 }
 0x1bd   : >> { %v15094_v11 = vadd.f32 %v2885_v43, %v2575_v18  ;;  %4632 = vmatpush.bf16.msra.mxu1 %v13002_v7  ;;  %4957 = vmatpush.bf16.msrb.mxu3 %v13022_v3  ;;  %v3954_v43 = vrot.slane %v3952_v61, 4  ;;  %v4283_v18 = vunpack.c.l.b16 %v4248_v24  ;;  %v3971_v7 = vshll.u32 %v15129_v57, 16  ;;  %v11031_v3 = vld [vmem:[%s13629_s22 + $0x84] sm:$0xc] }
 0x1be   : >> { %v15143_v61 = vpack.c.b16 %v4019_v60, %v4018_v39  ;;  %v3968_v17 = vor.u32 %v3967_v37, %v15133_v26  ;;  %v4253_v60 = vrot.slane %v4251_v20, 4 }
 0x1bf   : >> { %v15099_v56 = vpop.f32.mrf.mxu2  ;;  %v15101_v53 = vpop.f32.mrf.mxu3  ;;  %v3958_v28 = vor.u32 %v3957_v47, %v3954_v43  ;;  %v4289_v59 = vpack.c.b16 %v4283_v18, %v4282_v33  ;;  %v3973_v15 = vrot.slane %v3971_v7, 5  ;;  %v11039_v43 = vrot.slane %v11031_v3, 10  ;;  %v13019_v47 = vld [vmem:[%s17377_s2 + $0x198] sm:$0xff] }
 0x1c0   : >> { %v2429_v22 = vpop.f32.mrf.mxu1  ;;  %v2887_v32 = vpop.f32.mrf.mxu0  ;;  %v3969_v39 = vrot.slane %v3968_v17, 4  ;;  %v4254_v33 = vrot.slane %v15129_v57, 5  ;;  %v13010_v57 = vld [vmem:[%s17379_s4 + $0x190] sm:$0xff] }
 0x1c1   : >> { %v2442_v38 = vadd.f32 %v2429_v22, %v14892_v19  ;;  %v13012_v19 = vld [vmem:[%s17379_s4 + $0x1a0] sm:$0xff]  ;;  %4633 = vmatpush.bf16.msra.mxu1 %v13001_v6  ;;  %4958 = vmatpush.bf16.msrb.mxu3 %v13021_v44  ;;  %v4399_v22 = vrot.slane %v14973_v25, 6  ;;  %v3959_v24 = vrot.slane %v3958_v28, 4  ;;  %v10876_v25 = vld [vmem:[%s13629_s22 + $0xb4] sm:$0xf] }
 0x1c2   : >> { %4857 = vmatpush.bf16.msrb.mxu2 %v13012_v19  ;;  %v15164_v19 = vld [vmem:[%s13629_s22 + $0xb8] sm:$0xf]  ;;  %v3976_v18 = vshrl.u32 %v10876_v25, 16  ;;  %v3979_v37 = vshll.u32 %v10876_v25, 16 }
 0x1c3   : >> { %v2576_v35 = vadd.f32 %v15001_v41, %v2442_v38  ;;  %v11032_v38 = vld [vmem:[%s13629_s22 + $0x8c] sm:$0x3]  ;;  %v3964_v17 = vsel %vm14077_vm11, %v3959_v24, %v15133_v26 }
 0x1c4   : >> { %v4402_v6 = vrot.slane %v11032_v38, 6  ;;  %v3974_v38 = vsel %vm14077_vm11, %v3969_v39, %v3973_v15  ;;  %v3981_v26 = vrot.slane %v3979_v37, 5  ;;  %v12999_v15 = vld [vmem:[%s17377_s2 + $0x820] sm:$0xff] }
 0x1c5   : >> { %v15131_v41 = vadd.f32 %v2887_v32, %v2576_v35  ;;  %4959 = vmatpush.bf16.msrb.mxu3 %v13020_v45  ;;  %v10981_v35 = vrot.slane %v10977_v34, 9  ;;  %v4400_v45 = vsel %vm13699_vm8, %v11039_v43, %v4399_v22  ;;  %v4255_v43 = vsel %vm14171_vm14, %v4253_v60, %v4254_v33  ;;  %v13017_v33 = vld [vmem:[%s17377_s2 + $0x188] sm:$0xff] }
 0x1c6   : >> { %v4442_v25 = vunpack.c.l.b16 %v4400_v45  ;;  %v4021_v39 = vunpack.c.l.b16 %v3974_v38 }
 0x1c7   : >> { %v15135_v50 = vpop.f32.mrf.mxu2  ;;  %v15137_v40 = vpop.f32.mrf.mxu3 }
 0x1c8   : >> { %v2432_v62 = vpop.f32.mrf.mxu1  ;;  %v2890_v42 = vpop.f32.mrf.mxu0 }
 0x1c9   : >> { %v2443_v32 = vadd.f32 %v2432_v62, %v14922_v14  ;;  %v13011_v14 = vld [vmem:[%s17379_s4 + $0x198] sm:$0xff]  ;;  %4960 = vmatpush.bf16.msrb.mxu3 %v13019_v47  ;;  %v3985_v62 = vshll.u32 %v15164_v19, 16  ;;  %v3978_v47 = vrot.slane %v3976_v18, 4 }
 0x1ca   : >> { %3571 = vmatmul.bf16.gmra.mxu1 %v14903_v23  ;;  %3877 = vmatmul.bf16.gmra.mxu0 %v14903_v23  ;;  %v13000_v23 = vld [vmem:[%s17377_s2 + $0x828] sm:$0xff] }
 0x1cb   : >> { %v2577_v29 = vadd.f32 %v15034_v16, %v2443_v32  ;;  %v4401_v16 = vrot.slane %v4399_v22, 4  ;;  %4858 = vmatpush.bf16.msrb.mxu2 %v13011_v14  ;;  %4634 = vmatpush.bf16.msra.mxu1 %v13000_v23  ;;  %v15199_v14 = vld [vmem:[%s13629_s22 + $0xbc] sm:$0x1]  ;;  %v4020_v23 = vunpack.c.l.b16 %v3964_v17  ;;  %v3982_v37 = vor.u32 %v3981_v26, %v3978_v47  ;;  %v13016_v17 = vld [vmem:[%s17377_s2 + $0x180] sm:$0xff] }
 0x1cc   : >> { %4195 = vmatmul.bf16.gmra.mxu2 %v15143_v61  ;;  %4357 = vmatmul.bf16.gmra.mxu3 %v4289_v59  ;;  %v13018_v59 = vld [vmem:[%s17377_s2 + $0x190] sm:$0xff]  ;;  %v3995_v45 = vshll.u32 %v15199_v14, 16 }
 0x1cd   : >> { %v15169_v44 = vadd.f32 %v2890_v42, %v2577_v29  ;;  %v3989_v42 = vshrl.u32 %v15164_v19, 16  ;;  %v4403_v22 = vsel %vm13699_vm8, %v4401_v16, %v4402_v6  ;;  %v4252_v29 = vsel %vm14171_vm14, %v10981_v35, %v4251_v20  ;;  %4961 = vmatpush.bf16.msrb.mxu3 %v13018_v59  ;;  %v13032_v20 = vld [vmem:[%s17377_s2 + $0x3f8] sm:$0xff]  ;;  %v13009_v35 = vld [vmem:[%s17379_s4 + $0x188] sm:$0xff] }
 0x1ce   : >> { %v4443_v16 = vunpack.c.l.b16 %v4403_v22  ;;  %v4284_v60 = vunpack.c.l.b16 %v4252_v29  ;;  %5130 = vmatpush.bf16.msra.mxu0 %v13032_v20  ;;  %v15231_v38 = vpack.c.b16 %v4021_v39, %v4020_v23  ;;  %v3997_v20 = vrot.slane %v3995_v45, 5 }
 0x1cf   : >> { %v15172_v28 = vpop.f32.mrf.mxu2  ;;  %v15174_v7 = vpop.f32.mrf.mxu3  ;;  %4859 = vmatpush.bf16.msrb.mxu2 %v13010_v57  ;;  %v3991_v6 = vrot.slane %v3989_v42, 4  ;;  %4635 = vmatpush.bf16.msra.mxu1 %v12999_v15 }
 0x1d0   : >> { %v2434_v3 = vpop.f32.mrf.mxu1  ;;  %v2892_v32 = vpop.f32.mrf.mxu0  ;;  %v4450_v57 = vpack.c.b16 %v4443_v16, %v4442_v25  ;;  %v4406_v25 = vrot.slane %v15027_v30, 6  ;;  %v11034_v16 = vld [vmem:[%s13629_s22 + $0x9c] sm:$0x3]  ;;  %v4261_v30 = vrot.slane %v15199_v14, 5 }
 0x1d1   : >> { %v2444_v34 = vadd.f32 %v2434_v3, %v14946_v49  ;;  %v15202_v49 = vrot.slane %v3985_v62, 5  ;;  %4962 = vmatpush.bf16.msrb.mxu3 %v13017_v33  ;;  %v4258_v3 = vrot.slane %v15164_v19, 5 }
 0x1d3   : >> { %v2578_v24 = vadd.f32 %v15066_v63, %v2444_v34  ;;  %v4285_v63 = vunpack.c.l.b16 %v4255_v43  ;;  %4860 = vmatpush.bf16.msrb.mxu2 %v13009_v35  ;;  %v3992_v59 = vor.u32 %v3991_v6, %v15202_v49  ;;  %v10978_v43 = vld [vmem:[%s13629_s22 + $0xb4] sm:$0xe]  ;;  %v3983_v6 = vrot.slane %v3982_v37, 4 }
 0x1d4   : >> { %v10982_v23 = vrot.slane %v10978_v43, 9  ;;  %v4260_v39 = vrot.slane %v4258_v3, 4  ;;  %v11163_v43 = vld [vmem:[%s13629_s22 + $0x98] sm:$0xf] }
 0x1d5   : >> { %v15216_v18 = vadd.f32 %v2892_v32, %v2578_v24  ;;  %v13008_v32 = vld [vmem:[%s17379_s4 + $0x180] sm:$0xff]  ;;  %v4290_v29 = vpack.c.b16 %v4285_v63, %v4284_v60  ;;  %v11033_v24 = vld [vmem:[%s13629_s22 + $0x94] sm:$0xc]  ;;  %4963 = vmatpush.bf16.msrb.mxu3 %v13016_v17  ;;  %v3993_v35 = vrot.slane %v3992_v59, 4  ;;  %v4408_v60 = vrot.slane %v4406_v25, 4 }
 0x1d6   : >> { %v3988_v45 = vsel %vm14077_vm11, %v3983_v6, %v15202_v49 }
 0x1d7   : >> { %v15219_v62 = vpop.f32.mrf.mxu2  ;;  %v15221_v42 = vpop.f32.mrf.mxu3  ;;  %4861 = vmatpush.bf16.msrb.mxu2 %v13008_v32  ;;  %v3998_v14 = vsel %vm14077_vm11, %v3993_v35, %v3997_v20 }
 0x1d8   : >> { %v3037_v22 = vpop.f32.mrf.mxu1  ;;  %v3455_v34 = vpop.f32.mrf.mxu0 }
 0x1d9   : >> { %v3057_v47 = vadd.f32 %v3037_v22, %v14975_v10  ;;  %v15237_v26 = vadd.f32 %v3455_v34, %v14881_v12  ;;  %v13031_v10 = vld [vmem:[%s17377_s2 + $0x3f0] sm:$0xff]  ;;  %v12998_v12 = vld [vmem:[%s17377_s2 + $0x818] sm:$0xff] }
 0x1da   : >> { %4088 = vmatmul.bf16.vlgmr.msrb.gmra.mxu1 %v15068_v31  ;;  %4514 = vmatmul.bf16.vlgmr.msrb.gmra.mxu0 %v4450_v57  ;;  %v4409_v31 = vrot.slane %v11034_v16, 6  ;;  %v4259_v57 = vsel %vm14171_vm14, %v10982_v23, %v4258_v3  ;;  %v4022_v3 = vunpack.c.l.b16 %v3988_v45  ;;  %v4700_v23 = vshrl.u32 %v11163_v43, 16 }
 0x1db   : >> { %v3219_v15 = vadd.f32 %v15099_v56, %v3057_v47  ;;  %v11040_v56 = vrot.slane %v11033_v24, 10  ;;  %5131 = vmatpush.bf16.msra.mxu0 %v13031_v10  ;;  %4636 = vmatpush.bf16.msra.mxu1 %v12998_v12  ;;  %v4023_v47 = vunpack.c.l.b16 %v3998_v14  ;;  %v4286_v24 = vunpack.c.l.b16 %v4259_v57  ;;  %v13029_v14 = vld [vmem:[%s17377_s2 + $0x3e0] sm:$0xff] }
 0x1dc   : >> { %4200 = vmatmul.bf16.gmra.mxu2 %v15231_v38  ;;  %4362 = vmatmul.bf16.gmra.mxu3 %v4290_v29  ;;  %v4410_v22 = vsel %vm13699_vm8, %v4408_v60, %v4409_v31  ;;  %v11162_v29 = vld [vmem:[%s13629_s22 + $0x94] sm:$0xf]  ;;  %v11035_v60 = vld [vmem:[%s13629_s22 + $0xa4] sm:$0xc]  ;;  %v4413_v31 = vrot.slane %v15097_v54, 6 }
 0x1dd   : >> { %v15252_v63 = vadd.f32 %v15101_v53, %v3219_v15  ;;  %v4262_v53 = vsel %vm14171_vm14, %v4260_v39, %v4261_v30  ;;  %v4407_v17 = vsel %vm13699_vm8, %v11040_v56, %v4406_v25  ;;  %v4445_v15 = vunpack.c.l.b16 %v4410_v22  ;;  %v13030_v25 = vld [vmem:[%s17377_s2 + $0x3e8] sm:$0xff] }
 0x1de   : >> { %v4287_v6 = vunpack.c.l.b16 %v4262_v53  ;;  %v4444_v20 = vunpack.c.l.b16 %v4407_v17  ;;  %v4691_v35 = vshrl.u32 %v11162_v29, 16  ;;  %v15285_v39 = vpack.c.b16 %v4023_v47, %v4022_v3 }
 0x1df   : >> { %v15254_v33 = vpop.f32.mrf.mxu2  ;;  %v15256_v37 = vpop.f32.mrf.mxu3  ;;  %5132 = vmatpush.bf16.msra.mxu0 %v13030_v25  ;;  %v4702_v17 = vrot.slane %v4700_v23, 7  ;;  %v4703_v22 = vshll.u32 %v11163_v43, 16  ;;  %v11041_v47 = vrot.slane %v11035_v60, 10 }
 0x1e0   : >> { %v3039_v59 = vpop.f32.mrf.mxu1  ;;  %v3457_v32 = vpop.f32.mrf.mxu0  ;;  %v4291_v30 = vpack.c.b16 %v4287_v6, %v4286_v24  ;;  %v4451_v56 = vpack.c.b16 %v4445_v15, %v4444_v20  ;;  %v4693_v53 = vrot.slane %v4691_v35, 7  ;;  %v4415_v24 = vrot.slane %v4413_v31, 4 }
 0x1e1   : >> { %v3058_v49 = vadd.f32 %v3039_v59, %v14996_v36  ;;  %v15273_v34 = vadd.f32 %v3457_v32, %v14909_v21  ;;  %v12997_v21 = vld [vmem:[%s17377_s2 + $0x810] sm:$0xff]  ;;  %v11036_v32 = vld [vmem:[%s13629_s22 + $0xac] sm:$0x3]  ;;  %v4705_v6 = vor.u32 %v4703_v22, %v4702_v17  ;;  %v12995_v17 = vld [vmem:[%s17377_s2 + $0x800] sm:$0xff] }
 0x1e2   : >> { %v11161_v36 = vld [vmem:[%s13629_s22 + $0x90] sm:$0x8]  ;;  %4637 = vmatpush.bf16.msra.mxu1 %v12997_v21  ;;  %v4414_v21 = vsel %vm13699_vm8, %v11041_v47, %v4413_v31 }
 0x1e3   : >> { %v3220_v16 = vadd.f32 %v15135_v50, %v3058_v49  ;;  %v4686_v45 = vshrl.u32 %v11161_v36, 16  ;;  %5133 = vmatpush.bf16.msra.mxu0 %v13029_v14  ;;  %v13027_v36 = vld [vmem:[%s17377_s2 + $0x3d0] sm:$0xff]  ;;  %v4446_v14 = vunpack.c.l.b16 %v4414_v21 }
 0x1e5   : >> { %v15288_v50 = vadd.f32 %v15137_v40, %v3220_v16  ;;  %v4694_v40 = vshll.u32 %v11162_v29, 16  ;;  %v4416_v16 = vrot.slane %v11036_v32, 6  ;;  %v12996_v29 = vld [vmem:[%s17377_s2 + $0x808] sm:$0xff] }
 0x1e6   : >> { %4638 = vmatpush.bf16.msra.mxu1 %v12996_v29 }
 0x1e7   : >> { %v15290_v10 = vpop.f32.mrf.mxu2  ;;  %v15292_v12 = vpop.f32.mrf.mxu3  ;;  %v4696_v43 = vor.u32 %v4694_v40, %v4693_v53 }
 0x1e8   : >> { %v3042_v57 = vpop.f32.mrf.mxu1  ;;  %v3460_v59 = vpop.f32.mrf.mxu0 }
 0x1e9   : >> { %v3059_v49 = vadd.f32 %v3042_v57, %v15021_v2  ;;  %v15302_v3 = vadd.f32 %v3460_v59, %v14936_v9  ;;  %v13028_v2 = vld [vmem:[%s17377_s2 + $0x3d8] sm:$0xff]  ;;  %v11173_v9 = vrot.slane %v4686_v45, 11  ;;  %v11165_v45 = vld [vmem:[%s13629_s22 + $0xa4] sm:$0xf]  ;;  %v11166_v57 = vld [vmem:[%s13629_s22 + $0xa8] sm:$0xf] }
 0x1ea   : >> { %4093 = vmatmul.bf16.gmra.mxu1 %v15143_v61  ;;  %4519 = vmatmul.bf16.gmra.mxu0 %v4451_v56  ;;  %v13054_v61 = vld [vmem:[%s17377_s2 + $0x878] sm:$0xff]  ;;  %v4713_v22 = vshrl.u32 %v11165_v45, 16 }
 0x1eb   : >> { %v3221_v54 = vadd.f32 %v15172_v28, %v3059_v49  ;;  %v4698_v28 = vrot.slane %v4693_v53, 4  ;;  %5134 = vmatpush.bf16.msra.mxu0 %v13028_v2  ;;  %5442 = vmatpush.bf16.msra.mxu2 %v13054_v61  ;;  %v11164_v49 = vld [vmem:[%s13629_s22 + $0xa0] sm:$0x8] }
 0x1ec   : >> { %4205 = vmatmul.bf16.gmra.mxu2 %v15285_v39  ;;  %4367 = vmatmul.bf16.gmra.mxu3 %v4291_v30  ;;  %v4417_v30 = vsel %vm13699_vm8, %v4415_v24, %v4416_v16  ;;  %v13025_v2 = vld [vmem:[%s17377_s2 + $0x3c0] sm:$0xff]  ;;  %v4708_v61 = vshrl.u32 %v11164_v49, 16  ;;  %v4715_v21 = vrot.slane %v4713_v22, 7 }
 0x1ed   : >> { %v15317_v20 = vadd.f32 %v15174_v7, %v3221_v54  ;;  %v4697_v7 = vsel %vm13670_vm6, %v11173_v9, %v4696_v43  ;;  %v4706_v56 = vsel %vm13670_vm6, %v4698_v28, %v4705_v6  ;;  %v4447_v32 = vunpack.c.l.b16 %v4417_v30  ;;  %4639 = vmatpush.bf16.msra.mxu1 %v12995_v17  ;;  %v11037_v28 = vld [vmem:[%s13629_s22 + $0xb4] sm:$0xc] }
 0x1ee   : >> { %v4790_v53 = vunpack.c.l.b16 %v4697_v7  ;;  %v4791_v40 = vunpack.c.l.b16 %v4706_v56  ;;  %v4722_v54 = vshrl.u32 %v11166_v57, 16  ;;  %v4420_v6 = vrot.slane %v15164_v19, 6  ;;  %v13062_v19 = vld [vmem:[%s17379_s4 + $0x1f8] sm:$0xff]  ;;  %v13061_v17 = vld [vmem:[%s17379_s4 + $0x1f0] sm:$0xff] }
 0x1ef   : >> { %v15319_v15 = vpop.f32.mrf.mxu2  ;;  %v15321_v25 = vpop.f32.mrf.mxu3  ;;  %5135 = vmatpush.bf16.msra.mxu0 %v13027_v36  ;;  %v4452_v16 = vpack.c.b16 %v4447_v32, %v4446_v14  ;;  %v4716_v36 = vshll.u32 %v11165_v45, 16  ;;  %v4725_v7 = vshll.u32 %v11166_v57, 16  ;;  %5568 = vmatpush.bf16.msra.mxu3 %v13062_v19 }
 0x1f0   : >> { %v3044_v35 = vpop.f32.mrf.mxu1  ;;  %v3462_v23 = vpop.f32.mrf.mxu0  ;;  %v4798_v29 = vpack.c.b16 %v4791_v40, %v4790_v53  ;;  %v4724_v30 = vrot.slane %v4722_v54, 7  ;;  %v13041_v53 = vld [vmem:[%s17377_s2 + $0x638] sm:$0xff]  ;;  %v13052_v40 = vld [vmem:[%s17377_s2 + $0x868] sm:$0xff]  ;;  %v11168_v54 = vld [vmem:[%s13629_s22 + $0xb4] sm:$0xf] }
 0x1f1   : >> { %v3060_v60 = vadd.f32 %v3044_v35, %v15057_v13  ;;  %v15336_v31 = vadd.f32 %v3462_v23, %v14963_v52  ;;  %v13053_v13 = vld [vmem:[%s17377_s2 + $0x870] sm:$0xff]  ;;  %v13026_v52 = vld [vmem:[%s17377_s2 + $0x3c8] sm:$0xff]  ;;  %v11038_v23 = vld [vmem:[%s13629_s22 + $0xbc] sm:$0x3]  ;;  %v4718_v14 = vor.u32 %v4716_v36, %v4715_v21  ;;  %5304 = vmatpush.bf16.msrb.mxu1 %v13041_v53 }
 0x1f2   : >> { %5443 = vmatpush.bf16.msra.mxu2 %v13053_v13  ;;  %v4423_v45 = vrot.slane %v11038_v23, 6  ;;  %v4727_v57 = vor.u32 %v4725_v7, %v4724_v30  ;;  %v11276_v23 = vld [vmem:[%s13629_s22 + $0xa4] sm:$0xf] }
 0x1f3   : >> { %v3222_v59 = vadd.f32 %v15219_v62, %v3060_v60  ;;  %5136 = vmatpush.bf16.msra.mxu0 %v13026_v52  ;;  %v11042_v60 = vrot.slane %v11037_v28, 10  ;;  %5569 = vmatpush.bf16.msra.mxu3 %v13061_v17  ;;  %v5023_v17 = vrot.slane %v11276_v23, 7 }
 0x1f5   : >> { %v15352_v62 = vadd.f32 %v15221_v42, %v3222_v59  ;;  %v4720_v59 = vrot.slane %v4715_v21, 4 }
 0x1f6   : >> { %5444 = vmatpush.bf16.msra.mxu2 %v13052_v40 }
 0x1f7   : >> { %v15354_v47 = vpop.f32.mrf.mxu2  ;;  %v15356_v24 = vpop.f32.mrf.mxu3  ;;  %5137 = vmatpush.bf16.msra.mxu0 %v13025_v2  ;;  %v4728_v2 = vsel %vm13670_vm6, %v4720_v59, %v4727_v57 }
 0x1f8   : >> { %v3047_v9 = vpop.f32.mrf.mxu1  ;;  %v3465_v43 = vpop.f32.mrf.mxu0  ;;  %v4793_v36 = vunpack.c.l.b16 %v4728_v2 }
 0x1f9   : >> { %v3061_v42 = vadd.f32 %v3047_v9, %v15094_v11  ;;  %v15365_v35 = vadd.f32 %v3465_v43, %v14988_v48  ;;  %v4422_v11 = vrot.slane %v4420_v6, 4  ;;  %v11174_v48 = vrot.slane %v4708_v61, 11  ;;  %v11169_v9 = vld [vmem:[%s13629_s22 + $0xb8] sm:$0xf] }
 0x1fa   : >> { %4098 = vmatmul.bf16.gmra.mxu1 %v15231_v38  ;;  %4524 = vmatmul.bf16.gmra.mxu0 %v4452_v16  ;;  %v4735_v61 = vshrl.u32 %v11168_v54, 16  ;;  %v4747_v40 = vshll.u32 %v11169_v9, 16 }
 0x1fb   : >> { %v3223_v56 = vadd.f32 %v15254_v33, %v3061_v42  ;;  %v4424_v22 = vsel %vm13699_vm8, %v4422_v11, %v4423_v45  ;;  %v4719_v49 = vsel %vm13670_vm6, %v11174_v48, %v4718_v14  ;;  %v4744_v42 = vshrl.u32 %v11169_v9, 16  ;;  %v13040_v45 = vld [vmem:[%s17377_s2 + $0x630] sm:$0xff]  ;;  %v13051_v48 = vld [vmem:[%s17377_s2 + $0x860] sm:$0xff] }
 0x1fc   : >> { %4862 = vmatmul.bf16.vlgmr.msrb.gmra.mxu2 %v4798_v29  ;;  %4964 = vmatmul.bf16.vlgmr.msrb.gmra.mxu3 %v4798_v29  ;;  %v4792_v21 = vunpack.c.l.b16 %v4719_v49  ;;  %v4737_v19 = vrot.slane %v4735_v61, 7  ;;  %v4738_v11 = vshll.u32 %v11168_v54, 16 }
 0x1fd   : >> { %v15374_v33 = vadd.f32 %v15256_v37, %v3223_v56  ;;  %v4421_v37 = vsel %vm13699_vm8, %v11042_v60, %v4420_v6  ;;  %v4449_v6 = vunpack.c.l.b16 %v4424_v22  ;;  %v4746_v53 = vrot.slane %v4744_v42, 7  ;;  %v11277_v22 = vld [vmem:[%s13629_s22 + $0xa8] sm:$0x7]  ;;  %5305 = vmatpush.bf16.msrb.mxu1 %v13040_v45  ;;  %5445 = vmatpush.bf16.msra.mxu2 %v13051_v48 }
 0x1fe   : >> { %v4448_v28 = vunpack.c.l.b16 %v4421_v37  ;;  %v4799_v57 = vpack.c.b16 %v4793_v36, %v4792_v21  ;;  %v11275_v37 = vld [vmem:[%s13629_s22 + $0xa0] sm:$0x8]  ;;  %v4742_v2 = vrot.slane %v4737_v19, 4  ;;  %v13050_v21 = vld [vmem:[%s17377_s2 + $0x858] sm:$0xff]  ;;  %v11172_v48 = vld [vmem:[%s13629_s22 + $0xc8] sm:$0xf] }
 0x1ff   : >> { %v15376_v38 = vpop.f32.mrf.mxu2  ;;  %v15378_v32 = vpop.f32.mrf.mxu3  ;;  %v11287_v9 = vrot.slane %v11275_v37, 11  ;;  %v12991_v37 = vld [vmem:[%s13629_s22 + $0x88] sm:$0xff] }
 0x200   : >> { %v3049_v13 = vpop.f32.mrf.mxu1  ;;  %v3467_v52 = vpop.f32.mrf.mxu0 }
 0x201   : >> { %v3062_v16 = vadd.f32 %v3049_v13, %v15131_v41  ;;  %v15398_v29 = vadd.f32 %v3467_v52, %v15009_v27  ;;  %v13060_v41 = vld [vmem:[%s17379_s4 + $0x1e8] sm:$0xff]  ;;  %v11167_v27 = vld [vmem:[%s13629_s22 + $0xb0] sm:$0x8]  ;;  %v5024_v23 = vsel %vm13678_vm7, %v11287_v9, %v5023_v17  ;;  %5446 = vmatpush.bf16.msra.mxu2 %v13050_v21 }
 0x202   : >> { %5570 = vmatpush.bf16.msra.mxu3 %v13060_v41  ;;  %v4730_v60 = vshrl.u32 %v11167_v27, 16  ;;  %v13039_v41 = vld [vmem:[%s17377_s2 + $0x628] sm:$0xff] }
 0x203   : >> { %v3224_v43 = vadd.f32 %v15290_v10, %v3062_v16  ;;  %v4453_v10 = vpack.c.b16 %v4449_v6, %v4448_v28  ;;  %v4740_v16 = vor.u32 %v4738_v11, %v4737_v19  ;;  %v5026_v28 = vrot.slane %v11277_v22, 7  ;;  %v11171_v11 = vld [vmem:[%s13629_s22 + $0xc4] sm:$0xf]  ;;  %5306 = vmatpush.bf16.msrb.mxu1 %v13039_v41 }
 0x204   : >> { %v11175_v54 = vrot.slane %v4730_v60, 11  ;;  %v13055_v41 = vld [vmem:[%s17379_s4 + $0x1c0] sm:$0xff] }
 0x205   : >> { %v15410_v30 = vadd.f32 %v15292_v12, %v3224_v43  ;;  %v13059_v12 = vld [vmem:[%s17379_s4 + $0x1e0] sm:$0xff]  ;;  %v5025_v43 = vrot.slane %v5023_v17, 4  ;;  %v11279_v17 = vld [vmem:[%s13629_s22 + $0xb4] sm:$0xf] }
 0x206   : >> { %5571 = vmatpush.bf16.msra.mxu3 %v13059_v12  ;;  %v4741_v61 = vsel %vm13670_vm6, %v11175_v54, %v4740_v16  ;;  %v13070_v16 = vld [vmem:[%s17377_s2 + $0x1f8] sm:$0xff] }
 0x207   : >> { %v15412_v7 = vpop.f32.mrf.mxu2  ;;  %v15414_v56 = vpop.f32.mrf.mxu3  ;;  %v4794_v45 = vunpack.c.l.b16 %v4741_v61  ;;  %v5030_v61 = vrot.slane %v11279_v17, 7  ;;  %5670 = vmatpush.bf16.msrb.mxu0 %v13070_v16 }
 0x208   : >> { %v3052_v14 = vpop.f32.mrf.mxu1  ;;  %v3470_v59 = vpop.f32.mrf.mxu0 }
 0x209   : >> { %v3063_v13 = vadd.f32 %v3052_v14, %v15169_v44  ;;  %v15427_v52 = vadd.f32 %v3470_v59, %v15046_v58  ;;  %v13058_v44 = vld [vmem:[%s17379_s4 + $0x1d8] sm:$0xff]  ;;  %v4749_v58 = vor.u32 %v4747_v40, %v4746_v53  ;;  %v5066_v59 = vunpack.c.l.b16 %v5024_v23  ;;  %v11170_v40 = vld [vmem:[%s13629_s22 + $0xc0] sm:$0x8] }
 0x20a   : >> { %4103 = vmatmul.bf16.gmra.mxu1 %v15285_v39  ;;  %4529 = vmatmul.bf16.gmra.mxu0 %v4453_v10  ;;  %v5027_v10 = vsel %vm13678_vm7, %v5025_v43, %v5026_v28  ;;  %v4757_v53 = vshrl.u32 %v11171_v11, 16  ;;  %v4752_v9 = vshrl.u32 %v11170_v40, 16  ;;  %v4760_v28 = vshll.u32 %v11171_v11, 16  ;;  %v13037_v40 = vld [vmem:[%s17377_s2 + $0x618] sm:$0xff] }
 0x20b   : >> { %v3225_v49 = vadd.f32 %v15319_v15, %v3063_v13  ;;  %5572 = vmatpush.bf16.msra.mxu3 %v13058_v44  ;;  %v4750_v42 = vsel %vm13670_vm6, %v4742_v2, %v4749_v58  ;;  %v13038_v2 = vld [vmem:[%s17377_s2 + $0x620] sm:$0xff]  ;;  %v5032_v11 = vrot.slane %v5030_v61, 4 }
 0x20c   : >> { %4867 = vmatmul.bf16.gmra.mxu2 %v4799_v57  ;;  %4969 = vmatmul.bf16.gmra.mxu3 %v4799_v57  ;;  %v4795_v14 = vunpack.c.l.b16 %v4750_v42  ;;  %v5067_v57 = vunpack.c.l.b16 %v5027_v10  ;;  %v4759_v43 = vrot.slane %v4757_v53, 7  ;;  %v11280_v42 = vld [vmem:[%s13629_s22 + $0xb8] sm:$0x7]  ;;  %v13048_v10 = vld [vmem:[%s17377_s2 + $0x848] sm:$0xff]  ;;  %v13069_v53 = vld [vmem:[%s17377_s2 + $0x1f0] sm:$0xff] }
 0x20d   : >> { %v15437_v6 = vadd.f32 %v15321_v25, %v3225_v49  ;;  %v13057_v25 = vld [vmem:[%s17379_s4 + $0x1d0] sm:$0xff]  ;;  %5307 = vmatpush.bf16.msrb.mxu1 %v13038_v2  ;;  %5671 = vmatpush.bf16.msrb.mxu0 %v13069_v53 }
 0x20e   : >> { %v5074_v54 = vpack.c.b16 %v5067_v57, %v5066_v59 }
 0x20f   : >> { %v15439_v39 = vpop.f32.mrf.mxu2  ;;  %v15441_v15 = vpop.f32.mrf.mxu3  ;;  %5573 = vmatpush.bf16.msra.mxu3 %v13057_v25 }
 0x210   : >> { %v3054_v36 = vpop.f32.mrf.mxu1  ;;  %v3472_v27 = vpop.f32.mrf.mxu0 }
 0x211   : >> { %v3064_v60 = vadd.f32 %v3054_v36, %v15216_v18  ;;  %v15462_v19 = vadd.f32 %v3472_v27, %v15074_v8  ;;  %v13056_v18 = vld [vmem:[%s17379_s4 + $0x1c8] sm:$0xff]  ;;  %v4766_v8 = vshrl.u32 %v11172_v48, 16  ;;  %v4769_v36 = vshll.u32 %v11172_v48, 16  ;;  %v11278_v27 = vld [vmem:[%s13629_s22 + $0xb0] sm:$0x8]  ;;  %5308 = vmatpush.bf16.msrb.mxu1 %v13037_v40 }
 0x213   : >> { %v3226_v12 = vadd.f32 %v15354_v47, %v3064_v60  ;;  %5574 = vmatpush.bf16.msra.mxu3 %v13056_v18  ;;  %v4800_v47 = vpack.c.b16 %v4795_v14, %v4794_v45  ;;  %v4768_v25 = vrot.slane %v4766_v8, 7  ;;  %v11176_v60 = vrot.slane %v4752_v9, 11  ;;  %v13068_v9 = vld [vmem:[%s17377_s2 + $0x1e8] sm:$0xff] }
 0x214   : >> { %v5033_v45 = vrot.slane %v11280_v42, 7  ;;  %v4764_v14 = vrot.slane %v4759_v43, 4  ;;  %5672 = vmatpush.bf16.msrb.mxu0 %v13068_v9  ;;  %v13067_v42 = vld [vmem:[%s17377_s2 + $0x1e0] sm:$0xff]  ;;  %v13064_v9 = vld [vmem:[%s17377_s2 + $0x1c8] sm:$0xff] }
 0x215   : >> { %v15473_v13 = vadd.f32 %v15356_v24, %v3226_v12  ;;  %v13049_v24 = vld [vmem:[%s17377_s2 + $0x850] sm:$0xff]  ;;  %v4762_v12 = vor.u32 %v4760_v28, %v4759_v43  ;;  %v4771_v59 = vor.u32 %v4769_v36, %v4768_v25 }
 0x216   : >> { %5447 = vmatpush.bf16.msra.mxu2 %v13049_v24 }
 0x217   : >> { %v15476_v22 = vpop.f32.mrf.mxu2  ;;  %v15478_v49 = vpop.f32.mrf.mxu3  ;;  %5575 = vmatpush.bf16.msra.mxu3 %v13055_v41  ;;  %v4763_v16 = vsel %vm13670_vm6, %v11176_v60, %v4762_v12  ;;  %v4772_v2 = vsel %vm13670_vm6, %v4764_v14, %v4771_v59  ;;  %v13066_v12 = vld [vmem:[%s17377_s2 + $0x1d8] sm:$0xff] }
 0x218   : >> { %v3557_v44 = vpop.f32.mrf.mxu1  ;;  %v3863_v58 = vpop.f32.mrf.mxu0  ;;  %v4796_v43 = vunpack.c.l.b16 %v4763_v16  ;;  %5673 = vmatpush.bf16.msrb.mxu0 %v13067_v42 }
 0x219   : >> { %v3577_v21 = vadd.f32 %v3557_v44, %v15252_v63  ;;  %v11288_v63 = vrot.slane %v11278_v27, 11  ;;  %v13036_v27 = vld [vmem:[%s17377_s2 + $0x610] sm:$0xff] }
 0x21a   : >> { %4640 = vmatmul.bf16.vlgmr.msra.gmra.mxu1 %v12991_v37  ;;  %5138 = vmatmul.bf16.vlgmr.msra.gmra.mxu0 %v5074_v54 }
 0x21b   : >> { %v3679_v23 = vadd.f32 %v15376_v38, %v3577_v21  ;;  %5448 = vmatpush.bf16.msra.mxu2 %v13048_v10  ;;  %v5031_v37 = vsel %vm13678_vm7, %v11288_v63, %v5030_v61  ;;  %v11282_v61 = vld [vmem:[%s13629_s22 + $0xc4] sm:$0xf]  ;;  %5309 = vmatpush.bf16.msrb.mxu1 %v13036_v27 }
 0x21c   : >> { %4872 = vmatmul.bf16.gmra.mxu2 %v4800_v47  ;;  %4974 = vmatmul.bf16.gmra.mxu3 %v4800_v47  ;;  %v5034_v47 = vsel %vm13678_vm7, %v5032_v11, %v5033_v45  ;;  %v5068_v44 = vunpack.c.l.b16 %v5031_v37  ;;  %v5037_v60 = vrot.slane %v11282_v61, 7  ;;  %v11281_v11 = vld [vmem:[%s13629_s22 + $0xc0] sm:$0x8]  ;;  %v11283_v45 = vld [vmem:[%s13629_s22 + $0xc8] sm:$0x7] }
 0x21d   : >> { %v3781_v48 = vadd.f32 %v15378_v32, %v3679_v23  ;;  %v13047_v32 = vld [vmem:[%s17377_s2 + $0x840] sm:$0xff]  ;;  %v11289_v14 = vrot.slane %v11281_v11, 11  ;;  %v5040_v53 = vrot.slane %v11283_v45, 7  ;;  %5674 = vmatpush.bf16.msrb.mxu0 %v13066_v12  ;;  %v11284_v11 = vld [vmem:[%s13629_s22 + $0xd0] sm:$0x8] }
 0x21e   : >> { %v5039_v59 = vrot.slane %v5037_v60, 4  ;;  %v13063_v27 = vld [vmem:[%s17377_s2 + $0x1c0] sm:$0xff]  ;;  %v11286_v45 = vld [vmem:[%s13629_s22 + $0xd8] sm:$0x7] }
 0x21f   : >> { %v15500_v57 = vadd.f32 %v3863_v58, %v3781_v48  ;;  %v15502_v38 = vpop.f32.mrf.mxu2  ;;  %v15504_v18 = vpop.f32.mrf.mxu3  ;;  %5449 = vmatpush.bf16.msra.mxu2 %v13047_v32  ;;  %v5069_v58 = vunpack.c.l.b16 %v5034_v47 }
 0x220   : >> { %v3559_v8 = vpop.f32.mrf.mxu1  ;;  %v3865_v17 = vpop.f32.mrf.mxu0  ;;  %v5041_v16 = vsel %vm13678_vm7, %v5039_v59, %v5040_v53  ;;  %v5047_v53 = vrot.slane %v11286_v45, 7  ;;  %v11343_v45 = vld [vmem:[%s13629_s22 + $0xc8] sm:$0x3] }
 0x221   : >> { %v3578_v54 = vadd.f32 %v3559_v8, %v15288_v50  ;;  %v4797_v50 = vunpack.c.l.b16 %v4772_v2  ;;  %v5075_v36 = vpack.c.b16 %v5069_v58, %v5068_v44  ;;  %v5071_v58 = vunpack.c.l.b16 %v5041_v16 }
 0x223   : >> { %v3680_v24 = vadd.f32 %v15412_v7, %v3578_v54  ;;  %v12992_v7 = vld [vmem:[%s13629_s22 + $0x98] sm:$0xff]  ;;  %v4801_v10 = vpack.c.b16 %v4797_v50, %v4796_v43  ;;  %v5038_v54 = vsel %vm13678_vm7, %v11289_v14, %v5037_v60  ;;  %v11285_v50 = vld [vmem:[%s13629_s22 + $0xd4] sm:$0xf]  ;;  %v11290_v14 = vrot.slane %v11284_v11, 11 }
 0x224   : >> { %v5070_v44 = vunpack.c.l.b16 %v5038_v54  ;;  %v5044_v60 = vrot.slane %v11285_v50, 7  ;;  %v11342_v50 = vld [vmem:[%s13629_s22 + $0xc4] sm:$0xf] }
 0x225   : >> { %v3782_v28 = vadd.f32 %v15414_v56, %v3680_v24 }
 0x226   : >> { %v5046_v59 = vrot.slane %v5044_v60, 4  ;;  %v5045_v16 = vsel %vm13678_vm7, %v11290_v14, %v5044_v60  ;;  %v13044_v60 = vld [vmem:[%s13629_s22 + $0x110] sm:$0xff] }
 0x227   : >> { %v15530_v41 = vadd.f32 %v3865_v17, %v3782_v28  ;;  %v15532_v21 = vpop.f32.mrf.mxu2  ;;  %v15534_v25 = vpop.f32.mrf.mxu3  ;;  %v13094_v17 = vld [vmem:[%s17377_s2 + $0x678] sm:$0xff]  ;;  %v12993_v28 = vld [vmem:[%s13629_s22 + $0xa8] sm:$0xff] }
 0x228   : >> { %v3562_v56 = vpop.f32.mrf.mxu1  ;;  %v3868_v23 = vpop.f32.mrf.mxu0  ;;  %5922 = vmatpush.bf16.msrb.mxu2 %v13094_v17 }
 0x229   : >> { %v3579_v63 = vadd.f32 %v3562_v56, %v15317_v20 }
 0x22a   : >> { %4645 = vmatmul.bf16.gmra.mxu1 %v12992_v7  ;;  %5143 = vmatmul.bf16.gmra.mxu0 %v5075_v36  ;;  %v5076_v7 = vpack.c.b16 %v5071_v58, %v5070_v44  ;;  %v13034_v36 = vld [vmem:[%s17377_s2 + $0x600] sm:$0xff]  ;;  %v13105_v44 = vld [vmem:[%s17377_s2 + $0x8b0] sm:$0xff] }
 0x22b   : >> { %v3681_v48 = vadd.f32 %v15439_v39, %v3579_v63  ;;  %v13035_v39 = vld [vmem:[%s17377_s2 + $0x608] sm:$0xff] }
 0x22c   : >> { %4877 = vmatmul.bf16.gmra.mxu2 %v4801_v10  ;;  %4979 = vmatmul.bf16.gmra.mxu3 %v4801_v10  ;;  %v13043_v10 = vld [vmem:[%s13629_s22 + $0x100] sm:$0xff] }
 0x22d   : >> { %v3783_v40 = vadd.f32 %v15441_v15, %v3681_v48  ;;  %v13065_v15 = vld [vmem:[%s17377_s2 + $0x1d0] sm:$0xff]  ;;  %5310 = vmatpush.bf16.msrb.mxu1 %v13035_v39  ;;  %v13106_v48 = vld [vmem:[%s17377_s2 + $0x8b8] sm:$0xff] }
 0x22e   : >> { %5675 = vmatpush.bf16.msrb.mxu0 %v13065_v15  ;;  %6056 = vmatpush.bf16.msrb.mxu3 %v13106_v48 }
 0x22f   : >> { %v15551_v20 = vadd.f32 %v3868_v23, %v3783_v40  ;;  %v15553_v32 = vpop.f32.mrf.mxu2  ;;  %v15555_v8 = vpop.f32.mrf.mxu3  ;;  %v15594_v23 = vld [vmem:[%s13629_s22 + $0x94] sm:$0xff]  ;;  %v13092_v40 = vld [vmem:[%s17377_s2 + $0x668] sm:$0xff] }
 0x230   : >> { %v3564_v37 = vpop.f32.mrf.mxu1  ;;  %v3870_v47 = vpop.f32.mrf.mxu0 }
 0x231   : >> { %v3580_v2 = vadd.f32 %v3564_v37, %v15352_v62  ;;  %5311 = vmatpush.bf16.msrb.mxu1 %v13034_v36  ;;  %v12994_v36 = vld [vmem:[%s13629_s22 + $0xb8] sm:$0xff] }
 0x232   : >> { %5676 = vmatpush.bf16.msrb.mxu0 %v13064_v9  ;;  %v5072_v9 = vunpack.c.l.b16 %v5045_v16  ;;  %6057 = vmatpush.bf16.msrb.mxu3 %v13105_v44 }
 0x233   : >> { %v3682_v24 = vadd.f32 %v15476_v22, %v3580_v2  ;;  %v5048_v2 = vsel %vm13678_vm7, %v5046_v59, %v5047_v53  ;;  %v5200_v53 = vrot.slane %v11343_v45, 6  ;;  %v13113_v45 = vld [vmem:[%s17379_s4 + $0x230] sm:$0xff] }
 0x235   : >> { %v3784_v43 = vadd.f32 %v15478_v49, %v3682_v24  ;;  %v13093_v49 = vld [vmem:[%s17377_s2 + $0x670] sm:$0xff] }
 0x236   : >> { %5923 = vmatpush.bf16.msrb.mxu2 %v13093_v49  ;;  %5677 = vmatpush.bf16.msrb.mxu0 %v13063_v27 }
 0x237   : >> { %v15578_v62 = vadd.f32 %v3870_v47, %v3784_v43  ;;  %v15580_v61 = vpop.f32.mrf.mxu2  ;;  %v15582_v22 = vpop.f32.mrf.mxu3  ;;  %v5073_v43 = vunpack.c.l.b16 %v5048_v2 }
 0x238   : >> { %v3567_v42 = vpop.f32.mrf.mxu1  ;;  %v3873_v56 = vpop.f32.mrf.mxu0 }
 0x239   : >> { %v3581_v63 = vadd.f32 %v3567_v42, %v15374_v33  ;;  %v13082_v33 = vld [vmem:[%s17377_s2 + $0x438] sm:$0xff]  ;;  %v5077_v49 = vpack.c.b16 %v5073_v43, %v5072_v9  ;;  %v13079_v9 = vld [vmem:[%s17377_s2 + $0x420] sm:$0xff] }
 0x23a   : >> { %4650 = vmatmul.bf16.gmra.mxu1 %v12993_v28  ;;  %5148 = vmatmul.bf16.gmra.mxu0 %v5076_v7 }
 0x23b   : >> { %v3683_v12 = vadd.f32 %v15502_v38, %v3581_v63  ;;  %5796 = vmatpush.bf16.msra.mxu1 %v13082_v33  ;;  %5924 = vmatpush.bf16.msrb.mxu2 %v13092_v40  ;;  %v5197_v63 = vrot.slane %v11342_v50, 6  ;;  %v13090_v33 = vld [vmem:[%s17377_s2 + $0x658] sm:$0xff] }
 0x23c   : >> { %5576 = vmatmul.bf16.vlgmr.msra.gmra.mxu3 %v15594_v23  ;;  %5450 = vmatmul.bf16.vlgmr.msra.gmra.mxu2 %v13043_v10  ;;  %v15639_v10 = vld [vmem:[%s13629_s22 + $0xa4] sm:$0xff] }
 0x23d   : >> { %v3785_v39 = vadd.f32 %v15504_v18, %v3683_v12  ;;  %v13104_v12 = vld [vmem:[%s17377_s2 + $0x8a8] sm:$0xff]  ;;  %v5199_v59 = vrot.slane %v5197_v63, 4 }
 0x23e   : >> { %6058 = vmatpush.bf16.msrb.mxu3 %v13104_v12 }
 0x23f   : >> { %v15612_v38 = vadd.f32 %v3873_v56, %v3785_v39  ;;  %v4191_v17 = vpop.f32.mrf.mxu2  ;;  %v4353_v15 = vpop.f32.mrf.mxu3  ;;  %5925 = vmatpush.bf16.msrb.mxu2 %v13091_v55  ;;  %v5201_v16 = vsel %vm13699_vm8, %v5199_v59, %v5200_v53  ;;  %v11345_v55 = vld [vmem:[%s13629_s22 + $0xd4] sm:$0xf]  ;;  %v13087_v53 = vld [vmem:[%s17377_s2 + $0x640] sm:$0xff] }
 0x240   : >> { %v4211_v37 = vadd.f32 %v4191_v17, %v15500_v57  ;;  %v3569_v47 = vpop.f32.mrf.mxu1  ;;  %v3875_v54 = vpop.f32.mrf.mxu0  ;;  %v13081_v57 = vld [vmem:[%s17377_s2 + $0x430] sm:$0xff] }
 0x241   : >> { %v3582_v18 = vadd.f32 %v3569_v47, %v15410_v30  ;;  %5797 = vmatpush.bf16.msra.mxu1 %v13081_v57 }
 0x242   : >> { %v15620_v24 = vadd.f32 %v4353_v15, %v4211_v37 }
 0x243   : >> { %v3684_v58 = vadd.f32 %v15532_v21, %v3582_v18  ;;  %5926 = vmatpush.bf16.msrb.mxu2 %v13090_v33  ;;  %v13103_v18 = vld [vmem:[%s17377_s2 + $0x8a0] sm:$0xff] }
 0x244   : >> { %6059 = vmatpush.bf16.msrb.mxu3 %v13103_v18 }
 0x245   : >> { %v3786_v30 = vadd.f32 %v15534_v25, %v3684_v58  ;;  %v11341_v25 = vld [vmem:[%s13629_s22 + $0xc0] sm:$0xc]  ;;  %v5241_v58 = vunpack.c.l.b16 %v5201_v16 }
 0x247   : >> { %v15634_v28 = vadd.f32 %v3875_v54, %v3786_v30  ;;  %v4193_v7 = vpop.f32.mrf.mxu2  ;;  %v4355_v21 = vpop.f32.mrf.mxu3 }
 0x248   : >> { %v4212_v27 = vadd.f32 %v4193_v7, %v15530_v41  ;;  %v3572_v42 = vpop.f32.mrf.mxu1  ;;  %v3878_v56 = vpop.f32.mrf.mxu0  ;;  %v11353_v41 = vrot.slane %v11341_v25, 10 }
 0x249   : >> { %v3583_v11 = vadd.f32 %v3572_v42, %v15437_v6  ;;  %v13080_v6 = vld [vmem:[%s17377_s2 + $0x428] sm:$0xff]  ;;  %v13045_v42 = vld [vmem:[%s13629_s22 + $0x120] sm:$0xff] }
 0x24a   : >> { %v15645_v48 = vadd.f32 %v4355_v21, %v4212_v27  ;;  %4655 = vmatmul.bf16.gmra.mxu1 %v12994_v36  ;;  %5153 = vmatmul.bf16.gmra.mxu0 %v5077_v49  ;;  %v5198_v54 = vsel %vm13699_vm8, %v11353_v41, %v5197_v63  ;;  %v15688_v27 = vld [vmem:[%s13629_s22 + $0xb4] sm:$0xff]  ;;  %v11344_v63 = vld [vmem:[%s13629_s22 + $0xd0] sm:$0xc] }
 0x24b   : >> { %v3685_v14 = vadd.f32 %v15553_v32, %v3583_v11  ;;  %5798 = vmatpush.bf16.msra.mxu1 %v13080_v6  ;;  %v5240_v57 = vunpack.c.l.b16 %v5198_v54  ;;  %v11346_v11 = vld [vmem:[%s13629_s22 + $0xd8] sm:$0x3]  ;;  %v11354_v12 = vrot.slane %v11344_v63, 10  ;;  %v13077_v54 = vld [vmem:[%s17377_s2 + $0x410] sm:$0xff] }
 0x24c   : >> { %5581 = vmatmul.bf16.gmra.mxu3 %v15639_v10  ;;  %5455 = vmatmul.bf16.gmra.mxu2 %v13044_v60  ;;  %v5207_v41 = vrot.slane %v11346_v11, 6 }
 0x24d   : >> { %v3787_v40 = vadd.f32 %v15555_v8, %v3685_v14  ;;  %v5248_v7 = vpack.c.b16 %v5241_v58, %v5240_v57  ;;  %v13111_v57 = vld [vmem:[%s17379_s4 + $0x220] sm:$0xff] }
 0x24f   : >> { %v15659_v32 = vadd.f32 %v3878_v56, %v3787_v40  ;;  %v4196_v39 = vpop.f32.mrf.mxu2  ;;  %v4358_v17 = vpop.f32.mrf.mxu3  ;;  %5799 = vmatpush.bf16.msra.mxu1 %v13079_v9  ;;  %v5204_v56 = vrot.slane %v11345_v55, 6  ;;  %v13046_v55 = vld [vmem:[%s13629_s22 + $0x130] sm:$0xff] }
 0x250   : >> { %v4213_v15 = vadd.f32 %v4196_v39, %v15551_v20  ;;  %v3574_v37 = vpop.f32.mrf.mxu1  ;;  %v3880_v47 = vpop.f32.mrf.mxu0  ;;  %v13114_v20 = vld [vmem:[%s17379_s4 + $0x238] sm:$0xff] }
 0x251   : >> { %v3584_v8 = vadd.f32 %v3574_v37, %v15473_v13  ;;  %v13089_v13 = vld [vmem:[%s17377_s2 + $0x650] sm:$0xff]  ;;  %6282 = vmatpush.bf16.msra.mxu0 %v13114_v20  ;;  %v5206_v14 = vrot.slane %v5204_v56, 4  ;;  %v5205_v39 = vsel %vm13699_vm8, %v11354_v12, %v5204_v56 }
 0x252   : >> { %v15667_v2 = vadd.f32 %v4358_v17, %v4213_v15  ;;  %5927 = vmatpush.bf16.msrb.mxu2 %v13089_v13 }
 0x253   : >> { %v3686_v44 = vadd.f32 %v15580_v61, %v3584_v8  ;;  %v5208_v17 = vsel %vm13699_vm8, %v5206_v14, %v5207_v41  ;;  %v11348_v8 = vld [vmem:[%s13629_s22 + $0xe4] sm:$0xf] }
 0x255   : >> { %v3788_v43 = vadd.f32 %v15582_v22, %v3686_v44  ;;  %6283 = vmatpush.bf16.msra.mxu0 %v13113_v45 }
 0x257   : >> { %v15684_v61 = vadd.f32 %v3880_v47, %v3788_v43  ;;  %v4198_v30 = vpop.f32.mrf.mxu2  ;;  %v4360_v50 = vpop.f32.mrf.mxu3  ;;  %v13101_v47 = vld [vmem:[%s17377_s2 + $0x890] sm:$0xff]  ;;  %v15746_v43 = vld [vmem:[%s13629_s22 + $0xc4] sm:$0xff] }
 0x258   : >> { %v4214_v21 = vadd.f32 %v4198_v30, %v15578_v62  ;;  %v4089_v36 = vpop.f32.mrf.mxu1  ;;  %v4515_v49 = vpop.f32.mrf.mxu0  ;;  %v13102_v62 = vld [vmem:[%s17377_s2 + $0x898] sm:$0xff]  ;;  %v5211_v30 = vrot.slane %v11348_v8, 6 }
 0x259   : >> { %v15692_v22 = vadd.f32 %v4089_v36, %v15237_v26  ;;  %v15695_v60 = vadd.f32 %v4515_v49, %v15620_v24  ;;  %v13078_v26 = vld [vmem:[%s17377_s2 + $0x418] sm:$0xff]  ;;  %v13088_v24 = vld [vmem:[%s17377_s2 + $0x648] sm:$0xff]  ;;  %6060 = vmatpush.bf16.msrb.mxu3 %v13102_v62 }
 0x25a   : >> { %v15699_v25 = vadd.f32 %v4360_v50, %v4214_v21  ;;  %5312 = vmatmul.bf16.vlgmr.msrb.gmra.mxu1 %v5248_v7  ;;  %5678 = vmatmul.bf16.vlgmr.msrb.gmra.mxu0 %v15594_v23  ;;  %v11347_v21 = vld [vmem:[%s13629_s22 + $0xe0] sm:$0xc]  ;;  %v11349_v36 = vld [vmem:[%s13629_s22 + $0xe8] sm:$0x3]  ;;  %v5213_v63 = vrot.slane %v5211_v30, 4 }
 0x25b   : >> { %5800 = vmatpush.bf16.msra.mxu1 %v13078_v26  ;;  %5928 = vmatpush.bf16.msrb.mxu2 %v13088_v24  ;;  %v13100_v49 = vld [vmem:[%s17377_s2 + $0x888] sm:$0xff]  ;;  %v11355_v56 = vrot.slane %v11347_v21, 10  ;;  %v5214_v11 = vrot.slane %v11349_v36, 6  ;;  %v13109_v26 = vld [vmem:[%s17379_s4 + $0x210] sm:$0xff] }
 0x25c   : >> { %5586 = vmatmul.bf16.gmra.mxu3 %v15688_v27  ;;  %5460 = vmatmul.bf16.gmra.mxu2 %v13045_v42  ;;  %v13110_v42 = vld [vmem:[%s17379_s4 + $0x218] sm:$0xff]  ;;  %v11799_v36 = vld [vmem:[%s13629_s22 + $0x94] sm:$0xf] }
 0x25d   : >> { %6061 = vmatpush.bf16.msrb.mxu3 %v13101_v47  ;;  %v5212_v41 = vsel %vm13699_vm8, %v11355_v56, %v5211_v30  ;;  %v6106_v56 = vshrl.u32 %v11799_v36, 16 }
 0x25f   : >> { %v4201_v59 = vpop.f32.mrf.mxu2  ;;  %v4363_v23 = vpop.f32.mrf.mxu3  ;;  %5929 = vmatpush.bf16.msrb.mxu2 %v13087_v53  ;;  %5801 = vmatpush.bf16.msra.mxu1 %v13077_v54  ;;  %v13107_v54 = vld [vmem:[%s17379_s4 + $0x200] sm:$0xff] }
 0x260   : >> { %v4215_v6 = vadd.f32 %v4201_v59, %v15612_v38  ;;  %v4091_v33 = vpop.f32.mrf.mxu1  ;;  %v4517_v40 = vpop.f32.mrf.mxu0  ;;  %v13112_v38 = vld [vmem:[%s17379_s4 + $0x228] sm:$0xff]  ;;  %v5215_v59 = vsel %vm13699_vm8, %v5213_v63, %v5214_v11  ;;  %v6109_v63 = vshll.u32 %v11799_v36, 16 }
 0x261   : >> { %v15724_v15 = vadd.f32 %v4091_v33, %v15273_v34  ;;  %v15727_v37 = vadd.f32 %v4517_v40, %v15645_v48  ;;  %v5242_v34 = vunpack.c.l.b16 %v5205_v39  ;;  %v5243_v48 = vunpack.c.l.b16 %v5208_v17  ;;  %6284 = vmatpush.bf16.msra.mxu0 %v13112_v38  ;;  %6062 = vmatpush.bf16.msrb.mxu3 %v13100_v49  ;;  %v11351_v39 = vld [vmem:[%s13629_s22 + $0xf4] sm:$0xf]  ;;  %v11800_v49 = vld [vmem:[%s13629_s22 + $0x98] sm:$0xf]  ;;  %v11803_v36 = vld [vmem:[%s13629_s22 + $0xa8] sm:$0xf] }
 0x262   : >> { %v15738_v16 = vadd.f32 %v4363_v23, %v4215_v6  ;;  %v13129_v6 = vld [vmem:[%s17377_s2 + $0x470] sm:$0xff]  ;;  %v5245_v40 = vunpack.c.l.b16 %v5215_v59 }
 0x263   : >> { %v5249_v44 = vpack.c.b16 %v5243_v48, %v5242_v34 }
 0x265   : >> { %6285 = vmatpush.bf16.msra.mxu0 %v13111_v57  ;;  %v13095_v57 = vld [vmem:[%s13629_s22 + $0x104] sm:$0xff] }
 0x267   : >> { %v4203_v18 = vpop.f32.mrf.mxu2  ;;  %v4365_v20 = vpop.f32.mrf.mxu3 }
 0x268   : >> { %v4216_v58 = vadd.f32 %v4203_v18, %v15634_v28  ;;  %v4094_v9 = vpop.f32.mrf.mxu1  ;;  %v4520_v13 = vpop.f32.mrf.mxu0  ;;  %v13083_v18 = vld [vmem:[%s13629_s22 + $0xc4] sm:$0xff] }
 0x269   : >> { %v15750_v50 = vadd.f32 %v4094_v9, %v15302_v3  ;;  %v15753_v7 = vadd.f32 %v4520_v13, %v15667_v2  ;;  %v13076_v3 = vld [vmem:[%s17377_s2 + $0x408] sm:$0xff]  ;;  %v13130_v2 = vld [vmem:[%s17377_s2 + $0x478] sm:$0xff]  ;;  %6286 = vmatpush.bf16.msra.mxu0 %v13110_v42 }
 0x26a   : >> { %v15760_v28 = vadd.f32 %v4365_v20, %v4216_v58  ;;  %5317 = vmatmul.bf16.gmra.mxu1 %v5249_v44  ;;  %5683 = vmatmul.bf16.gmra.mxu0 %v15639_v10  ;;  %v13099_v10 = vld [vmem:[%s17377_s2 + $0x880] sm:$0xff]  ;;  %v11350_v20 = vld [vmem:[%s13629_s22 + $0xf0] sm:$0xc]  ;;  %v5218_v44 = vrot.slane %v11351_v39, 6  ;;  %v11352_v13 = vld [vmem:[%s13629_s22 + $0xf8] sm:$0x3] }
 0x26b   : >> { %5802 = vmatpush.bf16.msra.mxu1 %v13076_v3  ;;  %6554 = vmatpush.bf16.msra.mxu2 %v13130_v2  ;;  %v5221_v21 = vrot.slane %v11352_v13, 6  ;;  %v13128_v3 = vld [vmem:[%s17377_s2 + $0x468] sm:$0xff] }
 0x26c   : >> { %5591 = vmatmul.bf16.gmra.mxu3 %v15746_v43  ;;  %5465 = vmatmul.bf16.gmra.mxu2 %v13046_v55  ;;  %v5220_v30 = vrot.slane %v5218_v44, 4 }
 0x26d   : >> { %6063 = vmatpush.bf16.msrb.mxu3 %v13099_v10  ;;  %6287 = vmatpush.bf16.msra.mxu0 %v13109_v26  ;;  %v6115_v26 = vshll.u32 %v11800_v49, 16 }
 0x26f   : >> { %v4206_v62 = vpop.f32.mrf.mxu2  ;;  %v4368_v45 = vpop.f32.mrf.mxu3  ;;  %6555 = vmatpush.bf16.msra.mxu2 %v13129_v6  ;;  %v6111_v6 = vrot.slane %v6109_v63, 5 }
 0x270   : >> { %v4217_v24 = vadd.f32 %v4206_v62, %v15659_v32  ;;  %v4096_v12 = vpop.f32.mrf.mxu1  ;;  %v4522_v14 = vpop.f32.mrf.mxu0  ;;  %v13075_v32 = vld [vmem:[%s17377_s2 + $0x400] sm:$0xff] }
 0x271   : >> { %v15785_v23 = vadd.f32 %v4096_v12, %v15336_v31  ;;  %v15788_v53 = vadd.f32 %v4522_v14, %v15699_v25  ;;  %v13108_v31 = vld [vmem:[%s17379_s4 + $0x208] sm:$0xff]  ;;  %v5244_v25 = vunpack.c.l.b16 %v5212_v41  ;;  %5803 = vmatpush.bf16.msra.mxu1 %v13075_v32  ;;  %v6108_v32 = vrot.slane %v6106_v56, 4 }
 0x272   : >> { %v15796_v33 = vadd.f32 %v4368_v45, %v4217_v24  ;;  %6288 = vmatpush.bf16.msra.mxu0 %v13108_v31  ;;  %v5222_v45 = vsel %vm13699_vm8, %v5220_v30, %v5221_v21  ;;  %v6119_v24 = vshrl.u32 %v11800_v49, 16  ;;  %v6117_v31 = vrot.slane %v6115_v26, 5  ;;  %v11802_v21 = vld [vmem:[%s13629_s22 + $0xa4] sm:$0xf]  ;;  %v13136_v49 = vld [vmem:[%s17377_s2 + $0x6a8] sm:$0xff] }
 0x273   : >> { %v5250_v38 = vpack.c.b16 %v5245_v40, %v5244_v25  ;;  %6556 = vmatpush.bf16.msra.mxu2 %v13128_v3  ;;  %v5247_v59 = vunpack.c.l.b16 %v5222_v45  ;;  %v13137_v40 = vld [vmem:[%s17377_s2 + $0x6b0] sm:$0xff]  ;;  %v6130_v3 = vshrl.u32 %v11802_v21, 16  ;;  %v6143_v45 = vshrl.u32 %v11803_v36, 16 }
 0x274   : >> { %v6121_v25 = vrot.slane %v6119_v24, 4 }
 0x276   : >> { %6289 = vmatpush.bf16.msra.mxu0 %v13107_v54 }
 0x277   : >> { %v4208_v17 = vpop.f32.mrf.mxu2  ;;  %v4370_v47 = vpop.f32.mrf.mxu3 }
 0x278   : >> { %v4218_v34 = vadd.f32 %v4208_v17, %v15684_v61  ;;  %v4099_v48 = vpop.f32.mrf.mxu1  ;;  %v4525_v8 = vpop.f32.mrf.mxu0  ;;  %v11356_v61 = vrot.slane %v11350_v20, 10 }
 0x279   : >> { %v15810_v58 = vadd.f32 %v4099_v48, %v15365_v35  ;;  %v15813_v9 = vadd.f32 %v4525_v8, %v15738_v16  ;;  %v13138_v35 = vld [vmem:[%s17377_s2 + $0x6b8] sm:$0xff] }
 0x27a   : >> { %v15816_v55 = vadd.f32 %v4370_v47, %v4218_v34  ;;  %5322 = vmatmul.bf16.gmra.mxu1 %v5250_v38  ;;  %5688 = vmatmul.bf16.gmra.mxu0 %v15688_v27  ;;  %v13122_v16 = vld [vmem:[%s17377_s2 + $0x238] sm:$0xff]  ;;  %v5219_v42 = vsel %vm13699_vm8, %v11356_v61, %v5218_v44  ;;  %v6112_v38 = vor.u32 %v6111_v6, %v6108_v32  ;;  %v6132_v32 = vrot.slane %v6130_v3, 4  ;;  %v11804_v6 = vld [vmem:[%s13629_s22 + $0xac] sm:$0x1] }
 0x27b   : >> { %6724 = vmatpush.bf16.msra.mxu3 %v13138_v35  ;;  %6384 = vmatpush.bf16.msrb.mxu1 %v13122_v16  ;;  %v5246_v41 = vunpack.c.l.b16 %v5219_v42  ;;  %v13084_v8 = vld [vmem:[%s13629_s22 + $0xd4] sm:$0xff] }
 0x27c   : >> { %5930 = vmatmul.bf16.vlgmr.msrb.gmra.mxu2 %v13083_v18  ;;  %6064 = vmatmul.bf16.vlgmr.msrb.gmra.mxu3 %v13095_v57  ;;  %v6122_v18 = vor.u32 %v6121_v25, %v6117_v31  ;;  %v13096_v44 = vld [vmem:[%s13629_s22 + $0x114] sm:$0xff]  ;;  %v13135_v25 = vld [vmem:[%s17377_s2 + $0x6a0] sm:$0xff] }
 0x27d   : >> { %v5251_v47 = vpack.c.b16 %v5247_v59, %v5246_v41 }
 0x27e   : >> { %v6123_v61 = vrot.slane %v6122_v18, 4  ;;  %v13085_v18 = vld [vmem:[%s13629_s22 + $0xe4] sm:$0xff] }
 0x27f   : >> { %v4863_v27 = vpop.f32.mrf.mxu2  ;;  %v15830_v2 = vpop.f32.mrf.mxu3  ;;  %6725 = vmatpush.bf16.msra.mxu3 %v13137_v40  ;;  %v13125_v40 = vld [vmem:[%s17377_s2 + $0x450] sm:$0xff] }
 0x280   : >> { %v15835_v11 = vadd.f32 %v4863_v27, %v15692_v22  ;;  %v4101_v10 = vpop.f32.mrf.mxu1  ;;  %v4527_v62 = vpop.f32.mrf.mxu0  ;;  %v11801_v22 = vld [vmem:[%s13629_s22 + $0x9c] sm:$0x1]  ;;  %v6133_v27 = vshll.u32 %v11802_v21, 16 }
 0x281   : >> { %v15840_v12 = vadd.f32 %v4101_v10, %v15398_v29  ;;  %v15843_v14 = vadd.f32 %v4527_v62, %v15760_v28  ;;  %v13121_v29 = vld [vmem:[%s17377_s2 + $0x230] sm:$0xff]  ;;  %v13127_v28 = vld [vmem:[%s17377_s2 + $0x460] sm:$0xff]  ;;  %v6125_v20 = vshll.u32 %v11801_v22, 16  ;;  %v6139_v62 = vshll.u32 %v11803_v36, 16 }
 0x282   : >> { %6385 = vmatpush.bf16.msrb.mxu1 %v13121_v29  ;;  %6557 = vmatpush.bf16.msra.mxu2 %v13127_v28  ;;  %v11805_v36 = vld [vmem:[%s13629_s22 + $0xb4] sm:$0xf] }
 0x283   : >> { %v6127_v30 = vrot.slane %v6125_v20, 5  ;;  %6726 = vmatpush.bf16.msra.mxu3 %v13136_v49  ;;  %v6141_v22 = vrot.slane %v6139_v62, 5  ;;  %v6154_v3 = vshrl.u32 %v11805_v36, 16 }
 0x285   : >> { %v6128_v10 = vsel %vm14077_vm11, %v6123_v61, %v6127_v30 }
 0x286   : >> { %v6219_v59 = vunpack.c.l.b16 %v6128_v10 }
 0x287   : >> { %v4865_v39 = vpop.f32.mrf.mxu2  ;;  %v15855_v17 = vpop.f32.mrf.mxu3  ;;  %6727 = vmatpush.bf16.msra.mxu3 %v13135_v25  ;;  %v6156_v25 = vrot.slane %v6154_v3, 4 }
 0x288   : >> { %v15858_v54 = vadd.f32 %v4865_v39, %v15724_v15  ;;  %v4104_v34 = vpop.f32.mrf.mxu1  ;;  %v4530_v48 = vpop.f32.mrf.mxu0  ;;  %v6113_v15 = vrot.slane %v6112_v38, 4  ;;  %v13071_v39 = vld [vmem:[%s13629_s22 + $0xa4] sm:$0xff] }
 0x289   : >> { %v15863_v57 = vadd.f32 %v4104_v34, %v15427_v52  ;;  %v15866_v13 = vadd.f32 %v4530_v48, %v15796_v33  ;;  %v13120_v52 = vld [vmem:[%s17377_s2 + $0x228] sm:$0xff]  ;;  %v13126_v33 = vld [vmem:[%s17377_s2 + $0x458] sm:$0xff] }
 0x28a   : >> { %5327 = vmatmul.bf16.gmra.mxu1 %v5251_v47  ;;  %5693 = vmatmul.bf16.gmra.mxu0 %v15746_v43  ;;  %v6118_v16 = vsel %vm14077_vm11, %v6113_v15, %v6117_v31  ;;  %v6145_v31 = vrot.slane %v6143_v45, 4  ;;  %v13097_v15 = vld [vmem:[%s13629_s22 + $0x124] sm:$0xff] }
 0x28b   : >> { %6386 = vmatpush.bf16.msrb.mxu1 %v13120_v52  ;;  %6558 = vmatpush.bf16.msra.mxu2 %v13126_v33  ;;  %v6218_v41 = vunpack.c.l.b16 %v6118_v16  ;;  %v11806_v33 = vld [vmem:[%s13629_s22 + $0xb8] sm:$0xf] }
 0x28c   : >> { %5935 = vmatmul.bf16.gmra.mxu2 %v13084_v8  ;;  %6069 = vmatmul.bf16.gmra.mxu3 %v13096_v44  ;;  %v6146_v20 = vor.u32 %v6145_v31, %v6141_v22  ;;  %v6149_v44 = vshll.u32 %v11804_v6, 16  ;;  %v13118_v16 = vld [vmem:[%s17377_s2 + $0x218] sm:$0xff]  ;;  %v6163_v62 = vshll.u32 %v11806_v33, 16  ;;  %v6167_v45 = vshrl.u32 %v11806_v33, 16 }
 0x28d   : >> { %v15911_v47 = vpack.c.b16 %v6219_v59, %v6218_v41  ;;  %v13123_v41 = vld [vmem:[%s17377_s2 + $0x440] sm:$0xff]  ;;  %v13098_v33 = vld [vmem:[%s13629_s22 + $0x134] sm:$0xff] }
 0x28e   : >> { %v6147_v49 = vrot.slane %v6146_v20, 4  ;;  %v6151_v52 = vrot.slane %v6149_v44, 5 }
 0x28f   : >> { %v4868_v43 = vpop.f32.mrf.mxu2  ;;  %v15880_v35 = vpop.f32.mrf.mxu3  ;;  %6559 = vmatpush.bf16.msra.mxu2 %v13125_v40 }
 0x290   : >> { %v15885_v42 = vadd.f32 %v4868_v43, %v15750_v50  ;;  %v4106_v56 = vpop.f32.mrf.mxu1  ;;  %v4532_v63 = vpop.f32.mrf.mxu0  ;;  %v6135_v50 = vrot.slane %v6133_v27, 5  ;;  %v6157_v27 = vshll.u32 %v11805_v36, 16  ;;  %v6152_v6 = vsel %vm14077_vm11, %v6147_v49, %v6151_v52 }
 0x291   : >> { %v15890_v26 = vadd.f32 %v4106_v56, %v15462_v19  ;;  %v15893_v24 = vadd.f32 %v4532_v63, %v15816_v55  ;;  %v13150_v19 = vld [vmem:[%s17377_s2 + $0x8f8] sm:$0xff]  ;;  %v13119_v55 = vld [vmem:[%s17377_s2 + $0x220] sm:$0xff] }
 0x292   : >> { %v6136_v38 = vor.u32 %v6135_v50, %v6132_v32  ;;  %6858 = vmatpush.bf16.msrb.mxu0 %v13150_v19  ;;  %6387 = vmatpush.bf16.msrb.mxu1 %v13119_v55  ;;  %v6159_v55 = vrot.slane %v6157_v27, 5  ;;  %v11909_v27 = vld [vmem:[%s13629_s22 + $0xac] sm:$0x1] }
 0x294   : >> { %v6137_v21 = vrot.slane %v6136_v38, 4  ;;  %v11807_v38 = vld [vmem:[%s13629_s22 + $0xbc] sm:$0x1] }
 0x295   : >> { %v6173_v36 = vshll.u32 %v11807_v38, 16 }
 0x296   : >> { %v6142_v10 = vsel %vm14077_vm11, %v6137_v21, %v6141_v22  ;;  %6388 = vmatpush.bf16.msrb.mxu1 %v13118_v16  ;;  %v11972_v16 = vld [vmem:[%s13629_s22 + $0xc8] sm:$0xf] }
 0x297   : >> { %v4870_v29 = vpop.f32.mrf.mxu2  ;;  %v15908_v28 = vpop.f32.mrf.mxu3  ;;  %v6220_v31 = vunpack.c.l.b16 %v6142_v10  ;;  %v6617_v10 = vrot.slane %v11972_v16, 6 }
 0x298   : >> { %v15914_v34 = vadd.f32 %v4870_v29, %v15785_v23  ;;  %v4641_v48 = vpop.f32.mrf.mxu1  ;;  %v5139_v8 = vpop.f32.mrf.mxu0  ;;  %v13124_v23 = vld [vmem:[%s17377_s2 + $0x448] sm:$0xff]  ;;  %v15951_v29 = vrot.slane %v6163_v62, 5 }
 0x299   : >> { %v4661_v61 = vadd.f32 %v4641_v48, %v15695_v60  ;;  %v13134_v60 = vld [vmem:[%s17377_s2 + $0x698] sm:$0xff]  ;;  %6560 = vmatpush.bf16.msra.mxu2 %v13124_v23  ;;  %v11908_v48 = vld [vmem:[%s13629_s22 + $0xa8] sm:$0xf]  ;;  %v6619_v38 = vrot.slane %v6617_v10, 4 }
 0x29a   : >> { %5804 = vmatmul.bf16.vlgmr.msra.gmra.mxu1 %v13071_v39  ;;  %6290 = vmatmul.bf16.vlgmr.msra.gmra.mxu0 %v15911_v47  ;;  %v6169_v39 = vrot.slane %v6167_v45, 4  ;;  %v11973_v45 = vld [vmem:[%s13629_s22 + $0xcc] sm:$0x3] }
 0x29b   : >> { %v4985_v30 = vadd.f32 %v15830_v2, %v4661_v61  ;;  %v13149_v2 = vld [vmem:[%s17377_s2 + $0x8f0] sm:$0xff]  ;;  %6728 = vmatpush.bf16.msra.mxu3 %v13134_v60  ;;  %v11907_v60 = vld [vmem:[%s13629_s22 + $0xa4] sm:$0xe] }
 0x29c   : >> { %5940 = vmatmul.bf16.gmra.mxu2 %v13085_v18  ;;  %6074 = vmatmul.bf16.gmra.mxu3 %v13097_v15  ;;  %v13148_v18 = vld [vmem:[%s17377_s2 + $0x8e8] sm:$0xff]  ;;  %v13072_v15 = vld [vmem:[%s13629_s22 + $0xb4] sm:$0xff]  ;;  %v6170_v21 = vor.u32 %v6169_v39, %v15951_v29 }
 0x29d   : >> { %v15926_v43 = vadd.f32 %v5139_v8, %v4985_v30  ;;  %6859 = vmatpush.bf16.msrb.mxu0 %v13149_v2  ;;  %6561 = vmatpush.bf16.msra.mxu2 %v13123_v41  ;;  %v13086_v30 = vld [vmem:[%s13629_s22 + $0xf4] sm:$0xff] }
 0x29f   : >> { %v4873_v56 = vpop.f32.mrf.mxu2  ;;  %v15937_v63 = vpop.f32.mrf.mxu3 }
 0x2a0   : >> { %v15945_v59 = vadd.f32 %v4873_v56, %v15810_v58  ;;  %v4643_v32 = vpop.f32.mrf.mxu1  ;;  %v5141_v50 = vpop.f32.mrf.mxu0  ;;  %v6221_v58 = vunpack.c.l.b16 %v6152_v6  ;;  %v13132_v56 = vld [vmem:[%s17377_s2 + $0x688] sm:$0xff] }
 0x2a1   : >> { %v4662_v22 = vadd.f32 %v4643_v32, %v15727_v37  ;;  %13247 = vmatpush.bf16.msrb.mxu2 %v13150_v19  ;;  %v13133_v37 = vld [vmem:[%s17377_s2 + $0x690] sm:$0xff]  ;;  %v6160_v19 = vor.u32 %v6159_v55, %v6156_v25  ;;  %6860 = vmatpush.bf16.msrb.mxu0 %v13148_v18  ;;  %v6171_v32 = vrot.slane %v6170_v21, 4  ;;  %v11809_v25 = vld [vmem:[%s13629_s22 + $0xc8] sm:$0xf] }
 0x2a2   : >> { %v15969_v61 = vpack.c.b16 %v6221_v58, %v6220_v31  ;;  %6729 = vmatpush.bf16.msra.mxu3 %v13133_v37  ;;  %v11808_v31 = vld [vmem:[%s13629_s22 + $0xc4] sm:$0xf] }
 0x2a3   : >> { %v4986_v40 = vadd.f32 %v15855_v17, %v4662_v22  ;;  %v13117_v17 = vld [vmem:[%s17377_s2 + $0x210] sm:$0xff]  ;;  %v6161_v62 = vrot.slane %v6160_v19, 4  ;;  %v6450_v22 = vrot.slane %v11909_v27, 5  ;;  %v13131_v58 = vld [vmem:[%s17377_s2 + $0x680] sm:$0xff] }
 0x2a4   : >> { %6389 = vmatpush.bf16.msrb.mxu1 %v13117_v17 }
 0x2a5   : >> { %v15955_v8 = vadd.f32 %v5141_v50, %v4986_v40  ;;  %13248 = vmatpush.bf16.msrb.mxu2 %v13149_v2  ;;  %v6447_v2 = vrot.slane %v11908_v48, 5  ;;  %v6175_v50 = vrot.slane %v6173_v36, 5  ;;  %v13147_v40 = vld [vmem:[%s17377_s2 + $0x8e0] sm:$0xff]  ;;  %v6620_v48 = vrot.slane %v11973_v45, 6 }
 0x2a6   : >> { %6730 = vmatpush.bf16.msra.mxu3 %v13132_v56  ;;  %v6166_v37 = vsel %vm14077_vm11, %v6161_v62, %v15951_v29  ;;  %6861 = vmatpush.bf16.msrb.mxu0 %v13147_v40 }
 0x2a7   : >> { %v4875_v20 = vpop.f32.mrf.mxu2  ;;  %v15966_v44 = vpop.f32.mrf.mxu3  ;;  %v6449_v6 = vrot.slane %v6447_v2, 4  ;;  %v6176_v19 = vsel %vm14077_vm11, %v6171_v32, %v6175_v50  ;;  %v6621_v16 = vsel %vm13699_vm8, %v6619_v38, %v6620_v48 }
 0x2a8   : >> { %v15974_v23 = vadd.f32 %v4875_v20, %v15840_v12  ;;  %v4646_v49 = vpop.f32.mrf.mxu1  ;;  %v5144_v52 = vpop.f32.mrf.mxu0  ;;  %v11971_v12 = vld [vmem:[%s13629_s22 + $0xc4] sm:$0xc]  ;;  %v6223_v27 = vunpack.c.l.b16 %v6176_v19 }
 0x2a9   : >> { %v4663_v3 = vadd.f32 %v4646_v49, %v15753_v7  ;;  %13249 = vmatpush.bf16.msrb.mxu2 %v13148_v18  ;;  %v11919_v7 = vrot.slane %v11907_v60, 9  ;;  %v11983_v39 = vrot.slane %v11971_v12, 10  ;;  %v6451_v29 = vsel %vm14171_vm14, %v6449_v6, %v6450_v22  ;;  %v13115_v22 = vld [vmem:[%s17377_s2 + $0x200] sm:$0xff] }
 0x2aa   : >> { %5809 = vmatmul.bf16.gmra.mxu1 %v13072_v15  ;;  %6295 = vmatmul.bf16.gmra.mxu0 %v15969_v61  ;;  %v6178_v15 = vshrl.u32 %v11808_v31, 16  ;;  %v6491_v12 = vunpack.c.l.b16 %v6451_v29  ;;  %v11910_v29 = vld [vmem:[%s13629_s22 + $0xb4] sm:$0xe] }
 0x2ab   : >> { %v4987_v41 = vadd.f32 %v15880_v35, %v4663_v3  ;;  %v13116_v35 = vld [vmem:[%s17377_s2 + $0x208] sm:$0xff]  ;;  %v6448_v20 = vsel %vm14171_vm14, %v11919_v7, %v6447_v2  ;;  %6731 = vmatpush.bf16.msra.mxu3 %v13131_v58  ;;  %v6618_v2 = vsel %vm13699_vm8, %v11983_v39, %v6617_v10  ;;  %v6222_v3 = vunpack.c.l.b16 %v6166_v37 }
 0x2ac   : >> { %5945 = vmatmul.bf16.gmra.mxu2 %v13086_v30  ;;  %6079 = vmatmul.bf16.gmra.mxu3 %v13098_v33  ;;  %v6181_v30 = vshll.u32 %v11808_v31, 16  ;;  %v6191_v33 = vshrl.u32 %v11809_v25, 16  ;;  %v6490_v56 = vunpack.c.l.b16 %v6448_v20  ;;  %v6660_v50 = vunpack.c.l.b16 %v6618_v2  ;;  %v11911_v31 = vld [vmem:[%s13629_s22 + $0xb8] sm:$0xf]  ;;  %v11974_v2 = vld [vmem:[%s13629_s22 + $0xd4] sm:$0xc] }
 0x2ad   : >> { %v15990_v55 = vadd.f32 %v5144_v52, %v4987_v41  ;;  %6390 = vmatpush.bf16.msrb.mxu1 %v13116_v35  ;;  %v6187_v52 = vshll.u32 %v11809_v25, 16  ;;  %13250 = vmatpush.bf16.msrb.mxu2 %v13147_v40  ;;  %v11810_v41 = vld [vmem:[%s13629_s22 + $0xcc] sm:$0x1]  ;;  %v6661_v7 = vunpack.c.l.b16 %v6621_v16  ;;  %v13073_v35 = vld [vmem:[%s13629_s22 + $0xc4] sm:$0xff]  ;;  %v16039_v58 = vpack.c.b16 %v6223_v27, %v6222_v3 }
 0x2ae   : >> { %v6183_v45 = vrot.slane %v6181_v30, 5  ;;  %v6193_v32 = vrot.slane %v6191_v33, 4  ;;  %v6498_v39 = vpack.c.b16 %v6491_v12, %v6490_v56  ;;  %v6197_v48 = vshll.u32 %v11810_v41, 16  ;;  %v13144_v33 = vld [vmem:[%s17377_s2 + $0x8c8] sm:$0xff] }
 0x2af   : >> { %v4878_v18 = vpop.f32.mrf.mxu2  ;;  %v16004_v17 = vpop.f32.mrf.mxu3  ;;  %v16025_v10 = vrot.slane %v6187_v52, 5  ;;  %v6454_v30 = vrot.slane %v11911_v31, 5  ;;  %v11912_v52 = vld [vmem:[%s13629_s22 + $0xbc] sm:$0x1] }
 0x2b0   : >> { %v16011_v21 = vadd.f32 %v4878_v18, %v15863_v57  ;;  %v4648_v36 = vpop.f32.mrf.mxu1  ;;  %v5146_v49 = vpop.f32.mrf.mxu0  ;;  %v13146_v57 = vld [vmem:[%s17377_s2 + $0x8d8] sm:$0xff]  ;;  %v6199_v3 = vrot.slane %v6197_v48, 5 }
 0x2b1   : >> { %v4664_v60 = vadd.f32 %v4648_v36, %v15788_v53  ;;  %v6180_v53 = vrot.slane %v6178_v15, 4  ;;  %6862 = vmatpush.bf16.msrb.mxu0 %v13146_v57  ;;  %13251 = vmatpush.bf16.msrb.mxu2 %v13146_v57  ;;  %v6194_v20 = vor.u32 %v6193_v32, %v16025_v10  ;;  %v6668_v15 = vpack.c.b16 %v6661_v7, %v6660_v50  ;;  %v11975_v36 = vld [vmem:[%s13629_s22 + $0xd8] sm:$0xf] }
 0x2b2   : >> { %6391 = vmatpush.bf16.msrb.mxu1 %v13115_v22  ;;  %v6456_v56 = vrot.slane %v6454_v30, 4 }
 0x2b3   : >> { %v4988_v62 = vadd.f32 %v15908_v28, %v4664_v60  ;;  %v13145_v28 = vld [vmem:[%s17377_s2 + $0x8d0] sm:$0xff]  ;;  %v6184_v38 = vor.u32 %v6183_v45, %v6180_v53  ;;  %v6624_v60 = vrot.slane %v11975_v36, 6  ;;  %v6195_v27 = vrot.slane %v6194_v20, 4  ;;  %v13143_v53 = vld [vmem:[%s17377_s2 + $0x8c0] sm:$0xff] }
 0x2b4   : >> { %v11984_v45 = vrot.slane %v11974_v2, 10 }
 0x2b5   : >> { %v16027_v6 = vadd.f32 %v5146_v49, %v4988_v62  ;;  %6863 = vmatpush.bf16.msrb.mxu0 %v13145_v28  ;;  %13252 = vmatpush.bf16.msrb.mxu2 %v13145_v28  ;;  %v6185_v57 = vrot.slane %v6184_v38, 4  ;;  %v6457_v62 = vrot.slane %v11912_v52, 5  ;;  %v6200_v28 = vsel %vm14077_vm11, %v6195_v27, %v6199_v3  ;;  %v13074_v52 = vld [vmem:[%s13629_s22 + $0xd4] sm:$0xff]  ;;  %v11978_v3 = vld [vmem:[%s13629_s22 + $0xe8] sm:$0xf] }
 0x2b6   : >> { %v6625_v38 = vsel %vm13699_vm8, %v11984_v45, %v6624_v60  ;;  %v11979_v45 = vld [vmem:[%s13629_s22 + $0xec] sm:$0x3] }
 0x2b7   : >> { %v4880_v25 = vpop.f32.mrf.mxu2  ;;  %v16036_v40 = vpop.f32.mrf.mxu3  ;;  %v6190_v31 = vsel %vm14077_vm11, %v6185_v57, %v16025_v10 }
 0x2b8   : >> { %v16042_v37 = vadd.f32 %v4880_v25, %v15890_v26  ;;  %v4651_v18 = vpop.f32.mrf.mxu1  ;;  %v5149_v19 = vpop.f32.mrf.mxu0  ;;  %v11976_v26 = vld [vmem:[%s13629_s22 + $0xdc] sm:$0x3] }
 0x2b9   : >> { %v4665_v49 = vadd.f32 %v4651_v18, %v15813_v9  ;;  %v11920_v9 = vrot.slane %v11910_v29, 9  ;;  %6864 = vmatpush.bf16.msrb.mxu0 %v13144_v33  ;;  %v6627_v41 = vrot.slane %v11976_v26, 6  ;;  %13253 = vmatpush.bf16.msrb.mxu2 %v13144_v33  ;;  %v6224_v18 = vunpack.c.l.b16 %v6190_v31 }
 0x2ba   : >> { %5814 = vmatmul.bf16.gmra.mxu1 %v13073_v35  ;;  %6300 = vmatmul.bf16.gmra.mxu0 %v16039_v58  ;;  %v6458_v35 = vsel %vm14171_vm14, %v6456_v56, %v6457_v62  ;;  %v11915_v56 = vld [vmem:[%s13629_s22 + $0xcc] sm:$0x1]  ;;  %v6631_v62 = vrot.slane %v11978_v3, 6 }
 0x2bb   : >> { %v4989_v16 = vadd.f32 %v15937_v63, %v4665_v49  ;;  %v6626_v63 = vrot.slane %v6624_v60, 4  ;;  %v6455_v25 = vsel %vm14171_vm14, %v11920_v9, %v6454_v30  ;;  %v6662_v30 = vunpack.c.l.b16 %v6625_v38  ;;  %v11914_v49 = vld [vmem:[%s13629_s22 + $0xc8] sm:$0xf]  ;;  %v11913_v9 = vld [vmem:[%s13629_s22 + $0xc4] sm:$0xe] }
 0x2bc   : >> { %6562 = vmatmul.bf16.vlgmr.msra.gmra.mxu2 %v6498_v39  ;;  %6732 = vmatmul.bf16.vlgmr.msra.gmra.mxu3 %v6668_v15  ;;  %v6492_v20 = vunpack.c.l.b16 %v6455_v25  ;;  %v6493_v15 = vunpack.c.l.b16 %v6458_v35  ;;  %v6461_v57 = vrot.slane %v11914_v49, 5  ;;  %v6633_v25 = vrot.slane %v6631_v62, 4 }
 0x2bd   : >> { %v16056_v12 = vadd.f32 %v5149_v19, %v4989_v16  ;;  %6865 = vmatpush.bf16.msrb.mxu0 %v13143_v53  ;;  %v6628_v10 = vsel %vm13699_vm8, %v6626_v63, %v6627_v41  ;;  %13254 = vmatpush.bf16.msrb.mxu2 %v13143_v53  ;;  %v6225_v19 = vunpack.c.l.b16 %v6200_v28  ;;  %v11977_v53 = vld [vmem:[%s13629_s22 + $0xe4] sm:$0xc]  ;;  %v11921_v41 = vrot.slane %v11913_v9, 9 }
 0x2be   : >> { %v6663_v36 = vunpack.c.l.b16 %v6628_v10  ;;  %v6499_v26 = vpack.c.b16 %v6493_v15, %v6492_v20  ;;  %v11985_v28 = vrot.slane %v11977_v53, 10  ;;  %v11916_v53 = vld [vmem:[%s13629_s22 + $0xd4] sm:$0xe] }
 0x2bf   : >> { %v16061_v32 = vpop.f32.mrf.mxu3  ;;  %v16063_v50 = vpop.f32.mrf.mxu2  ;;  %v16086_v33 = vpack.c.b16 %v6225_v19, %v6224_v18  ;;  %v6462_v10 = vsel %vm14171_vm14, %v11921_v41, %v6461_v57  ;;  %v11980_v41 = vld [vmem:[%s13629_s22 + $0xf4] sm:$0xc] }
 0x2c0   : >> { %v4653_v7 = vpop.f32.mrf.mxu1  ;;  %v5151_v22 = vpop.f32.mrf.mxu0  ;;  %v6669_v16 = vpack.c.b16 %v6663_v36, %v6662_v30  ;;  %v6632_v19 = vsel %vm13699_vm8, %v11985_v28, %v6631_v62  ;;  %v6494_v30 = vunpack.c.l.b16 %v6462_v10  ;;  %v11922_v28 = vrot.slane %v11916_v53, 9 }
 0x2c1   : >> { %v4666_v39 = vadd.f32 %v4653_v7, %v15843_v14  ;;  %v6463_v7 = vrot.slane %v6461_v57, 4  ;;  %v6664_v49 = vunpack.c.l.b16 %v6632_v19 }
 0x2c3   : >> { %v4990_v48 = vadd.f32 %v15966_v44, %v4666_v39 }
 0x2c5   : >> { %v16080_v14 = vadd.f32 %v5151_v22, %v4990_v48  ;;  %v6464_v22 = vrot.slane %v11915_v56, 5  ;;  %v11981_v56 = vld [vmem:[%s13629_s22 + $0xf8] sm:$0xf] }
 0x2c7   : >> { %v16083_v29 = vpop.f32.mrf.mxu3  ;;  %v16088_v44 = vpop.f32.mrf.mxu2  ;;  %v6465_v18 = vsel %vm14171_vm14, %v6463_v7, %v6464_v22  ;;  %v11982_v7 = vld [vmem:[%s13629_s22 + $0xfc] sm:$0x3] }
 0x2c8   : >> { %v4656_v60 = vpop.f32.mrf.mxu1  ;;  %v5154_v2 = vpop.f32.mrf.mxu0  ;;  %v6495_v36 = vunpack.c.l.b16 %v6465_v18 }
 0x2c9   : >> { %v4667_v27 = vadd.f32 %v4656_v60, %v15866_v13  ;;  %v6634_v13 = vrot.slane %v11979_v45, 6  ;;  %v11917_v60 = vld [vmem:[%s13629_s22 + $0xd8] sm:$0xf]  ;;  %v11918_v45 = vld [vmem:[%s13629_s22 + $0xdc] sm:$0x1] }
 0x2ca   : >> { %5819 = vmatmul.bf16.gmra.mxu1 %v13074_v52  ;;  %6305 = vmatmul.bf16.gmra.mxu0 %v16086_v33 }
 0x2cb   : >> { %v4991_v63 = vadd.f32 %v16004_v17, %v4667_v27  ;;  %v6635_v20 = vsel %vm13699_vm8, %v6633_v25, %v6634_v13  ;;  %v6500_v27 = vpack.c.b16 %v6495_v36, %v6494_v30  ;;  %v6471_v13 = vrot.slane %v11918_v45, 5 }
 0x2cc   : >> { %6567 = vmatmul.bf16.gmra.mxu2 %v6499_v26  ;;  %6737 = vmatmul.bf16.gmra.mxu3 %v6669_v16  ;;  %v6665_v52 = vunpack.c.l.b16 %v6635_v20  ;;  %v13139_v16 = vld [vmem:[%s13629_s22 + $0x108] sm:$0xff] }
 0x2cd   : >> { %v16098_v31 = vadd.f32 %v5154_v2, %v4991_v63  ;;  %v6638_v63 = vrot.slane %v11981_v56, 6 }
 0x2ce   : >> { %v6670_v9 = vpack.c.b16 %v6665_v52, %v6664_v49 }
 0x2cf   : >> { %v16100_v35 = vpop.f32.mrf.mxu3  ;;  %v16102_v39 = vpop.f32.mrf.mxu2  ;;  %v6640_v10 = vrot.slane %v6638_v63, 4 }
 0x2d0   : >> { %v4658_v38 = vpop.f32.mrf.mxu1  ;;  %v5156_v17 = vpop.f32.mrf.mxu0 }
 0x2d1   : >> { %v4668_v48 = vadd.f32 %v4658_v38, %v15893_v24 }
 0x2d3   : >> { %v4992_v15 = vadd.f32 %v16036_v40, %v4668_v48  ;;  %v6468_v40 = vrot.slane %v11917_v60, 5 }
 0x2d5   : >> { %v16114_v24 = vadd.f32 %v5156_v17, %v4992_v15  ;;  %v6470_v25 = vrot.slane %v6468_v40, 4  ;;  %v11986_v17 = vrot.slane %v11980_v41, 10 }
 0x2d7   : >> { %v16117_v2 = vpop.f32.mrf.mxu3  ;;  %v5458_v26 = vpop.f32.mrf.mxu2  ;;  %v6472_v15 = vsel %vm14171_vm14, %v6470_v25, %v6471_v13  ;;  %v6639_v30 = vsel %vm13699_vm8, %v11986_v17, %v6638_v63 }
 0x2d8   : >> { %v5313_v57 = vpop.f32.mrf.mxu1  ;;  %v5679_v3 = vpop.f32.mrf.mxu0  ;;  %v6497_v60 = vunpack.c.l.b16 %v6472_v15 }
 0x2d9   : >> { %v5333_v62 = vadd.f32 %v5313_v57, %v15926_v43  ;;  %v6641_v43 = vrot.slane %v11982_v7, 6 }
 0x2da   : >> { %6392 = vmatmul.bf16.vlgmr.msrb.gmra.mxu1 %v15911_v47  ;;  %6866 = vmatmul.bf16.vlgmr.msrb.gmra.mxu0 %v13139_v16  ;;  %v6469_v47 = vsel %vm14171_vm14, %v11922_v28, %v6468_v40  ;;  %v6666_v16 = vunpack.c.l.b16 %v6639_v30 }
 0x2db   : >> { %v5471_v22 = vadd.f32 %v16063_v50, %v5333_v62  ;;  %v6642_v36 = vsel %vm13699_vm8, %v6640_v10, %v6641_v43  ;;  %v6496_v52 = vunpack.c.l.b16 %v6469_v47  ;;  %v13142_v43 = vld [vmem:[%s13629_s22 + $0x138] sm:$0xff] }
 0x2dc   : >> { %6572 = vmatmul.bf16.gmra.mxu2 %v6500_v27  ;;  %6742 = vmatmul.bf16.gmra.mxu3 %v6670_v9  ;;  %v6667_v57 = vunpack.c.l.b16 %v6642_v36  ;;  %v13140_v9 = vld [vmem:[%s13629_s22 + $0x118] sm:$0xff] }
 0x2dd   : >> { %v16128_v38 = vadd.f32 %v5679_v3, %v5471_v22  ;;  %v6501_v62 = vpack.c.b16 %v6497_v60, %v6496_v52 }
 0x2de   : >> { %v6671_v53 = vpack.c.b16 %v6667_v57, %v6666_v16 }
 0x2df   : >> { %v16130_v48 = vpop.f32.mrf.mxu3  ;;  %v5461_v18 = vpop.f32.mrf.mxu2 }
 0x2e0   : >> { %v5315_v19 = vpop.f32.mrf.mxu1  ;;  %v5681_v20 = vpop.f32.mrf.mxu0 }
 0x2e1   : >> { %v5334_v50 = vadd.f32 %v5315_v19, %v15955_v8 }
 0x2e3   : >> { %v5472_v49 = vadd.f32 %v16088_v44, %v5334_v50 }
 0x2e5   : >> { %v16142_v3 = vadd.f32 %v5681_v20, %v5472_v49 }
 0x2e7   : >> { %v16144_v27 = vpop.f32.mrf.mxu3  ;;  %v5463_v8 = vpop.f32.mrf.mxu2 }
 0x2e8   : >> { %v5318_v40 = vpop.f32.mrf.mxu1  ;;  %v5684_v56 = vpop.f32.mrf.mxu0 }
 0x2e9   : >> { %v5335_v45 = vadd.f32 %v5318_v40, %v15990_v55 }
 0x2ea   : >> { %6397 = vmatmul.bf16.gmra.mxu1 %v15969_v61  ;;  %6871 = vmatmul.bf16.gmra.mxu0 %v13140_v9  ;;  %v13141_v61 = vld [vmem:[%s13629_s22 + $0x128] sm:$0xff]  ;;  %s17402_s22 = sshll.u32 %s13473_s13, 6  ;;  %s329_s13 = sadd.s32 1, %s13473_s13  }
 0x2eb   : >> { %v5473_v4 = vadd.f32 %v16102_v39, %v5335_v45  ;;  %v5597_v45 = vadd.f32 %v16061_v32, %v15835_v11  ;;  %s16188_s0 = scalar_lea.vmem [#allocation3], %s17402_s22  ;;  %p326_p11 = scmp.ge.s32.totalorder %s329_s13, 4  }
 0x2ec   : >> { %6577 = vmatmul.bf16.gmra.mxu2 %v6501_v62  ;;  %6747 = vmatmul.bf16.gmra.mxu3 %v6671_v53  ;;  %vm16371_vm0 = vmand (%p326_p11), %vm694_vm2, %vm6996_vm1  ;;  %s16421_s10 = smov (%p326_p11), 0  }
 0x2ed   : >> { %v16150_v44 = vadd.f32 %v5684_v56, %v5473_v4 }
 0x2ef   : >> { %v16152_v63 = vpop.f32.mrf.mxu3  ;;  %v5466_v41 = vpop.f32.mrf.mxu2 }
 0x2f0   : >> { %v5320_v7 = vpop.f32.mrf.mxu1  ;;  %v5686_v22 = vpop.f32.mrf.mxu0 }
 0x2f1   : >> { %v5336_v28 = vadd.f32 %v5320_v7, %v16027_v6 }
 0x2f3   : >> { %v5474_v25 = vadd.f32 %v5458_v26, %v5336_v28  ;;  %v5598_v28 = vadd.f32 %v16083_v29, %v15858_v54 }
 0x2f5   : >> { %v16155_v55 = vadd.f32 %v5686_v22, %v5474_v25 }
 0x2f7   : >> { %v16157_v13 = vpop.f32.mrf.mxu3  ;;  %v5468_v39 = vpop.f32.mrf.mxu2 }
 0x2f8   : >> { %v5323_v17 = vpop.f32.mrf.mxu1  ;;  %v5689_v10 = vpop.f32.mrf.mxu0 }
 0x2f9   : >> { %v5337_v19 = vadd.f32 %v5323_v17, %v16056_v12 }
 0x2fa   : >> { %6402 = vmatmul.bf16.gmra.mxu1 %v16039_v58  ;;  %6876 = vmatmul.bf16.gmra.mxu0 %v13141_v61 }
 0x2fb   : >> { %v5475_v20 = vadd.f32 %v5461_v18, %v5337_v19 }
 0x2fc   : >> { %6881 = vmatmul.bf16.vlgmr.msrb.gmra.mxu2 %v13142_v43 }
 0x2fd   : >> { %v16163_v47 = vadd.f32 %v5689_v10, %v5475_v20 }
 0x2ff   : >> { %v5931_v6 = vpop.f32.mrf.mxu2  ;;  %v16165_v26 = vpop.f32.mrf.mxu3 }
 0x300   : >> { %v5325_v50 = vpop.f32.mrf.mxu1  ;;  %v5691_v15 = vpop.f32.mrf.mxu0 }
 0x301   : >> { %v5338_v30 = vadd.f32 %v5325_v50, %v16080_v14 }
 0x303   : >> { %v5476_v36 = vadd.f32 %v5463_v8, %v5338_v30 }
 0x305   : >> { %v16168_v49 = vadd.f32 %v5691_v15, %v5476_v36 }
 0x307   : >> { %v5933_v52 = vpop.f32.mrf.mxu2  ;;  %v16170_v60 = vpop.f32.mrf.mxu3 }
 0x308   : >> { %v5328_v12 = vpop.f32.mrf.mxu1  ;;  %v5694_v18 = vpop.f32.mrf.mxu0 }
 0x309   : >> { %v5339_v58 = vadd.f32 %v5328_v12, %v16098_v31 }
 0x30a   : >> { %6407 = vmatmul.bf16.gmra.mxu1 %v16086_v33 }
 0x30b   : >> { %v5477_v16 = vadd.f32 %v5466_v41, %v5339_v58 }
 0x30d   : >> { %v16174_v57 = vadd.f32 %v5694_v18, %v5477_v16  ;;  %v5600_v18 = vadd.f32 %v16117_v2, %v15914_v34 }
 0x30f   : >> { %v5936_v9 = vpop.f32.mrf.mxu2  ;;  %v16177_v8 = vpop.f32.mrf.mxu3 }
 0x310   : >> { %v5330_v40 = vpop.f32.mrf.mxu1  ;;  %v5696_v56 = vpop.f32.mrf.mxu0 }
 0x311   : >> { %v5340_v14 = vadd.f32 %v5330_v40, %v16114_v24 }
 0x313   : >> { %v5478_v62 = vadd.f32 %v5468_v39, %v5340_v14 }
 0x315   : >> { %v16179_v53 = vadd.f32 %v5696_v56, %v5478_v62 }
 0x317   : >> { %v5938_v31 = vpop.f32.mrf.mxu2  ;;  %v16191_v24 = vpop.f32.mrf.mxu3 }
 0x318   : >> { %v5805_v4 = vpop.f32.mrf.mxu1  ;;  %v6291_v41 = vpop.f32.mrf.mxu0 }
 0x319   : >> { %v5825_v33 = vadd.f32 %v5805_v4, %v16128_v38  ;;  %v6311_v7 = vadd.f32 %v6291_v41, %v5597_v45  ;;  %v5601_v45 = vadd.f32 %v16130_v48, %v15945_v59 }
 0x31b   : >> { %v16184_v22 = vadd.f32 %v5931_v6, %v5825_v33  ;;  %7029 = vst [vmem:[%s16188_s0] sm:$0xff] %v6311_v7  ;;  %v7051_v61 = vmul.f32 %v6311_v7, %v6311_v7  ;;  %v5599_v6 = vadd.f32 %v16100_v35, %v15885_v42 }
 0x31f   : >> { %v5941_v11 = vpop.f32.mrf.mxu2  ;;  %v16199_v20 = vpop.f32.mrf.mxu3 }
 0x320   : >> { %v5807_v32 = vpop.f32.mrf.mxu1  ;;  %v6293_v25 = vpop.f32.mrf.mxu0 }
 0x321   : >> { %v5826_v39 = vadd.f32 %v5807_v32, %v16142_v3  ;;  %v6312_v38 = vadd.f32 %v6293_v25, %v5598_v28  ;;  %v5602_v25 = vadd.f32 %v16144_v27, %v15974_v23 }
 0x323   : >> { %v16196_v17 = vadd.f32 %v5933_v52, %v5826_v39  ;;  %7030 = vst [vmem:[%s16188_s0 + $0x8] sm:$0xff] %v6312_v38  ;;  %v7037_v10 = vadd.f32 %v6312_v38, %v6311_v7  ;;  %v7052_v43 = vmul.f32 %v6312_v38, %v6312_v38 }
 0x325   : >> { %v7059_v19 = vadd.f32 %v7052_v43, %v7051_v61 }
 0x327   : >> { %v5943_v54 = vpop.f32.mrf.mxu2  ;;  %v16209_v16 = vpop.f32.mrf.mxu3 }
 0x328   : >> { %v5810_v29 = vpop.f32.mrf.mxu1  ;;  %v6296_v50 = vpop.f32.mrf.mxu0 }
 0x329   : >> { %v5827_v3 = vadd.f32 %v5810_v29, %v16150_v44  ;;  %v6313_v15 = vadd.f32 %v6296_v50, %v5599_v6  ;;  %v5603_v6 = vadd.f32 %v16152_v63, %v16011_v21 }
 0x32b   : >> { %v16204_v30 = vadd.f32 %v5936_v9, %v5827_v3  ;;  %7031 = vst [vmem:[%s16188_s0 + $0x10] sm:$0xff] %v6313_v15  ;;  %v7038_v36 = vadd.f32 %v7037_v10, %v6313_v15  ;;  %v7053_v52 = vmul.f32 %v6313_v15, %v6313_v15 }
 0x32d   : >> { %v7060_v12 = vadd.f32 %v7059_v19, %v7053_v52 }
 0x32f   : >> { %v5946_v58 = vpop.f32.mrf.mxu2  ;;  %v16218_v7 = vpop.f32.mrf.mxu3 }
 0x330   : >> { %v5812_v42 = vpop.f32.mrf.mxu1  ;;  %v6298_v35 = vpop.f32.mrf.mxu0 }
 0x331   : >> { %v5828_v40 = vadd.f32 %v5812_v42, %v16155_v55  ;;  %v6314_v56 = vadd.f32 %v6298_v35, %v5600_v18 }
 0x333   : >> { %v16212_v44 = vadd.f32 %v5938_v31, %v5828_v40  ;;  %7032 = vst [vmem:[%s16188_s0 + $0x18] sm:$0xff] %v6314_v56  ;;  %v7039_v9 = vadd.f32 %v7038_v36, %v6314_v56  ;;  %v7054_v14 = vmul.f32 %v6314_v56, %v6314_v56 }
 0x335   : >> { %v7061_v62 = vadd.f32 %v7060_v12, %v7054_v14  ;;  %v5604_v12 = vadd.f32 %v16157_v13, %v16042_v37 }
 0x337   : >> { %v5948_v4 = vpop.f32.mrf.mxu2  ;;  %v16229_v43 = vpop.f32.mrf.mxu3 }
 0x338   : >> { %v5815_v34 = vpop.f32.mrf.mxu1  ;;  %v6301_v2 = vpop.f32.mrf.mxu0 }
 0x339   : >> { %v5829_v41 = vadd.f32 %v5815_v34, %v16163_v47  ;;  %v6315_v33 = vadd.f32 %v6301_v2, %v5601_v45  ;;  %v6085_v45 = vadd.f32 %v16165_v26, %v16184_v22  ;;  %v6086_v26 = vadd.f32 %v16170_v60, %v16196_v17 }
 0x33b   : >> { %v16220_v55 = vadd.f32 %v5941_v11, %v5829_v41  ;;  %7033 = vst [vmem:[%s16188_s0 + $0x20] sm:$0xff] %v6315_v33  ;;  %v7040_v31 = vadd.f32 %v7039_v9, %v6315_v33  ;;  %v7055_v28 = vmul.f32 %v6315_v33, %v6315_v33 }
 0x33d   : >> { %v7062_v32 = vadd.f32 %v7061_v62, %v7055_v28 }
 0x33f   : >> { %v6563_v39 = vpop.f32.mrf.mxu2  ;;  %v6733_v52 = vpop.f32.mrf.mxu3 }
 0x340   : >> { %v5817_v59 = vpop.f32.mrf.mxu1  ;;  %v6303_v48 = vpop.f32.mrf.mxu0 }
 0x341   : >> { %v5830_v38 = vadd.f32 %v5817_v59, %v16168_v49  ;;  %v6316_v61 = vadd.f32 %v6303_v48, %v5602_v25 }
 0x343   : >> { %v16226_v47 = vadd.f32 %v5943_v54, %v5830_v38  ;;  %7034 = vst [vmem:[%s16188_s0 + $0x28] sm:$0xff] %v6316_v61  ;;  %v7041_v10 = vadd.f32 %v7040_v31, %v6316_v61  ;;  %v7056_v11 = vmul.f32 %v6316_v61, %v6316_v61 }
 0x345   : >> { %v7063_v19 = vadd.f32 %v7062_v32, %v7056_v11 }
 0x347   : >> { %v6565_v29 = vpop.f32.mrf.mxu2  ;;  %v6735_v34 = vpop.f32.mrf.mxu3 }
 0x348   : >> { %v5820_v23 = vpop.f32.mrf.mxu1  ;;  %v6306_v27 = vpop.f32.mrf.mxu0 }
 0x349   : >> { %v5831_v50 = vadd.f32 %v5820_v23, %v16174_v57  ;;  %v6317_v3 = vadd.f32 %v6306_v27, %v5603_v6 }
 0x34b   : >> { %v16234_v49 = vadd.f32 %v5946_v58, %v5831_v50  ;;  %7035 = vst [vmem:[%s16188_s0 + $0x30] sm:$0xff] %v6317_v3  ;;  %v7042_v54 = vadd.f32 %v7041_v10, %v6317_v3  ;;  %v7057_v15 = vmul.f32 %v6317_v3, %v6317_v3 }
 0x34d   : >> { %v7064_v36 = vadd.f32 %v7063_v19, %v7057_v15 }
 0x34f   : >> { %v6568_v18 = vpop.f32.mrf.mxu2  ;;  %v6738_v27 = vpop.f32.mrf.mxu3 }
 0x350   : >> { %v5822_v42 = vpop.f32.mrf.mxu1  ;;  %v6308_v21 = vpop.f32.mrf.mxu0 }
 0x351   : >> { %v5832_v63 = vadd.f32 %v5822_v42, %v16179_v53  ;;  %v6318_v35 = vadd.f32 %v6308_v21, %v5604_v12 }
 0x353   : >> { %v16240_v40 = vadd.f32 %v5948_v4, %v5832_v63  ;;  %7036 = vst [vmem:[%s16188_s0 + $0x38] sm:$0xff] %v6318_v35  ;;  %v7043_v57 = vadd.f32 %v7042_v54, %v6318_v35  ;;  %v7058_v58 = vmul.f32 %v6318_v35, %v6318_v35 }
 0x355   : >> { %v7044_v56 = vrot.slane %v7043_v57, 4  ;;  %v7065_v9 = vadd.f32 %v7064_v36, %v7058_v58 }
 0x357   : >> { %v7045_v14 = vadd.f32 %v7044_v56, %v7043_v57  ;;  %v7066_v62 = vrot.slane %v7065_v9, 4  ;;  %v16245_v53 = vpop.f32.mrf.mxu2  ;;  %v6740_v58 = vpop.f32.mrf.mxu3 }
 0x358   : >> { %v6393_v37 = vpop.f32.mrf.mxu1  ;;  %v6867_v13 = vpop.f32.mrf.mxu0 }
 0x359   : >> { %v7046_v2 = vrot.slane %v7045_v14, 2  ;;  %v7067_v41 = vadd.f32 %v7066_v62, %v7065_v9  ;;  %v6413_v33 = vadd.f32 %v6393_v37, %v6085_v45  ;;  %v6088_v37 = vadd.f32 %v16191_v24, %v16212_v44 }
 0x35b   : >> { %v7047_v4 = vadd.f32 %v7046_v2, %v7045_v14  ;;  %v7068_v31 = vrot.slane %v7067_v41, 2  ;;  %v6583_v28 = vadd.f32 %v6563_v39, %v6413_v33 }
 0x35d   : >> { %v7048_v32 = vrot.slane %v7047_v4, 1  ;;  %v7069_v25 = vadd.f32 %v7068_v31, %v7067_v41  ;;  %v6753_v59 = vadd.f32 %v6733_v52, %v6583_v28 }
 0x35f   : >> { %v7049_v48 = vadd.f32 %v7048_v32, %v7047_v4  ;;  %v7070_v38 = vrot.slane %v7069_v25, 1  ;;  %v6887_v61 = vadd.f32 %v6867_v13, %v6753_v59  ;;  %v6573_v54 = vpop.f32.mrf.mxu2 }
 0x360   : >> { %v6395_v22 = vpop.f32.mrf.mxu1  ;;  %v6869_v10 = vpop.f32.mrf.mxu0 }
 0x361   : >> { %v16250_v1 = vadd.f32 %v13469_v1, %v7049_v48   ;;  %v7071_v19 = vadd.f32 %v7070_v38, %v7069_v25  ;;  %v6895_v6 = vmax.f32 %v6887_v61, 0.0  ;;  %v6414_v23 = vadd.f32 %v6395_v22, %v6086_v26  ;;  %v6743_v61 = vpop.f32.mrf.mxu3 }
 0x363   : >> { %v17403_v11 = vmov %v16250_v1  ;;  %v16254_v0 = vadd.f32 %v13465_v0, %v7071_v19   ;;  %v6903_v50 = vpack.c.bf16 %v6895_v6, %v6895_v6  ;;  %v6584_v3 = vadd.f32 %v6565_v29, %v6414_v23  ;;  %v12114_v6 = vld [vmem:[%s16263_s1 + $0x18] sm:$0xf] }
 0x364   : >> { %v6087_v1 = vadd.f32 %v16177_v8, %v16204_v30  ;;  %v6089_v19 = vadd.f32 %v16199_v20, %v16220_v55  ;;  %v6090_v55 = vadd.f32 %v16209_v16, %v16226_v47 }
 0x365   : >> { %v17404_v39 = vmov %v16254_v0  ;;  %v6913_v15 = vshrl.u32 %v6903_v50, 16  ;;  %v6754_v60 = vadd.f32 %v6735_v34, %v6584_v3  ;;  %v6916_v36 = vshll.u32 %v6903_v50, 16  ;;  %v12109_v0 = vld [vmem:[%s16263_s1 + $0xc] sm:$0xf] }
 0x367   : >> { %v6915_v17 = vrot.slane %v6913_v15, 7  ;;  %v6888_v52 = vadd.f32 %v6869_v10, %v6754_v60  ;;  %v6575_v14 = vpop.f32.mrf.mxu2 }
 0x368   : >> { %v6398_v29 = vpop.f32.mrf.mxu1  ;;  %v6872_v42 = vpop.f32.mrf.mxu0 }
 0x369   : >> { %v6918_v21 = vor.u32 %v6916_v36, %v6915_v17  ;;  %v6896_v63 = vmax.f32 %v6888_v52, 0.0  ;;  %v6415_v35 = vadd.f32 %v6398_v29, %v6087_v1  ;;  %v6919_v13 = vrot.slane %v6915_v17, 4 }
 0x36b   : >> { %v6999_v57 = vsel %vm16259_vm3, %v6918_v21, %v12109_v0  ;;  %v6904_v8 = vpack.c.bf16 %v6896_v63, %v6896_v63  ;;  %v6585_v30 = vadd.f32 %v6568_v18, %v6415_v35  ;;  %v12112_v18 = vld [vmem:[%s16263_s1 + $0x14] sm:$0x1]  ;;  %v12117_v21 = vld [vmem:[%s16263_s1 + $0x20] sm:$0x1]  ;;  %v6745_v63 = vpop.f32.mrf.mxu3 }
 0x36c   : >> { %12110 = vst [vmem:[%s16263_s1 + $0xc] sm:$0xf] %v6999_v57 }
 0x36d   : >> { %v6921_v56 = vshrl.u32 %v6904_v8, 16  ;;  %v6755_v9 = vadd.f32 %v6738_v27, %v6585_v30  ;;  %v6924_v45 = vshll.u32 %v6904_v8, 16 }
 0x36f   : >> { %v6923_v62 = vrot.slane %v6921_v56, 7  ;;  %v6889_v34 = vadd.f32 %v6872_v42, %v6755_v9  ;;  %v6578_v23 = vpop.f32.mrf.mxu2 }
 0x370   : >> { %v6400_v41 = vpop.f32.mrf.mxu1  ;;  %v6874_v33 = vpop.f32.mrf.mxu0 }
 0x371   : >> { %v6926_v4 = vor.u32 %v6924_v45, %v6923_v62  ;;  %v6928_v31 = vrot.slane %v6923_v62, 4  ;;  %v6897_v28 = vmax.f32 %v6889_v34, 0.0  ;;  %v6416_v32 = vadd.f32 %v6400_v41, %v6088_v37 }
 0x372   : >> { %v6091_v41 = vadd.f32 %v16218_v7, %v16234_v49  ;;  %v6092_v49 = vadd.f32 %v16229_v43, %v16240_v40 }
 0x373   : >> { %v6927_v25 = vsel %vm13670_vm6, %v6919_v13, %v6926_v4  ;;  %v7004_v24 = vsel %vm16273_vm4, %v6928_v31, %v12112_v18  ;;  %v6905_v44 = vpack.c.bf16 %v6897_v28, %v6897_v28  ;;  %v6586_v59 = vadd.f32 %v16245_v53, %v6416_v32 }
 0x374   : >> { %12111 = vst [vmem:[%s16263_s1 + $0x10] sm:$0xf] %v6927_v25  ;;  %v6748_v25 = vpop.f32.mrf.mxu3 }
 0x375   : >> { %12113 = vst [vmem:[%s16263_s1 + $0x14] sm:$0x1] %v7004_v24  ;;  %v6930_v48 = vshrl.u32 %v6905_v44, 16  ;;  %v6756_v38 = vadd.f32 %v6740_v58, %v6586_v59  ;;  %v6933_v22 = vshll.u32 %v6905_v44, 16 }
 0x377   : >> { %v6932_v26 = vrot.slane %v6930_v48, 7  ;;  %v6890_v10 = vadd.f32 %v6874_v33, %v6756_v38  ;;  %v6580_v58 = vpop.f32.mrf.mxu2  ;;  %v12119_v33 = vld [vmem:[%s16263_s1 + $0x24] sm:$0xf] }
 0x378   : >> { %v6403_v27 = vpop.f32.mrf.mxu1  ;;  %v6877_v53 = vpop.f32.mrf.mxu0 }
 0x379   : >> { %v6935_v50 = vor.u32 %v6933_v22, %v6932_v26  ;;  %v6898_v3 = vmax.f32 %v6890_v10, 0.0  ;;  %v6417_v15 = vadd.f32 %v6403_v27, %v6089_v19  ;;  %v6936_v42 = vrot.slane %v6932_v26, 4  ;;  %v12122_v10 = vld [vmem:[%s16263_s1 + $0x2c] sm:$0x1] }
 0x37b   : >> { %v7007_v60 = vsel %vm16259_vm3, %v6935_v50, %v12114_v6  ;;  %v6906_v17 = vpack.c.bf16 %v6898_v3, %v6898_v3  ;;  %v6587_v36 = vadd.f32 %v6573_v54, %v6417_v15 }
 0x37c   : >> { %12115 = vst [vmem:[%s16263_s1 + $0x18] sm:$0xf] %v7007_v60 }
 0x37d   : >> { %v6938_v52 = vshrl.u32 %v6906_v17, 16  ;;  %v6757_v1 = vadd.f32 %v6743_v61, %v6587_v36  ;;  %v6941_v29 = vshll.u32 %v6906_v17, 16  ;;  %v6750_v17 = vpop.f32.mrf.mxu3 }
 0x37f   : >> { %v6940_v0 = vrot.slane %v6938_v52, 7  ;;  %v6891_v20 = vadd.f32 %v6877_v53, %v6757_v1  ;;  %v6882_v59 = vpop.f32.mrf.mxu2 }
 0x380   : >> { %v6405_v35 = vpop.f32.mrf.mxu1  ;;  %v6879_v16 = vpop.f32.mrf.mxu0 }
 0x381   : >> { %v6943_v57 = vor.u32 %v6941_v29, %v6940_v0  ;;  %v6945_v8 = vrot.slane %v6940_v0, 4  ;;  %v6899_v30 = vmax.f32 %v6891_v20, 0.0  ;;  %v6418_v54 = vadd.f32 %v6405_v35, %v6090_v55  ;;  %v12124_v29 = vld [vmem:[%s16263_s1 + $0x30] sm:$0xf] }
 0x383   : >> { %v6944_v56 = vsel %vm13670_vm6, %v6936_v42, %v6943_v57  ;;  %v7011_v9 = vsel %vm16273_vm4, %v6945_v8, %v12117_v21  ;;  %v6907_v62 = vpack.c.bf16 %v6899_v30, %v6899_v30  ;;  %v6588_v45 = vadd.f32 %v6575_v14, %v6418_v54  ;;  %v12127_v8 = vld [vmem:[%s16263_s1 + $0x38] sm:$0x1] }
 0x384   : >> { %12116 = vst [vmem:[%s16263_s1 + $0x1c] sm:$0xf] %v6944_v56 }
 0x385   : >> { %12118 = vst [vmem:[%s16263_s1 + $0x20] sm:$0x1] %v7011_v9  ;;  %v6947_v47 = vshrl.u32 %v6907_v62, 16  ;;  %v6758_v34 = vadd.f32 %v6745_v63, %v6588_v45  ;;  %v6950_v13 = vshll.u32 %v6907_v62, 16 }
 0x387   : >> { %v6949_v37 = vrot.slane %v6947_v47, 7  ;;  %v6892_v18 = vadd.f32 %v6879_v16, %v6758_v34  ;;  %v6884_v36 = vpop.f32.mrf.mxu2 }
 0x388   : >> { %v6408_v4 = vpop.f32.mrf.mxu1 }
 0x389   : >> { %v6952_v31 = vor.u32 %v6950_v13, %v6949_v37  ;;  %v6900_v28 = vmax.f32 %v6892_v18, 0.0  ;;  %v6419_v32 = vadd.f32 %v6408_v4, %v6091_v41  ;;  %v6953_v22 = vrot.slane %v6949_v37, 4 }
 0x38b   : >> { %v7014_v14 = vsel %vm16259_vm3, %v6952_v31, %v12119_v33  ;;  %v6908_v24 = vpack.c.bf16 %v6900_v28, %v6900_v28  ;;  %v6589_v44 = vadd.f32 %v6578_v23, %v6419_v32 }
 0x38c   : >> { %12120 = vst [vmem:[%s16263_s1 + $0x24] sm:$0xf] %v7014_v14 }
 0x38d   : >> { %v6955_v48 = vshrl.u32 %v6908_v24, 16  ;;  %v6759_v38 = vadd.f32 %v6748_v25, %v6589_v44  ;;  %v6958_v26 = vshll.u32 %v6908_v24, 16 }
 0x38f   : >> { %v6957_v61 = vrot.slane %v6955_v48, 7  ;;  %v6893_v7 = vadd.f32 %v6882_v59, %v6759_v38 }
 0x390   : >> { %v6410_v19 = vpop.f32.mrf.mxu1 }
 0x391   : >> { %v6960_v6 = vor.u32 %v6958_v26, %v6957_v61  ;;  %v6962_v27 = vrot.slane %v6957_v61, 4  ;;  %v6901_v50 = vmax.f32 %v6893_v7, 0.0  ;;  %v6420_v23 = vadd.f32 %v6410_v19, %v6092_v49 }
 0x393   : >> { %v6961_v3 = vsel %vm13670_vm6, %v6953_v22, %v6960_v6  ;;  %v7018_v15 = vsel %vm16273_vm4, %v6962_v27, %v12122_v10  ;;  %v6909_v53 = vpack.c.bf16 %v6901_v50, %v6901_v50  ;;  %v6590_v60 = vadd.f32 %v6580_v58, %v6420_v23 }
 0x394   : >> { %12121 = vst [vmem:[%s16263_s1 + $0x28] sm:$0xf] %v6961_v3 }
 0x395   : >> { %12123 = vst [vmem:[%s16263_s1 + $0x2c] sm:$0x1] %v7018_v15  ;;  %v6964_v43 = vshrl.u32 %v6909_v53, 16  ;;  %v6760_v40 = vadd.f32 %v6750_v17, %v6590_v60  ;;  %v6967_v1 = vshll.u32 %v6909_v53, 16 }
 0x397   : >> { %v6966_v52 = vrot.slane %v6964_v43, 7  ;;  %v6894_v0 = vadd.f32 %v6884_v36, %v6760_v40 }
 0x399   : >> { %v6969_v20 = vor.u32 %v6967_v1, %v6966_v52  ;;  %v6902_v55 = vmax.f32 %v6894_v0, 0.0  ;;  %v6970_v30 = vrot.slane %v6966_v52, 4  ;;  %v17409_v0 = vmov %v17404_v39 }
 0x39a   : >> { %v17410_v1 = vmov %v17403_v11 }
 0x39b   : >> { %v7021_v42 = vsel %vm16259_vm3, %v6969_v20, %v12124_v29  ;;  %v6910_v21 = vpack.c.bf16 %v6902_v55, %v6902_v55 }
 0x39c   : >> { %12125 = vst [vmem:[%s16263_s1 + $0x30] sm:$0xf] %v7021_v42 }
 0x39d   : >> { %v6972_v63 = vshrl.u32 %v6910_v21, 16  ;;  %v6975_v57 = vshll.u32 %v6910_v21, 16 }
 0x39f   : >> { %v6974_v35 = vrot.slane %v6972_v63, 7 }
 0x3a1   : >> { %v6977_v54 = vor.u32 %v6975_v57, %v6974_v35  ;;  %v6979_v58 = vrot.slane %v6974_v35, 4  ;;  %328 = sbr.rel (!%p326_p11) target bundleno = 26 (0x1a), region = 175 }
 0x3a3   : >> { %v6978_v56 = vsel %vm13670_vm6, %v6970_v30, %v6977_v54  ;;  %v7025_v9 = vsel %vm16273_vm4, %v6979_v58, %v12127_v8 }
 0x3a4   : >> { %12126 = vst [vmem:[%s16263_s1 + $0x34] sm:$0xf] %v6978_v56 }
 0x3a5   : >> { %12128 = vst [vmem:[%s16263_s1 + $0x38] sm:$0x1] %v7025_v9 }
 0x3ac   : > { %v7074_v12 = vld [vmem:[#allocation2 + $0x18] sm:$0xf]  ;;  %v7081_v46 = vld [vmem:[#allocation2 + $0xb4] sm:$0xf]  ;;  %v7075_v62 = vld [vmem:[#allocation2 + $0x1c] sm:$0xf] }
 0x3ad   : > { %7077 = vst [vmem:[#allocation2] sm:$0xf] %v7074_v12  ;;  %v7082_v45 = vld [vmem:[#allocation2 + $0xb8] sm:$0xf]  ;;  %v7076_v16 = vld [vmem:[#allocation2 + $0x20] sm:$0x1] }
 0x3ae   : > { %7085 = vst [vmem:[#allocation2 + $0xcc] sm:$0xf] %v7081_v46  ;;  %v7083_v47 = vld [vmem:[#allocation2 + $0xbc] sm:$0x1]  ;;  %v7089_v34 = vld [vmem:[#allocation2 + $0xc] sm:$0x2] }
 0x3af   : > { %7078 = vst [vmem:[#allocation2 + $0x4] sm:$0xf] %v7075_v62  ;;  %v12131_v37 = vrot.slane %v7089_v34, 9  ;;  %v7184_v13 = vld [vmem:[#allocation2 + $0xc] sm:$0x1] }
 0x3b0   : > { %7086 = vst [vmem:[#allocation2 + $0xd0] sm:$0xf] %v7082_v45  ;;  %v7090_v18 = vld [vmem:[#allocation2 + $0x18] sm:$0x2]  ;;  %v7187_v41 = vld [vmem:[#allocation2 + $0x18] sm:$0x1] }
 0x3b1   : > { %7079 = vst [vmem:[#allocation2 + $0x8] sm:$0x1] %v7076_v16  ;;  %v7185_v33 = vsel %vm16273_vm4, %v12131_v37, %v7184_v13  ;;  %v12132_v4 = vrot.slane %v7090_v18, 9  ;;  %v7091_v31 = vld [vmem:[#allocation2 + $0x24] sm:$0x2] }
 0x3b2   : > { %7087 = vst [vmem:[#allocation2 + $0xd4] sm:$0x1] %v7083_v47  ;;  %v12133_v28 = vrot.slane %v7091_v31, 9  ;;  %v7190_v32 = vld [vmem:[#allocation2 + $0x24] sm:$0x1] }
 0x3b3   : > { %7186 = vst [vmem:[#allocation2 + $0xc] sm:$0x1] %v7185_v33  ;;  %v7188_v25 = vsel %vm16273_vm4, %v12132_v4, %v7187_v41  ;;  %v7092_v14 = vld [vmem:[#allocation2 + $0x30] sm:$0x2]  ;;  %v7193_v24 = vld [vmem:[#allocation2 + $0x30] sm:$0x1] }
 0x3b4   : > { %v7088_v44 = vld [vmem:[#allocation2] sm:$0x2]  ;;  %v7181_v59 = vld [vmem:[#allocation2] sm:$0x1]  ;;  %7189 = vst [vmem:[#allocation2 + $0x18] sm:$0x1] %v7188_v25  ;;  %v7191_v48 = vsel %vm16273_vm4, %v12133_v28, %v7190_v32 }
 0x3b5   : > { %v12130_v38 = vrot.slane %v7088_v44, 9  ;;  %v7105_v61 = vld [vmem:[#allocation2 + $0xcc] sm:$0x2]  ;;  %v7232_v26 = vld [vmem:[#allocation2 + $0xcc] sm:$0x1]  ;;  %v12134_v7 = vrot.slane %v7092_v14, 9 }
 0x3b6   : > { %v12147_v49 = vrot.slane %v7105_v61, 9  ;;  %7192 = vst [vmem:[#allocation2 + $0x24] sm:$0x1] %v7191_v48  ;;  %v7093_v22 = vld [vmem:[#allocation2 + $0x3c] sm:$0x2] }
 0x3b7   : > { %v7182_v10 = vsel %vm16273_vm4, %v12130_v38, %v7181_v59  ;;  %v7194_v19 = vsel %vm16273_vm4, %v12134_v7, %v7193_v24  ;;  %v12135_v6 = vrot.slane %v7093_v22, 9  ;;  %v7196_v27 = vld [vmem:[#allocation2 + $0x3c] sm:$0x1]  ;;  %v7094_v50 = vld [vmem:[#allocation2 + $0x48] sm:$0x2] }
 0x3b8   : > { %7183 = vst [vmem:[#allocation2] sm:$0x1] %v7182_v10  ;;  %v7233_v23 = vsel %vm16273_vm4, %v12147_v49, %v7232_v26  ;;  %v12136_v3 = vrot.slane %v7094_v50, 9  ;;  %v7199_v15 = vld [vmem:[#allocation2 + $0x48] sm:$0x1] }
 0x3b9   : > { %7234 = vst [vmem:[#allocation2 + $0xcc] sm:$0x1] %v7233_v23  ;;  %v7197_v53 = vsel %vm16273_vm4, %v12135_v6, %v7196_v27  ;;  %v7095_v60 = vld [vmem:[#allocation2 + $0x54] sm:$0x2]  ;;  %v7202_v17 = vld [vmem:[#allocation2 + $0x54] sm:$0x1] }
 0x3ba   : > { %7195 = vst [vmem:[#allocation2 + $0x30] sm:$0x1] %v7194_v19  ;;  %v7200_v43 = vsel %vm16273_vm4, %v12136_v3, %v7199_v15  ;;  %v12137_v40 = vrot.slane %v7095_v60, 9  ;;  %v7096_v36 = vld [vmem:[#allocation2 + $0x60] sm:$0x2] }
 0x3bb   : > { %7198 = vst [vmem:[#allocation2 + $0x3c] sm:$0x1] %v7197_v53  ;;  %v12138_v52 = vrot.slane %v7096_v36, 9  ;;  %v7205_v1 = vld [vmem:[#allocation2 + $0x60] sm:$0x1] }
 0x3bc   : > { %7201 = vst [vmem:[#allocation2 + $0x48] sm:$0x1] %v7200_v43  ;;  %v7203_v0 = vsel %vm16273_vm4, %v12137_v40, %v7202_v17  ;;  %v7097_v29 = vld [vmem:[#allocation2 + $0x6c] sm:$0x2]  ;;  %v7208_v20 = vld [vmem:[#allocation2 + $0x6c] sm:$0x1] }
 0x3bd   : > { %7204 = vst [vmem:[#allocation2 + $0x54] sm:$0x1] %v7203_v0  ;;  %v7206_v55 = vsel %vm16273_vm4, %v12138_v52, %v7205_v1  ;;  %v12139_v42 = vrot.slane %v7097_v29, 9  ;;  %v7098_v21 = vld [vmem:[#allocation2 + $0x78] sm:$0x2] }
 0x3be   : > { %7207 = vst [vmem:[#allocation2 + $0x60] sm:$0x1] %v7206_v55  ;;  %v12140_v63 = vrot.slane %v7098_v21, 9  ;;  %v7211_v35 = vld [vmem:[#allocation2 + $0x78] sm:$0x1]  ;;  %v16390_v21 = vmul.f32 0.00390625, %v17403_v11 }
 0x3bf   : > { %v7209_v57 = vsel %vm16273_vm4, %v12139_v42, %v7208_v20  ;;  %v7099_v8 = vld [vmem:[#allocation2 + $0x84] sm:$0x2]  ;;  %v7214_v30 = vld [vmem:[#allocation2 + $0x84] sm:$0x1]  ;;  %v7100_v54 = vld [vmem:[#allocation2 + $0x90] sm:$0x2] }
 0x3c0   : > { %7210 = vst [vmem:[#allocation2 + $0x6c] sm:$0x1] %v7209_v57  ;;  %v7212_v58 = vsel %vm16273_vm4, %v12140_v63, %v7211_v35  ;;  %v12141_v56 = vrot.slane %v7099_v8, 9  ;;  %v12142_v9 = vrot.slane %v7100_v54, 9  ;;  %v7217_v12 = vld [vmem:[#allocation2 + $0x90] sm:$0x1] }
 0x3c1   : > { %7213 = vst [vmem:[#allocation2 + $0x78] sm:$0x1] %v7212_v58  ;;  %v7101_v46 = vld [vmem:[#allocation2 + $0x9c] sm:$0x2]  ;;  %v7220_v62 = vld [vmem:[#allocation2 + $0x9c] sm:$0x1] }
 0x3c2   : > { %v7215_v45 = vsel %vm16273_vm4, %v12141_v56, %v7214_v30  ;;  %v7218_v16 = vsel %vm16273_vm4, %v12142_v9, %v7217_v12  ;;  %v12143_v47 = vrot.slane %v7101_v46, 9  ;;  %v7102_v34 = vld [vmem:[#allocation2 + $0xa8] sm:$0x2]  ;;  %v7223_v37 = vld [vmem:[#allocation2 + $0xa8] sm:$0x1] }
 0x3c3   : > { %7216 = vst [vmem:[#allocation2 + $0x84] sm:$0x1] %v7215_v45  ;;  %v12144_v13 = vrot.slane %v7102_v34, 9  ;;  %v7103_v18 = vld [vmem:[#allocation2 + $0xb4] sm:$0x2] }
 0x3c4   : > { %7219 = vst [vmem:[#allocation2 + $0x90] sm:$0x1] %v7218_v16  ;;  %v7221_v41 = vsel %vm16273_vm4, %v12143_v47, %v7220_v62  ;;  %v12145_v33 = vrot.slane %v7103_v18, 9  ;;  %v7226_v4 = vld [vmem:[#allocation2 + $0xb4] sm:$0x1] }
 0x3c5   : > { %7222 = vst [vmem:[#allocation2 + $0x9c] sm:$0x1] %v7221_v41  ;;  %v7224_v31 = vsel %vm16273_vm4, %v12144_v13, %v7223_v37  ;;  %v7104_v28 = vld [vmem:[#allocation2 + $0xc0] sm:$0x2]  ;;  %v7229_v32 = vld [vmem:[#allocation2 + $0xc0] sm:$0x1]  ;;  %v7382_v13 = vmul.f32 %v16390_v21, %v17403_v11 }
 0x3c6   : > { %7225 = vst [vmem:[#allocation2 + $0xa8] sm:$0x1] %v7224_v31  ;;  %v7227_v25 = vsel %vm16273_vm4, %v12145_v33, %v7226_v4  ;;  %v12146_v14 = vrot.slane %v7104_v28, 9  ;;  %v7235_v24 = vld [vmem:[#allocation2 + $0x4] sm:$0x8] }
 0x3c7   : > { %7228 = vst [vmem:[#allocation2 + $0xb4] sm:$0x1] %v7227_v25  ;;  %v12148_v59 = vrot.slane %v7235_v24, 11  ;;  %v7327_v48 = vld [vmem:[#allocation2 + $0x8] sm:$0x1] }
 0x3c8   : > { %v7230_v38 = vsel %vm16273_vm4, %v12146_v14, %v7229_v32  ;;  %v7236_v61 = vld [vmem:[#allocation2 + $0x10] sm:$0x8]  ;;  %v7330_v26 = vld [vmem:[#allocation2 + $0x14] sm:$0x1]  ;;  %v7237_v7 = vld [vmem:[#allocation2 + $0x1c] sm:$0x8] }
 0x3c9   : > { %7231 = vst [vmem:[#allocation2 + $0xc0] sm:$0x1] %v7230_v38  ;;  %v7328_v49 = vsel %vm16371_vm0, %v12148_v59, %v7327_v48  ;;  %v12149_v22 = vrot.slane %v7236_v61, 11  ;;  %v12150_v10 = vrot.slane %v7237_v7, 11  ;;  %v7333_v19 = vld [vmem:[#allocation2 + $0x20] sm:$0x1]  ;;  %v7383_v59 = vsub.f32 %v17404_v39, %v7382_v13 }
 0x3ca   : > { %7329 = vst [vmem:[#allocation2 + $0x8] sm:$0x1] %v7328_v49  ;;  %v7238_v6 = vld [vmem:[#allocation2 + $0x28] sm:$0x8]  ;;  %v7336_v27 = vld [vmem:[#allocation2 + $0x2c] sm:$0x1] }
 0x3cb   : > { %v7331_v50 = vsel %vm16371_vm0, %v12149_v22, %v7330_v26  ;;  %v7334_v2 = vsel %vm16371_vm0, %v12150_v10, %v7333_v19  ;;  %v12151_v23 = vrot.slane %v7238_v6, 11  ;;  %v7239_v3 = vld [vmem:[#allocation2 + $0x34] sm:$0x8]  ;;  %v7339_v15 = vld [vmem:[#allocation2 + $0x38] sm:$0x1] }
 0x3cc   : > { %7332 = vst [vmem:[#allocation2 + $0x14] sm:$0x1] %v7331_v50  ;;  %v12152_v53 = vrot.slane %v7239_v3, 11  ;;  %v7240_v60 = vld [vmem:[#allocation2 + $0x40] sm:$0x8] }
 0x3cd   : > { %7335 = vst [vmem:[#allocation2 + $0x20] sm:$0x1] %v7334_v2  ;;  %v7337_v17 = vsel %vm16371_vm0, %v12151_v23, %v7336_v27  ;;  %v12153_v43 = vrot.slane %v7240_v60, 11  ;;  %v7342_v40 = vld [vmem:[#allocation2 + $0x44] sm:$0x1] }
 0x3ce   : > { %7338 = vst [vmem:[#allocation2 + $0x2c] sm:$0x1] %v7337_v17  ;;  %v7340_v36 = vsel %vm16371_vm0, %v12152_v53, %v7339_v15  ;;  %v7241_v52 = vld [vmem:[#allocation2 + $0x4c] sm:$0x8]  ;;  %v7345_v1 = vld [vmem:[#allocation2 + $0x50] sm:$0x1] }
 0x3cf   : > { %7341 = vst [vmem:[#allocation2 + $0x38] sm:$0x1] %v7340_v36  ;;  %v7343_v0 = vsel %vm16371_vm0, %v12153_v43, %v7342_v40  ;;  %v12154_v29 = vrot.slane %v7241_v52, 11  ;;  %v7242_v20 = vld [vmem:[#allocation2 + $0x58] sm:$0x8] }
 0x3d0   : > { %7344 = vst [vmem:[#allocation2 + $0x44] sm:$0x1] %v7343_v0  ;;  %v12155_v55 = vrot.slane %v7242_v20, 11  ;;  %v7348_v42 = vld [vmem:[#allocation2 + $0x5c] sm:$0x1] }
 0x3d1   : > { %v7346_v63 = vsel %vm16371_vm0, %v12154_v29, %v7345_v1  ;;  %v7243_v35 = vld [vmem:[#allocation2 + $0x64] sm:$0x8]  ;;  %v7351_v57 = vld [vmem:[#allocation2 + $0x68] sm:$0x1]  ;;  %v7244_v8 = vld [vmem:[#allocation2 + $0x70] sm:$0x8] }
 0x3d2   : > { %7347 = vst [vmem:[#allocation2 + $0x50] sm:$0x1] %v7346_v63  ;;  %v7349_v30 = vsel %vm16371_vm0, %v12155_v55, %v7348_v42  ;;  %v12156_v54 = vrot.slane %v7243_v35, 11  ;;  %v12157_v58 = vrot.slane %v7244_v8, 11  ;;  %v7354_v56 = vld [vmem:[#allocation2 + $0x74] sm:$0x1] }
 0x3d3   : > { %7350 = vst [vmem:[#allocation2 + $0x5c] sm:$0x1] %v7349_v30  ;;  %v7245_v9 = vld [vmem:[#allocation2 + $0x7c] sm:$0x8]  ;;  %v7357_v12 = vld [vmem:[#allocation2 + $0x80] sm:$0x1] }
 0x3d4   : > { %v7352_v46 = vsel %vm16371_vm0, %v12156_v54, %v7351_v57  ;;  %v7355_v62 = vsel %vm16371_vm0, %v12157_v58, %v7354_v56  ;;  %v12158_v45 = vrot.slane %v7245_v9, 11  ;;  %v7246_v16 = vld [vmem:[#allocation2 + $0x88] sm:$0x8]  ;;  %v7360_v47 = vld [vmem:[#allocation2 + $0x8c] sm:$0x1] }
 0x3d5   : > { %7353 = vst [vmem:[#allocation2 + $0x68] sm:$0x1] %v7352_v46  ;;  %v12159_v34 = vrot.slane %v7246_v16, 11  ;;  %v7247_v37 = vld [vmem:[#allocation2 + $0x94] sm:$0x8] }
 0x3d6   : > { %7356 = vst [vmem:[#allocation2 + $0x74] sm:$0x1] %v7355_v62  ;;  %v7358_v18 = vsel %vm16371_vm0, %v12158_v45, %v7357_v12  ;;  %v12160_v41 = vrot.slane %v7247_v37, 11  ;;  %v7363_v33 = vld [vmem:[#allocation2 + $0x98] sm:$0x1] }
 0x3d7   : > { %7359 = vst [vmem:[#allocation2 + $0x80] sm:$0x1] %v7358_v18  ;;  %v7361_v4 = vsel %vm16371_vm0, %v12159_v34, %v7360_v47  ;;  %v7248_v31 = vld [vmem:[#allocation2 + $0xa0] sm:$0x8]  ;;  %v7366_v28 = vld [vmem:[#allocation2 + $0xa4] sm:$0x1] }
 0x3d8   : > { %7362 = vst [vmem:[#allocation2 + $0x8c] sm:$0x1] %v7361_v4  ;;  %v7364_v32 = vsel %vm16371_vm0, %v12160_v41, %v7363_v33  ;;  %v12161_v25 = vrot.slane %v7248_v31, 11  ;;  %v7249_v14 = vld [vmem:[#allocation2 + $0xac] sm:$0x8] }
 0x3d9   : > { %7365 = vst [vmem:[#allocation2 + $0x98] sm:$0x1] %v7364_v32  ;;  %v12162_v11 = vrot.slane %v7249_v14, 11  ;;  %v7369_v24 = vld [vmem:[#allocation2 + $0xb0] sm:$0x1] }
 0x3da   : > { %v7367_v48 = vsel %vm16371_vm0, %v12161_v25, %v7366_v28  ;;  %v7250_v38 = vld [vmem:[#allocation2 + $0xb8] sm:$0x8]  ;;  %v7372_v61 = vld [vmem:[#allocation2 + $0xbc] sm:$0x1]  ;;  %v7251_v26 = vld [vmem:[#allocation2 + $0xc4] sm:$0x8] }
 0x3db   : > { %7368 = vst [vmem:[#allocation2 + $0xa4] sm:$0x1] %v7367_v48  ;;  %v7370_v7 = vsel %vm16371_vm0, %v12162_v11, %v7369_v24  ;;  %v12163_v49 = vrot.slane %v7250_v38, 11  ;;  %v12164_v22 = vrot.slane %v7251_v26, 11  ;;  %v7375_v10 = vld [vmem:[#allocation2 + $0xc8] sm:$0x1] }
 0x3dc   : > { %7371 = vst [vmem:[#allocation2 + $0xb0] sm:$0x1] %v7370_v7  ;;  %v7252_v19 = vld [vmem:[#allocation2 + $0xd0] sm:$0x8]  ;;  %v7378_v6 = vld [vmem:[#allocation2 + $0xd4] sm:$0x1] }
 0x3dd   : > { %v7373_v27 = vsel %vm16371_vm0, %v12163_v49, %v7372_v61  ;;  %v7376_v39 = vsel %vm16371_vm0, %v12164_v22, %v7375_v10  ;;  %v12165_v50 = vrot.slane %v7252_v19, 11  ;;  %v7384_v2 = vmul.f32 0.003921569, %v7383_v59 }
 0x3de   : > { %7374 = vst [vmem:[#allocation2 + $0xbc] sm:$0x1] %v7373_v27 }
 0x3df   : > { %7377 = vst [vmem:[#allocation2 + $0xc8] sm:$0x1] %v7376_v39  ;;  %v7379_v23 = vsel %vm16371_vm0, %v12165_v50, %v7378_v6  ;;  %v7385_v3 = vmax.f32 %v7384_v2, 0.0 }
 0x3e0   : > { %7380 = vst [vmem:[#allocation2 + $0xd4] sm:$0x1] %v7379_v23 }
 0x3e1   : > { %13346 = vrsqrt.f32 %v7385_v3  ;;  %vm7393_vm2 = vcmp.eq.f32.partialorder %v7385_v3, inf  ;;  %v7396_v36 = vand.u32 2147483648, %v7385_v3  ;;  %vm7395_vm5 = vcmp.eq.f32.partialorder %v7385_v3, 0.0 }
 0x3e7   : > { %v13347_v15 = vpop.eup %13346 }
 0x3e8   : > { %v7387_v53 = vmul.f32 %v13347_v15, %v7385_v3 }
 0x3ea   : > { %v7388_v60 = vmul.f32 %v13347_v15, %v7387_v53 }
 0x3ec   : > { %v7389_v17 = vmul.f32 0.5, %v7388_v60 }
 0x3ee   : > { %v7390_v43 = vsub.f32 1.5, %v7389_v17 }
 0x3f0   : > { %v7391_v40 = vmul.f32 %v13347_v15, %v7390_v43 }
 0x3f2   : > { %v7392_v52 = vmul.f32 %v7391_v40, %v7385_v3 }
 0x3f4   : > { %v7394_v1 = vsel %vm7393_vm2, %v7385_v3, %v7392_v52 }
 0x3f5   : > { %v7397_v0 = vsel %vm7395_vm5, %v7396_v36, %v7394_v1 }
 0x3f6   : > { %v7398_v29 = vadd.f32 1e-09, %v7397_v0 }
 0x3f8   : > { %13348 = vrcp.f32 %v7398_v29 }
 0x3fe   : > { %v16419_v20 = vpop.eup %13348 }
 0x3ff LB: >> { %v13164_v44 = vld [vmem:[%s17381_s6 + $0x38] sm:$0xff]  ;;  %v13163_v42 = vld [vmem:[%s17381_s6 + $0x30] sm:$0xff]  ;;  %s13152_s13 = smul.u32 48, %s13477_s10  ;;  %v13162_v8 = vld [vmem:[%s17381_s6 + $0x28] sm:$0xff]  ;;  %s13477_s10 = sphi %s16421_s10, %s7405_s10  }
 0x400   : >> { %v13180_v55 = vld [vmem:[%s17381_s6 + $0xb8] sm:$0xff]  ;;  %13255 = vmatpush.bf16.msra.mxu1 %v13164_v44  ;;  %7510 = vmatpush.bf16.msra.mxu0 %v13164_v44  ;;  %v13179_v63 = vld [vmem:[%s17381_s6 + $0xb0] sm:$0xff]  ;;  %v13178_v30 = vld [vmem:[%s17381_s6 + $0xa8] sm:$0xff] }
 0x401   : >> { %7904 = vmatpush.bf16.msra.mxu2 %v13180_v55  ;;  %v13192_v35 = vld [vmem:[%s17381_s6 + $0xf8] sm:$0xff]  ;;  %v13191_v57 = vld [vmem:[%s17381_s6 + $0xf0] sm:$0xff]  ;;  %v13190_v54 = vld [vmem:[%s17381_s6 + $0xe8] sm:$0xff]  ;;  %s16460_s1 = scalar_lea.vmem [#allocation2], %s13152_s13  ;;  %s17419_s13 = scalar_lea.vmem [#allocation4], %s13578_s18 }
 0x402   : >> { %8042 = vmatpush.bf16.msra.mxu3 %v13192_v35  ;;  %v13161_v58 = vld [vmem:[%s17381_s6 + $0x20] sm:$0xff]  ;;  %v13160_v46 = vld [vmem:[%s17381_s6 + $0x18] sm:$0xff]  ;;  %v16476_v16 = vld [vmem:[%s16460_s1 + $0x8] sm:$0x1] }
 0x403   : >> { %v13177_v56 = vld [vmem:[%s17381_s6 + $0xa0] sm:$0xff]  ;;  %v13176_v62 = vld [vmem:[%s17381_s6 + $0x98] sm:$0xff]  ;;  %v13159_v37 = vld [vmem:[%s17381_s6 + $0x10] sm:$0xff]  ;;  %v7800_v33 = vrot.slane %v16476_v16, 5 }
 0x404   : >> { %13256 = vmatpush.bf16.msra.mxu1 %v13163_v42  ;;  %7511 = vmatpush.bf16.msra.mxu0 %v13163_v42  ;;  %v16463_v9 = vld [vmem:[%s16460_s1 + $0x4] sm:$0xf]  ;;  %v7776_v47 = vld [vmem:[%s16460_s1] sm:$0xe]  ;;  %v13188_v34 = vld [vmem:[%s17381_s6 + $0xd8] sm:$0xff] }
 0x405   : >> { %7905 = vmatpush.bf16.msra.mxu2 %v13179_v63  ;;  %v13189_v12 = vld [vmem:[%s17381_s6 + $0xe0] sm:$0xff]  ;;  %v7797_v45 = vrot.slane %v16463_v9, 5  ;;  %v13175_v13 = vld [vmem:[%s17381_s6 + $0x90] sm:$0xff]  ;;  %v12265_v18 = vrot.slane %v7776_v47, 9  ;;  %v13158_v31 = vld [vmem:[%s17381_s6 + $0x8] sm:$0xff]  ;;  %v7576_v6 = vshrl.u32 %v16463_v9, 16 }
 0x406   : >> { %8043 = vmatpush.bf16.msra.mxu3 %v13191_v57  ;;  %v13187_v4 = vld [vmem:[%s17381_s6 + $0xd0] sm:$0xff]  ;;  %v13174_v28 = vld [vmem:[%s17381_s6 + $0x88] sm:$0xff]  ;;  %v13157_v11 = vld [vmem:[%s17381_s6] sm:$0xff]  ;;  %v7572_v15 = vshll.u32 %v16463_v9, 16 }
 0x407   : >> { %v7799_v41 = vrot.slane %v7797_v45, 4  ;;  %v7798_v32 = vsel %vm14171_vm14, %v12265_v18, %v7797_v45  ;;  %v13186_v14 = vld [vmem:[%s17381_s6 + $0xc8] sm:$0xff]  ;;  %v16509_v48 = vld [vmem:[%s16460_s1 + $0x10] sm:$0xf]  ;;  %v13172_v38 = vld [vmem:[%s17381_s6 + $0x78] sm:$0xff]  ;;  %v7578_v42 = vrot.slane %v7576_v6, 4 }
 0x408   : >> { %13257 = vmatpush.bf16.msra.mxu1 %v13162_v8  ;;  %7512 = vmatpush.bf16.msra.mxu0 %v13162_v8  ;;  %v7840_v24 = vunpack.c.l.b16 %v7798_v32  ;;  %v13173_v61 = vld [vmem:[%s17381_s6 + $0x80] sm:$0xff]  ;;  %v13200_v26 = vld [vmem:[%s17381_s6 + $0x138] sm:$0xff]  ;;  %v7804_v10 = vrot.slane %v16509_v48, 5  ;;  %v13171_v19 = vld [vmem:[%s17381_s6 + $0x70] sm:$0xff]  ;;  %v16557_v55 = vrot.slane %v7572_v15, 5 }
 0x409   : >> { %7906 = vmatpush.bf16.msra.mxu2 %v13178_v30  ;;  %v7801_v25 = vsel %vm14171_vm14, %v7799_v41, %v7800_v33  ;;  %v13220_v7 = vld [vmem:[%s17381_s6 + $0x1b8] sm:$0xff]  ;;  %v13153_v22 = vld [vmem:[%s16460_s1] sm:$0xff]  ;;  %v16534_v50 = vld [vmem:[%s16460_s1 + $0x14] sm:$0x1] }
 0x40a   : >> { %8044 = vmatpush.bf16.msra.mxu3 %v13190_v54  ;;  %v7841_v59 = vunpack.c.l.b16 %v7801_v25  ;;  %v13155_v49 = vld [vmem:[%s16460_s1 + $0x18] sm:$0xff]  ;;  %v13185_v39 = vld [vmem:[%s17381_s6 + $0xc0] sm:$0xff]  ;;  %v7777_v2 = vld [vmem:[%s16460_s1 + $0xc] sm:$0xe]  ;;  %v7806_v40 = vrot.slane %v7804_v10, 4  ;;  %v7807_v1 = vrot.slane %v16534_v50, 5  ;;  %v7579_v47 = vor.u32 %v7578_v42, %v16557_v55 }
 0x40b   : >> { %v13228_v23 = vld [vmem:[%s17381_s6 + $0x1f8] sm:$0xff]  ;;  %v7547_v3 = vld [vmem:[%s16460_s1] sm:$0xf]  ;;  %v13199_v53 = vld [vmem:[%s17381_s6 + $0x130] sm:$0xff]  ;;  %v12266_v52 = vrot.slane %v7777_v2, 9 }
 0x40c   : >> { %13258 = vmatpush.bf16.msra.mxu1 %v13161_v58  ;;  %7513 = vmatpush.bf16.msra.mxu0 %v13161_v58  ;;  %v7848_v27 = vpack.c.b16 %v7841_v59, %v7840_v24  ;;  %v13219_v60 = vld [vmem:[%s17381_s6 + $0x1b0] sm:$0xff]  ;;  %v12391_v17 = vld [vmem:[%s16460_s1 + $0xc] sm:$0xf]  ;;  %v7563_v0 = vshrl.u32 %v7547_v3, 16  ;;  %v7566_v29 = vshll.u32 %v7547_v3, 16  ;;  %v13217_v33 = vld [vmem:[%s17381_s6 + $0x1a0] sm:$0xff] }
 0x40d   : >> { %7907 = vmatpush.bf16.msra.mxu2 %v13177_v56  ;;  %v13181_v43 = vld [vmem:[%s16460_s1 + $0xc] sm:$0xff]  ;;  %v8092_v63 = vshrl.u32 %v12391_v17, 16  ;;  %v8095_v35 = vshll.u32 %v12391_v17, 16  ;;  %v7582_v56 = vshll.u32 %v16476_v16, 16  ;;  %v7805_v9 = vsel %vm14171_vm14, %v12266_v52, %v7804_v10  ;;  %v13168_v25 = vld [vmem:[%s17381_s6 + $0x58] sm:$0xff] }
 0x40e   : >> { %8045 = vmatpush.bf16.msra.mxu3 %v13189_v12  ;;  %v16551_v36 = vld [vmem:[%s16460_s1 + $0x10] sm:$0xf]  ;;  %v13170_v44 = vld [vmem:[%s17381_s6 + $0x68] sm:$0xff]  ;;  %v7808_v12 = vsel %vm14171_vm14, %v7806_v40, %v7807_v1  ;;  %v7568_v45 = vrot.slane %v7566_v29, 5  ;;  %v16611_v6 = vld [vmem:[%s16460_s1 + $0x20] sm:$0x1] }
 0x40f   : >> { %v13227_v57 = vld [vmem:[%s17381_s6 + $0x1f0] sm:$0xff]  ;;  %v13198_v8 = vld [vmem:[%s17381_s6 + $0x128] sm:$0xff]  ;;  %v8101_v54 = vshll.u32 %v16551_v36, 16  ;;  %v8105_v58 = vshrl.u32 %v16551_v36, 16  ;;  %v7843_v32 = vunpack.c.l.b16 %v7808_v12  ;;  %v7584_v24 = vrot.slane %v7582_v56, 5 }
 0x410   : >> { %13259 = vmatpush.bf16.msra.mxu1 %v13160_v46  ;;  %7514 = vmatpush.bf16.msra.mxu0 %v13160_v46  ;;  %v13218_v30 = vld [vmem:[%s17381_s6 + $0x1a8] sm:$0xff]  ;;  %v7565_v46 = vrot.slane %v7563_v0, 4  ;;  %v13167_v10 = vld [vmem:[%s17381_s6 + $0x50] sm:$0xff]  ;;  %v12394_v15 = vld [vmem:[%s16460_s1 + $0x18] sm:$0xf]  ;;  %v7596_v52 = vshll.u32 %v16509_v48, 16 }
 0x411   : >> { %7908 = vmatpush.bf16.msra.mxu2 %v13176_v62  ;;  %v13169_v62 = vld [vmem:[%s17381_s6 + $0x60] sm:$0xff]  ;;  %v13226_v16 = vld [vmem:[%s17381_s6 + $0x1e8] sm:$0xff]  ;;  %v16585_v18 = vrot.slane %v8101_v54, 5  ;;  %v8107_v41 = vrot.slane %v8105_v58, 4  ;;  %v7814_v0 = vrot.slane %v16611_v6, 5  ;;  %v7600_v29 = vshrl.u32 %v16509_v48, 16 }
 0x412   : >> { %8046 = vmatpush.bf16.msra.mxu3 %v13188_v34  ;;  %v8094_v34 = vrot.slane %v8092_v63, 4  ;;  %v7550_v3 = vld [vmem:[%s16460_s1 + $0xc] sm:$0xf]  ;;  %v16629_v42 = vld [vmem:[%s16460_s1 + $0x1c] sm:$0xf]  ;;  %v13215_v56 = vld [vmem:[%s17381_s6 + $0x190] sm:$0xff] }
 0x413   : >> { %v7587_v63 = vshrl.u32 %v7550_v3, 16  ;;  %v13166_v48 = vld [vmem:[%s17381_s6 + $0x48] sm:$0xff] }
 0x414   : >> { %13260 = vmatpush.bf16.msra.mxu1 %v13159_v37  ;;  %7515 = vmatpush.bf16.msra.mxu0 %v13159_v37  ;;  %v8097_v37 = vrot.slane %v8095_v35, 5  ;;  %v7590_v35 = vshll.u32 %v7550_v3, 16 }
 0x415   : >> { %7909 = vmatpush.bf16.msra.mxu2 %v13175_v13  ;;  %v13197_v13 = vld [vmem:[%s17381_s6 + $0x120] sm:$0xff] }
 0x416   : >> { %8047 = vmatpush.bf16.msra.mxu3 %v13187_v4  ;;  %v16591_v4 = vld [vmem:[%s16460_s1 + $0x14] sm:$0x1]  ;;  %v8098_v59 = vor.u32 %v8097_v37, %v8094_v34  ;;  %v16662_v37 = vrot.slane %v7596_v52, 5 }
 0x418   : >> { %13261 = vmatpush.bf16.msra.mxu1 %v13158_v31  ;;  %7516 = vmatpush.bf16.msra.mxu0 %v13158_v31  ;;  %v16594_v31 = vld [vmem:[%s16460_s1 + $0x1c] sm:$0xf] }
 0x419   : >> { %7910 = vmatpush.bf16.msra.mxu2 %v13174_v28  ;;  %v7842_v28 = vunpack.c.l.b16 %v7805_v9  ;;  %v13194_v9 = vld [vmem:[%s17381_s6 + $0x108] sm:$0xff]  ;;  %v7624_v52 = vshrl.u32 %v16594_v31, 16 }
 0x41a   : >> { %8048 = vmatpush.bf16.msra.mxu3 %v13186_v14  ;;  %v7569_v14 = vor.u32 %v7568_v45, %v7565_v46  ;;  %v13224_v45 = vld [vmem:[%s17381_s6 + $0x1d8] sm:$0xff] }
 0x41c   : >> { %13262 = vmatpush.bf16.msra.mxu1 %v13157_v11  ;;  %7517 = vmatpush.bf16.msra.mxu0 %v13157_v11  ;;  %v7580_v11 = vrot.slane %v7579_v47, 4 }
 0x41d   : >> { %7911 = vmatpush.bf16.msra.mxu2 %v13173_v61  ;;  %v8108_v61 = vor.u32 %v8107_v41, %v16585_v18 }
 0x41e   : >> { %8049 = vmatpush.bf16.msra.mxu3 %v13185_v39  ;;  %v7570_v39 = vrot.slane %v7569_v14, 4  ;;  %v7585_v2 = vsel %vm14077_vm11, %v7580_v11, %v7584_v24  ;;  %v7606_v11 = vshll.u32 %v16534_v50, 16  ;;  %v13208_v24 = vld [vmem:[%s17381_s6 + $0x178] sm:$0xff] }
 0x41f   : >> { %7528 = vmatmul.bf16.vlgmr.msra.gmra.mxu1 %v13155_v49  ;;  %7518 = vmatmul.bf16.vlgmr.msra.gmra.mxu0 %v13153_v22  ;;  %v13156_v49 = vld [vmem:[%s16460_s1 + $0x24] sm:$0xff]  ;;  %v13154_v22 = vld [vmem:[%s16460_s1 + $0xc] sm:$0xff]  ;;  %v8109_v17 = vrot.slane %v8108_v61, 4  ;;  %v16640_v58 = vunpack.c.l.b16 %v7585_v2  ;;  %v16682_v50 = vld [vmem:[%s17381_s6 + $0x238] sm:$0xff] }
 0x420   : >> { %7739 = vmatpush.bf16.msrb.mxu1 %v13172_v38  ;;  %8268 = vmatpush.bf16.msrb.mxu0 %v13200_v26  ;;  %v13196_v38 = vld [vmem:[%s17381_s6 + $0x118] sm:$0xff]  ;;  %v8111_v26 = vshll.u32 %v16591_v4, 16  ;;  %v7575_v54 = vsel %vm14077_vm11, %v7570_v39, %v16557_v55  ;;  %v8125_v55 = vshll.u32 %v16629_v42, 16  ;;  %v12397_v39 = vld [vmem:[%s16460_s1 + $0x24] sm:$0xf]  ;;  %v16688_v3 = vrot.slane %v7606_v11, 5 }
 0x421   : >> { %8568 = vmatpush.bf16.msrb.mxu2 %v13220_v7  ;;  %8050 = vmatmul.bf16.vlgmr.msra.gmra.mxu3 %v13181_v43  ;;  %v7811_v7 = vrot.slane %v16594_v31, 5  ;;  %v13213_v11 = vld [vmem:[%s17381_s6 + $0x180] sm:$0xff] }
 0x422   : >> { %7912 = vmatmul.bf16.vlgmr.msra.gmra.mxu2 %v7848_v27  ;;  %8794 = vmatpush.bf16.msrb.mxu3 %v13228_v23  ;;  %v7778_v27 = vld [vmem:[%s16460_s1 + $0x18] sm:$0xe]  ;;  %v8099_v23 = vrot.slane %v8098_v59, 4  ;;  %v8113_v43 = vrot.slane %v8111_v26, 5  ;;  %v13193_v59 = vld [vmem:[%s17381_s6 + $0x100] sm:$0xff] }
 0x423   : >> { %v7813_v40 = vrot.slane %v7811_v7, 4  ;;  %v12267_v1 = vrot.slane %v7778_v27, 9  ;;  %v16675_v26 = vld [vmem:[%s16460_s1 + $0x20] sm:$0x1]  ;;  %v7553_v27 = vld [vmem:[%s16460_s1 + $0x18] sm:$0xf] }
 0x424   : >> { %7740 = vmatpush.bf16.msrb.mxu1 %v13171_v19  ;;  %8269 = vmatpush.bf16.msrb.mxu0 %v13199_v53  ;;  %v7849_v19 = vpack.c.b16 %v7843_v32, %v7842_v28  ;;  %v13195_v53 = vld [vmem:[%s17381_s6 + $0x110] sm:$0xff]  ;;  %v8104_v12 = vsel %vm14077_vm11, %v8099_v23, %v16585_v18  ;;  %v8114_v46 = vsel %vm14077_vm11, %v8109_v17, %v8113_v43  ;;  %v7592_v18 = vrot.slane %v7590_v35, 5  ;;  %v13165_v28 = vld [vmem:[%s17381_s6 + $0x40] sm:$0xff] }
 0x425   : >> { %8569 = vmatpush.bf16.msrb.mxu2 %v13219_v60  ;;  %v13182_v60 = vld [vmem:[%s16460_s1 + $0x18] sm:$0xff]  ;;  %v7812_v47 = vsel %vm14171_vm14, %v12267_v1, %v7811_v7  ;;  %v7815_v34 = vsel %vm14171_vm14, %v7813_v40, %v7814_v0  ;;  %v7675_v32 = vunpack.c.l.b16 %v7575_v54  ;;  %v8205_v14 = vunpack.c.l.b16 %v8114_v46  ;;  %v13207_v17 = vld [vmem:[%s17381_s6 + $0x170] sm:$0xff]  ;;  %v16701_v1 = vld [vmem:[%s16460_s1 + $0x28] sm:$0xf] }
 0x426   : >> { %8795 = vmatpush.bf16.msrb.mxu3 %v13227_v57  ;;  %v8116_v57 = vshrl.u32 %v12394_v15, 16  ;;  %v7845_v61 = vunpack.c.l.b16 %v7815_v34  ;;  %v16677_v7 = vrot.slane %v8125_v55, 5  ;;  %v7620_v40 = vshll.u32 %v16594_v31, 16  ;;  %v13206_v31 = vld [vmem:[%s17381_s6 + $0x168] sm:$0xff]  ;;  %v7779_v46 = vld [vmem:[%s16460_s1 + $0x24] sm:$0xe] }
 0x427   : >> { %v7683_v2 = vpack.c.b16 %v16640_v58, %v7675_v32  ;;  %v7611_v0 = vshrl.u32 %v7553_v27, 16  ;;  %v16714_v58 = vld [vmem:[%s16460_s1 + $0x2c] sm:$0x1] }
 0x428   : >> { %7741 = vmatpush.bf16.msrb.mxu1 %v13170_v44  ;;  %8270 = vmatpush.bf16.msrb.mxu0 %v13198_v8  ;;  %v13216_v44 = vld [vmem:[%s17381_s6 + $0x198] sm:$0xff]  ;;  %v8119_v8 = vshll.u32 %v12394_v15, 16  ;;  %v8118_v41 = vrot.slane %v8116_v57, 4  ;;  %v8135_v15 = vshll.u32 %v16675_v26, 16  ;;  %v16719_v55 = vrot.slane %v7620_v40, 5  ;;  %v16735_v32 = vld [vmem:[%s17381_s6 + $0x228] sm:$0xff] }
 0x429   : >> { %8570 = vmatpush.bf16.msrb.mxu2 %v13218_v30  ;;  %v13225_v30 = vld [vmem:[%s17381_s6 + $0x1e0] sm:$0xff]  ;;  %v7613_v34 = vrot.slane %v7611_v0, 4 }
 0x42a   : >> { %8796 = vmatpush.bf16.msrb.mxu3 %v13226_v16  ;;  %v7602_v16 = vrot.slane %v7600_v29, 4  ;;  %v7614_v29 = vshll.u32 %v7553_v27, 16  ;;  %v8137_v54 = vrot.slane %v8135_v15, 5 }
 0x42c   : >> { %7742 = vmatpush.bf16.msrb.mxu1 %v13169_v62  ;;  %8271 = vmatpush.bf16.msrb.mxu0 %v13197_v13  ;;  %v8129_v62 = vshrl.u32 %v16629_v42, 16  ;;  %v7589_v13 = vrot.slane %v7587_v63, 4  ;;  %v8143_v63 = vshll.u32 %v12397_v39, 16 }
 0x42d   : >> { %8571 = vmatpush.bf16.msrb.mxu2 %v13217_v33  ;;  %v8121_v33 = vrot.slane %v8119_v8, 5 }
 0x42e   : >> { %8797 = vmatpush.bf16.msrb.mxu3 %v13225_v30 }
 0x42f   : >> { %7533 = vmatmul.bf16.gmra.mxu1 %v13156_v49  ;;  %7523 = vmatmul.bf16.gmra.mxu0 %v13154_v22  ;;  %v8131_v49 = vrot.slane %v8129_v62, 4  ;;  %v7593_v22 = vor.u32 %v7592_v18, %v7589_v13  ;;  %v7626_v62 = vrot.slane %v7624_v52, 4  ;;  %v8145_v18 = vrot.slane %v8143_v63, 5  ;;  %v13204_v52 = vld [vmem:[%s17381_s6 + $0x158] sm:$0xff] }
 0x430   : >> { %7743 = vmatpush.bf16.msrb.mxu1 %v13168_v25  ;;  %8272 = vmatpush.bf16.msrb.mxu0 %v13196_v38  ;;  %v8204_v25 = vunpack.c.l.b16 %v8104_v12  ;;  %v7844_v38 = vunpack.c.l.b16 %v7812_v47  ;;  %v13183_v47 = vld [vmem:[%s16460_s1 + $0x24] sm:$0xff] }
 0x431   : >> { %8572 = vmatpush.bf16.msrb.mxu2 %v13216_v44  ;;  %8055 = vmatmul.bf16.gmra.mxu3 %v13182_v60  ;;  %v8132_v43 = vor.u32 %v8131_v49, %v16677_v7  ;;  %v8140_v44 = vshrl.u32 %v12397_v39, 16  ;;  %v7594_v35 = vrot.slane %v7593_v22, 4  ;;  %v13205_v22 = vld [vmem:[%s17381_s6 + $0x160] sm:$0xff]  ;;  %v7627_v27 = vor.u32 %v7626_v62, %v16719_v55 }
 0x432   : >> { %7917 = vmatmul.bf16.gmra.mxu2 %v7849_v19  ;;  %8798 = vmatpush.bf16.msrb.mxu3 %v13224_v45  ;;  %v8122_v19 = vor.u32 %v8121_v33, %v8118_v41  ;;  %v8212_v23 = vpack.c.b16 %v8205_v14, %v8204_v25  ;;  %v7850_v60 = vpack.c.b16 %v7845_v61, %v7844_v38  ;;  %v13214_v45 = vld [vmem:[%s17381_s6 + $0x188] sm:$0xff]  ;;  %v12268_v25 = vrot.slane %v7779_v46, 9  ;;  %v16784_v46 = vld [vmem:[%s16460_s1 + $0x1c] sm:$0xf] }
 0x433   : >> { %v8133_v12 = vrot.slane %v8132_v43, 4  ;;  %v8142_v13 = vrot.slane %v8140_v44, 4  ;;  %v7821_v14 = vrot.slane %v16714_v58, 5  ;;  %v7599_v38 = vsel %vm14077_vm11, %v7594_v35, %v16662_v37  ;;  %v12581_v35 = vld [vmem:[%s16460_s1 + $0x18] sm:$0xf] }
 0x434   : >> { %7744 = vmatpush.bf16.msrb.mxu1 %v13167_v10  ;;  %8273 = vmatpush.bf16.msrb.mxu0 %v13195_v53  ;;  %v7603_v10 = vor.u32 %v7602_v16, %v16662_v37  ;;  %v16692_v53 = vld [vmem:[%s16460_s1 + $0x28] sm:$0xf]  ;;  %v8123_v8 = vrot.slane %v8122_v19, 4  ;;  %v7616_v16 = vrot.slane %v7614_v29, 5  ;;  %v7628_v29 = vrot.slane %v7627_v27, 4 }
 0x435   : >> { %8573 = vmatpush.bf16.msrb.mxu2 %v13215_v56  ;;  %v7818_v30 = vrot.slane %v16692_v53, 5  ;;  %v8149_v56 = vshll.u32 %v16701_v1, 16  ;;  %v8138_v49 = vsel %vm14077_vm11, %v8133_v12, %v8137_v54  ;;  %v13222_v19 = vld [vmem:[%s17381_s6 + $0x1c8] sm:$0xff]  ;;  %v8146_v39 = vor.u32 %v8145_v18, %v8142_v13  ;;  %v13203_v12 = vld [vmem:[%s17381_s6 + $0x150] sm:$0xff]  ;;  %v16797_v18 = vld [vmem:[%s16460_s1 + $0x20] sm:$0x1] }
 0x436   : >> { %v7604_v57 = vrot.slane %v7603_v10, 4  ;;  %v8128_v61 = vsel %vm14077_vm11, %v8123_v8, %v16677_v7  ;;  %v16755_v10 = vld [vmem:[%s16460_s1 + $0x2c] sm:$0x1]  ;;  %v7617_v37 = vor.u32 %v7616_v16, %v7613_v34  ;;  %v7630_v7 = vshll.u32 %v16611_v6, 16 }
 0x437   : >> { %v7820_v33 = vrot.slane %v7818_v30, 4  ;;  %v8159_v6 = vshll.u32 %v16755_v10, 16  ;;  %v8206_v43 = vunpack.c.l.b16 %v8128_v61  ;;  %v8207_v40 = vunpack.c.l.b16 %v8138_v49  ;;  %v13184_v61 = vld [vmem:[%s16460_s1 + $0x30] sm:$0xff]  ;;  %v13202_v49 = vld [vmem:[%s17381_s6 + $0x148] sm:$0xff] }
 0x438   : >> { %7745 = vmatpush.bf16.msrb.mxu1 %v13166_v48  ;;  %8274 = vmatpush.bf16.msrb.mxu0 %v13194_v9  ;;  %v16708_v48 = vld [vmem:[%s17381_s6 + $0x230] sm:$0xff]  ;;  %v8153_v9 = vshrl.u32 %v16701_v1, 16  ;;  %v7609_v41 = vsel %vm14077_vm11, %v7604_v57, %v16688_v3  ;;  %v7618_v0 = vrot.slane %v7617_v37, 4  ;;  %v7632_v44 = vrot.slane %v7630_v7, 5 }
 0x439   : >> { %8574 = vmatpush.bf16.msrb.mxu2 %v13214_v45  ;;  %v7822_v3 = vsel %vm14171_vm14, %v7820_v33, %v7821_v14  ;;  %v8147_v63 = vrot.slane %v8146_v39, 4  ;;  %v8618_v54 = vshrl.u32 %v12581_v35, 16  ;;  %v8326_v16 = vrot.slane %v16591_v4, 5  ;;  %v7556_v33 = vld [vmem:[%s16460_s1 + $0x24] sm:$0xf] }
 0x43a   : >> { %v7847_v8 = vunpack.c.l.b16 %v7822_v3  ;;  %v7623_v62 = vsel %vm14077_vm11, %v7618_v0, %v16719_v55  ;;  %v7633_v45 = vsel %vm14077_vm11, %v7628_v29, %v7632_v44  ;;  %v8631_v14 = vshrl.u32 %v16784_v46, 16  ;;  %v13232_v3 = vld [vmem:[%s17381_s6 + $0x218] sm:$0xff]  ;;  %v13201_v29 = vld [vmem:[%s17381_s6 + $0x140] sm:$0xff] }
 0x43b   : >> { %v8620_v34 = vrot.slane %v8618_v54, 4  ;;  %v7635_v39 = vshrl.u32 %v7556_v33, 16 }
 0x43c   : >> { %7746 = vmatpush.bf16.msrb.mxu1 %v13165_v28  ;;  %8275 = vmatpush.bf16.msrb.mxu0 %v13193_v59  ;;  %v13223_v28 = vld [vmem:[%s17381_s6 + $0x1d0] sm:$0xff]  ;;  %v8155_v59 = vrot.slane %v8153_v9, 4  ;;  %v8213_v9 = vpack.c.b16 %v8207_v40, %v8206_v43  ;;  %v8633_v27 = vrot.slane %v8631_v14, 4  ;;  %v12451_v40 = vld [vmem:[%s16460_s1 + $0xc] sm:$0xe] }
 0x43d   : >> { %8799 = vmatpush.bf16.msrb.mxu3 %v13223_v28  ;;  %8575 = vmatpush.bf16.msrb.mxu2 %v13213_v11  ;;  %v7644_v28 = vshll.u32 %v16692_v53, 16  ;;  %v16805_v11 = vunpack.c.l.b16 %v7623_v62  ;;  %v12455_v44 = vrot.slane %v12451_v40, 9 }
 0x43f   : >> { %7747 = vmatmul.bf16.vlgmr.msrb.gmra.mxu1 %v7683_v2  ;;  %8276 = vmatmul.bf16.vlgmr.msrb.gmra.mxu0 %v8212_v23  ;;  %v16766_v2 = vld [vmem:[%s17381_s6 + $0x220] sm:$0xff]  ;;  %v7819_v23 = vsel %vm14171_vm14, %v12268_v25, %v7818_v30  ;;  %v8627_v25 = vshll.u32 %v16784_v46, 16 }
 0x440   : >> { %8430 = vmatpush.bf16.msra.mxu1 %v13208_v24  ;;  %8956 = vmatpush.bf16.msra.mxu0 %v16682_v50  ;;  %v16741_v24 = vrot.slane %v8149_v56, 5  ;;  %v7846_v57 = vunpack.c.l.b16 %v7819_v23  ;;  %v7638_v23 = vshll.u32 %v7556_v33, 16  ;;  %v12584_v33 = vld [vmem:[%s16460_s1 + $0x24] sm:$0xf] }
 0x441   : >> { %8060 = vmatmul.bf16.gmra.mxu3 %v13183_v47  ;;  %13263 = vmatpush.bf16.msra.mxu2 %v16682_v50  ;;  %v8621_v50 = vshll.u32 %v12581_v35, 16  ;;  %v8629_v37 = vrot.slane %v8627_v25, 5  ;;  %v8642_v14 = vshrl.u32 %v12584_v33, 16 }
 0x442   : >> { %7922 = vmatmul.bf16.gmra.mxu2 %v7850_v60  ;;  %v8156_v15 = vor.u32 %v8155_v59, %v16741_v24  ;;  %v7677_v60 = vunpack.c.l.b16 %v7599_v38  ;;  %8800 = vmatpush.bf16.msrb.mxu3 %v13222_v19  ;;  %v8152_v47 = vsel %vm14077_vm11, %v8147_v63, %v16741_v24  ;;  %v7851_v13 = vpack.c.b16 %v7847_v8, %v7846_v57  ;;  %v12400_v59 = vld [vmem:[%s16460_s1 + $0x30] sm:$0xf]  ;;  %v16814_v38 = vld [vmem:[%s16460_s1 + $0x34] sm:$0xf] }
 0x443   : >> { %v16809_v4 = vunpack.c.l.b16 %v8152_v47  ;;  %v7648_v24 = vshrl.u32 %v16692_v53, 16  ;;  %v8637_v53 = vshll.u32 %v16797_v18, 16  ;;  %v8634_v43 = vor.u32 %v8633_v27, %v8629_v37 }
 0x444   : >> { %8431 = vmatpush.bf16.msra.mxu1 %v13207_v17  ;;  %8957 = vmatpush.bf16.msra.mxu0 %v16708_v48  ;;  %v7678_v17 = vunpack.c.l.b16 %v7609_v41  ;;  %v8157_v30 = vrot.slane %v8156_v15, 4  ;;  %v8623_v41 = vrot.slane %v8621_v50, 5  ;;  %v8323_v15 = vrot.slane %v16551_v36, 5  ;;  %v13231_v36 = vld [vmem:[%s17381_s6 + $0x210] sm:$0xff] }
 0x445   : >> { %13264 = vmatpush.bf16.msra.mxu2 %v16708_v48  ;;  %v16807_v48 = vunpack.c.l.b16 %v7633_v45  ;;  %v8177_v0 = vshrl.u32 %v16814_v38, 16  ;;  %v7650_v35 = vrot.slane %v7648_v24, 4  ;;  %v8639_v8 = vrot.slane %v8637_v53, 5 }
 0x446   : >> { %v7684_v56 = vpack.c.b16 %v7678_v17, %v7677_v60  ;;  %v8624_v19 = vor.u32 %v8623_v41, %v8620_v34  ;;  %v8164_v60 = vshrl.u32 %v12400_v59, 16  ;;  %v8167_v17 = vshll.u32 %v12400_v59, 16  ;;  %v16856_v41 = vld [vmem:[%s16460_s1 + $0x38] sm:$0x1] }
 0x447   : >> { %v8325_v63 = vrot.slane %v8323_v15, 4  ;;  %v8324_v54 = vsel %vm14171_vm14, %v12455_v44, %v8323_v15  ;;  %v7654_v45 = vshll.u32 %v16714_v58, 16  ;;  %v8179_v34 = vrot.slane %v8177_v0, 4  ;;  %v16877_v15 = vld [vmem:[%s16460_s1 + $0x2c] sm:$0x1] }
 0x448   : >> { %8432 = vmatpush.bf16.msra.mxu1 %v13206_v31  ;;  %8958 = vmatpush.bf16.msra.mxu0 %v16735_v32  ;;  %v8161_v31 = vrot.slane %v8159_v6, 5  ;;  %v16830_v6 = vrot.slane %v7644_v28, 5  ;;  %v8625_v57 = vrot.slane %v8624_v19, 4  ;;  %v8366_v50 = vunpack.c.l.b16 %v8324_v54  ;;  %v16866_v28 = vld [vmem:[%s16460_s1 + $0x28] sm:$0xf] }
 0x449   : >> { %13265 = vmatpush.bf16.msra.mxu2 %v16735_v32  ;;  %v8635_v32 = vrot.slane %v8634_v43, 4  ;;  %v8645_v24 = vshll.u32 %v12584_v33, 16  ;;  %v8183_v19 = vshll.u32 %v16856_v41, 16  ;;  %v7656_v43 = vrot.slane %v7654_v45, 5 }
 0x44a   : >> { %v8162_v55 = vsel %vm14077_vm11, %v8157_v30, %v8161_v31  ;;  %v7637_v30 = vrot.slane %v7635_v39, 4  ;;  %v7640_v31 = vrot.slane %v7638_v23, 5  ;;  %v7651_v59 = vor.u32 %v7650_v35, %v16830_v6  ;;  %v13209_v23 = vld [vmem:[%s16460_s1 + $0x18] sm:$0xff] }
 0x44b   : >> { %v16824_v7 = vunpack.c.l.b16 %v8162_v55  ;;  %v8630_v55 = vsel %vm14077_vm11, %v8625_v57, %v8629_v37  ;;  %v8640_v58 = vsel %vm14077_vm11, %v8635_v32, %v8639_v8  ;;  %v8647_v53 = vrot.slane %v8645_v24, 5  ;;  %v12452_v57 = vld [vmem:[%s16460_s1 + $0x18] sm:$0xe]  ;;  %v12587_v24 = vld [vmem:[%s16460_s1 + $0x30] sm:$0xf] }
 0x44c   : >> { %8433 = vmatpush.bf16.msra.mxu1 %v13205_v22  ;;  %8959 = vmatpush.bf16.msra.mxu0 %v16766_v2  ;;  %v13221_v22 = vld [vmem:[%s17381_s6 + $0x1c0] sm:$0xff]  ;;  %v8730_v37 = vunpack.c.l.b16 %v8630_v55  ;;  %v8731_v27 = vunpack.c.l.b16 %v8640_v58  ;;  %v8661_v35 = vshll.u32 %v16877_v15, 16  ;;  %v8330_v32 = vrot.slane %v16629_v42, 5 }
 0x44d   : >> { %8801 = vmatpush.bf16.msrb.mxu3 %v13221_v22  ;;  %13266 = vmatpush.bf16.msra.mxu2 %v16766_v2  ;;  %v8214_v25 = vpack.c.b16 %v16824_v7, %v16809_v4  ;;  %v8644_v4 = vrot.slane %v8642_v14, 4  ;;  %v8849_v55 = vrot.slane %v16784_v46, 5 }
 0x44e   : >> { %v8738_v0 = vpack.c.b16 %v8731_v27, %v8730_v37  ;;  %v8332_v54 = vrot.slane %v8330_v32, 4 }
 0x44f   : >> { %7752 = vmatmul.bf16.gmra.mxu1 %v7684_v56  ;;  %8281 = vmatmul.bf16.gmra.mxu0 %v8213_v9  ;;  %v8327_v56 = vsel %vm14171_vm14, %v8325_v63, %v8326_v16  ;;  %v8166_v9 = vrot.slane %v8164_v60, 4  ;;  %v7685_v16 = vpack.c.b16 %v16807_v48, %v16805_v11  ;;  %v8651_v11 = vshll.u32 %v16866_v28, 16 }
 0x450   : >> { %8434 = vmatpush.bf16.msra.mxu1 %v13204_v52  ;;  %v8173_v52 = vshll.u32 %v16814_v38, 16  ;;  %8960 = vmatpush.bf16.msra.mxu0 %v13232_v3  ;;  %v8367_v62 = vunpack.c.l.b16 %v8327_v56  ;;  %v7641_v48 = vor.u32 %v7640_v31, %v7637_v30  ;;  %v8648_v44 = vor.u32 %v8647_v53, %v8644_v4 }
 0x451   : >> { %8065 = vmatmul.bf16.gmra.mxu3 %v13184_v61  ;;  %13267 = vmatpush.bf16.msra.mxu2 %v13232_v3  ;;  %v8653_v7 = vrot.slane %v8651_v11, 5  ;;  %v12456_v31 = vrot.slane %v12452_v57, 9  ;;  %v8333_v56 = vrot.slane %v16675_v26, 5  ;;  %v16910_v11 = vld [vmem:[%s16460_s1 + $0x34] sm:$0xf] }
 0x452   : >> { %7927 = vmatmul.bf16.gmra.mxu2 %v7851_v13  ;;  %v16848_v47 = vrot.slane %v8173_v52, 5  ;;  %v13230_v13 = vld [vmem:[%s17381_s6 + $0x208] sm:$0xff]  ;;  %v16862_v2 = vpack.c.b16 %v8367_v62, %v8366_v50  ;;  %v7642_v60 = vrot.slane %v7641_v48, 4  ;;  %v8185_v52 = vrot.slane %v8183_v19, 5 }
 0x453   : >> { %v8331_v50 = vsel %vm14171_vm14, %v12456_v31, %v8330_v32  ;;  %v8334_v62 = vsel %vm14171_vm14, %v8332_v54, %v8333_v56  ;;  %v8666_v48 = vshrl.u32 %v12587_v24, 16  ;;  %v8679_v46 = vshrl.u32 %v16910_v11, 16  ;;  %v12453_v54 = vld [vmem:[%s16460_s1 + $0x24] sm:$0xe]  ;;  %v12590_v56 = vld [vmem:[%s16460_s1 + $0x3c] sm:$0xf] }
 0x454   : >> { %8435 = vmatpush.bf16.msra.mxu1 %v13203_v12  ;;  %v8169_v12 = vrot.slane %v8167_v17, 5  ;;  %8961 = vmatpush.bf16.msra.mxu0 %v13231_v36  ;;  %v8180_v22 = vor.u32 %v8179_v34, %v16848_v47  ;;  %v7652_v17 = vrot.slane %v7651_v59, 4  ;;  %v8368_v34 = vunpack.c.l.b16 %v8331_v50 }
 0x455   : >> { %13268 = vmatpush.bf16.msra.mxu2 %v13231_v36  ;;  %v7647_v36 = vsel %vm14077_vm11, %v7642_v60, %v16830_v6  ;;  %v8369_v26 = vunpack.c.l.b16 %v8334_v62  ;;  %v8669_v59 = vshll.u32 %v12587_v24, 16  ;;  %v8668_v4 = vrot.slane %v8666_v48, 4  ;;  %v13210_v60 = vld [vmem:[%s16460_s1 + $0x24] sm:$0xff] }
 0x456   : >> { %v8170_v61 = vor.u32 %v8169_v12, %v8166_v9  ;;  %v8181_v40 = vrot.slane %v8180_v22, 4  ;;  %v7657_v8 = vsel %vm14077_vm11, %v7652_v17, %v7656_v43  ;;  %v8649_v9 = vrot.slane %v8648_v44, 4  ;;  %v16917_v43 = vld [vmem:[%s16460_s1 + $0x38] sm:$0x1] }
 0x457   : >> { %v8663_v12 = vrot.slane %v8661_v35, 5  ;;  %v7681_v45 = vunpack.c.l.b16 %v7647_v36  ;;  %v16906_v14 = vpack.c.b16 %v8369_v26, %v8368_v34  ;;  %v8671_v53 = vrot.slane %v8669_v59, 5 }
 0x458   : >> { %8436 = vmatpush.bf16.msra.mxu1 %v13202_v49  ;;  %v8655_v49 = vshrl.u32 %v16866_v28, 16  ;;  %8962 = vmatpush.bf16.msra.mxu0 %v13230_v13  ;;  %v8171_v3 = vrot.slane %v8170_v61, 4  ;;  %v8186_v42 = vsel %vm14077_vm11, %v8181_v40, %v8185_v52  ;;  %v8654_v58 = vsel %vm14077_vm11, %v8649_v9, %v8653_v7 }
 0x459   : >> { %13269 = vmatpush.bf16.msra.mxu2 %v13230_v13  ;;  %v8675_v61 = vshll.u32 %v16910_v11, 16  ;;  %v8732_v19 = vunpack.c.l.b16 %v8654_v58  ;;  %v8851_v17 = vrot.slane %v8849_v55, 4  ;;  %v8672_v52 = vor.u32 %v8671_v53, %v8668_v4 }
 0x45a   : >> { %v8657_v39 = vrot.slane %v8655_v49, 4  ;;  %v8176_v30 = vsel %vm14077_vm11, %v8171_v3, %v16848_v47  ;;  %v7682_v47 = vunpack.c.l.b16 %v7657_v8  ;;  %v8337_v36 = vrot.slane %v16701_v1, 5 }
 0x45b   : >> { %v8210_v13 = vunpack.c.l.b16 %v8176_v30  ;;  %v8673_v35 = vrot.slane %v8672_v52, 4  ;;  %v12457_v9 = vrot.slane %v12453_v54, 9  ;;  %v8690_v50 = vshrl.u32 %v12590_v56, 16  ;;  %v12643_v54 = vld [vmem:[%s16460_s1 + $0x30] sm:$0xe] }
 0x45c   : >> { %8437 = vmatpush.bf16.msra.mxu1 %v13201_v29  ;;  %v13229_v29 = vld [vmem:[%s17381_s6 + $0x200] sm:$0xff]  ;;  %v8658_v63 = vor.u32 %v8657_v39, %v8653_v7  ;;  %v7686_v49 = vpack.c.b16 %v7682_v47, %v7681_v45  ;;  %v8677_v7 = vrot.slane %v8675_v61, 5  ;;  %v8681_v39 = vrot.slane %v8679_v46, 4 }
 0x45d   : >> { %8963 = vmatpush.bf16.msra.mxu0 %v13229_v29  ;;  %13270 = vmatpush.bf16.msra.mxu2 %v13229_v29  ;;  %v8685_v29 = vshll.u32 %v16917_v43, 16  ;;  %v8856_v1 = vrot.slane %v16866_v28, 5  ;;  %v8693_v62 = vshll.u32 %v12590_v56, 16  ;;  %v13211_v28 = vld [vmem:[%s16460_s1 + $0x30] sm:$0xff]  ;;  %v12592_v61 = vld [vmem:[%s16460_s1 + $0x44] sm:$0x1] }
 0x45e   : >> { %v8659_v6 = vrot.slane %v8658_v63, 4  ;;  %v8678_v30 = vsel %vm14077_vm11, %v8673_v35, %v8677_v7  ;;  %v8709_v4 = vshll.u32 %v12592_v61, 16 }
 0x45f   : >> { %7757 = vmatmul.bf16.gmra.mxu1 %v7685_v16  ;;  %8286 = vmatmul.bf16.gmra.mxu0 %v8214_v25  ;;  %v8211_v16 = vunpack.c.l.b16 %v8186_v42  ;;  %v12641_v25 = vld [vmem:[%s16460_s1 + $0x18] sm:$0xe]  ;;  %v8687_v32 = vrot.slane %v8685_v29, 5  ;;  %v16932_v42 = vld [vmem:[%s16460_s1 + $0x40] sm:$0xf]  ;;  %v8734_v34 = vunpack.c.l.b16 %v8678_v30  ;;  %v8863_v30 = vrot.slane %v16910_v11, 5 }
 0x460   : >> { %v8664_v33 = vsel %vm14077_vm11, %v8659_v6, %v8663_v12  ;;  %v12645_v27 = vrot.slane %v12641_v25, 9  ;;  %v8339_v6 = vrot.slane %v8337_v36, 4  ;;  %v8340_v12 = vrot.slane %v16755_v10, 5 }
 0x461   : >> { %8802 = vmatmul.bf16.vlgmr.msrb.gmra.mxu3 %v8738_v0  ;;  %v8215_v22 = vpack.c.b16 %v8211_v16, %v8210_v13  ;;  %v8733_v37 = vunpack.c.l.b16 %v8664_v33  ;;  %v8682_v0 = vor.u32 %v8681_v39, %v8677_v7  ;;  %v8699_v45 = vshll.u32 %v16932_v42, 16 }
 0x462   : >> { %8576 = vmatmul.bf16.vlgmr.msrb.gmra.mxu2 %v13209_v23  ;;  %v8852_v23 = vrot.slane %v16797_v18, 5  ;;  %v8850_v3 = vsel %vm14171_vm14, %v12645_v27, %v8849_v55  ;;  %v8703_v47 = vshrl.u32 %v16932_v42, 16  ;;  %v8338_v13 = vsel %vm14171_vm14, %v12457_v9, %v8337_v36  ;;  %v12642_v55 = vld [vmem:[%s16460_s1 + $0x24] sm:$0xe]  ;;  %v12644_v9 = vld [vmem:[%s16460_s1 + $0x3c] sm:$0xe] }
 0x463   : >> { %v8739_v40 = vpack.c.b16 %v8733_v37, %v8732_v19  ;;  %v8892_v44 = vunpack.c.l.b16 %v8850_v3  ;;  %v8683_v57 = vrot.slane %v8682_v0, 4  ;;  %v8341_v16 = vsel %vm14171_vm14, %v8339_v6, %v8340_v12 }
 0x464   : >> { %v8853_v18 = vsel %vm14171_vm14, %v8851_v17, %v8852_v23  ;;  %v8370_v58 = vunpack.c.l.b16 %v8338_v13  ;;  %v8371_v10 = vunpack.c.l.b16 %v8341_v16  ;;  %v8692_v33 = vrot.slane %v8690_v50, 4 }
 0x465   : >> { %v8893_v63 = vunpack.c.l.b16 %v8853_v18  ;;  %v8688_v31 = vsel %vm14077_vm11, %v8683_v57, %v8687_v32  ;;  %v8695_v25 = vrot.slane %v8693_v62, 5  ;;  %v8701_v24 = vrot.slane %v8699_v45, 5 }
 0x466   : >> { %v8735_v26 = vunpack.c.l.b16 %v8688_v31  ;;  %v8705_v48 = vrot.slane %v8703_v47, 4  ;;  %v16944_v59 = vpack.c.b16 %v8371_v10, %v8370_v58  ;;  %v12646_v46 = vrot.slane %v12642_v55, 9 }
 0x467   : >> { %v8900_v8 = vpack.c.b16 %v8893_v63, %v8892_v44  ;;  %v8859_v19 = vrot.slane %v16877_v15, 5  ;;  %v8696_v37 = vor.u32 %v8695_v25, %v8692_v33  ;;  %v8344_v3 = vrot.slane %v16814_v38, 5 }
 0x468   : >> { %v8706_v27 = vor.u32 %v8705_v48, %v8701_v24  ;;  %v8857_v53 = vsel %vm14171_vm14, %v12646_v46, %v8856_v1  ;;  %v8347_v18 = vrot.slane %v16856_v41, 5  ;;  %v8870_v31 = vrot.slane %v16932_v42, 5 }
 0x469   : >> { %v8697_v39 = vrot.slane %v8696_v37, 4  ;;  %v8346_v29 = vrot.slane %v8344_v3, 4  ;;  %v12647_v6 = vrot.slane %v12643_v54, 9  ;;  %v8865_v12 = vrot.slane %v8863_v30, 4 }
 0x46a   : >> { %v8707_v23 = vrot.slane %v8706_v27, 4  ;;  %v8866_v50 = vrot.slane %v16917_v43, 5  ;;  %v12648_v62 = vrot.slane %v12644_v9, 9  ;;  %v8872_v45 = vrot.slane %v8870_v31, 4  ;;  %v17000_v27 = vld [vmem:[%s17382_s7] ss:$0 sm:$0xff] }
 0x46b   : >> { %v8702_v15 = vsel %vm14077_vm11, %v8697_v39, %v8701_v24  ;;  %v8348_v38 = vsel %vm14171_vm14, %v8346_v29, %v8347_v18  ;;  %v8864_v11 = vsel %vm14171_vm14, %v12647_v6, %v8863_v30 }
 0x46c   : >> { %v8736_v35 = vunpack.c.l.b16 %v8702_v15  ;;  %v8373_v36 = vunpack.c.l.b16 %v8348_v38  ;;  %v8867_v42 = vsel %vm14171_vm14, %v8865_v12, %v8866_v50 }
 0x46f   : >> { %7762 = vmatmul.bf16.gmra.mxu1 %v7686_v49  ;;  %8291 = vmatmul.bf16.gmra.mxu0 %v8215_v22  ;;  %v8740_v49 = vpack.c.b16 %v8735_v26, %v8734_v34  ;;  %v8858_v22 = vrot.slane %v8856_v1, 4  ;;  %v8873_v1 = vrot.slane %v12592_v61, 5  ;;  %v8896_v34 = vunpack.c.l.b16 %v8864_v11 }
 0x470   : >> { %v8897_v26 = vunpack.c.l.b16 %v8867_v42 }
 0x471   : >> { %8807 = vmatmul.bf16.gmra.mxu3 %v8739_v40  ;;  %v8860_v7 = vsel %vm14171_vm14, %v8858_v22, %v8859_v19  ;;  %v12454_v40 = vld [vmem:[%s16460_s1 + $0x30] sm:$0xe]  ;;  %v8874_v47 = vsel %vm14171_vm14, %v8872_v45, %v8873_v1 }
 0x472   : >> { %8581 = vmatmul.bf16.gmra.mxu2 %v13210_v60  ;;  %v8894_v60 = vunpack.c.l.b16 %v8857_v53  ;;  %v8895_v17 = vunpack.c.l.b16 %v8860_v7  ;;  %v12458_v0 = vrot.slane %v12454_v40, 9  ;;  %v8899_v43 = vunpack.c.l.b16 %v8874_v47 }
 0x473   : >> { %v8902_v16 = vpack.c.b16 %v8897_v26, %v8896_v34 }
 0x474   : >> { %v8901_v44 = vpack.c.b16 %v8895_v17, %v8894_v60  ;;  %v8345_v63 = vsel %vm14171_vm14, %v12458_v0, %v8344_v3 }
 0x475   : >> { %v8372_v32 = vunpack.c.l.b16 %v8345_v63 }
 0x477   : >> { %v8377_v56 = vpack.c.b16 %v8373_v36, %v8372_v32 }
 0x47f   : >> { %8438 = vmatmul.bf16.vlgmr.msra.gmra.mxu1 %v16862_v2  ;;  %8964 = vmatmul.bf16.vlgmr.msra.gmra.mxu0 %v8900_v8  ;;  %v8711_v2 = vrot.slane %v8709_v4, 5  ;;  %v13212_v8 = vld [vmem:[%s16460_s1 + $0x3c] sm:$0xff]  ;;  %s16995_s1 = sshll.u32 %s13477_s10, 6  ;;  %s7405_s10 = sadd.s32 1, %s13477_s10  }
 0x480   : >> { %s17006_s17 = scalar_lea.vmem [#allocation3], %s16995_s1  ;;  %s17149_s23 = scalar_lea.vmem %s13584_s24, %s16995_s1 }
 0x481   : >> { %8812 = vmatmul.bf16.gmra.mxu3 %v8740_v49  ;;  %v8712_v52 = vsel %vm14077_vm11, %v8707_v23, %v8711_v2  ;;  %v8995_v23 = vld [vmem:[%s17006_s17] sm:$0xff]  ;;  %v8996_v63 = vld [vmem:[%s17006_s17 + $0x8] sm:$0xff]  ;;  %v8997_v6 = vld [vmem:[%s17006_s17 + $0x10] sm:$0xff]  ;;  %s17194_s25 = scalar_lea.vmem %s17419_s13, %s16995_s1 [#allocation4]  ;;  %p7402_p12 = scmp.ge.s32.totalorder %s7405_s10, 4  }
 0x482   : >> { %8586 = vmatmul.bf16.gmra.mxu2 %v13211_v28  ;;  %v8737_v57 = vunpack.c.l.b16 %v8712_v52  ;;  %v9012_v60 = vsub.f32 %v8995_v23, %v16390_v21  ;;  %v9014_v50 = vsub.f32 %v8997_v6, %v16390_v21  ;;  %v9000_v6 = vld [vmem:[%s17006_s17 + $0x28] sm:$0xff]  ;;  %s13238_s26 = sshll.u32 (%p7402_p12), %s13547_s9, 8  ;;  %s17432_s12 = scalar_lea.vmem (%p7402_p12), [#allocation4], %s13578_s18 }
 0x483   : > { %s9257_s19 = scalar_lea.hbm (%p7402_p12), %s17383_s8, %s13238_s26  ;;  %s9258_s1 = sshll.u32 (%p7402_p12), %s17432_s12, 4  ;;  %s9259_s1 = int_to_ptr.vmem [resolvable:$true] %s9258_s1 }
 0x484   : >> { %v8741_v41 = vpack.c.b16 %v8737_v57, %v8736_v35  ;;  %v9020_v15 = vmul.f32 2.0, %v9012_v60  ;;  %v9013_v35 = vsub.f32 %v8996_v63, %v16390_v21  ;;  %v9022_v45 = vmul.f32 2.0, %v9014_v50  ;;  %s9260_s20 = sshll.u32 (%p7402_p12), %s9257_s19, 4  ;;  %s17433_s21 = sand.u32 (%p7402_p12), 1, %s13453_s28   ;;  %s9261_s20 = int_to_ptr.hbm [resolvable:$true] %s9260_s20 }
 0x485   : >> { %v9017_v50 = vsub.f32 %v9000_v6, %v16390_v21  ;;  %s13403_s13 = scalar_lea.hbm (%p7402_p12), %s17383_s8, 512 }
 0x486   : >> { %v9028_v40 = vmul.f32 %v16419_v20, %v9020_v15  ;;  %v9021_v32 = vmul.f32 2.0, %v9013_v35  ;;  %v9030_v42 = vmul.f32 %v16419_v20, %v9022_v45  ;;  %v8999_v15 = vld [vmem:[%s17006_s17 + $0x20] sm:$0xff] }
 0x488   : >> { %v9029_v30 = vmul.f32 %v16419_v20, %v9021_v32 }
 0x48a   : >> { %v12699_v1 = vadd.f32 -1.0, %v9029_v30 }
 0x48c   : >> { %v12707_v11 = vmul.f32 -5.0, %v12699_v1 }
 0x48f   : >> { %8443 = vmatmul.bf16.gmra.mxu1 %v16906_v14  ;;  %8969 = vmatmul.bf16.gmra.mxu0 %v8901_v44  ;;  %v8871_v14 = vsel %vm14171_vm14, %v12648_v62, %v8870_v31  ;;  %v12698_v44 = vadd.f32 -1.0, %v9028_v40 }
 0x490   : >> { %v8898_v13 = vunpack.c.l.b16 %v8871_v14 }
 0x491   : >> { %8817 = vmatmul.bf16.gmra.mxu3 %v8741_v41  ;;  %v12706_v36 = vmul.f32 -5.0, %v12698_v44 }
 0x492   : >> { %8591 = vmatmul.bf16.gmra.mxu2 %v13212_v8  ;;  %v8903_v10 = vpack.c.b16 %v8899_v43, %v8898_v13  ;;  %v8998_v43 = vld [vmem:[%s17006_s17 + $0x18] sm:$0xff] }
 0x493   : >> { %v9060_v41 = vmul.f32 1.442695, %v12706_v36 }
 0x495   : >> { %13351 = vpow2.f32 %v9060_v41 }
 0x49c   : >> { %v16979_v55 = vpop.f32.mrf.mxu1  ;;  %v7519_v58 = vpop.f32.mrf.mxu0 }
 0x49d   : >> { %v7539_v4 = vadd.f32 %v17000_v27, %v7519_v58  ;;  %v9015_v58 = vsub.f32 %v8998_v43, %v16390_v21 }
 0x49f   : >> { %8448 = vmatmul.bf16.gmra.mxu1 %v16944_v59  ;;  %8974 = vmatmul.bf16.gmra.mxu0 %v8902_v16 }
 0x4a2   : >> { %8979 = vmatmul.bf16.vlgmr.msra.gmra.mxu2 %v8903_v10  ;;  %v13352_v10 = vpop.eup %13351 }
 0x4a4   : >> { %v16982_v25 = vpop.f32.mrf.mxu1  ;;  %v7521_v28 = vpop.f32.mrf.mxu0 }
 0x4a5   : >> { %v7913_v33 = vpop.f32.mrf.mxu2  ;;  %v16984_v24 = vpop.f32.mrf.mxu3  ;;  %v7540_v52 = vadd.f32 %v17000_v27, %v7521_v28  ;;  %v12700_v28 = vadd.f32 -1.0, %v9030_v42  ;;  %v7544_v32 = vadd.f32 %v17000_v27, %v16982_v25 }
 0x4ac   : >> { %v16986_v61 = vpop.f32.mrf.mxu1  ;;  %v7524_v46 = vpop.f32.mrf.mxu0 }
 0x4ad   : >> { %v7915_v48 = vpop.f32.mrf.mxu2  ;;  %v16988_v49 = vpop.f32.mrf.mxu3  ;;  %v7541_v31 = vadd.f32 %v17000_v27, %v7524_v46  ;;  %v9023_v46 = vmul.f32 2.0, %v9015_v58  ;;  %v7545_v43 = vadd.f32 %v17000_v27, %v16986_v61 }
 0x4af   : >> { %8453 = vmatmul.bf16.gmra.mxu1 %v8377_v56  ;;  %v9031_v23 = vmul.f32 %v16419_v20, %v9023_v46 }
 0x4b4   : >> { %v16990_v19 = vpop.f32.mrf.mxu1  ;;  %v7526_v59 = vpop.f32.mrf.mxu0 }
 0x4b5   : >> { %v7918_v22 = vpop.f32.mrf.mxu2  ;;  %v16992_v37 = vpop.f32.mrf.mxu3  ;;  %v7542_v14 = vadd.f32 %v17000_v27, %v7526_v59  ;;  %v12708_v59 = vmul.f32 -5.0, %v12700_v28 }
 0x4bc   : >> { %v7748_v7 = vpop.f32.mrf.mxu1  ;;  %v17003_v39 = vpop.f32.mrf.mxu0 }
 0x4bd   : >> { %v7920_v53 = vpop.f32.mrf.mxu2  ;;  %v7768_v2 = vadd.f32 %v7748_v7, %v7539_v4  ;;  %v17012_v3 = vpop.f32.mrf.mxu3  ;;  %v7543_v4 = vadd.f32 %v17000_v27, %v16979_v55  ;;  %v12701_v55 = vadd.f32 -1.0, %v9031_v23 }
 0x4bf   : >> { %v17010_v17 = vadd.f32 %v7913_v33, %v7768_v2  ;;  %v9062_v33 = vmul.f32 1.442695, %v12707_v11 }
 0x4c1   : >> { %13353 = vpow2.f32 %v9062_v33 }
 0x4c4   : >> { %v7750_v29 = vpop.f32.mrf.mxu1  ;;  %v17016_v18 = vpop.f32.mrf.mxu0 }
 0x4c5   : >> { %v7923_v0 = vpop.f32.mrf.mxu2  ;;  %v7769_v38 = vadd.f32 %v7750_v29, %v7540_v52  ;;  %v17022_v8 = vpop.f32.mrf.mxu3  ;;  %v9064_v29 = vmul.f32 1.442695, %v12708_v59  ;;  %v9001_v59 = vld [vmem:[%s17006_s17 + $0x30] sm:$0xff] }
 0x4c7   : >> { %v17020_v57 = vadd.f32 %v7915_v48, %v7769_v38  ;;  %v13354_v63 = vpop.eup %13353 }
 0x4c8   : >> { %v17066_v30 = vadd.f32 1.0, %v13354_v63 }
 0x4ca   : >> { %vm9104_vm10 = vweird.f32 %v17066_v30 }
 0x4cc   : >> { %v7753_v56 = vpop.f32.mrf.mxu1  ;;  %v17026_v9 = vpop.f32.mrf.mxu0 }
 0x4cd   : >> { %v7925_v54 = vpop.f32.mrf.mxu2  ;;  %v7770_v12 = vadd.f32 %v7753_v56, %v7541_v31  ;;  %v17036_v34 = vpop.f32.mrf.mxu3  ;;  %v12709_v31 = vmul.f32 -5.0, %v12701_v55 }
 0x4cf   : >> { %v17030_v62 = vadd.f32 %v7918_v22, %v7770_v12  ;;  %v17044_v22 = vadd.f32 1.0, %v13352_v10  ;;  %v9066_v11 = vmul.f32 1.442695, %v12709_v31 }
 0x4d1   : >> { %13355 = vrcp.f32 %v17044_v22  ;;  %vm9089_vm6 = vweird.f32 %v17044_v22  ;;  %v9093_v6 = vand.u32 2147483647, %v17044_v22 }
 0x4d2   : >> { %13357 = vpow2.f32 %v9064_v29 }
 0x4d3   : >> { %13359 = vrcp.f32 %v17066_v30  ;;  %vm9094_vm9 = vcmp.eq.f32.partialorder %v9093_v6, 8.507059e+37 }
 0x4d4   : >> { %v7755_v26 = vpop.f32.mrf.mxu1  ;;  %v17038_v13 = vpop.f32.mrf.mxu0  ;;  %13361 = vpow2.f32 %v9066_v11 }
 0x4d5   : >> { %v17034_v47 = vpop.f32.mrf.mxu2  ;;  %v7771_v16 = vadd.f32 %v7755_v26, %v7542_v14  ;;  %v17054_v52 = vpop.f32.mrf.mxu3  ;;  %v9025_v26 = vmul.f32 2.0, %v9017_v50 }
 0x4d7   : >> { %v17042_v48 = vadd.f32 %v7920_v53, %v7771_v16  ;;  %v9016_v53 = vsub.f32 %v8999_v15, %v16390_v21  ;;  %v17060_v35 = vpop.eup %13355  ;;  %v9033_v33 = vmul.f32 %v16419_v20, %v9025_v26 }
 0x4d8   : >> { %v9085_v1 = vmul.f32 %v17060_v35, %v17044_v22  ;;  %v13358_v14 = vpop.eup %13357  ;;  %vm9090_vm7 = vweird.f32 %v17060_v35 }
 0x4d9   : >> { %v9024_v38 = vmul.f32 2.0, %v9016_v53  ;;  %v17084_v10 = vadd.f32 1.0, %v13358_v14  ;;  %v12703_v53 = vadd.f32 -1.0, %v9033_v33  ;;  %vm17114_vm8 = vmor %vm9089_vm6, %vm9090_vm7 }
 0x4da   : >> { %v9086_v16 = vsub.f32 1.0, %v9085_v1 }
 0x4db   : >> { %13363 = vrcp.f32 %v17084_v10  ;;  %vm9119_vm1 = vweird.f32 %v17084_v10 }
 0x4dc   : >> { %v7758_v2 = vpop.f32.mrf.mxu1  ;;  %v17051_v60 = vpop.f32.mrf.mxu0  ;;  %v9087_v61 = vmul.f32 %v17060_v35, %v9086_v16 }
 0x4dd   : >> { %v17048_v7 = vpop.f32.mrf.mxu2  ;;  %v7772_v40 = vadd.f32 %v7758_v2, %v7543_v4  ;;  %v17077_v25 = vpop.f32.mrf.mxu3  ;;  %v9018_v2 = vsub.f32 %v9001_v59, %v16390_v21 }
 0x4de   : >> { %v17090_v4 = vpop.eup %13359 }
 0x4df   : >> { %v17058_v44 = vadd.f32 %v7923_v0, %v7772_v40  ;;  %v9032_v0 = vmul.f32 %v16419_v20, %v9024_v38  ;;  %v9100_v29 = vmul.f32 %v17090_v4, %v17066_v30  ;;  %v9026_v55 = vmul.f32 2.0, %v9018_v2  ;;  %v13362_v63 = vpop.eup %13361 }
 0x4e0   : >> { %vm9105_vm12 = vweird.f32 %v17090_v4 }
 0x4e1   : >> { %v12702_v42 = vadd.f32 -1.0, %v9032_v0  ;;  %v9034_v31 = vmul.f32 %v16419_v20, %v9026_v55  ;;  %v9088_v0 = vadd.f32 %v17060_v35, %v9087_v61  ;;  %v17121_v14 = vpop.eup %13363  ;;  %vm17155_vm13 = vmor %vm9104_vm10, %vm9105_vm12 }
 0x4e2   : >> { %v9115_v2 = vmul.f32 %v17121_v14, %v17084_v10  ;;  %vm9120_vm3 = vweird.f32 %v17121_v14 }
 0x4e3   : >> { %vm17182_vm4 = vmor %vm9119_vm1, %vm9120_vm3 }
 0x4e4   : >> { %v7760_v56 = vpop.f32.mrf.mxu1  ;;  %v17068_v41 = vpop.f32.mrf.mxu0 }
 0x4e5   : >> { %v17064_v36 = vpop.f32.mrf.mxu2  ;;  %v7773_v12 = vadd.f32 %v7760_v56, %v7544_v32  ;;  %v17100_v38 = vpop.f32.mrf.mxu3  ;;  %v9095_v32 = vand.u32 2147483648, %v17044_v22  ;;  %v8071_v22 = vadd.f32 %v16984_v24, %v17010_v17 }
 0x4e7   : >> { %v17075_v45 = vadd.f32 %v7925_v54, %v7773_v12  ;;  %v12710_v54 = vmul.f32 -5.0, %v12702_v42  ;;  %v12711_v12 = vmul.f32 -5.0, %v12703_v53  ;;  %v9002_v42 = vld [vmem:[%s17006_s17 + $0x38] sm:$0xff]  ;;  %v9096_v16 = vor.u32 1.1754944e-38, %v9095_v32  ;;  %s9246_s17 = scalar_lea.sflag (%p7402_p12), [#allocation5], %s17433_s21 }
 0x4e8   : >> { %v8297_v17 = vadd.f32 %v17003_v39, %v8071_v22  ;;  %v9110_v53 = vand.u32 2147483648, %v17066_v30  ;;  %v9108_v39 = vand.u32 2147483647, %v17066_v30  ;;  %v9116_v32 = vsub.f32 1.0, %v9115_v2 }
 0x4e9   : >> { %v9068_v40 = vmul.f32 1.442695, %v12710_v54  ;;  %v12704_v54 = vadd.f32 -1.0, %v9034_v31  ;;  %v9070_v59 = vmul.f32 1.442695, %v12711_v12 }
 0x4ea   : >> { %vm9109_vm15 = vcmp.eq.f32.partialorder %v9108_v39, 8.507059e+37  ;;  %v8073_v39 = vadd.f32 %v16992_v37, %v17030_v62 }
 0x4eb   : >> { %13365 = vpow2.f32 %v9068_v40 }
 0x4ec   : >> { %v7763_v28 = vpop.f32.mrf.mxu1  ;;  %v17087_v46 = vpop.f32.mrf.mxu0 }
 0x4ed   : >> { %v17082_v58 = vpop.f32.mrf.mxu2  ;;  %v7774_v23 = vadd.f32 %v7763_v28, %v7545_v43  ;;  %v9019_v43 = vsub.f32 %v9002_v42, %v16390_v21  ;;  %v9092_v28 = vsel %vm17114_vm8, %v17060_v35, %v9088_v0  ;;  %v17139_v35 = vpop.f32.mrf.mxu3 }
 0x4ee   : >> { %v9097_v40 = vsel %vm9094_vm9, %v9096_v16, %v9092_v28  ;;  %v9004_v16 = vld [vmem:[%s17149_s23] sm:$0xff] }
 0x4ef   : >> { %v17095_v15 = vadd.f32 %v17034_v47, %v7774_v23  ;;  %v7546_v47 = vadd.f32 %v17000_v27, %v16990_v19  ;;  %v9101_v19 = vsub.f32 1.0, %v9100_v29  ;;  %v17118_v27 = vadd.f32 1.0, %v13362_v63 }
 0x4f0   : >> { %v9027_v61 = vmul.f32 2.0, %v9019_v43  ;;  %v9111_v43 = vor.u32 1.1754944e-38, %v9110_v53 }
 0x4f1   : >> { %v9102_v23 = vmul.f32 %v17090_v4, %v9101_v19  ;;  %13367 = vrcp.f32 %v17118_v27  ;;  %v13366_v24 = vpop.eup %13365  ;;  %vm9134_vm2 = vweird.f32 %v17118_v27 }
 0x4f2   : >> { %13369 = vpow2.f32 %v9070_v59  ;;  %v9035_v29 = vmul.f32 %v16419_v20, %v9027_v61  ;;  %v17145_v31 = vadd.f32 1.0, %v13366_v24 }
 0x4f4   : >> { %v7765_v50 = vpop.f32.mrf.mxu1  ;;  %v17112_v1 = vpop.f32.mrf.mxu0  ;;  %v12705_v22 = vadd.f32 -1.0, %v9035_v29  ;;  %13371 = vrcp.f32 %v17145_v31  ;;  %vm9149_vm8 = vweird.f32 %v17145_v31  ;;  %v8076_v29 = vadd.f32 %v17036_v34, %v17075_v45 }
 0x4f5   : >> { %v17108_v56 = vpop.f32.mrf.mxu2  ;;  %v7775_v26 = vadd.f32 %v7765_v50, %v7546_v47  ;;  %v9103_v47 = vadd.f32 %v17090_v4, %v9102_v23  ;;  %v8072_v50 = vadd.f32 %v16988_v49, %v17020_v57 }
 0x4f6   : >> { %v12713_v2 = vmul.f32 -5.0, %v12705_v22  ;;  %v8299_v22 = vadd.f32 %v17026_v9, %v8073_v39  ;;  %v8302_v45 = vadd.f32 %v17068_v41, %v8076_v29 }
 0x4f7   : >> { %v17127_v33 = vadd.f32 %v17048_v7, %v7775_v26  ;;  %v12712_v7 = vmul.f32 -5.0, %v12704_v54  ;;  %v17159_v12 = vpop.eup %13367  ;;  %v9204_v26 = vsub.f32 1.0, %v9097_v40  ;;  %v9107_v30 = vsel %vm17155_vm13, %v17090_v4, %v9103_v47 }
 0x4f8   : >> { %v9117_v54 = vmul.f32 %v17121_v14, %v9116_v32  ;;  %v13370_v28 = vpop.eup %13369  ;;  %v9130_v57 = vmul.f32 %v17159_v12, %v17118_v27  ;;  %v9112_v23 = vsel %vm9109_vm15, %v9111_v43, %v9107_v30  ;;  %v8808_v32 = vpop.f32.mrf.mxu3  ;;  %vm9135_vm5 = vweird.f32 %v17159_v12 }
 0x4f9   : >> { %v9072_v19 = vmul.f32 1.442695, %v12712_v7  ;;  %v9212_v4 = vmul.f32 %v9204_v26, %v9004_v16  ;;  %v17180_v7 = vadd.f32 1.0, %v13370_v28  ;;  %vm17223_vm6 = vmor %vm9134_vm2, %vm9135_vm5 }
 0x4fa   : >> { %v17187_v47 = vpop.eup %13371 }
 0x4fb   : >> { %13373 = vpow2.f32 %v9072_v19  ;;  %v9074_v19 = vmul.f32 1.442695, %v12713_v2  ;;  %vm9150_vm9 = vweird.f32 %v17187_v47  ;;  %vm9164_vm13 = vweird.f32 %v17180_v7 }
 0x4fc   : >> { %v8439_v55 = vpop.f32.mrf.mxu1  ;;  %v8965_v63 = vpop.f32.mrf.mxu0  ;;  %13375 = vrcp.f32 %v17180_v7  ;;  %vm17257_vm10 = vmor %vm9149_vm8, %vm9150_vm9 }
 0x4fd   : >> { %v8459_v0 = vadd.f32 %v8439_v55, %v8297_v17  ;;  %v17163_v11 = vpop.f32.mrf.mxu2  ;;  %v9125_v17 = vand.u32 2147483648, %v17084_v10  ;;  %v9123_v55 = vand.u32 2147483647, %v17084_v10  ;;  %13377 = vpow2.f32 %v9074_v19 }
 0x4fe   : >> { %v9153_v19 = vand.u32 2147483647, %v17145_v31 }
 0x4ff   : >> { %v8597_v42 = vadd.f32 %v17064_v36, %v8459_v0  ;;  %v8298_v36 = vadd.f32 %v17016_v18, %v8072_v50  ;;  %v9205_v0 = vsub.f32 1.0, %v9112_v23  ;;  %v9005_v50 = vld [vmem:[%s17149_s23 + $0x8] sm:$0xff]  ;;  %v9126_v43 = vor.u32 1.1754944e-38, %v9125_v17 }
 0x500   : >> { %vm9124_vm0 = vcmp.eq.f32.partialorder %v9123_v55, 8.507059e+37  ;;  %vm9154_vm12 = vcmp.eq.f32.partialorder %v9153_v19, 8.507059e+37 }
 0x501   : >> { %v8823_v49 = vadd.f32 %v17100_v38, %v8597_v42  ;;  %v9118_v38 = vadd.f32 %v17121_v14, %v9117_v54  ;;  %v13374_v42 = vpop.eup %13373  ;;  %v9213_v16 = vmul.f32 %v9205_v0, %v9005_v50 }
 0x502   : >> { %v17217_v2 = vpop.eup %13375 }
 0x503   : >> { %v8985_v59 = vadd.f32 %v8965_v63, %v8823_v49  ;;  %v9131_v63 = vsub.f32 1.0, %v9130_v57  ;;  %v9122_v10 = vsel %vm17182_vm4, %v17121_v14, %v9118_v38  ;;  %v17212_v14 = vadd.f32 1.0, %v13374_v42 }
 0x504   : >> { %v8441_v61 = vpop.f32.mrf.mxu1  ;;  %v8967_v24 = vpop.f32.mrf.mxu0  ;;  %v9138_v49 = vand.u32 2147483647, %v17118_v27  ;;  %v9140_v57 = vand.u32 2147483648, %v17118_v27  ;;  %v9155_v42 = vand.u32 2147483648, %v17145_v31  ;;  %vm9165_vm15 = vweird.f32 %v17217_v2 }
 0x505   : >> { %v9220_v18 = vmul.f32 %v9097_v40, %v8985_v59  ;;  %v8460_v53 = vadd.f32 %v8441_v61, %v8298_v36  ;;  %v17198_v26 = vpop.f32.mrf.mxu2  ;;  %v9132_v62 = vmul.f32 %v17159_v12, %v9131_v63  ;;  %v8074_v61 = vadd.f32 %v17012_v3, %v17042_v48  ;;  %v13378_v3 = vpop.eup %13377  ;;  %vm17283_vm1 = vmor %vm9164_vm13, %vm9165_vm15 }
 0x506   : >> { %13379 = vrcp.f32 %v17212_v14  ;;  %vm17230_vm7 = vcmp.eq.f32.partialorder %v9138_v49, 8.507059e+37  ;;  %v9141_v55 = vor.u32 1.1754944e-38, %v9140_v57  ;;  %v9156_v49 = vor.u32 1.1754944e-38, %v9155_v42 }
 0x507   : >> { %v9228_v40 = vadd.f32 %v9220_v18, %v9212_v4  ;;  %v8598_v6 = vadd.f32 %v17082_v58, %v8460_v53  ;;  %v9145_v58 = vmul.f32 %v17187_v47, %v17145_v31  ;;  %v9133_v59 = vadd.f32 %v17159_v12, %v9132_v62  ;;  %v8810_v18 = vpop.f32.mrf.mxu3  ;;  %v9006_v53 = vld [vmem:[%s17149_s23 + $0x10] sm:$0xff] }
 0x508   : >> { %v8300_v39 = vadd.f32 %v17038_v13, %v8074_v61  ;;  %v17250_v13 = vadd.f32 1.0, %v13378_v3  ;;  %vm9179_vm4 = vweird.f32 %v17212_v14 }
 0x509   : >> { %9237 = vst [vmem:[%s17194_s25] sm:$0xff] %v9228_v40  ;;  %v8824_v37 = vadd.f32 %v17139_v35, %v8598_v6  ;;  %v9127_v35 = vsel %vm9124_vm0, %v9126_v43, %v9122_v10  ;;  %v9146_v4 = vsub.f32 1.0, %v9145_v58  ;;  %v9137_v27 = vsel %vm17223_vm6, %v17159_v12, %v9133_v59 }
 0x50a   : >> { %v9142_v12 = vsel %vm17230_vm7, %v9141_v55, %v9137_v27  ;;  %13381 = vrcp.f32 %v17250_v13  ;;  %vm9194_vm6 = vweird.f32 %v17250_v13 }
 0x50b   : >> { %v8986_v30 = vadd.f32 %v8967_v24, %v8824_v37  ;;  %v9147_v63 = vmul.f32 %v17187_v47, %v9146_v4 }
 0x50c   : >> { %v8444_v54 = vpop.f32.mrf.mxu1  ;;  %v8970_v28 = vpop.f32.mrf.mxu0 }
 0x50d   : >> { %v9221_v36 = vmul.f32 %v9112_v23, %v8986_v30  ;;  %v8461_v9 = vadd.f32 %v8444_v54, %v8299_v22  ;;  %v9206_v23 = vsub.f32 1.0, %v9127_v35  ;;  %v17242_v0 = vpop.f32.mrf.mxu2  ;;  %v17252_v10 = vpop.eup %13379  ;;  %v9148_v62 = vadd.f32 %v17187_v47, %v9147_v63 }
 0x50e   : >> { %v8075_v22 = vadd.f32 %v17022_v8, %v17058_v44  ;;  %v9207_v54 = vsub.f32 1.0, %v9142_v12  ;;  %vm9180_vm0 = vweird.f32 %v17252_v10 }
 0x50f   : >> { %v9229_v38 = vadd.f32 %v9221_v36, %v9213_v16  ;;  %v8599_v17 = vadd.f32 %v17108_v56, %v8461_v9  ;;  %v9160_v56 = vmul.f32 %v17217_v2, %v17180_v7  ;;  %v9214_v6 = vmul.f32 %v9206_v23, %v9006_v53  ;;  %vm17304_vm2 = vmor %vm9179_vm4, %vm9180_vm0 }
 0x510   : >> { %v9152_v8 = vsel %vm17257_vm10, %v17187_v47, %v9148_v62  ;;  %v8301_v36 = vadd.f32 %v17051_v60, %v8075_v22  ;;  %v17279_v53 = vpop.eup %13381  ;;  %v9183_v62 = vand.u32 2147483647, %v17212_v14 }
 0x511   : >> { %9238 = vst [vmem:[%s17194_s25 + $0x8] sm:$0xff] %v9229_v38  ;;  %v8825_v48 = vadd.f32 %v8808_v32, %v8599_v17  ;;  %v9161_v58 = vsub.f32 1.0, %v9160_v56  ;;  %v9157_v24 = vsel %vm9154_vm12, %v9156_v49, %v9152_v8  ;;  %v9170_v38 = vand.u32 2147483648, %v17180_v7  ;;  %v9008_v56 = vld [vmem:[%s17149_s23 + $0x20] sm:$0xff]  ;;  %v9009_v49 = vld [vmem:[%s17149_s23 + $0x28] sm:$0xff] }
 0x512   : >> { %v9208_v63 = vsub.f32 1.0, %v9157_v24  ;;  %v9190_v34 = vmul.f32 %v17279_v53, %v17250_v13  ;;  %vm9184_vm5 = vcmp.eq.f32.partialorder %v9183_v62, 8.507059e+37  ;;  %vm9195_vm7 = vweird.f32 %v17279_v53 }
 0x513   : >> { %v8987_v40 = vadd.f32 %v8970_v28, %v8825_v48  ;;  %v9007_v28 = vld [vmem:[%s17149_s23 + $0x18] sm:$0xff]  ;;  %v9162_v44 = vmul.f32 %v17217_v2, %v9161_v58  ;;  %v8077_v58 = vadd.f32 %v17054_v52, %v17095_v15  ;;  %vm17321_vm8 = vmor %vm9194_vm6, %vm9195_vm7 }
 0x514   : >> { %v8446_v32 = vpop.f32.mrf.mxu1  ;;  %v8972_v50 = vpop.f32.mrf.mxu0  ;;  %v9215_v59 = vmul.f32 %v9207_v54, %v9007_v28  ;;  %v9191_v41 = vsub.f32 1.0, %v9190_v34 }
 0x515   : >> { %v9222_v43 = vmul.f32 %v9127_v35, %v8987_v40  ;;  %v8462_v37 = vadd.f32 %v8446_v32, %v8300_v39  ;;  %v9175_v35 = vmul.f32 %v17252_v10, %v17212_v14  ;;  %v17274_v4 = vpop.f32.mrf.mxu2  ;;  %v9163_v60 = vadd.f32 %v17217_v2, %v9162_v44 }
 0x516   : >> { %v9171_v39 = vor.u32 1.1754944e-38, %v9170_v38  ;;  %v9192_v52 = vmul.f32 %v17279_v53, %v9191_v41  ;;  %v8303_v15 = vadd.f32 %v17087_v46, %v8077_v58  ;;  %v8078_v38 = vadd.f32 %v17077_v25, %v17127_v33 }
 0x517   : >> { %v9230_v30 = vadd.f32 %v9222_v43, %v9214_v6  ;;  %v8600_v31 = vadd.f32 %v17163_v11, %v8462_v37  ;;  %v8813_v11 = vpop.f32.mrf.mxu3  ;;  %v9176_v47 = vsub.f32 1.0, %v9175_v35  ;;  %v9167_v6 = vsel %vm17283_vm1, %v17217_v2, %v9163_v60 }
 0x518   : >> { %v9185_v2 = vand.u32 2147483648, %v17212_v14  ;;  %v8304_v3 = vadd.f32 %v17112_v1, %v8078_v38 }
 0x519   : >> { %9239 = vst [vmem:[%s17194_s25 + $0x10] sm:$0xff] %v9230_v30  ;;  %v8826_v57 = vadd.f32 %v8810_v18, %v8600_v31  ;;  %v9168_v18 = vand.u32 2147483647, %v17180_v7  ;;  %v9177_v40 = vmul.f32 %v17252_v10, %v9176_v47 }
 0x51a   : >> { %v9186_v35 = vor.u32 1.1754944e-38, %v9185_v2 }
 0x51b   : >> { %v8988_v9 = vadd.f32 %v8972_v50, %v8826_v57  ;;  %vm9169_vm3 = vcmp.eq.f32.partialorder %v9168_v18, 8.507059e+37  ;;  %v9216_v50 = vmul.f32 %v9208_v63, %v9008_v56  ;;  %v9178_v42 = vadd.f32 %v17252_v10, %v9177_v40  ;;  %v9010_v18 = vld [vmem:[%s17149_s23 + $0x30] sm:$0xff] }
 0x51c   : >> { %v8449_v61 = vpop.f32.mrf.mxu1  ;;  %v8975_v55 = vpop.f32.mrf.mxu0  ;;  %v9172_v19 = vsel %vm9169_vm3, %v9171_v39, %v9167_v6  ;;  %v9011_v6 = vld [vmem:[%s17149_s23 + $0x38] sm:$0xff]  ;;  %s13397_s23 = sshra.s32 (%p7402_p12), %s9261_s20, 4  ;;  %s13398_s23 = int_to_ptr.hbm [resolvable:$true] %s13397_s23 }
 0x51d   : >> { %v9223_v17 = vmul.f32 %v9142_v12, %v8988_v9  ;;  %v8463_v23 = vadd.f32 %v8449_v61, %v8301_v36  ;;  %v8594_v22 = vpop.f32.mrf.mxu2  ;;  %v9209_v54 = vsub.f32 1.0, %v9172_v19  ;;  %v9182_v14 = vsel %vm17304_vm2, %v17252_v10, %v9178_v42  ;;  %s13399_s10 = scalar_lea.hbm (%p7402_p12), %s13398_s23, 256  ;;  %p13404_p2 = scmp.lt.s32.totalorder (%p7402_p12), %s13398_s23, %s17383_s8 }
 0x51e   : >> { %v9187_v36 = vsel %vm9184_vm5, %v9186_v35, %v9182_v14  ;;  %v9193_v10 = vadd.f32 %v17279_v53, %v9192_v52  ;;  %v9198_v61 = vand.u32 2147483647, %v17250_v13  ;;  %p13400_p13 = scmp.ne.s32.totalorder (%p7402_p12), %s13398_s23, %s13399_s10  ;;  %p13405_p3 = scmp.lt.s32.totalorder (%p7402_p12), %s13403_s13, %s13399_s10 }
 0x51f   : >> { %v9231_v48 = vadd.f32 %v9223_v17, %v9215_v59  ;;  %v8601_v27 = vadd.f32 %v17198_v26, %v8463_v23  ;;  %v8815_v26 = vpop.f32.mrf.mxu3  ;;  %v9217_v44 = vmul.f32 %v9209_v54, %v9009_v49  ;;  %v9210_v23 = vsub.f32 1.0, %v9187_v36 }
 0x520   : >> { %vm9199_vm9 = vcmp.eq.f32.partialorder %v9198_v61, 8.507059e+37  ;;  %p13401_p0 = pnand (%p7402_p12), %p13400_p13, %p13564_p5  ;;  %p13406_p4 = por (%p7402_p12), %p13405_p3, %p13404_p2 }
 0x521   : >> { %9240 = vst [vmem:[%s17194_s25 + $0x18] sm:$0xff] %v9231_v48  ;;  %v8827_v7 = vadd.f32 %v8813_v11, %v8601_v27  ;;  %v9200_v11 = vand.u32 2147483648, %v17250_v13  ;;  %v9197_v13 = vsel %vm17321_vm8, %v17279_v53, %v9193_v10  ;;  %v9218_v25 = vmul.f32 %v9210_v23, %v9010_v18 }
 0x522   : > { %p13402_p1 = pneg (%p7402_p12), %p13401_p0 }
 0x523   : >> { %v8989_v32 = vadd.f32 %v8975_v55, %v8827_v7  ;;  %v9201_v29 = vor.u32 1.1754944e-38, %v9200_v11 }
 0x524   : >> { %v8451_v12 = vpop.f32.mrf.mxu1  ;;  %v8977_v28 = vpop.f32.mrf.mxu0  ;;  %p13407_p7 = pnand (%p7402_p12), %p13406_p4, %p13402_p1 }
 0x525   : >> { %v9224_v43 = vmul.f32 %v9157_v24, %v8989_v32  ;;  %v8464_v37 = vadd.f32 %v8451_v12, %v8302_v45  ;;  %v8980_v60 = vpop.f32.mrf.mxu2 }
 0x527   : >> { %v9232_v30 = vadd.f32 %v9224_v43, %v9216_v50  ;;  %v8602_v31 = vadd.f32 %v17242_v0, %v8464_v37  ;;  %v8818_v24 = vpop.f32.mrf.mxu3 }
 0x529   : >> { %9241 = vst [vmem:[%s17194_s25 + $0x20] sm:$0xff] %v9232_v30  ;;  %v8828_v57 = vadd.f32 %v8815_v26, %v8602_v31 }
 0x52b   : >> { %v8990_v8 = vadd.f32 %v8977_v28, %v8828_v57 }
 0x52c   : >> { %v8454_v0 = vpop.f32.mrf.mxu1 }
 0x52d   : >> { %v9225_v9 = vmul.f32 %v9172_v19, %v8990_v8  ;;  %v8465_v59 = vadd.f32 %v8454_v0, %v8303_v15  ;;  %v8982_v45 = vpop.f32.mrf.mxu2 }
 0x52f   : >> { %v9233_v47 = vadd.f32 %v9225_v9, %v9217_v44  ;;  %v8603_v17 = vadd.f32 %v17274_v4, %v8465_v59  ;;  %v9202_v4 = vsel %vm9199_vm9, %v9201_v29, %v9197_v13  ;;  %v8820_v7 = vpop.f32.mrf.mxu3 }
 0x530   : >> { %v9211_v40 = vsub.f32 1.0, %v9202_v4 }
 0x531   : >> { %9242 = vst [vmem:[%s17194_s25 + $0x28] sm:$0xff] %v9233_v47  ;;  %v8829_v55 = vadd.f32 %v8818_v24, %v8603_v17 }
 0x532   : >> { %v9219_v53 = vmul.f32 %v9211_v40, %v9011_v6 }
 0x533   : >> { %v8991_v48 = vadd.f32 %v8980_v60, %v8829_v55 }
 0x534   : >> { %v8456_v33 = vpop.f32.mrf.mxu1 }
 0x535   : >> { %v9226_v27 = vmul.f32 %v9187_v36, %v8991_v48  ;;  %v8466_v63 = vadd.f32 %v8456_v33, %v8304_v3 }
 0x537   : >> { %v9234_v56 = vadd.f32 %v9226_v27, %v9218_v25  ;;  %v8604_v39 = vadd.f32 %v8594_v22, %v8466_v63 }
 0x539   : >> { %9243 = vst [vmem:[%s17194_s25 + $0x30] sm:$0xff] %v9234_v56  ;;  %v8830_v34 = vadd.f32 %v8820_v7, %v8604_v39 }
 0x53b   : >> { %v8992_v32 = vadd.f32 %v8982_v45, %v8830_v34 }
 0x53d   : >> { %v9227_v50 = vmul.f32 %v9202_v4, %v8992_v32  ;;  %7404 = sbr.rel (!%p7402_p12) target bundleno = 1023 (0x3ff), region = 186 }
 0x53f   : >> { %v9235_v26 = vadd.f32 %v9227_v50, %v9219_v53 }
 0x541   : >> { %9244 = vst [vmem:[%s17194_s25 + $0x38] sm:$0xff] %v9235_v26 }
 0x542   : > { %13410 = shalt.err (!%p13407_p7)
}
 0x543   : > { %s13479_s18 = smov 128   ;;  %s13480_s22 = smov 8  }
 0x544   : > { %13271 = dma.vmem_to_hbm [thread:$0]  (%p13564_p5), %s9259_s1, 4096, %s9261_s20, %s9246_s17, %s13479_s18, %s13479_s18, %s13480_s22  }
 0x545 PF: > { %p13277_p8 = scmp.ge.s32.totalorder %s13461_s30, 2  ;;  %s9275_s0 = sand.u32 1, %s13449_s27  }
 0x546   : > { %s9276_s19 = scalar_lea.sflag [#allocation5], %s9275_s0 }
 0x547   : > { %p13274_p9 = pnand %p13277_p8, %p13568_p6 }
 0x549   : > { %p13275_p10 = pneg %p13274_p9 }
 0x54b   : > { %13444 = dma.done.wait (%p13275_p10), %s9276_s19, 4096  }
 0x54c   : > { %13446 = vsyncadd (%p13275_p10), %s9276_s19, 4294963200  ;;  %p18_p11 = scmp.ge.s32.totalorder %s13551_s11, 4   ;;  %s17434_s27 = smov %s13453_s28 }
 0x54d   : > { %s17435_s28 = smov %s13457_s29  ;;  %s17436_s29 = smov %s13562_s14 }
 0x54e   : > { %s17437_s30 = smov %s13551_s11  ;;  %20 = sbr.rel (!%p18_p11) target bundleno = 6 (0x6), region = 197 }
 0x553   :  { %9282 = vsyncpa [#allocation5], 1 }
 0x554   :  { %9284 = vsyncpa [#allocation5 + $0x1], 1 }

</bundles_post_ra>
